<compile_context>
chip_gen: v7x
topology: tpu7x:2x2x1
jax: 0.10.0
libtpu: 0.0.40
codegen_flags: <defaults>
</compile_context>

<pallas_src>
import functools

import jax
import jax.numpy as jnp
from jax import lax
from jax.experimental import pallas as pl
from jax.experimental.pallas import tpu as pltpu

MODALITY_NAMES = ["sentinel2_l2a", "sentinel1", "worldcover", "openstreetmap_raster"]

# Synthetic modality metadata (channels + band-set groupings); stands in for Modality.get().
MODALITY_INFO = {
    "sentinel2_l2a": {"num_channels": 4, "band_sets": [[0, 1, 2], [3]]},
    "sentinel1": {"num_channels": 2, "band_sets": [[0, 1]]},
    "worldcover": {"num_channels": 1, "band_sets": [[0]]},
    "openstreetmap_raster": {"num_channels": 3, "band_sets": [[0, 1, 2]]},
}

PATCH_SIZE = 4
EMBED_DIM = 32
NUM_HEADS = 4
HEAD_DIM = EMBED_DIM // NUM_HEADS
NUM_LAYERS = 2
MLP_RATIO = 4
LN_EPS = 1e-5
ONLINE_ENCODER_VALUE = 0  # MaskValue.ONLINE_ENCODER.value


# --------------------------------------------------------------------------------------
# The single fused Pallas kernel: patch-embed + transformer + final LN + pooled features.
# One invocation processes the ENTIRE batch (tokens stacked along sublanes).
# --------------------------------------------------------------------------------------
def _helios_fused_kernel(
    xpe_ref,                 # (B*S, Ktot) bf16  block-diagonal patched pixels
    emb_ref,                 # (B*S, D)    f32   pos + pe-bias + band-set + time, pre-summed
    pew_ref,                 # (Ktot, D)   bf16  stacked patch-embed weights
    ln1g_ref, ln1b_ref,      # (L, 1, D)   f32
    wqkv_ref, bqkv_ref,      # (L, D, 3D)  bf16 (scale folded into q cols), (L, 1, 3D) f32
    wprj_ref, bprj_ref,      # (L, D, D)   bf16, (L, 1, D) f32
    ln2g_ref, ln2b_ref,      # (L, 1, D)   f32
    w1_ref, b1_ref,          # (L, D, 4D)  bf16, (L, 1, 4D) f32
    w2_ref, b2_ref,          # (L, 4D, D)  bf16, (L, 1, D)  f32
    flng_ref, flnb_ref,      # (1, D)      f32
    out_ref,                 # (B, hp*wp, D) f32
    *,
    batch, n_bs, npt, t_steps, n_heads, n_layers, pool_w,
):
    f32, bf16 = jnp.float32, jnp.bfloat16
    d_model = out_ref.shape[-1]
    dh = d_model // n_heads
    seq = n_bs * npt                     # tokens per batch element
    hpwp = npt // t_steps

    def layer_norm(v, g, b):
        mu = jnp.mean(v, axis=-1, keepdims=True)
        var = jnp.mean(jnp.square(v - mu), axis=-1, keepdims=True)
        return (v - mu) * lax.rsqrt(var + LN_EPS) * g + b

    # ---- patch embedding: one block-diagonal GEMM over all band sets + one additive add
    x = jnp.dot(xpe_ref[...], pew_ref[...], preferred_element_type=f32) + emb_ref[...]

    # ---- transformer blocks (all layers fused, everything stays in vregs/VMEM) ---------
    for l in range(n_layers):
        # attention
        h = layer_norm(x, ln1g_ref[l], ln1b_ref[l]).astype(bf16)
        qkv = jnp.dot(h, wqkv_ref[l], preferred_element_type=f32) + bqkv_ref[l]   # (BS, 3D)
        qkv = qkv.astype(bf16)
        q = qkv[:, 0 * d_model:1 * d_model].reshape(batch, seq, d_model)
        k = qkv[:, 1 * d_model:2 * d_model].reshape(batch, seq, d_model)
        v = qkv[:, 2 * d_model:3 * d_model].reshape(batch, seq, d_model)
        o_heads = []
        for hh in range(n_heads):
            sl = slice(hh * dh, (hh + 1) * dh)
            # scores batched over the batch dim; scale already folded into q columns.
            s = jnp.einsum("bqd,bkd->bqk", q[:, :, sl], k[:, :, sl],
                           preferred_element_type=f32)                     # (B, S, S)
            s = s - jnp.max(s, axis=-1, keepdims=True)
            p = jnp.exp(s)
            p = p * pl.reciprocal(jnp.sum(p, axis=-1, keepdims=True), approx=True)
            o_heads.append(jnp.einsum("bqk,bkd->bqd", p.astype(bf16), v[:, :, sl],
                                      preferred_element_type=f32))         # (B, S, dh)
        # head-merge + single fused output projection
        o = jnp.concatenate(o_heads, axis=-1).reshape(batch * seq, d_model).astype(bf16)
        x = x + jnp.dot(o, wprj_ref[l], preferred_element_type=f32) + bprj_ref[l]

        # MLP
        h = layer_norm(x, ln2g_ref[l], ln2b_ref[l]).astype(bf16)
        h = jnp.dot(h, w1_ref[l], preferred_element_type=f32) + b1_ref[l]
        # TODO(synk): PyTorch nn.GELU defaults to the exact erf form; tanh approximation here.
        h = jax.nn.gelu(h, approximate=True)
        h = jnp.dot(h.astype(bf16), w2_ref[l], preferred_element_type=f32) + b2_ref[l]
        x = x + h

    # ---- final LN + fused mean-pool over (T, band sets) and across modalities ----------
    x = layer_norm(x, flng_ref[...], flnb_ref[...])
    for b in range(batch):
        pooled = jnp.zeros((hpwp, d_model), f32)
        for bsi in range(n_bs):
            base = (b * n_bs + bsi) * npt
            xs = x[base:base + npt, :]                 # tokens of this band set, order [patch, t]
            if t_steps != 1:
                xs = xs.reshape(hpwp, t_steps, d_model).sum(axis=1)
            pooled = pooled + pool_w[bsi] * xs         # weight = 1/(n_mod * T * n_bs(mod))
        out_ref[b] = pooled.astype(out_ref.dtype)


# --------------------------------------------------------------------------------------
# Deterministic parameter initialization (synthetic Helios encoder)
# --------------------------------------------------------------------------------------
def init_params(key):
    def nrm(k, shape, scale=0.02):
        return scale * jax.random.normal(k, shape, dtype=jnp.float32)

    keys = iter(jax.random.split(key, 256))
    params = {"patch_embed": {}, "bandset_embed": {}}
    for mod, info in MODALITY_INFO.items():
        pes, bes = [], []
        for bands in info["band_sets"]:
            k_in = PATCH_SIZE * PATCH_SIZE * len(bands)
            pes.append(
                {
                    "w": nrm(next(keys), (k_in, EMBED_DIM)),
                    "b": jnp.zeros((EMBED_DIM,), jnp.float32),
                }
            )
            bes.append(nrm(next(keys), (EMBED_DIM,)))
        params["patch_embed"][mod] = pes
        params["bandset_embed"][mod] = bes
    params["time_embed"] = {
        "w": nrm(next(keys), (3, EMBED_DIM)),
        "b": jnp.zeros((EMBED_DIM,), jnp.float32),
    }
    params["blocks"] = []
    for _ in range(NUM_LAYERS):
        params["blocks"].append(
            {
                "ln1_g": jnp.ones((EMBED_DIM,), jnp.float32),
                "ln1_b": jnp.zeros((EMBED_DIM,), jnp.float32),
                "qkv_w": nrm(next(keys), (EMBED_DIM, 3 * EMBED_DIM)),
                "qkv_b": jnp.zeros((3 * EMBED_DIM,), jnp.float32),
                "proj_w": nrm(next(keys), (EMBED_DIM, EMBED_DIM)),
                "proj_b": jnp.zeros((EMBED_DIM,), jnp.float32),
                "ln2_g": jnp.ones((EMBED_DIM,), jnp.float32),
                "ln2_b": jnp.zeros((EMBED_DIM,), jnp.float32),
                "mlp_w1": nrm(next(keys), (EMBED_DIM, MLP_RATIO * EMBED_DIM)),
                "mlp_b1": jnp.zeros((MLP_RATIO * EMBED_DIM,), jnp.float32),
                "mlp_w2": nrm(next(keys), (MLP_RATIO * EMBED_DIM, EMBED_DIM)),
                "mlp_b2": jnp.zeros((EMBED_DIM,), jnp.float32),
            }
        )
    params["final_ln_g"] = jnp.ones((EMBED_DIM,), jnp.float32)
    params["final_ln_b"] = jnp.zeros((EMBED_DIM,), jnp.float32)
    return params


def _sincos_1d(pos, dim):
    omega = jnp.arange(dim // 2, dtype=jnp.float32)
    omega = 1.0 / (10000.0 ** (omega / (dim / 2.0)))
    out = pos[:, None] * omega[None, :]
    return jnp.concatenate([jnp.sin(out), jnp.cos(out)], axis=-1)


def sincos_pos_embed_2d(hp, wp, dim):
    eh = _sincos_1d(jnp.arange(hp, dtype=jnp.float32), dim // 2)
    ew = _sincos_1d(jnp.arange(wp, dtype=jnp.float32), dim // 2)
    eh = jnp.broadcast_to(eh[:, None, :], (hp, wp, dim // 2))
    ew = jnp.broadcast_to(ew[None, :, :], (hp, wp, dim // 2))
    return jnp.concatenate([eh, ew], axis=-1)  # (hp, wp, dim)


# --------------------------------------------------------------------------------------
# Encoder + pooling: builds the kernel operands (layout plumbing / setup-scale work only)
# and runs the single fused pallas_call.  Returns pooled features (B, hp, wp, D).
# --------------------------------------------------------------------------------------
def helios_encode_and_pool(params, modality_inputs, modality_masks, timestamps):
    # TODO(synk): masks are carried for parity with MaskedHeliosSample but ignored here,
    # since the wrapper marks every position ONLINE_ENCODER (no token is dropped).
    del modality_masks

    B, T, _ = timestamps.shape
    D, L, H, Dh = EMBED_DIM, NUM_LAYERS, NUM_HEADS, HEAD_DIM

    # Time embedding: tiny 3 -> D projection, done once in XLA (setup-scale work).
    ts = timestamps.astype(jnp.float32) / jnp.array([31.0, 12.0, 2100.0], jnp.float32)
    time_emb = ts.reshape(B * T, 3) @ params["time_embed"]["w"] + params["time_embed"]["b"]
    time_emb = time_emb.reshape(B, T, D)

    present = [m for m in MODALITY_NAMES if m in modality_inputs]
    n_mod = len(present)
    band_sets = [
        (m, bsi, bands)
        for m in present
        for bsi, bands in enumerate(MODALITY_INFO[m]["band_sets"])
    ]
    k_sizes = [PATCH_SIZE * PATCH_SIZE * len(b) for _, _, b in band_sets]
    k_total = sum(k_sizes)

    hp = wp = None
    xpe_blocks, pew_rows, emb_rows, pool_w = [], [], [], []
    k_off = 0
    for (mod, bsi, bands), k_in in zip(band_sets, k_sizes):
        x = modality_inputs[mod]  # (B, H, W, T, C)
        B_, H_, W_, T_, _ = x.shape
        assert T_ == T
        hp_m, wp_m = H_ // PATCH_SIZE, W_ // PATCH_SIZE
        if hp is None:
            hp, wp = hp_m, wp_m
        assert (hp, wp) == (hp_m, wp_m)
        nb = len(bands)
        xb = x[..., jnp.array(bands)]
        xb = xb.reshape(B_, hp, PATCH_SIZE, wp, PATCH_SIZE, T, nb)
        xb = xb.transpose(0, 1, 3, 5, 2, 4, 6)                 # (B, hp, wp, T, P, P, nb)
        xb = xb.reshape(B_, hp * wp * T, k_in)
        # Place this band set's pixels in its own column block -> block-diagonal input.
        xpe_blocks.append(jnp.pad(xb, ((0, 0), (0, 0), (k_off, k_total - k_off - k_in))))
        pe = params["patch_embed"][mod][bsi]
        pew_rows.append(pe["w"])                               # rows align with column block
        # Hoisted additive embeddings: patch-embed bias + band-set embedding pre-summed.
        emb_rows.append(pe["b"] + params["bandset_embed"][mod][bsi])
        n_bs_mod = len(MODALITY_INFO[mod]["band_sets"])
        # Per-token weight reproducing mean(dim=[3,4]) per modality then cross-modality mean.
        pool_w.append(1.0 / (n_mod * n_bs_mod * T))
        k_off += k_in

    n_bs = len(band_sets)
    npt = hp * wp * T
    S = n_bs * npt
    BT = B * S

    # Block-diagonal patched pixels, token order [batch, band_set, patch, t]; pre-cast bf16.
    xpe = jnp.concatenate(xpe_blocks, axis=1).reshape(BT, k_total).astype(jnp.bfloat16)
    # Stacked patch-embed weights (row blocks match the input column blocks); pre-cast bf16.
    pew_blk = jnp.concatenate(pew_rows, axis=0).astype(jnp.bfloat16)   # (Ktot, D)

    # Pre-summed additive embeddings: pos + pe-bias + band-set + time  -> one kernel add.
    pos = sincos_pos_embed_2d(hp, wp, D).reshape(hp * wp, D)
    if T != 1:
        pos = jnp.repeat(pos, T, axis=0)                       # (npt, D), order [patch, t]
    static_emb = jnp.concatenate([pos + e[None, :] for e in emb_rows], axis=0)   # (S, D)
    time_full = jnp.tile(jnp.tile(time_emb, (1, hp * wp, 1)), (1, n_bs, 1))      # (B, S, D)
    emb_add = (static_emb[None] + time_full).reshape(BT, D).astype(jnp.float32)

    # Transformer weights: fused QKV (softmax scale folded into the q columns), fused
    # head-merge projection; all MXU-facing weights pre-cast to bf16 in the wrapper.
    def stack(name):
        return jnp.stack([blk[name] for blk in params["blocks"]], axis=0)

    scale = 1.0 / float(Dh) ** 0.5
    qcol = jnp.concatenate([jnp.full((D,), scale, jnp.float32),
                            jnp.ones((2 * D,), jnp.float32)])
    w_qkv = (stack("qkv_w") * qcol).astype(jnp.bfloat16)           # (L, D, 3D)
    b_qkv = (stack("qkv_b") * qcol).reshape(L, 1, 3 * D)           # (L, 1, 3D) f32
    w_prj = stack("proj_w").astype(jnp.bfloat16)                   # (L, D, D)
    b_prj = stack("proj_b").reshape(L, 1, D)
    ln1_g = stack("ln1_g").reshape(L, 1, D)
    ln1_b = stack("ln1_b").reshape(L, 1, D)
    ln2_g = stack("ln2_g").reshape(L, 1, D)
    ln2_b = stack("ln2_b").reshape(L, 1, D)
    w1 = stack("mlp_w1").astype(jnp.bfloat16)                      # (L, D, 4D)
    b1 = stack("mlp_b1").reshape(L, 1, MLP_RATIO * D)
    w2 = stack("mlp_w2").astype(jnp.bfloat16)                      # (L, 4D, D)
    b2 = stack("mlp_b2").reshape(L, 1, D)
    fln_g = params["final_ln_g"].reshape(1, D)
    fln_b = params["final_ln_b"].reshape(1, D)

    kern = functools.partial(
        _helios_fused_kernel,
        batch=B, n_bs=n_bs, npt=npt, t_steps=T, n_heads=H, n_layers=L,
        pool_w=tuple(pool_w),
    )

    operands = (xpe, emb_add, pew_blk, ln1_g, ln1_b, w_qkv, b_qkv, w_prj, b_prj,
                ln2_g, ln2_b, w1, b1, w2, b2, fln_g, fln_b)

    def full(arr):
        nd = arr.ndim
        return pl.BlockSpec(arr.shape, lambda i, _nd=nd: (0,) * _nd)

    # TODO(synk): on v7x, split the batch over the two TensorCores (pl.core_map /
    # CORE_PARALLEL); single-step batched GEMMs are the right shape for v5e/v6e (1 TC).
    pooled = pl.pallas_call(
        kern,
        grid=(1,),
        in_specs=[full(a) for a in operands],
        out_specs=pl.BlockSpec((B, hp * wp, D), lambda i: (0, 0, 0)),
        out_shape=jax.ShapeDtypeStruct((B, hp * wp, D), jnp.float32),
        compiler_params=pltpu.CompilerParams(dimension_semantics=("arbitrary",)),
    )(*operands)
    return pooled.reshape(B, hp, wp, D)


# --------------------------------------------------------------------------------------
# Helios wrapper forward (mirrors the PyTorch module's forward)
# --------------------------------------------------------------------------------------
def helios_forward(params, inputs):
    kwargs = {}
    present_modalities = []
    for modality in MODALITY_NAMES:
        if modality not in inputs[0]:
            continue
        present_modalities.append(modality)
        cur = jnp.stack([inp[modality] for inp in inputs], axis=0)  # (B, C, H, W)
        cur = jnp.transpose(cur, (0, 2, 3, 1))[:, :, :, None, :]    # b c h w -> b h w 1 c
        kwargs[modality] = cur
        num_band_sets = len(MODALITY_INFO[modality]["band_sets"])
        mask_shape = cur.shape[0:4] + (num_band_sets,)
        kwargs[modality + "_mask"] = jnp.full(mask_shape, ONLINE_ENCODER_VALUE, jnp.int32)

    B = len(inputs)
    timestamps = jnp.zeros((B, 1, 3), dtype=jnp.int32)
    timestamps = timestamps.at[:, :, 0].set(1).at[:, :, 1].set(7).at[:, :, 2].set(2024)

    mod_inputs = {m: kwargs[m] for m in present_modalities}
    mod_masks = {m: kwargs[m + "_mask"] for m in present_modalities}

    # Encoder + the wrapper's mean-pools run fused in one Pallas kernel; the per-token
    # weighting inside the kernel is mathematically identical to mean(dim=[3,4]) per
    # modality followed by the mean across modalities.
    pooled = helios_encode_and_pool(params, mod_inputs, mod_masks, timestamps)  # (B, hp, wp, D)
    pooled = jnp.transpose(pooled, (0, 3, 1, 2))  # b h w c -> b c h w
    return [pooled]


# --------------------------------------------------------------------------------------
if __name__ == "__main__":
    key = jax.random.PRNGKey(0)
    pkey, ikey = jax.random.split(key)
    params = init_params(pkey)

    B, H, W = 2, 16, 16
    inputs = []
    for i in range(B):
        k1, k2 = jax.random.split(jax.random.fold_in(ikey, i))
        inputs.append(
            {
                # per-sample tensors are CHW like the PyTorch module expects
                "sentinel2_l2a": jax.random.normal(k1, (4, H, W), dtype=jnp.float32),
                "sentinel1": jax.random.normal(k2, (2, H, W), dtype=jnp.float32),
            }
        )

    out = helios_forward(params, inputs)
    out = [jax.block_until_ready(o) for o in out]

    expected_shape = (B, EMBED_DIM, H // PATCH_SIZE, W // PATCH_SIZE)
    assert out[0].shape == expected_shape, (out[0].shape, expected_shape)
    assert bool(jnp.all(jnp.isfinite(out[0])))
    print("KERNEL_OK")
</pallas_src>

<mosaic_0001>
module attributes {stable_mosaic.version = 11 : i64} {
  func.func @_helios_fused_kernel(%arg0: i32, %arg1: memref<96x96xbf16, #tpu.memory_space<vmem>>, %arg2: memref<96x32xf32, #tpu.memory_space<vmem>>, %arg3: memref<96x32xbf16, #tpu.memory_space<vmem>>, %arg4: memref<2x1x32xf32, #tpu.memory_space<vmem>>, %arg5: memref<2x1x32xf32, #tpu.memory_space<vmem>>, %arg6: memref<2x32x96xbf16, #tpu.memory_space<vmem>>, %arg7: memref<2x1x96xf32, #tpu.memory_space<vmem>>, %arg8: memref<2x32x32xbf16, #tpu.memory_space<vmem>>, %arg9: memref<2x1x32xf32, #tpu.memory_space<vmem>>, %arg10: memref<2x1x32xf32, #tpu.memory_space<vmem>>, %arg11: memref<2x1x32xf32, #tpu.memory_space<vmem>>, %arg12: memref<2x32x128xbf16, #tpu.memory_space<vmem>>, %arg13: memref<2x1x128xf32, #tpu.memory_space<vmem>>, %arg14: memref<2x128x32xbf16, #tpu.memory_space<vmem>>, %arg15: memref<2x1x32xf32, #tpu.memory_space<vmem>>, %arg16: memref<1x32xf32, #tpu.memory_space<vmem>>, %arg17: memref<1x32xf32, #tpu.memory_space<vmem>>, %arg18: memref<2x16x32xf32, #tpu.memory_space<vmem>>) attributes {dimension_semantics = [#tpu.dimension_semantics<arbitrary>], iteration_bounds = array<i64: 1>, scalar_prefetch = 0 : i64, scratch_operands = 0 : i64, tpu.core_type = #tpu.core_type<tc>, window_params = [{pipeline_mode = #tpu.pipeline_mode<synchronous>, transform_indices = @transform_0, window_bounds = array<i64: 96, 96>}, {pipeline_mode = #tpu.pipeline_mode<synchronous>, transform_indices = @transform_1, window_bounds = array<i64: 96, 32>}, {pipeline_mode = #tpu.pipeline_mode<synchronous>, transform_indices = @transform_2, window_bounds = array<i64: 96, 32>}, {pipeline_mode = #tpu.pipeline_mode<synchronous>, transform_indices = @transform_3, window_bounds = array<i64: 2, 1, 32>}, {pipeline_mode = #tpu.pipeline_mode<synchronous>, transform_indices = @transform_4, window_bounds = array<i64: 2, 1, 32>}, {pipeline_mode = #tpu.pipeline_mode<synchronous>, transform_indices = @transform_5, window_bounds = array<i64: 2, 32, 96>}, {pipeline_mode = #tpu.pipeline_mode<synchronous>, transform_indices = @transform_6, window_bounds = array<i64: 2, 1, 96>}, {pipeline_mode = #tpu.pipeline_mode<synchronous>, transform_indices = @transform_7, window_bounds = array<i64: 2, 32, 32>}, {pipeline_mode = #tpu.pipeline_mode<synchronous>, transform_indices = @transform_8, window_bounds = array<i64: 2, 1, 32>}, {pipeline_mode = #tpu.pipeline_mode<synchronous>, transform_indices = @transform_9, window_bounds = array<i64: 2, 1, 32>}, {pipeline_mode = #tpu.pipeline_mode<synchronous>, transform_indices = @transform_10, window_bounds = array<i64: 2, 1, 32>}, {pipeline_mode = #tpu.pipeline_mode<synchronous>, transform_indices = @transform_11, window_bounds = array<i64: 2, 32, 128>}, {pipeline_mode = #tpu.pipeline_mode<synchronous>, transform_indices = @transform_12, window_bounds = array<i64: 2, 1, 128>}, {pipeline_mode = #tpu.pipeline_mode<synchronous>, transform_indices = @transform_13, window_bounds = array<i64: 2, 128, 32>}, {pipeline_mode = #tpu.pipeline_mode<synchronous>, transform_indices = @transform_14, window_bounds = array<i64: 2, 1, 32>}, {pipeline_mode = #tpu.pipeline_mode<synchronous>, transform_indices = @transform_15, window_bounds = array<i64: 1, 32>}, {pipeline_mode = #tpu.pipeline_mode<synchronous>, transform_indices = @transform_16, window_bounds = array<i64: 1, 32>}, {pipeline_mode = #tpu.pipeline_mode<synchronous>, transform_indices = @transform_17, window_bounds = array<i64: 2, 16, 32>}]} {
    %c0 = arith.constant 0 : index
    %c0_0 = arith.constant 0 : index
    %0 = vector.load %arg1[%c0, %c0_0] : memref<96x96xbf16, #tpu.memory_space<vmem>>, vector<96x96xbf16>
    %c0_1 = arith.constant 0 : index
    %c0_2 = arith.constant 0 : index
    %1 = vector.load %arg3[%c0_1, %c0_2] : memref<96x32xbf16, #tpu.memory_space<vmem>>, vector<96x32xbf16>
    %cst = arith.constant dense<0.000000e+00> : vector<96x32xf32>
    %2 = tpu.matmul %0, %1, %cst {dimension_numbers = #tpu.dot_dimension_numbers<[1], [0], [0], [1], [0, 0, 1, 1], [], []>} : vector<96x96xbf16>, vector<96x32xbf16>, vector<96x32xf32> -> vector<96x32xf32>
    %c0_3 = arith.constant 0 : index
    %c0_4 = arith.constant 0 : index
    %3 = vector.load %arg2[%c0_3, %c0_4] : memref<96x32xf32, #tpu.memory_space<vmem>>, vector<96x32xf32>
    %4 = arith.addf %2, %3 : vector<96x32xf32>
    %c0_5 = arith.constant 0 : index
    %c0_6 = arith.constant 0 : index
    %c0_7 = arith.constant 0 : index
    %5 = vector.load %arg4[%c0_5, %c0_6, %c0_7] : memref<2x1x32xf32, #tpu.memory_space<vmem>>, vector<1x1x32xf32>
    %6 = vector.shape_cast %5 : vector<1x1x32xf32> to vector<1x32xf32>
    %c0_8 = arith.constant 0 : index
    %c0_9 = arith.constant 0 : index
    %c0_10 = arith.constant 0 : index
    %7 = vector.load %arg5[%c0_8, %c0_9, %c0_10] : memref<2x1x32xf32, #tpu.memory_space<vmem>>, vector<1x1x32xf32>
    %8 = vector.shape_cast %7 : vector<1x1x32xf32> to vector<1x32xf32>
    %cst_11 = arith.constant dense<0.000000e+00> : vector<96xf32>
    %9 = vector.multi_reduction <add>, %4, %cst_11 [1] : vector<96x32xf32> to vector<96xf32>
    %10 = vector.shape_cast %9 : vector<96xf32> to vector<96x1xf32>
    %cst_12 = arith.constant 3.200000e+01 : f32
    %11 = vector.broadcast %cst_12 : f32 to vector<96x1xf32>
    %12 = arith.divf %10, %11 : vector<96x1xf32>
    %13 = vector.broadcast %12 : vector<96x1xf32> to vector<96x32xf32>
    %14 = arith.subf %4, %13 : vector<96x32xf32>
    %15 = arith.mulf %14, %14 : vector<96x32xf32>
    %cst_13 = arith.constant dense<0.000000e+00> : vector<96xf32>
    %16 = vector.multi_reduction <add>, %15, %cst_13 [1] : vector<96x32xf32> to vector<96xf32>
    %17 = vector.shape_cast %16 : vector<96xf32> to vector<96x1xf32>
    %cst_14 = arith.constant 3.200000e+01 : f32
    %18 = vector.broadcast %cst_14 : f32 to vector<96x1xf32>
    %19 = arith.divf %17, %18 : vector<96x1xf32>
    %20 = vector.broadcast %12 : vector<96x1xf32> to vector<96x32xf32>
    %21 = arith.subf %4, %20 : vector<96x32xf32>
    %cst_15 = arith.constant 9.99999974E-6 : f32
    %22 = vector.broadcast %cst_15 : f32 to vector<96x1xf32>
    %23 = arith.addf %19, %22 : vector<96x1xf32>
    %24 = math.rsqrt %23 : vector<96x1xf32>
    %25 = vector.broadcast %24 : vector<96x1xf32> to vector<96x32xf32>
    %26 = arith.mulf %21, %25 : vector<96x32xf32>
    %27 = vector.broadcast %6 : vector<1x32xf32> to vector<96x32xf32>
    %28 = arith.mulf %26, %27 : vector<96x32xf32>
    %29 = vector.broadcast %8 : vector<1x32xf32> to vector<96x32xf32>
    %30 = arith.addf %28, %29 : vector<96x32xf32>
    %31 = arith.truncf %30 : vector<96x32xf32> to vector<96x32xbf16>
    %c0_16 = arith.constant 0 : index
    %c0_17 = arith.constant 0 : index
    %c0_18 = arith.constant 0 : index
    %32 = vector.load %arg6[%c0_16, %c0_17, %c0_18] : memref<2x32x96xbf16, #tpu.memory_space<vmem>>, vector<1x32x96xbf16>
    %33 = vector.shape_cast %32 : vector<1x32x96xbf16> to vector<32x96xbf16>
    %cst_19 = arith.constant dense<0.000000e+00> : vector<96x96xf32>
    %34 = tpu.matmul %31, %33, %cst_19 {dimension_numbers = #tpu.dot_dimension_numbers<[1], [0], [0], [1], [0, 0, 1, 1], [], []>} : vector<96x32xbf16>, vector<32x96xbf16>, vector<96x96xf32> -> vector<96x96xf32>
    %c0_20 = arith.constant 0 : index
    %c0_21 = arith.constant 0 : index
    %c0_22 = arith.constant 0 : index
    %35 = vector.load %arg7[%c0_20, %c0_21, %c0_22] : memref<2x1x96xf32, #tpu.memory_space<vmem>>, vector<1x1x96xf32>
    %36 = vector.shape_cast %35 : vector<1x1x96xf32> to vector<1x96xf32>
    %37 = vector.broadcast %36 : vector<1x96xf32> to vector<96x96xf32>
    %38 = arith.addf %34, %37 : vector<96x96xf32>
    %39 = arith.truncf %38 : vector<96x96xf32> to vector<96x96xbf16>
    %40 = vector.extract_strided_slice %39 {offsets = [0, 0], sizes = [96, 32], strides = [1, 1]} : vector<96x96xbf16> to vector<96x32xbf16>
    %41 = vector.shape_cast %40 : vector<96x32xbf16> to vector<2x48x32xbf16>
    %42 = vector.extract_strided_slice %39 {offsets = [0, 32], sizes = [96, 32], strides = [1, 1]} : vector<96x96xbf16> to vector<96x32xbf16>
    %43 = vector.shape_cast %42 : vector<96x32xbf16> to vector<2x48x32xbf16>
    %44 = vector.extract_strided_slice %39 {offsets = [0, 64], sizes = [96, 32], strides = [1, 1]} : vector<96x96xbf16> to vector<96x32xbf16>
    %45 = vector.shape_cast %44 : vector<96x32xbf16> to vector<2x48x32xbf16>
    %46 = vector.extract_strided_slice %41 {offsets = [0, 0, 0], sizes = [2, 48, 8], strides = [1, 1, 1]} : vector<2x48x32xbf16> to vector<2x48x8xbf16>
    %47 = vector.extract_strided_slice %43 {offsets = [0, 0, 0], sizes = [2, 48, 8], strides = [1, 1, 1]} : vector<2x48x32xbf16> to vector<2x48x8xbf16>
    "tpu.trace_start"() <{level = 10 : i32, message = "bqd,bkd->bqk"}> : () -> ()
    %cst_23 = arith.constant dense<0.000000e+00> : vector<2x48x48xf32>
    %48 = tpu.matmul %46, %47, %cst_23 {dimension_numbers = #tpu.dot_dimension_numbers<[2], [2], [1], [1], [0, 0, 0, 1, 1, 1], [0], [0]>} : vector<2x48x8xbf16>, vector<2x48x8xbf16>, vector<2x48x48xf32> -> vector<2x48x48xf32>
    "tpu.trace_stop"() : () -> ()
    %cst_24 = arith.constant dense<0xFF800000> : vector<2x48xf32>
    %49 = vector.multi_reduction <maximumf>, %48, %cst_24 [2] : vector<2x48x48xf32> to vector<2x48xf32>
    %50 = vector.shape_cast %49 : vector<2x48xf32> to vector<2x48x1xf32>
    %51 = vector.broadcast %50 : vector<2x48x1xf32> to vector<2x48x48xf32>
    %52 = arith.subf %48, %51 : vector<2x48x48xf32>
    %53 = math.exp %52 : vector<2x48x48xf32>
    %cst_25 = arith.constant dense<0.000000e+00> : vector<2x48xf32>
    %54 = vector.multi_reduction <add>, %53, %cst_25 [2] : vector<2x48x48xf32> to vector<2x48xf32>
    %55 = vector.shape_cast %54 : vector<2x48xf32> to vector<2x48x1xf32>
    %56 = tpu.reciprocal %55 {approx = true} : vector<2x48x1xf32> -> vector<2x48x1xf32>
    %57 = vector.broadcast %56 : vector<2x48x1xf32> to vector<2x48x48xf32>
    %58 = arith.mulf %53, %57 : vector<2x48x48xf32>
    %59 = arith.truncf %58 : vector<2x48x48xf32> to vector<2x48x48xbf16>
    %60 = vector.extract_strided_slice %45 {offsets = [0, 0, 0], sizes = [2, 48, 8], strides = [1, 1, 1]} : vector<2x48x32xbf16> to vector<2x48x8xbf16>
    "tpu.trace_start"() <{level = 10 : i32, message = "bqk,bkd->bqd"}> : () -> ()
    %cst_26 = arith.constant dense<0.000000e+00> : vector<2x48x8xf32>
    %61 = tpu.matmul %59, %60, %cst_26 {dimension_numbers = #tpu.dot_dimension_numbers<[2], [1], [1], [2], [0, 0, 0, 1, 1, 2], [0], [0]>} : vector<2x48x48xbf16>, vector<2x48x8xbf16>, vector<2x48x8xf32> -> vector<2x48x8xf32>
    "tpu.trace_stop"() : () -> ()
    %62 = vector.extract_strided_slice %41 {offsets = [0, 0, 8], sizes = [2, 48, 8], strides = [1, 1, 1]} : vector<2x48x32xbf16> to vector<2x48x8xbf16>
    %63 = vector.extract_strided_slice %43 {offsets = [0, 0, 8], sizes = [2, 48, 8], strides = [1, 1, 1]} : vector<2x48x32xbf16> to vector<2x48x8xbf16>
    "tpu.trace_start"() <{level = 10 : i32, message = "bqd,bkd->bqk"}> : () -> ()
    %cst_27 = arith.constant dense<0.000000e+00> : vector<2x48x48xf32>
    %64 = tpu.matmul %62, %63, %cst_27 {dimension_numbers = #tpu.dot_dimension_numbers<[2], [2], [1], [1], [0, 0, 0, 1, 1, 1], [0], [0]>} : vector<2x48x8xbf16>, vector<2x48x8xbf16>, vector<2x48x48xf32> -> vector<2x48x48xf32>
    "tpu.trace_stop"() : () -> ()
    %cst_28 = arith.constant dense<0xFF800000> : vector<2x48xf32>
    %65 = vector.multi_reduction <maximumf>, %64, %cst_28 [2] : vector<2x48x48xf32> to vector<2x48xf32>
    %66 = vector.shape_cast %65 : vector<2x48xf32> to vector<2x48x1xf32>
    %67 = vector.broadcast %66 : vector<2x48x1xf32> to vector<2x48x48xf32>
    %68 = arith.subf %64, %67 : vector<2x48x48xf32>
    %69 = math.exp %68 : vector<2x48x48xf32>
    %cst_29 = arith.constant dense<0.000000e+00> : vector<2x48xf32>
    %70 = vector.multi_reduction <add>, %69, %cst_29 [2] : vector<2x48x48xf32> to vector<2x48xf32>
    %71 = vector.shape_cast %70 : vector<2x48xf32> to vector<2x48x1xf32>
    %72 = tpu.reciprocal %71 {approx = true} : vector<2x48x1xf32> -> vector<2x48x1xf32>
    %73 = vector.broadcast %72 : vector<2x48x1xf32> to vector<2x48x48xf32>
    %74 = arith.mulf %69, %73 : vector<2x48x48xf32>
    %75 = arith.truncf %74 : vector<2x48x48xf32> to vector<2x48x48xbf16>
    %76 = vector.extract_strided_slice %45 {offsets = [0, 0, 8], sizes = [2, 48, 8], strides = [1, 1, 1]} : vector<2x48x32xbf16> to vector<2x48x8xbf16>
    "tpu.trace_start"() <{level = 10 : i32, message = "bqk,bkd->bqd"}> : () -> ()
    %cst_30 = arith.constant dense<0.000000e+00> : vector<2x48x8xf32>
    %77 = tpu.matmul %75, %76, %cst_30 {dimension_numbers = #tpu.dot_dimension_numbers<[2], [1], [1], [2], [0, 0, 0, 1, 1, 2], [0], [0]>} : vector<2x48x48xbf16>, vector<2x48x8xbf16>, vector<2x48x8xf32> -> vector<2x48x8xf32>
    "tpu.trace_stop"() : () -> ()
    %78 = vector.extract_strided_slice %41 {offsets = [0, 0, 16], sizes = [2, 48, 8], strides = [1, 1, 1]} : vector<2x48x32xbf16> to vector<2x48x8xbf16>
    %79 = vector.extract_strided_slice %43 {offsets = [0, 0, 16], sizes = [2, 48, 8], strides = [1, 1, 1]} : vector<2x48x32xbf16> to vector<2x48x8xbf16>
    "tpu.trace_start"() <{level = 10 : i32, message = "bqd,bkd->bqk"}> : () -> ()
    %cst_31 = arith.constant dense<0.000000e+00> : vector<2x48x48xf32>
    %80 = tpu.matmul %78, %79, %cst_31 {dimension_numbers = #tpu.dot_dimension_numbers<[2], [2], [1], [1], [0, 0, 0, 1, 1, 1], [0], [0]>} : vector<2x48x8xbf16>, vector<2x48x8xbf16>, vector<2x48x48xf32> -> vector<2x48x48xf32>
    "tpu.trace_stop"() : () -> ()
    %cst_32 = arith.constant dense<0xFF800000> : vector<2x48xf32>
    %81 = vector.multi_reduction <maximumf>, %80, %cst_32 [2] : vector<2x48x48xf32> to vector<2x48xf32>
    %82 = vector.shape_cast %81 : vector<2x48xf32> to vector<2x48x1xf32>
    %83 = vector.broadcast %82 : vector<2x48x1xf32> to vector<2x48x48xf32>
    %84 = arith.subf %80, %83 : vector<2x48x48xf32>
    %85 = math.exp %84 : vector<2x48x48xf32>
    %cst_33 = arith.constant dense<0.000000e+00> : vector<2x48xf32>
    %86 = vector.multi_reduction <add>, %85, %cst_33 [2] : vector<2x48x48xf32> to vector<2x48xf32>
    %87 = vector.shape_cast %86 : vector<2x48xf32> to vector<2x48x1xf32>
    %88 = tpu.reciprocal %87 {approx = true} : vector<2x48x1xf32> -> vector<2x48x1xf32>
    %89 = vector.broadcast %88 : vector<2x48x1xf32> to vector<2x48x48xf32>
    %90 = arith.mulf %85, %89 : vector<2x48x48xf32>
    %91 = arith.truncf %90 : vector<2x48x48xf32> to vector<2x48x48xbf16>
    %92 = vector.extract_strided_slice %45 {offsets = [0, 0, 16], sizes = [2, 48, 8], strides = [1, 1, 1]} : vector<2x48x32xbf16> to vector<2x48x8xbf16>
    "tpu.trace_start"() <{level = 10 : i32, message = "bqk,bkd->bqd"}> : () -> ()
    %cst_34 = arith.constant dense<0.000000e+00> : vector<2x48x8xf32>
    %93 = tpu.matmul %91, %92, %cst_34 {dimension_numbers = #tpu.dot_dimension_numbers<[2], [1], [1], [2], [0, 0, 0, 1, 1, 2], [0], [0]>} : vector<2x48x48xbf16>, vector<2x48x8xbf16>, vector<2x48x8xf32> -> vector<2x48x8xf32>
    "tpu.trace_stop"() : () -> ()
    %94 = vector.extract_strided_slice %41 {offsets = [0, 0, 24], sizes = [2, 48, 8], strides = [1, 1, 1]} : vector<2x48x32xbf16> to vector<2x48x8xbf16>
    %95 = vector.extract_strided_slice %43 {offsets = [0, 0, 24], sizes = [2, 48, 8], strides = [1, 1, 1]} : vector<2x48x32xbf16> to vector<2x48x8xbf16>
    "tpu.trace_start"() <{level = 10 : i32, message = "bqd,bkd->bqk"}> : () -> ()
    %cst_35 = arith.constant dense<0.000000e+00> : vector<2x48x48xf32>
    %96 = tpu.matmul %94, %95, %cst_35 {dimension_numbers = #tpu.dot_dimension_numbers<[2], [2], [1], [1], [0, 0, 0, 1, 1, 1], [0], [0]>} : vector<2x48x8xbf16>, vector<2x48x8xbf16>, vector<2x48x48xf32> -> vector<2x48x48xf32>
    "tpu.trace_stop"() : () -> ()
    %cst_36 = arith.constant dense<0xFF800000> : vector<2x48xf32>
    %97 = vector.multi_reduction <maximumf>, %96, %cst_36 [2] : vector<2x48x48xf32> to vector<2x48xf32>
    %98 = vector.shape_cast %97 : vector<2x48xf32> to vector<2x48x1xf32>
    %99 = vector.broadcast %98 : vector<2x48x1xf32> to vector<2x48x48xf32>
    %100 = arith.subf %96, %99 : vector<2x48x48xf32>
    %101 = math.exp %100 : vector<2x48x48xf32>
    %cst_37 = arith.constant dense<0.000000e+00> : vector<2x48xf32>
    %102 = vector.multi_reduction <add>, %101, %cst_37 [2] : vector<2x48x48xf32> to vector<2x48xf32>
    %103 = vector.shape_cast %102 : vector<2x48xf32> to vector<2x48x1xf32>
    %104 = tpu.reciprocal %103 {approx = true} : vector<2x48x1xf32> -> vector<2x48x1xf32>
    %105 = vector.broadcast %104 : vector<2x48x1xf32> to vector<2x48x48xf32>
    %106 = arith.mulf %101, %105 : vector<2x48x48xf32>
    %107 = arith.truncf %106 : vector<2x48x48xf32> to vector<2x48x48xbf16>
    %108 = vector.extract_strided_slice %45 {offsets = [0, 0, 24], sizes = [2, 48, 8], strides = [1, 1, 1]} : vector<2x48x32xbf16> to vector<2x48x8xbf16>
    "tpu.trace_start"() <{level = 10 : i32, message = "bqk,bkd->bqd"}> : () -> ()
    %cst_38 = arith.constant dense<0.000000e+00> : vector<2x48x8xf32>
    %109 = tpu.matmul %107, %108, %cst_38 {dimension_numbers = #tpu.dot_dimension_numbers<[2], [1], [1], [2], [0, 0, 0, 1, 1, 2], [0], [0]>} : vector<2x48x48xbf16>, vector<2x48x8xbf16>, vector<2x48x8xf32> -> vector<2x48x8xf32>
    "tpu.trace_stop"() : () -> ()
    %110 = tpu.concatenate %61, %77, %93, %109 in 2 : vector<2x48x8xf32>, vector<2x48x8xf32>, vector<2x48x8xf32>, vector<2x48x8xf32> -> vector<2x48x32xf32>
    %111 = vector.shape_cast %110 : vector<2x48x32xf32> to vector<96x32xf32>
    %112 = arith.truncf %111 : vector<96x32xf32> to vector<96x32xbf16>
    %c0_39 = arith.constant 0 : index
    %c0_40 = arith.constant 0 : index
    %c0_41 = arith.constant 0 : index
    %113 = vector.load %arg8[%c0_39, %c0_40, %c0_41] : memref<2x32x32xbf16, #tpu.memory_space<vmem>>, vector<1x32x32xbf16>
    %114 = vector.shape_cast %113 : vector<1x32x32xbf16> to vector<32x32xbf16>
    %cst_42 = arith.constant dense<0.000000e+00> : vector<96x32xf32>
    %115 = tpu.matmul %112, %114, %cst_42 {dimension_numbers = #tpu.dot_dimension_numbers<[1], [0], [0], [1], [0, 0, 1, 1], [], []>} : vector<96x32xbf16>, vector<32x32xbf16>, vector<96x32xf32> -> vector<96x32xf32>
    %116 = arith.addf %4, %115 : vector<96x32xf32>
    %c0_43 = arith.constant 0 : index
    %c0_44 = arith.constant 0 : index
    %c0_45 = arith.constant 0 : index
    %117 = vector.load %arg9[%c0_43, %c0_44, %c0_45] : memref<2x1x32xf32, #tpu.memory_space<vmem>>, vector<1x1x32xf32>
    %118 = vector.shape_cast %117 : vector<1x1x32xf32> to vector<1x32xf32>
    %119 = vector.broadcast %118 : vector<1x32xf32> to vector<96x32xf32>
    %120 = arith.addf %116, %119 : vector<96x32xf32>
    %c0_46 = arith.constant 0 : index
    %c0_47 = arith.constant 0 : index
    %c0_48 = arith.constant 0 : index
    %121 = vector.load %arg10[%c0_46, %c0_47, %c0_48] : memref<2x1x32xf32, #tpu.memory_space<vmem>>, vector<1x1x32xf32>
    %122 = vector.shape_cast %121 : vector<1x1x32xf32> to vector<1x32xf32>
    %c0_49 = arith.constant 0 : index
    %c0_50 = arith.constant 0 : index
    %c0_51 = arith.constant 0 : index
    %123 = vector.load %arg11[%c0_49, %c0_50, %c0_51] : memref<2x1x32xf32, #tpu.memory_space<vmem>>, vector<1x1x32xf32>
    %124 = vector.shape_cast %123 : vector<1x1x32xf32> to vector<1x32xf32>
    %cst_52 = arith.constant dense<0.000000e+00> : vector<96xf32>
    %125 = vector.multi_reduction <add>, %120, %cst_52 [1] : vector<96x32xf32> to vector<96xf32>
    %126 = vector.shape_cast %125 : vector<96xf32> to vector<96x1xf32>
    %cst_53 = arith.constant 3.200000e+01 : f32
    %127 = vector.broadcast %cst_53 : f32 to vector<96x1xf32>
    %128 = arith.divf %126, %127 : vector<96x1xf32>
    %129 = vector.broadcast %128 : vector<96x1xf32> to vector<96x32xf32>
    %130 = arith.subf %120, %129 : vector<96x32xf32>
    %131 = arith.mulf %130, %130 : vector<96x32xf32>
    %cst_54 = arith.constant dense<0.000000e+00> : vector<96xf32>
    %132 = vector.multi_reduction <add>, %131, %cst_54 [1] : vector<96x32xf32> to vector<96xf32>
    %133 = vector.shape_cast %132 : vector<96xf32> to vector<96x1xf32>
    %cst_55 = arith.constant 3.200000e+01 : f32
    %134 = vector.broadcast %cst_55 : f32 to vector<96x1xf32>
    %135 = arith.divf %133, %134 : vector<96x1xf32>
    %136 = vector.broadcast %128 : vector<96x1xf32> to vector<96x32xf32>
    %137 = arith.subf %120, %136 : vector<96x32xf32>
    %cst_56 = arith.constant 9.99999974E-6 : f32
    %138 = vector.broadcast %cst_56 : f32 to vector<96x1xf32>
    %139 = arith.addf %135, %138 : vector<96x1xf32>
    %140 = math.rsqrt %139 : vector<96x1xf32>
    %141 = vector.broadcast %140 : vector<96x1xf32> to vector<96x32xf32>
    %142 = arith.mulf %137, %141 : vector<96x32xf32>
    %143 = vector.broadcast %122 : vector<1x32xf32> to vector<96x32xf32>
    %144 = arith.mulf %142, %143 : vector<96x32xf32>
    %145 = vector.broadcast %124 : vector<1x32xf32> to vector<96x32xf32>
    %146 = arith.addf %144, %145 : vector<96x32xf32>
    %147 = arith.truncf %146 : vector<96x32xf32> to vector<96x32xbf16>
    %c0_57 = arith.constant 0 : index
    %c0_58 = arith.constant 0 : index
    %c0_59 = arith.constant 0 : index
    %148 = vector.load %arg12[%c0_57, %c0_58, %c0_59] : memref<2x32x128xbf16, #tpu.memory_space<vmem>>, vector<1x32x128xbf16>
    %149 = vector.shape_cast %148 : vector<1x32x128xbf16> to vector<32x128xbf16>
    %cst_60 = arith.constant dense<0.000000e+00> : vector<96x128xf32>
    %150 = tpu.matmul %147, %149, %cst_60 {dimension_numbers = #tpu.dot_dimension_numbers<[1], [0], [0], [1], [0, 0, 1, 1], [], []>} : vector<96x32xbf16>, vector<32x128xbf16>, vector<96x128xf32> -> vector<96x128xf32>
    %c0_61 = arith.constant 0 : index
    %c0_62 = arith.constant 0 : index
    %c0_63 = arith.constant 0 : index
    %151 = vector.load %arg13[%c0_61, %c0_62, %c0_63] : memref<2x1x128xf32, #tpu.memory_space<vmem>>, vector<1x1x128xf32>
    %152 = vector.shape_cast %151 : vector<1x1x128xf32> to vector<1x128xf32>
    %153 = vector.broadcast %152 : vector<1x128xf32> to vector<96x128xf32>
    %154 = arith.addf %150, %153 : vector<96x128xf32>
    %155 = arith.mulf %154, %154 : vector<96x128xf32>
    %156 = arith.mulf %154, %155 : vector<96x128xf32>
    %cst_64 = arith.constant 4.471500e-02 : f32
    %157 = vector.broadcast %cst_64 : f32 to vector<96x128xf32>
    %158 = arith.mulf %157, %156 : vector<96x128xf32>
    %159 = arith.addf %154, %158 : vector<96x128xf32>
    %cst_65 = arith.constant 0.797884583 : f32
    %160 = vector.broadcast %cst_65 : f32 to vector<96x128xf32>
    %161 = arith.mulf %160, %159 : vector<96x128xf32>
    %162 = math.tanh %161 : vector<96x128xf32>
    %cst_66 = arith.constant 1.000000e+00 : f32
    %163 = vector.broadcast %cst_66 : f32 to vector<96x128xf32>
    %164 = arith.addf %163, %162 : vector<96x128xf32>
    %cst_67 = arith.constant 5.000000e-01 : f32
    %165 = vector.broadcast %cst_67 : f32 to vector<96x128xf32>
    %166 = arith.mulf %165, %164 : vector<96x128xf32>
    %167 = arith.mulf %154, %166 : vector<96x128xf32>
    %168 = arith.truncf %167 : vector<96x128xf32> to vector<96x128xbf16>
    %c0_68 = arith.constant 0 : index
    %c0_69 = arith.constant 0 : index
    %c0_70 = arith.constant 0 : index
    %169 = vector.load %arg14[%c0_68, %c0_69, %c0_70] : memref<2x128x32xbf16, #tpu.memory_space<vmem>>, vector<1x128x32xbf16>
    %170 = vector.shape_cast %169 : vector<1x128x32xbf16> to vector<128x32xbf16>
    %cst_71 = arith.constant dense<0.000000e+00> : vector<96x32xf32>
    %171 = tpu.matmul %168, %170, %cst_71 {dimension_numbers = #tpu.dot_dimension_numbers<[1], [0], [0], [1], [0, 0, 1, 1], [], []>} : vector<96x128xbf16>, vector<128x32xbf16>, vector<96x32xf32> -> vector<96x32xf32>
    %c0_72 = arith.constant 0 : index
    %c0_73 = arith.constant 0 : index
    %c0_74 = arith.constant 0 : index
    %172 = vector.load %arg15[%c0_72, %c0_73, %c0_74] : memref<2x1x32xf32, #tpu.memory_space<vmem>>, vector<1x1x32xf32>
    %173 = vector.shape_cast %172 : vector<1x1x32xf32> to vector<1x32xf32>
    %174 = vector.broadcast %173 : vector<1x32xf32> to vector<96x32xf32>
    %175 = arith.addf %171, %174 : vector<96x32xf32>
    %176 = arith.addf %120, %175 : vector<96x32xf32>
    %c1 = arith.constant 1 : index
    %c0_75 = arith.constant 0 : index
    %c0_76 = arith.constant 0 : index
    %177 = vector.load %arg4[%c1, %c0_75, %c0_76] : memref<2x1x32xf32, #tpu.memory_space<vmem>>, vector<1x1x32xf32>
    %178 = vector.shape_cast %177 : vector<1x1x32xf32> to vector<1x32xf32>
    %c1_77 = arith.constant 1 : index
    %c0_78 = arith.constant 0 : index
    %c0_79 = arith.constant 0 : index
    %179 = vector.load %arg5[%c1_77, %c0_78, %c0_79] : memref<2x1x32xf32, #tpu.memory_space<vmem>>, vector<1x1x32xf32>
    %180 = vector.shape_cast %179 : vector<1x1x32xf32> to vector<1x32xf32>
    %cst_80 = arith.constant dense<0.000000e+00> : vector<96xf32>
    %181 = vector.multi_reduction <add>, %176, %cst_80 [1] : vector<96x32xf32> to vector<96xf32>
    %182 = vector.shape_cast %181 : vector<96xf32> to vector<96x1xf32>
    %cst_81 = arith.constant 3.200000e+01 : f32
    %183 = vector.broadcast %cst_81 : f32 to vector<96x1xf32>
    %184 = arith.divf %182, %183 : vector<96x1xf32>
    %185 = vector.broadcast %184 : vector<96x1xf32> to vector<96x32xf32>
    %186 = arith.subf %176, %185 : vector<96x32xf32>
    %187 = arith.mulf %186, %186 : vector<96x32xf32>
    %cst_82 = arith.constant dense<0.000000e+00> : vector<96xf32>
    %188 = vector.multi_reduction <add>, %187, %cst_82 [1] : vector<96x32xf32> to vector<96xf32>
    %189 = vector.shape_cast %188 : vector<96xf32> to vector<96x1xf32>
    %cst_83 = arith.constant 3.200000e+01 : f32
    %190 = vector.broadcast %cst_83 : f32 to vector<96x1xf32>
    %191 = arith.divf %189, %190 : vector<96x1xf32>
    %192 = vector.broadcast %184 : vector<96x1xf32> to vector<96x32xf32>
    %193 = arith.subf %176, %192 : vector<96x32xf32>
    %cst_84 = arith.constant 9.99999974E-6 : f32
    %194 = vector.broadcast %cst_84 : f32 to vector<96x1xf32>
    %195 = arith.addf %191, %194 : vector<96x1xf32>
    %196 = math.rsqrt %195 : vector<96x1xf32>
    %197 = vector.broadcast %196 : vector<96x1xf32> to vector<96x32xf32>
    %198 = arith.mulf %193, %197 : vector<96x32xf32>
    %199 = vector.broadcast %178 : vector<1x32xf32> to vector<96x32xf32>
    %200 = arith.mulf %198, %199 : vector<96x32xf32>
    %201 = vector.broadcast %180 : vector<1x32xf32> to vector<96x32xf32>
    %202 = arith.addf %200, %201 : vector<96x32xf32>
    %203 = arith.truncf %202 : vector<96x32xf32> to vector<96x32xbf16>
    %c1_85 = arith.constant 1 : index
    %c0_86 = arith.constant 0 : index
    %c0_87 = arith.constant 0 : index
    %204 = vector.load %arg6[%c1_85, %c0_86, %c0_87] : memref<2x32x96xbf16, #tpu.memory_space<vmem>>, vector<1x32x96xbf16>
    %205 = vector.shape_cast %204 : vector<1x32x96xbf16> to vector<32x96xbf16>
    %cst_88 = arith.constant dense<0.000000e+00> : vector<96x96xf32>
    %206 = tpu.matmul %203, %205, %cst_88 {dimension_numbers = #tpu.dot_dimension_numbers<[1], [0], [0], [1], [0, 0, 1, 1], [], []>} : vector<96x32xbf16>, vector<32x96xbf16>, vector<96x96xf32> -> vector<96x96xf32>
    %c1_89 = arith.constant 1 : index
    %c0_90 = arith.constant 0 : index
    %c0_91 = arith.constant 0 : index
    %207 = vector.load %arg7[%c1_89, %c0_90, %c0_91] : memref<2x1x96xf32, #tpu.memory_space<vmem>>, vector<1x1x96xf32>
    %208 = vector.shape_cast %207 : vector<1x1x96xf32> to vector<1x96xf32>
    %209 = vector.broadcast %208 : vector<1x96xf32> to vector<96x96xf32>
    %210 = arith.addf %206, %209 : vector<96x96xf32>
    %211 = arith.truncf %210 : vector<96x96xf32> to vector<96x96xbf16>
    %212 = vector.extract_strided_slice %211 {offsets = [0, 0], sizes = [96, 32], strides = [1, 1]} : vector<96x96xbf16> to vector<96x32xbf16>
    %213 = vector.shape_cast %212 : vector<96x32xbf16> to vector<2x48x32xbf16>
    %214 = vector.extract_strided_slice %211 {offsets = [0, 32], sizes = [96, 32], strides = [1, 1]} : vector<96x96xbf16> to vector<96x32xbf16>
    %215 = vector.shape_cast %214 : vector<96x32xbf16> to vector<2x48x32xbf16>
    %216 = vector.extract_strided_slice %211 {offsets = [0, 64], sizes = [96, 32], strides = [1, 1]} : vector<96x96xbf16> to vector<96x32xbf16>
    %217 = vector.shape_cast %216 : vector<96x32xbf16> to vector<2x48x32xbf16>
    %218 = vector.extract_strided_slice %213 {offsets = [0, 0, 0], sizes = [2, 48, 8], strides = [1, 1, 1]} : vector<2x48x32xbf16> to vector<2x48x8xbf16>
    %219 = vector.extract_strided_slice %215 {offsets = [0, 0, 0], sizes = [2, 48, 8], strides = [1, 1, 1]} : vector<2x48x32xbf16> to vector<2x48x8xbf16>
    "tpu.trace_start"() <{level = 10 : i32, message = "bqd,bkd->bqk"}> : () -> ()
    %cst_92 = arith.constant dense<0.000000e+00> : vector<2x48x48xf32>
    %220 = tpu.matmul %218, %219, %cst_92 {dimension_numbers = #tpu.dot_dimension_numbers<[2], [2], [1], [1], [0, 0, 0, 1, 1, 1], [0], [0]>} : vector<2x48x8xbf16>, vector<2x48x8xbf16>, vector<2x48x48xf32> -> vector<2x48x48xf32>
    "tpu.trace_stop"() : () -> ()
    %cst_93 = arith.constant dense<0xFF800000> : vector<2x48xf32>
    %221 = vector.multi_reduction <maximumf>, %220, %cst_93 [2] : vector<2x48x48xf32> to vector<2x48xf32>
    %222 = vector.shape_cast %221 : vector<2x48xf32> to vector<2x48x1xf32>
    %223 = vector.broadcast %222 : vector<2x48x1xf32> to vector<2x48x48xf32>
    %224 = arith.subf %220, %223 : vector<2x48x48xf32>
    %225 = math.exp %224 : vector<2x48x48xf32>
    %cst_94 = arith.constant dense<0.000000e+00> : vector<2x48xf32>
    %226 = vector.multi_reduction <add>, %225, %cst_94 [2] : vector<2x48x48xf32> to vector<2x48xf32>
    %227 = vector.shape_cast %226 : vector<2x48xf32> to vector<2x48x1xf32>
    %228 = tpu.reciprocal %227 {approx = true} : vector<2x48x1xf32> -> vector<2x48x1xf32>
    %229 = vector.broadcast %228 : vector<2x48x1xf32> to vector<2x48x48xf32>
    %230 = arith.mulf %225, %229 : vector<2x48x48xf32>
    %231 = arith.truncf %230 : vector<2x48x48xf32> to vector<2x48x48xbf16>
    %232 = vector.extract_strided_slice %217 {offsets = [0, 0, 0], sizes = [2, 48, 8], strides = [1, 1, 1]} : vector<2x48x32xbf16> to vector<2x48x8xbf16>
    "tpu.trace_start"() <{level = 10 : i32, message = "bqk,bkd->bqd"}> : () -> ()
    %cst_95 = arith.constant dense<0.000000e+00> : vector<2x48x8xf32>
    %233 = tpu.matmul %231, %232, %cst_95 {dimension_numbers = #tpu.dot_dimension_numbers<[2], [1], [1], [2], [0, 0, 0, 1, 1, 2], [0], [0]>} : vector<2x48x48xbf16>, vector<2x48x8xbf16>, vector<2x48x8xf32> -> vector<2x48x8xf32>
    "tpu.trace_stop"() : () -> ()
    %234 = vector.extract_strided_slice %213 {offsets = [0, 0, 8], sizes = [2, 48, 8], strides = [1, 1, 1]} : vector<2x48x32xbf16> to vector<2x48x8xbf16>
    %235 = vector.extract_strided_slice %215 {offsets = [0, 0, 8], sizes = [2, 48, 8], strides = [1, 1, 1]} : vector<2x48x32xbf16> to vector<2x48x8xbf16>
    "tpu.trace_start"() <{level = 10 : i32, message = "bqd,bkd->bqk"}> : () -> ()
    %cst_96 = arith.constant dense<0.000000e+00> : vector<2x48x48xf32>
    %236 = tpu.matmul %234, %235, %cst_96 {dimension_numbers = #tpu.dot_dimension_numbers<[2], [2], [1], [1], [0, 0, 0, 1, 1, 1], [0], [0]>} : vector<2x48x8xbf16>, vector<2x48x8xbf16>, vector<2x48x48xf32> -> vector<2x48x48xf32>
    "tpu.trace_stop"() : () -> ()
    %cst_97 = arith.constant dense<0xFF800000> : vector<2x48xf32>
    %237 = vector.multi_reduction <maximumf>, %236, %cst_97 [2] : vector<2x48x48xf32> to vector<2x48xf32>
    %238 = vector.shape_cast %237 : vector<2x48xf32> to vector<2x48x1xf32>
    %239 = vector.broadcast %238 : vector<2x48x1xf32> to vector<2x48x48xf32>
    %240 = arith.subf %236, %239 : vector<2x48x48xf32>
    %241 = math.exp %240 : vector<2x48x48xf32>
    %cst_98 = arith.constant dense<0.000000e+00> : vector<2x48xf32>
    %242 = vector.multi_reduction <add>, %241, %cst_98 [2] : vector<2x48x48xf32> to vector<2x48xf32>
    %243 = vector.shape_cast %242 : vector<2x48xf32> to vector<2x48x1xf32>
    %244 = tpu.reciprocal %243 {approx = true} : vector<2x48x1xf32> -> vector<2x48x1xf32>
    %245 = vector.broadcast %244 : vector<2x48x1xf32> to vector<2x48x48xf32>
    %246 = arith.mulf %241, %245 : vector<2x48x48xf32>
    %247 = arith.truncf %246 : vector<2x48x48xf32> to vector<2x48x48xbf16>
    %248 = vector.extract_strided_slice %217 {offsets = [0, 0, 8], sizes = [2, 48, 8], strides = [1, 1, 1]} : vector<2x48x32xbf16> to vector<2x48x8xbf16>
    "tpu.trace_start"() <{level = 10 : i32, message = "bqk,bkd->bqd"}> : () -> ()
    %cst_99 = arith.constant dense<0.000000e+00> : vector<2x48x8xf32>
    %249 = tpu.matmul %247, %248, %cst_99 {dimension_numbers = #tpu.dot_dimension_numbers<[2], [1], [1], [2], [0, 0, 0, 1, 1, 2], [0], [0]>} : vector<2x48x48xbf16>, vector<2x48x8xbf16>, vector<2x48x8xf32> -> vector<2x48x8xf32>
    "tpu.trace_stop"() : () -> ()
    %250 = vector.extract_strided_slice %213 {offsets = [0, 0, 16], sizes = [2, 48, 8], strides = [1, 1, 1]} : vector<2x48x32xbf16> to vector<2x48x8xbf16>
    %251 = vector.extract_strided_slice %215 {offsets = [0, 0, 16], sizes = [2, 48, 8], strides = [1, 1, 1]} : vector<2x48x32xbf16> to vector<2x48x8xbf16>
    "tpu.trace_start"() <{level = 10 : i32, message = "bqd,bkd->bqk"}> : () -> ()
    %cst_100 = arith.constant dense<0.000000e+00> : vector<2x48x48xf32>
    %252 = tpu.matmul %250, %251, %cst_100 {dimension_numbers = #tpu.dot_dimension_numbers<[2], [2], [1], [1], [0, 0, 0, 1, 1, 1], [0], [0]>} : vector<2x48x8xbf16>, vector<2x48x8xbf16>, vector<2x48x48xf32> -> vector<2x48x48xf32>
    "tpu.trace_stop"() : () -> ()
    %cst_101 = arith.constant dense<0xFF800000> : vector<2x48xf32>
    %253 = vector.multi_reduction <maximumf>, %252, %cst_101 [2] : vector<2x48x48xf32> to vector<2x48xf32>
    %254 = vector.shape_cast %253 : vector<2x48xf32> to vector<2x48x1xf32>
    %255 = vector.broadcast %254 : vector<2x48x1xf32> to vector<2x48x48xf32>
    %256 = arith.subf %252, %255 : vector<2x48x48xf32>
    %257 = math.exp %256 : vector<2x48x48xf32>
    %cst_102 = arith.constant dense<0.000000e+00> : vector<2x48xf32>
    %258 = vector.multi_reduction <add>, %257, %cst_102 [2] : vector<2x48x48xf32> to vector<2x48xf32>
    %259 = vector.shape_cast %258 : vector<2x48xf32> to vector<2x48x1xf32>
    %260 = tpu.reciprocal %259 {approx = true} : vector<2x48x1xf32> -> vector<2x48x1xf32>
    %261 = vector.broadcast %260 : vector<2x48x1xf32> to vector<2x48x48xf32>
    %262 = arith.mulf %257, %261 : vector<2x48x48xf32>
    %263 = arith.truncf %262 : vector<2x48x48xf32> to vector<2x48x48xbf16>
    %264 = vector.extract_strided_slice %217 {offsets = [0, 0, 16], sizes = [2, 48, 8], strides = [1, 1, 1]} : vector<2x48x32xbf16> to vector<2x48x8xbf16>
    "tpu.trace_start"() <{level = 10 : i32, message = "bqk,bkd->bqd"}> : () -> ()
    %cst_103 = arith.constant dense<0.000000e+00> : vector<2x48x8xf32>
    %265 = tpu.matmul %263, %264, %cst_103 {dimension_numbers = #tpu.dot_dimension_numbers<[2], [1], [1], [2], [0, 0, 0, 1, 1, 2], [0], [0]>} : vector<2x48x48xbf16>, vector<2x48x8xbf16>, vector<2x48x8xf32> -> vector<2x48x8xf32>
    "tpu.trace_stop"() : () -> ()
    %266 = vector.extract_strided_slice %213 {offsets = [0, 0, 24], sizes = [2, 48, 8], strides = [1, 1, 1]} : vector<2x48x32xbf16> to vector<2x48x8xbf16>
    %267 = vector.extract_strided_slice %215 {offsets = [0, 0, 24], sizes = [2, 48, 8], strides = [1, 1, 1]} : vector<2x48x32xbf16> to vector<2x48x8xbf16>
    "tpu.trace_start"() <{level = 10 : i32, message = "bqd,bkd->bqk"}> : () -> ()
    %cst_104 = arith.constant dense<0.000000e+00> : vector<2x48x48xf32>
    %268 = tpu.matmul %266, %267, %cst_104 {dimension_numbers = #tpu.dot_dimension_numbers<[2], [2], [1], [1], [0, 0, 0, 1, 1, 1], [0], [0]>} : vector<2x48x8xbf16>, vector<2x48x8xbf16>, vector<2x48x48xf32> -> vector<2x48x48xf32>
    "tpu.trace_stop"() : () -> ()
    %cst_105 = arith.constant dense<0xFF800000> : vector<2x48xf32>
    %269 = vector.multi_reduction <maximumf>, %268, %cst_105 [2] : vector<2x48x48xf32> to vector<2x48xf32>
    %270 = vector.shape_cast %269 : vector<2x48xf32> to vector<2x48x1xf32>
    %271 = vector.broadcast %270 : vector<2x48x1xf32> to vector<2x48x48xf32>
    %272 = arith.subf %268, %271 : vector<2x48x48xf32>
    %273 = math.exp %272 : vector<2x48x48xf32>
    %cst_106 = arith.constant dense<0.000000e+00> : vector<2x48xf32>
    %274 = vector.multi_reduction <add>, %273, %cst_106 [2] : vector<2x48x48xf32> to vector<2x48xf32>
    %275 = vector.shape_cast %274 : vector<2x48xf32> to vector<2x48x1xf32>
    %276 = tpu.reciprocal %275 {approx = true} : vector<2x48x1xf32> -> vector<2x48x1xf32>
    %277 = vector.broadcast %276 : vector<2x48x1xf32> to vector<2x48x48xf32>
    %278 = arith.mulf %273, %277 : vector<2x48x48xf32>
    %279 = arith.truncf %278 : vector<2x48x48xf32> to vector<2x48x48xbf16>
    %280 = vector.extract_strided_slice %217 {offsets = [0, 0, 24], sizes = [2, 48, 8], strides = [1, 1, 1]} : vector<2x48x32xbf16> to vector<2x48x8xbf16>
    "tpu.trace_start"() <{level = 10 : i32, message = "bqk,bkd->bqd"}> : () -> ()
    %cst_107 = arith.constant dense<0.000000e+00> : vector<2x48x8xf32>
    %281 = tpu.matmul %279, %280, %cst_107 {dimension_numbers = #tpu.dot_dimension_numbers<[2], [1], [1], [2], [0, 0, 0, 1, 1, 2], [0], [0]>} : vector<2x48x48xbf16>, vector<2x48x8xbf16>, vector<2x48x8xf32> -> vector<2x48x8xf32>
    "tpu.trace_stop"() : () -> ()
    %282 = tpu.concatenate %233, %249, %265, %281 in 2 : vector<2x48x8xf32>, vector<2x48x8xf32>, vector<2x48x8xf32>, vector<2x48x8xf32> -> vector<2x48x32xf32>
    %283 = vector.shape_cast %282 : vector<2x48x32xf32> to vector<96x32xf32>
    %284 = arith.truncf %283 : vector<96x32xf32> to vector<96x32xbf16>
    %c1_108 = arith.constant 1 : index
    %c0_109 = arith.constant 0 : index
    %c0_110 = arith.constant 0 : index
    %285 = vector.load %arg8[%c1_108, %c0_109, %c0_110] : memref<2x32x32xbf16, #tpu.memory_space<vmem>>, vector<1x32x32xbf16>
    %286 = vector.shape_cast %285 : vector<1x32x32xbf16> to vector<32x32xbf16>
    %cst_111 = arith.constant dense<0.000000e+00> : vector<96x32xf32>
    %287 = tpu.matmul %284, %286, %cst_111 {dimension_numbers = #tpu.dot_dimension_numbers<[1], [0], [0], [1], [0, 0, 1, 1], [], []>} : vector<96x32xbf16>, vector<32x32xbf16>, vector<96x32xf32> -> vector<96x32xf32>
    %288 = arith.addf %176, %287 : vector<96x32xf32>
    %c1_112 = arith.constant 1 : index
    %c0_113 = arith.constant 0 : index
    %c0_114 = arith.constant 0 : index
    %289 = vector.load %arg9[%c1_112, %c0_113, %c0_114] : memref<2x1x32xf32, #tpu.memory_space<vmem>>, vector<1x1x32xf32>
    %290 = vector.shape_cast %289 : vector<1x1x32xf32> to vector<1x32xf32>
    %291 = vector.broadcast %290 : vector<1x32xf32> to vector<96x32xf32>
    %292 = arith.addf %288, %291 : vector<96x32xf32>
    %c1_115 = arith.constant 1 : index
    %c0_116 = arith.constant 0 : index
    %c0_117 = arith.constant 0 : index
    %293 = vector.load %arg10[%c1_115, %c0_116, %c0_117] : memref<2x1x32xf32, #tpu.memory_space<vmem>>, vector<1x1x32xf32>
    %294 = vector.shape_cast %293 : vector<1x1x32xf32> to vector<1x32xf32>
    %c1_118 = arith.constant 1 : index
    %c0_119 = arith.constant 0 : index
    %c0_120 = arith.constant 0 : index
    %295 = vector.load %arg11[%c1_118, %c0_119, %c0_120] : memref<2x1x32xf32, #tpu.memory_space<vmem>>, vector<1x1x32xf32>
    %296 = vector.shape_cast %295 : vector<1x1x32xf32> to vector<1x32xf32>
    %cst_121 = arith.constant dense<0.000000e+00> : vector<96xf32>
    %297 = vector.multi_reduction <add>, %292, %cst_121 [1] : vector<96x32xf32> to vector<96xf32>
    %298 = vector.shape_cast %297 : vector<96xf32> to vector<96x1xf32>
    %cst_122 = arith.constant 3.200000e+01 : f32
    %299 = vector.broadcast %cst_122 : f32 to vector<96x1xf32>
    %300 = arith.divf %298, %299 : vector<96x1xf32>
    %301 = vector.broadcast %300 : vector<96x1xf32> to vector<96x32xf32>
    %302 = arith.subf %292, %301 : vector<96x32xf32>
    %303 = arith.mulf %302, %302 : vector<96x32xf32>
    %cst_123 = arith.constant dense<0.000000e+00> : vector<96xf32>
    %304 = vector.multi_reduction <add>, %303, %cst_123 [1] : vector<96x32xf32> to vector<96xf32>
    %305 = vector.shape_cast %304 : vector<96xf32> to vector<96x1xf32>
    %cst_124 = arith.constant 3.200000e+01 : f32
    %306 = vector.broadcast %cst_124 : f32 to vector<96x1xf32>
    %307 = arith.divf %305, %306 : vector<96x1xf32>
    %308 = vector.broadcast %300 : vector<96x1xf32> to vector<96x32xf32>
    %309 = arith.subf %292, %308 : vector<96x32xf32>
    %cst_125 = arith.constant 9.99999974E-6 : f32
    %310 = vector.broadcast %cst_125 : f32 to vector<96x1xf32>
    %311 = arith.addf %307, %310 : vector<96x1xf32>
    %312 = math.rsqrt %311 : vector<96x1xf32>
    %313 = vector.broadcast %312 : vector<96x1xf32> to vector<96x32xf32>
    %314 = arith.mulf %309, %313 : vector<96x32xf32>
    %315 = vector.broadcast %294 : vector<1x32xf32> to vector<96x32xf32>
    %316 = arith.mulf %314, %315 : vector<96x32xf32>
    %317 = vector.broadcast %296 : vector<1x32xf32> to vector<96x32xf32>
    %318 = arith.addf %316, %317 : vector<96x32xf32>
    %319 = arith.truncf %318 : vector<96x32xf32> to vector<96x32xbf16>
    %c1_126 = arith.constant 1 : index
    %c0_127 = arith.constant 0 : index
    %c0_128 = arith.constant 0 : index
    %320 = vector.load %arg12[%c1_126, %c0_127, %c0_128] : memref<2x32x128xbf16, #tpu.memory_space<vmem>>, vector<1x32x128xbf16>
    %321 = vector.shape_cast %320 : vector<1x32x128xbf16> to vector<32x128xbf16>
    %cst_129 = arith.constant dense<0.000000e+00> : vector<96x128xf32>
    %322 = tpu.matmul %319, %321, %cst_129 {dimension_numbers = #tpu.dot_dimension_numbers<[1], [0], [0], [1], [0, 0, 1, 1], [], []>} : vector<96x32xbf16>, vector<32x128xbf16>, vector<96x128xf32> -> vector<96x128xf32>
    %c1_130 = arith.constant 1 : index
    %c0_131 = arith.constant 0 : index
    %c0_132 = arith.constant 0 : index
    %323 = vector.load %arg13[%c1_130, %c0_131, %c0_132] : memref<2x1x128xf32, #tpu.memory_space<vmem>>, vector<1x1x128xf32>
    %324 = vector.shape_cast %323 : vector<1x1x128xf32> to vector<1x128xf32>
    %325 = vector.broadcast %324 : vector<1x128xf32> to vector<96x128xf32>
    %326 = arith.addf %322, %325 : vector<96x128xf32>
    %327 = arith.mulf %326, %326 : vector<96x128xf32>
    %328 = arith.mulf %326, %327 : vector<96x128xf32>
    %cst_133 = arith.constant 4.471500e-02 : f32
    %329 = vector.broadcast %cst_133 : f32 to vector<96x128xf32>
    %330 = arith.mulf %329, %328 : vector<96x128xf32>
    %331 = arith.addf %326, %330 : vector<96x128xf32>
    %cst_134 = arith.constant 0.797884583 : f32
    %332 = vector.broadcast %cst_134 : f32 to vector<96x128xf32>
    %333 = arith.mulf %332, %331 : vector<96x128xf32>
    %334 = math.tanh %333 : vector<96x128xf32>
    %cst_135 = arith.constant 1.000000e+00 : f32
    %335 = vector.broadcast %cst_135 : f32 to vector<96x128xf32>
    %336 = arith.addf %335, %334 : vector<96x128xf32>
    %cst_136 = arith.constant 5.000000e-01 : f32
    %337 = vector.broadcast %cst_136 : f32 to vector<96x128xf32>
    %338 = arith.mulf %337, %336 : vector<96x128xf32>
    %339 = arith.mulf %326, %338 : vector<96x128xf32>
    %340 = arith.truncf %339 : vector<96x128xf32> to vector<96x128xbf16>
    %c1_137 = arith.constant 1 : index
    %c0_138 = arith.constant 0 : index
    %c0_139 = arith.constant 0 : index
    %341 = vector.load %arg14[%c1_137, %c0_138, %c0_139] : memref<2x128x32xbf16, #tpu.memory_space<vmem>>, vector<1x128x32xbf16>
    %342 = vector.shape_cast %341 : vector<1x128x32xbf16> to vector<128x32xbf16>
    %cst_140 = arith.constant dense<0.000000e+00> : vector<96x32xf32>
    %343 = tpu.matmul %340, %342, %cst_140 {dimension_numbers = #tpu.dot_dimension_numbers<[1], [0], [0], [1], [0, 0, 1, 1], [], []>} : vector<96x128xbf16>, vector<128x32xbf16>, vector<96x32xf32> -> vector<96x32xf32>
    %c1_141 = arith.constant 1 : index
    %c0_142 = arith.constant 0 : index
    %c0_143 = arith.constant 0 : index
    %344 = vector.load %arg15[%c1_141, %c0_142, %c0_143] : memref<2x1x32xf32, #tpu.memory_space<vmem>>, vector<1x1x32xf32>
    %345 = vector.shape_cast %344 : vector<1x1x32xf32> to vector<1x32xf32>
    %346 = vector.broadcast %345 : vector<1x32xf32> to vector<96x32xf32>
    %347 = arith.addf %343, %346 : vector<96x32xf32>
    %348 = arith.addf %292, %347 : vector<96x32xf32>
    %c0_144 = arith.constant 0 : index
    %c0_145 = arith.constant 0 : index
    %349 = vector.load %arg16[%c0_144, %c0_145] : memref<1x32xf32, #tpu.memory_space<vmem>>, vector<1x32xf32>
    %c0_146 = arith.constant 0 : index
    %c0_147 = arith.constant 0 : index
    %350 = vector.load %arg17[%c0_146, %c0_147] : memref<1x32xf32, #tpu.memory_space<vmem>>, vector<1x32xf32>
    %cst_148 = arith.constant dense<0.000000e+00> : vector<96xf32>
    %351 = vector.multi_reduction <add>, %348, %cst_148 [1] : vector<96x32xf32> to vector<96xf32>
    %352 = vector.shape_cast %351 : vector<96xf32> to vector<96x1xf32>
    %cst_149 = arith.constant 3.200000e+01 : f32
    %353 = vector.broadcast %cst_149 : f32 to vector<96x1xf32>
    %354 = arith.divf %352, %353 : vector<96x1xf32>
    %355 = vector.broadcast %354 : vector<96x1xf32> to vector<96x32xf32>
    %356 = arith.subf %348, %355 : vector<96x32xf32>
    %357 = arith.mulf %356, %356 : vector<96x32xf32>
    %cst_150 = arith.constant dense<0.000000e+00> : vector<96xf32>
    %358 = vector.multi_reduction <add>, %357, %cst_150 [1] : vector<96x32xf32> to vector<96xf32>
    %359 = vector.shape_cast %358 : vector<96xf32> to vector<96x1xf32>
    %cst_151 = arith.constant 3.200000e+01 : f32
    %360 = vector.broadcast %cst_151 : f32 to vector<96x1xf32>
    %361 = arith.divf %359, %360 : vector<96x1xf32>
    %362 = vector.broadcast %354 : vector<96x1xf32> to vector<96x32xf32>
    %363 = arith.subf %348, %362 : vector<96x32xf32>
    %cst_152 = arith.constant 9.99999974E-6 : f32
    %364 = vector.broadcast %cst_152 : f32 to vector<96x1xf32>
    %365 = arith.addf %361, %364 : vector<96x1xf32>
    %366 = math.rsqrt %365 : vector<96x1xf32>
    %367 = vector.broadcast %366 : vector<96x1xf32> to vector<96x32xf32>
    %368 = arith.mulf %363, %367 : vector<96x32xf32>
    %369 = vector.broadcast %349 : vector<1x32xf32> to vector<96x32xf32>
    %370 = arith.mulf %368, %369 : vector<96x32xf32>
    %371 = vector.broadcast %350 : vector<1x32xf32> to vector<96x32xf32>
    %372 = arith.addf %370, %371 : vector<96x32xf32>
    %cst_153 = arith.constant 0.000000e+00 : f32
    %373 = vector.broadcast %cst_153 : f32 to vector<16x32xf32>
    %374 = vector.extract_strided_slice %372 {offsets = [0, 0], sizes = [16, 32], strides = [1, 1]} : vector<96x32xf32> to vector<16x32xf32>
    %cst_154 = arith.constant 2.500000e-01 : f32
    %375 = vector.broadcast %cst_154 : f32 to vector<16x32xf32>
    %376 = arith.mulf %375, %374 : vector<16x32xf32>
    %377 = arith.addf %373, %376 : vector<16x32xf32>
    %378 = vector.extract_strided_slice %372 {offsets = [16, 0], sizes = [16, 32], strides = [1, 1]} : vector<96x32xf32> to vector<16x32xf32>
    %cst_155 = arith.constant 2.500000e-01 : f32
    %379 = vector.broadcast %cst_155 : f32 to vector<16x32xf32>
    %380 = arith.mulf %379, %378 : vector<16x32xf32>
    %381 = arith.addf %377, %380 : vector<16x32xf32>
    %382 = vector.extract_strided_slice %372 {offsets = [32, 0], sizes = [16, 32], strides = [1, 1]} : vector<96x32xf32> to vector<16x32xf32>
    %cst_156 = arith.constant 5.000000e-01 : f32
    %383 = vector.broadcast %cst_156 : f32 to vector<16x32xf32>
    %384 = arith.mulf %383, %382 : vector<16x32xf32>
    %385 = arith.addf %381, %384 : vector<16x32xf32>
    %c0_157 = arith.constant 0 : index
    %c0_158 = arith.constant 0 : index
    %c0_159 = arith.constant 0 : index
    %386 = vector.load %arg18[%c0_157, %c0_158, %c0_159] : memref<2x16x32xf32, #tpu.memory_space<vmem>>, vector<1x16x32xf32>
    %387 = vector.shape_cast %386 : vector<1x16x32xf32> to vector<16x32xf32>
    %388 = vector.shape_cast %385 : vector<16x32xf32> to vector<1x16x32xf32>
    tpu.vector_store %arg18[%c0_157, %c0_158, %c0_159], %388 {strides = array<i32>} : memref<2x16x32xf32, #tpu.memory_space<vmem>>, vector<1x16x32xf32>,
    %cst_160 = arith.constant 0.000000e+00 : f32
    %389 = vector.broadcast %cst_160 : f32 to vector<16x32xf32>
    %390 = vector.extract_strided_slice %372 {offsets = [48, 0], sizes = [16, 32], strides = [1, 1]} : vector<96x32xf32> to vector<16x32xf32>
    %cst_161 = arith.constant 2.500000e-01 : f32
    %391 = vector.broadcast %cst_161 : f32 to vector<16x32xf32>
    %392 = arith.mulf %391, %390 : vector<16x32xf32>
    %393 = arith.addf %389, %392 : vector<16x32xf32>
    %394 = vector.extract_strided_slice %372 {offsets = [64, 0], sizes = [16, 32], strides = [1, 1]} : vector<96x32xf32> to vector<16x32xf32>
    %cst_162 = arith.constant 2.500000e-01 : f32
    %395 = vector.broadcast %cst_162 : f32 to vector<16x32xf32>
    %396 = arith.mulf %395, %394 : vector<16x32xf32>
    %397 = arith.addf %393, %396 : vector<16x32xf32>
    %398 = vector.extract_strided_slice %372 {offsets = [80, 0], sizes = [16, 32], strides = [1, 1]} : vector<96x32xf32> to vector<16x32xf32>
    %cst_163 = arith.constant 5.000000e-01 : f32
    %399 = vector.broadcast %cst_163 : f32 to vector<16x32xf32>
    %400 = arith.mulf %399, %398 : vector<16x32xf32>
    %401 = arith.addf %397, %400 : vector<16x32xf32>
    %c1_164 = arith.constant 1 : index
    %c0_165 = arith.constant 0 : index
    %c0_166 = arith.constant 0 : index
    %402 = vector.load %arg18[%c1_164, %c0_165, %c0_166] : memref<2x16x32xf32, #tpu.memory_space<vmem>>, vector<1x16x32xf32>
    %403 = vector.shape_cast %402 : vector<1x16x32xf32> to vector<16x32xf32>
    %404 = vector.shape_cast %401 : vector<16x32xf32> to vector<1x16x32xf32>
    tpu.vector_store %arg18[%c1_164, %c0_165, %c0_166], %404 {strides = array<i32>} : memref<2x16x32xf32, #tpu.memory_space<vmem>>, vector<1x16x32xf32>,
    return
  }
  func.func @transform_0(%arg0: i32) -> (i32, i32) {
    %c0_i32 = arith.constant 0 : i32
    %c0_i32_0 = arith.constant 0 : i32
    %c0_i32_1 = arith.constant 0 : i32
    return %c0_i32, %c0_i32_0 : i32, i32
  }
  func.func @transform_1(%arg0: i32) -> (i32, i32) {
    %c0_i32 = arith.constant 0 : i32
    %c0_i32_0 = arith.constant 0 : i32
    %c0_i32_1 = arith.constant 0 : i32
    return %c0_i32, %c0_i32_0 : i32, i32
  }
  func.func @transform_2(%arg0: i32) -> (i32, i32) {
    %c0_i32 = arith.constant 0 : i32
    %c0_i32_0 = arith.constant 0 : i32
    %c0_i32_1 = arith.constant 0 : i32
    return %c0_i32, %c0_i32_0 : i32, i32
  }
  func.func @transform_3(%arg0: i32) -> (i32, i32, i32) {
    %c0_i32 = arith.constant 0 : i32
    %c0_i32_0 = arith.constant 0 : i32
    %c0_i32_1 = arith.constant 0 : i32
    %c0_i32_2 = arith.constant 0 : i32
    return %c0_i32, %c0_i32_0, %c0_i32_1 : i32, i32, i32
  }
  func.func @transform_4(%arg0: i32) -> (i32, i32, i32) {
    %c0_i32 = arith.constant 0 : i32
    %c0_i32_0 = arith.constant 0 : i32
    %c0_i32_1 = arith.constant 0 : i32
    %c0_i32_2 = arith.constant 0 : i32
    return %c0_i32, %c0_i32_0, %c0_i32_1 : i32, i32, i32
  }
  func.func @transform_5(%arg0: i32) -> (i32, i32, i32) {
    %c0_i32 = arith.constant 0 : i32
    %c0_i32_0 = arith.constant 0 : i32
    %c0_i32_1 = arith.constant 0 : i32
    %c0_i32_2 = arith.constant 0 : i32
    return %c0_i32, %c0_i32_0, %c0_i32_1 : i32, i32, i32
  }
  func.func @transform_6(%arg0: i32) -> (i32, i32, i32) {
    %c0_i32 = arith.constant 0 : i32
    %c0_i32_0 = arith.constant 0 : i32
    %c0_i32_1 = arith.constant 0 : i32
    %c0_i32_2 = arith.constant 0 : i32
    return %c0_i32, %c0_i32_0, %c0_i32_1 : i32, i32, i32
  }
  func.func @transform_7(%arg0: i32) -> (i32, i32, i32) {
    %c0_i32 = arith.constant 0 : i32
    %c0_i32_0 = arith.constant 0 : i32
    %c0_i32_1 = arith.constant 0 : i32
    %c0_i32_2 = arith.constant 0 : i32
    return %c0_i32, %c0_i32_0, %c0_i32_1 : i32, i32, i32
  }
  func.func @transform_8(%arg0: i32) -> (i32, i32, i32) {
    %c0_i32 = arith.constant 0 : i32
    %c0_i32_0 = arith.constant 0 : i32
    %c0_i32_1 = arith.constant 0 : i32
    %c0_i32_2 = arith.constant 0 : i32
    return %c0_i32, %c0_i32_0, %c0_i32_1 : i32, i32, i32
  }
  func.func @transform_9(%arg0: i32) -> (i32, i32, i32) {
    %c0_i32 = arith.constant 0 : i32
    %c0_i32_0 = arith.constant 0 : i32
    %c0_i32_1 = arith.constant 0 : i32
    %c0_i32_2 = arith.constant 0 : i32
    return %c0_i32, %c0_i32_0, %c0_i32_1 : i32, i32, i32
  }
  func.func @transform_10(%arg0: i32) -> (i32, i32, i32) {
    %c0_i32 = arith.constant 0 : i32
    %c0_i32_0 = arith.constant 0 : i32
    %c0_i32_1 = arith.constant 0 : i32
    %c0_i32_2 = arith.constant 0 : i32
    return %c0_i32, %c0_i32_0, %c0_i32_1 : i32, i32, i32
  }
  func.func @transform_11(%arg0: i32) -> (i32, i32, i32) {
    %c0_i32 = arith.constant 0 : i32
    %c0_i32_0 = arith.constant 0 : i32
    %c0_i32_1 = arith.constant 0 : i32
    %c0_i32_2 = arith.constant 0 : i32
    return %c0_i32, %c0_i32_0, %c0_i32_1 : i32, i32, i32
  }
  func.func @transform_12(%arg0: i32) -> (i32, i32, i32) {
    %c0_i32 = arith.constant 0 : i32
    %c0_i32_0 = arith.constant 0 : i32
    %c0_i32_1 = arith.constant 0 : i32
    %c0_i32_2 = arith.constant 0 : i32
    return %c0_i32, %c0_i32_0, %c0_i32_1 : i32, i32, i32
  }
  func.func @transform_13(%arg0: i32) -> (i32, i32, i32) {
    %c0_i32 = arith.constant 0 : i32
    %c0_i32_0 = arith.constant 0 : i32
    %c0_i32_1 = arith.constant 0 : i32
    %c0_i32_2 = arith.constant 0 : i32
    return %c0_i32, %c0_i32_0, %c0_i32_1 : i32, i32, i32
  }
  func.func @transform_14(%arg0: i32) -> (i32, i32, i32) {
    %c0_i32 = arith.constant 0 : i32
    %c0_i32_0 = arith.constant 0 : i32
    %c0_i32_1 = arith.constant 0 : i32
    %c0_i32_2 = arith.constant 0 : i32
    return %c0_i32, %c0_i32_0, %c0_i32_1 : i32, i32, i32
  }
  func.func @transform_15(%arg0: i32) -> (i32, i32) {
    %c0_i32 = arith.constant 0 : i32
    %c0_i32_0 = arith.constant 0 : i32
    %c0_i32_1 = arith.constant 0 : i32
    return %c0_i32, %c0_i32_0 : i32, i32
  }
  func.func @transform_16(%arg0: i32) -> (i32, i32) {
    %c0_i32 = arith.constant 0 : i32
    %c0_i32_0 = arith.constant 0 : i32
    %c0_i32_1 = arith.constant 0 : i32
    return %c0_i32, %c0_i32_0 : i32, i32
  }
  func.func @transform_17(%arg0: i32) -> (i32, i32, i32) {
    %c0_i32 = arith.constant 0 : i32
    %c0_i32_0 = arith.constant 0 : i32
    %c0_i32_1 = arith.constant 0 : i32
    %c0_i32_2 = arith.constant 0 : i32
    return %c0_i32, %c0_i32_0, %c0_i32_1 : i32, i32, i32
  }
}

</mosaic_0001>

<bundles_post_ra>
// kernel: tpu_custom_call.1
= control target key start
LH: loop header
LB: loop body
LE: loop exit
PB: predicated region body
PF: predicated region fallthrough
CT: control target
= control target key end

     0   :  { %s12178_s0 = inlined_call_operand.vmem [shape: bf16[96,96], index: 0, kind: input, shape index: {}]   ;;  %s12179_s1 = inlined_call_operand.vmem [shape: f32[96,32], index: 1, kind: input, shape index: {}]   ;;  %s12180_s2 = inlined_call_operand.vmem [shape: bf16[96,32], index: 2, kind: input, shape index: {}]   ;;  %s12181_s3 = inlined_call_operand.vmem [shape: f32[2,1,32], index: 3, kind: input, shape index: {}]   ;;  %s12182_s4 = inlined_call_operand.vmem [shape: f32[2,1,32], index: 4, kind: input, shape index: {}]   ;;  %s12183_s5 = inlined_call_operand.vmem [shape: bf16[2,32,96], index: 5, kind: input, shape index: {}]   ;;  %s12184_s6 = inlined_call_operand.vmem [shape: f32[2,1,96], index: 6, kind: input, shape index: {}]   ;;  %s12185_s7 = inlined_call_operand.vmem [shape: bf16[2,32,32], index: 7, kind: input, shape index: {}]   ;;  %s12186_s8 = inlined_call_operand.vmem [shape: f32[2,1,32], index: 8, kind: input, shape index: {}]   ;;  %s12187_s9 = inlined_call_operand.vmem [shape: f32[2,1,32], index: 9, kind: input, shape index: {}]   ;;  %s12188_s10 = inlined_call_operand.vmem [shape: f32[2,1,32], index: 10, kind: input, shape index: {}]   ;;  %s12189_s11 = inlined_call_operand.vmem [shape: bf16[2,32,128], index: 11, kind: input, shape index: {}]   ;;  %s12190_s12 = inlined_call_operand.vmem [shape: f32[2,1,128], index: 12, kind: input, shape index: {}]   ;;  %s12191_s13 = inlined_call_operand.vmem [shape: bf16[2,128,32], index: 13, kind: input, shape index: {}]   ;;  %s12192_s14 = inlined_call_operand.vmem [shape: f32[2,1,32], index: 14, kind: input, shape index: {}]   ;;  %s12193_s15 = inlined_call_operand.vmem [shape: f32[1,32], index: 15, kind: input, shape index: {}]   ;;  %s12194_s16 = inlined_call_operand.vmem [shape: f32[1,32], index: 16, kind: input, shape index: {}]   ;;  %s12195_s17 = inlined_call_operand.hbm [shape: f32[2,16,32], index: 17, kind: output, shape index: {}]  }
   0x1   :  { %12236 = sst [smem:[#allocation20_spill]] %s12178_s0 }
   0x2   :  { %12237 = sst [smem:[#allocation21_spill]] %s12179_s1 }
   0x3   :  { %v8189_v0 = vld [vmem:[%s12180_s2] sm:$0xff]   ;;  %v8190_v1 = vld [vmem:[%s12180_s2 + $0x8] sm:$0xff]   ;;  %v8191_v2 = vld [vmem:[%s12180_s2 + $0x10] sm:$0xff]   ;;  %vm160_vm0 = vcmask 785408   ;;  %s12238_s18 = sld [smem:[#allocation20_spill]] }
   0x4   :  { %7233 = vmatprep.subr.bf16.mxu0 %v8189_v0  ;;  %v8192_v4 = vld [vmem:[%s12180_s2 + $0x18] sm:$0xff]   ;;  %v8193_v5 = vld [vmem:[%s12180_s2 + $0x20] sm:$0xff]   ;;  %v8194_v6 = vld [vmem:[%s12180_s2 + $0x28] sm:$0xff]  }
   0x5   :  { %7234 = vmatpush3.bf16.msra.mxu0 %v8189_v0 }
   0x6   :  { %7235 = vmatprep.subr.bf16.mxu0 %v8190_v1 }
   0x9   :  { %v8195_v3 = vld [vmem:[%s12238_s18] sm:$0xff]   ;;  %7236 = vmatpush3.bf16.msra.mxu0 %v8190_v1  ;;  %v8196_v7 = vld [vmem:[%s12238_s18 + $0x8] sm:$0xff]   ;;  %v8197_v8 = vld [vmem:[%s12238_s18 + $0x10] sm:$0xff]  }
   0xa   :  { %7237 = vmatprep.subr.bf16.mxu0 %v8191_v2  ;;  %7245 = vmatprep.mubr.msk.bf16.mxu0 %vm160_vm0, %v8195_v3  ;;  %v8198_v9 = vld [vmem:[%s12238_s18 + $0x18] sm:$0xff]   ;;  %v8199_v10 = vld [vmem:[%s12238_s18 + $0x20] sm:$0xff]  }
   0xd   :  { %7238 = vmatpush3.bf16.msra.mxu0 %v8191_v2 }
   0xe   :  { %7239 = vmatprep.subr.bf16.mxu0 %v8192_v4 }
  0x11   :  { %7240 = vmatpush3.bf16.msra.mxu0 %v8192_v4 }
  0x12   :  { %7241 = vmatprep.subr.bf16.mxu0 %v8193_v5 }
  0x15   :  { %7242 = vmatpush3.bf16.msra.mxu0 %v8193_v5 }
  0x16   :  { %7243 = vmatprep.subr.bf16.mxu0 %v8194_v6 }
  0x19   :  { %7244 = vmatpush3.bf16.msra.mxu0 %v8194_v6 }
  0x1c   :  { %7246 = vmatmul.mubr.msk.bf16.vlgmr.msra.gmra.mrb[0].mxu0 %vm160_vm0, %v8196_v7 }
  0x1d   :  { %7249 = vmatprep.mubr.msk.bf16.mxu0 %vm160_vm0, %v8197_v8 }
  0x1e   :  { %22 = vsyncpa [#allocation3], 0  ;;  %v8200_v11 = vld [vmem:[%s12238_s18 + $0x28] sm:$0xff]   ;;  %s12239_s21 = sld [smem:[#allocation21_spill]]  ;;  %vm262_vm1 = vcmask 261120   ;;  %s8806_s23 = smov 96  }
  0x1f   :  { %vm8807_vm2 = vmmov 0   ;;  %s8808_s24 = smov 64   ;;  %s8809_s25 = smov 88   ;;  %vm599_vm3 = vcmask 64512   ;;  %vm759_vm4 = vcmask 392192   ;;  %vm2590_vm5 = vcmask 130048  }
  0x20   :  { %s8810_s18 = smov 120   ;;  %s8811_s26 = smov 56   ;;  %vm2603_vm6 = vcmask 195584  }
  0x21   :  { %s8812_s27 = smov 80   ;;  %s8814_s28 = smov 48  }
  0x22   :  { %s12222_s29 = smov 72   ;;  %s12220_s2 = smov 104  }
  0x23   :  { %s12212_s0 = smov 40   ;;  %s12218_s30 = smov 8  }
  0x24   :  { %7250 = vmatmul.mubr.msk.bf16.gmra.mrb[4].mxu0 %vm160_vm0, %v8198_v9  ;;  %v84_v12 = vld [vmem:[%s12239_s21 + $0x10] sm:$0xff]  ;;  %v82_v13 = vld [vmem:[%s12239_s21] sm:$0xff]  ;;  %v85_v15 = vld [vmem:[%s12239_s21 + $0x18] sm:$0xff]  ;;  %s12216_s19 = smov 16   ;;  %s12214_s22 = smov 24  }
  0x25   :  { %7253 = vmatprep.mubr.msk.bf16.mxu0 %vm160_vm0, %v8199_v10  ;;  %v83_v18 = vld [vmem:[%s12239_s21 + $0x8] sm:$0xff]  ;;  %v86_v27 = vld [vmem:[%s12239_s21 + $0x20] sm:$0xff]  ;;  %v88_v30 = vld [vmem:[%s12239_s21 + $0x30] sm:$0xff]  ;;  %s12309_s20 = smov 24  }
  0x26   :  { %v87_v32 = vld [vmem:[%s12239_s21 + $0x28] sm:$0xff]  ;;  %v89_v35 = vld [vmem:[%s12239_s21 + $0x38] sm:$0xff]  ;;  %v92_v42 = vld [vmem:[%s12239_s21 + $0x50] sm:$0xff] }
  0x27   :  { %v90_v43 = vld [vmem:[%s12239_s21 + $0x40] sm:$0xff]  ;;  %v93_v47 = vld [vmem:[%s12239_s21 + $0x58] sm:$0xff]  ;;  %v91_v48 = vld [vmem:[%s12239_s21 + $0x48] sm:$0xff]  ;;  %s8813_s21 = smov 112  }
  0x2c   :  { %7254 = vmatmul.mubr.msk.bf16.gmra.mrb[8].mxu0 %vm160_vm0, %v8200_v11 }
  0xef   :  { %v7247_v14 = vpop.f32.mrb[0].mxu0 }
  0xf0   :  { %v8964_v16 = vadd.f32 %v7247_v14, %v84_v12  ;;  %v213_v17 = vpop.f32.mrb[1].mxu0 }
  0xf1   :  { %v8969_v19 = vadd.f32 %v213_v17, %v82_v13  ;;  %v7248_v20 = vpop.f32.mrb[2].mxu0 }
  0xf2   :  { %12240 = vst [vmem:[#allocation5_spill] sm:$0xff] %v8964_v16  ;;  %v8971_v21 = vadd.f32 %v7248_v20, %v85_v15  ;;  %v216_v22 = vpop.f32.mrb[3].mxu0  ;;  %v269_v23 = vsel %vm262_vm1, %v8964_v16, 0.0 }
  0xf3   :  { %12241 = vst [vmem:[#allocation6_spill] sm:$0xff] %v8969_v19  ;;  %v8975_v24 = vadd.f32 %v216_v22, %v83_v18  ;;  %270 = vadd.xlane.f32.xlu1 %v269_v23  ;;  %v263_v25 = vsel %vm262_vm1, %v8969_v19, 0.0 }
  0xf4   :  { %12242 = vst [vmem:[#allocation7_spill] sm:$0xff] %v8971_v21  ;;  %264 = vadd.xlane.f32.xlu0 %v263_v25  ;;  %v272_v26 = vsel %vm262_vm1, %v8971_v21, 0.0 }
  0xf5   :  { %12243 = vst [vmem:[#allocation8_spill] sm:$0xff] %v8975_v24  ;;  %v266_v29 = vsel %vm262_vm1, %v8975_v24, 0.0 }
  0xf7   :  { %273 = vadd.xlane.f32.xlu1 %v272_v26  ;;  %v7251_v28 = vpop.f32.mrb[4].mxu0 }
  0xf8   :  { %v229_v31 = vpop.f32.mrb[5].mxu0  ;;  %267 = vadd.xlane.f32.xlu0 %v266_v29  ;;  %v8997_v37 = vadd.f32 %v7251_v28, %v88_v30 }
  0xf9   :  { %v8992_v33 = vadd.f32 %v229_v31, %v86_v27  ;;  %v7252_v34 = vpop.f32.mrb[6].mxu0 }
  0xfa   :  { %v232_v36 = vpop.f32.mrb[7].mxu0  ;;  %12245 = vst [vmem:[#allocation10_spill] sm:$0xff] %v8997_v37  ;;  %v9003_v40 = vadd.f32 %v7252_v34, %v89_v35  ;;  %v281_v45 = vsel %vm262_vm1, %v8997_v37, 0.0 }
  0xfb   :  { %12244 = vst [vmem:[#allocation9_spill] sm:$0xff] %v8992_v33  ;;  %v8999_v38 = vadd.f32 %v232_v36, %v87_v32  ;;  %v275_v39 = vsel %vm262_vm1, %v8992_v33, 0.0 }
  0xfc   :  { %276 = vadd.xlane.f32.xlu0 %v275_v39  ;;  %12247 = vst [vmem:[#allocation12_spill] sm:$0xff] %v9003_v40  ;;  %v284_v52 = vsel %vm262_vm1, %v9003_v40, 0.0 }
  0xfd   :  { %12246 = vst [vmem:[#allocation11_spill] sm:$0xff] %v8999_v38  ;;  %v278_v41 = vsel %vm262_vm1, %v8999_v38, 0.0 }
  0xfe   :  { %279 = vadd.xlane.f32.xlu1 %v278_v41 }
  0xff   :  { %v7255_v44 = vpop.f32.mrb[8].mxu0 }
 0x100   :  { %v245_v46 = vpop.f32.mrb[9].mxu0  ;;  %282 = vadd.xlane.f32.xlu0 %v281_v45  ;;  %v9021_v49 = vadd.f32 %v7255_v44, %v92_v42 }
 0x101   :  { %v9023_v50 = vadd.f32 %v245_v46, %v90_v43  ;;  %v7256_v51 = vpop.f32.mrb[10].mxu0 }
 0x102   :  { %12248 = vst [vmem:[#allocation13_spill] sm:$0xff] %v9021_v49  ;;  %v248_v53 = vpop.f32.mrb[11].mxu0  ;;  %285 = vadd.xlane.f32.xlu1 %v284_v52  ;;  %v9027_v54 = vadd.f32 %v7256_v51, %v93_v47  ;;  %v293_v58 = vsel %vm262_vm1, %v9021_v49, 0.0 }
 0x103   :  { %12249 = vst [vmem:[#allocation14_spill] sm:$0xff] %v9023_v50  ;;  %v9029_v55 = vadd.f32 %v248_v53, %v91_v48  ;;  %v287_v56 = vsel %vm262_vm1, %v9023_v50, 0.0 }
 0x104   :  { %12250 = vst [vmem:[#allocation15_spill] sm:$0xff] %v9027_v54  ;;  %288 = vadd.xlane.f32.xlu0 %v287_v56  ;;  %v296_v59 = vsel %vm262_vm1, %v9027_v54, 0.0 }
 0x105   :  { %12251 = vst [vmem:[#allocation16_spill] sm:$0xff] %v9029_v55  ;;  %v290_v57 = vsel %vm262_vm1, %v9029_v55, 0.0 }
 0x106   :  { %291 = vadd.xlane.f32.xlu1 %v290_v57 }
 0x108   :  { %294 = vadd.xlane.f32.xlu0 %v293_v58 }
 0x10a   :  { %297 = vadd.xlane.f32.xlu1 %v296_v59 }
 0x180   :  { %v271_v60 = vpop.xlane.xlu1 %270 }
 0x181   :  { %v302_v61 = vmul.f32 0.03125, %v271_v60  ;;  %v265_v62 = vpop.xlane.xlu0 %264 }
 0x182   :  { %v300_v63 = vmul.f32 0.03125, %v265_v62 }
 0x183   :  { %v9040_v0 = vsub.f32 %v8964_v16, %v302_v61 }
 0x184   :  { %v9043_v1 = vsub.f32 %v8969_v19, %v300_v63  ;;  %v274_v2 = vpop.xlane.xlu1 %273 }
 0x185   :  { %v303_v3 = vmul.f32 0.03125, %v274_v2  ;;  %v268_v4 = vpop.xlane.xlu0 %267  ;;  %v326_v10 = vmul.f32 %v9040_v0, %v9040_v0 }
 0x186   :  { %v301_v5 = vmul.f32 0.03125, %v268_v4  ;;  %v324_v6 = vmul.f32 %v9043_v1, %v9043_v1 }
 0x187   :  { %v9048_v7 = vsub.f32 %v8971_v21, %v303_v3  ;;  %v342_v20 = vsel %vm262_vm1, %v326_v10, 0.0 }
 0x188   :  { %v9051_v8 = vsub.f32 %v8975_v24, %v301_v5  ;;  %v336_v9 = vsel %vm262_vm1, %v324_v6, 0.0  ;;  %v8201_v6 = vld [vmem:[%s12183_s5] sm:$0xff]  }
 0x189   :  { %337 = vadd.xlane.f32.xlu0 %v336_v9  ;;  %v277_v11 = vpop.xlane.xlu0 %276  ;;  %v327_v15 = vmul.f32 %v9048_v7, %v9048_v7  ;;  %7257 = vmatprep.subr.bf16.mxu1 %v8201_v6  ;;  %v8202_v9 = vld [vmem:[%s12183_s5 + $0x8] sm:$0xff]  }
 0x18a   :  { %v304_v12 = vmul.f32 0.03125, %v277_v11  ;;  %v325_v13 = vmul.f32 %v9051_v8, %v9051_v8  ;;  %7258 = vmatpush3.bf16.msra.mxu1 %v8201_v6 }
 0x18b   :  { %v280_v14 = vpop.xlane.xlu1 %279  ;;  %v345_v29 = vsel %vm262_vm1, %v327_v15, 0.0  ;;  %7259 = vmatprep.subr.bf16.mxu1 %v8202_v9 }
 0x18c   :  { %v9061_v17 = vsub.f32 %v8992_v33, %v304_v12  ;;  %v305_v18 = vmul.f32 0.03125, %v280_v14  ;;  %v339_v22 = vsel %vm262_vm1, %v325_v13, 0.0 }
 0x18d   :  { %343 = vadd.xlane.f32.xlu0 %v342_v20  ;;  %340 = vadd.xlane.f32.xlu1 %v339_v22  ;;  %v283_v23 = vpop.xlane.xlu0 %282 }
 0x18e   :  { %v9066_v25 = vsub.f32 %v8999_v38, %v305_v18  ;;  %v306_v26 = vmul.f32 0.03125, %v283_v23  ;;  %v328_v27 = vmul.f32 %v9061_v17, %v9061_v17  ;;  %7260 = vmatpush3.bf16.msra.mxu1 %v8202_v9 }
 0x18f   :  { %v286_v28 = vpop.xlane.xlu1 %285 }
 0x190   :  { %v9072_v30 = vsub.f32 %v8997_v37, %v306_v26  ;;  %v307_v31 = vmul.f32 0.03125, %v286_v28  ;;  %v348_v32 = vsel %vm262_vm1, %v328_v27, 0.0  ;;  %v329_v34 = vmul.f32 %v9066_v25, %v9066_v25 }
 0x191   :  { %346 = vadd.xlane.f32.xlu1 %v345_v29  ;;  %349 = vadd.xlane.f32.xlu0 %v348_v32  ;;  %v289_v35 = vpop.xlane.xlu0 %288 }
 0x192   :  { %v9078_v36 = vsub.f32 %v9003_v40, %v307_v31  ;;  %v308_v39 = vmul.f32 0.03125, %v289_v35  ;;  %v330_v41 = vmul.f32 %v9072_v30, %v9072_v30  ;;  %v351_v43 = vsel %vm262_vm1, %v329_v34, 0.0 }
 0x193   :  { %v292_v42 = vpop.xlane.xlu1 %291 }
 0x194   :  { %v9084_v44 = vsub.f32 %v9023_v50, %v308_v39  ;;  %v309_v45 = vmul.f32 0.03125, %v292_v42  ;;  %v354_v46 = vsel %vm262_vm1, %v330_v41, 0.0  ;;  %v331_v47 = vmul.f32 %v9078_v36, %v9078_v36 }
 0x195   :  { %352 = vadd.xlane.f32.xlu1 %v351_v43  ;;  %355 = vadd.xlane.f32.xlu0 %v354_v46  ;;  %v295_v48 = vpop.xlane.xlu0 %294 }
 0x196   :  { %v9090_v51 = vsub.f32 %v9029_v55, %v309_v45  ;;  %v310_v52 = vmul.f32 0.03125, %v295_v48  ;;  %v332_v53 = vmul.f32 %v9084_v44, %v9084_v44  ;;  %v357_v57 = vsel %vm262_vm1, %v331_v47, 0.0 }
 0x197   :  { %v298_v56 = vpop.xlane.xlu1 %297 }
 0x198   :  { %v9096_v58 = vsub.f32 %v9021_v49, %v310_v52  ;;  %v311_v59 = vmul.f32 0.03125, %v298_v56  ;;  %v360_v60 = vsel %vm262_vm1, %v332_v53, 0.0  ;;  %v333_v61 = vmul.f32 %v9090_v51, %v9090_v51  ;;  %v9121_v53 = vld [vmem:[%s12181_s3] ss:$0 sm:$0xff] }
 0x199   :  { %358 = vadd.xlane.f32.xlu1 %v357_v57  ;;  %361 = vadd.xlane.f32.xlu0 %v360_v60 }
 0x19a   :  { %v9102_v62 = vsub.f32 %v9027_v54, %v311_v59  ;;  %v334_v63 = vmul.f32 %v9096_v58, %v9096_v58  ;;  %v363_v2 = vsel %vm262_vm1, %v333_v61, 0.0 }
 0x19c   :  { %v366_v3 = vsel %vm262_vm1, %v334_v63, 0.0  ;;  %v335_v4 = vmul.f32 %v9102_v62, %v9102_v62 }
 0x19d   :  { %364 = vadd.xlane.f32.xlu1 %v363_v2  ;;  %367 = vadd.xlane.f32.xlu0 %v366_v3 }
 0x19e   :  { %v369_v5 = vsel %vm262_vm1, %v335_v4, 0.0 }
 0x1a1   :  { %370 = vadd.xlane.f32.xlu1 %v369_v5  ;;  %v6740_v5 = vld [vmem:[%s12182_s4] ss:$0 sm:$0xff] }
 0x216   :  { %v338_v10 = vpop.xlane.xlu0 %337 }
 0x217   :  { %v372_v11 = vmul.f32 0.03125, %v338_v10 }
 0x219   :  { %v384_v12 = vadd.f32 1e-05, %v372_v11 }
 0x21a   :  { %v341_v13 = vpop.xlane.xlu1 %340  ;;  %v344_v14 = vpop.xlane.xlu0 %343 }
 0x21b   :  { %8229 = vrsqrt.f32 %v384_v12  ;;  %v373_v15 = vmul.f32 0.03125, %v341_v13  ;;  %v374_v18 = vmul.f32 0.03125, %v344_v14 }
 0x21d   :  { %v385_v20 = vadd.f32 1e-05, %v373_v15  ;;  %v386_v22 = vadd.f32 1e-05, %v374_v18 }
 0x21e   :  { %v347_v23 = vpop.xlane.xlu1 %346  ;;  %v350_v26 = vpop.xlane.xlu0 %349 }
 0x21f   :  { %8231 = vrsqrt.f32 %v385_v20  ;;  %v375_v27 = vmul.f32 0.03125, %v347_v23  ;;  %v376_v28 = vmul.f32 0.03125, %v350_v26 }
 0x220   :  { %8233 = vrsqrt.f32 %v386_v22 }
 0x221   :  { %v387_v29 = vadd.f32 1e-05, %v375_v27  ;;  %v388_v31 = vadd.f32 1e-05, %v376_v28 }
 0x222   :  { %v353_v32 = vpop.xlane.xlu1 %352  ;;  %v356_v34 = vpop.xlane.xlu0 %355 }
 0x223   :  { %8235 = vrsqrt.f32 %v387_v29  ;;  %v377_v35 = vmul.f32 0.03125, %v353_v32  ;;  %v378_v39 = vmul.f32 0.03125, %v356_v34 }
 0x224   :  { %8237 = vrsqrt.f32 %v388_v31 }
 0x225   :  { %v8230_v41 = vpop.eup %8229  ;;  %v389_v42 = vadd.f32 1e-05, %v377_v35  ;;  %v390_v43 = vadd.f32 1e-05, %v378_v39 }
 0x226   :  { %v359_v45 = vpop.xlane.xlu1 %358  ;;  %v362_v46 = vpop.xlane.xlu0 %361  ;;  %v408_v47 = vmul.f32 %v8230_v41, %v9043_v1 }
 0x227   :  { %8239 = vrsqrt.f32 %v389_v42  ;;  %v379_v48 = vmul.f32 0.03125, %v359_v45  ;;  %v380_v52 = vmul.f32 0.03125, %v362_v46 }
 0x228   :  { %8241 = vrsqrt.f32 %v390_v43  ;;  %v426_v3 = vmul.f32 %v9121_v53, %v408_v47 }
 0x229   :  { %v8232_v56 = vpop.eup %8231  ;;  %v391_v57 = vadd.f32 1e-05, %v379_v48  ;;  %v392_v59 = vadd.f32 1e-05, %v380_v52 }
 0x22a   :  { %v8234_v60 = vpop.eup %8233  ;;  %v365_v61 = vpop.xlane.xlu1 %364  ;;  %v409_v2 = vmul.f32 %v8232_v56, %v9051_v8  ;;  %v444_v8 = vadd.f32 %v6740_v5, %v426_v3 }
 0x22b   :  { %v368_v63 = vpop.xlane.xlu0 %367  ;;  %8243 = vrsqrt.f32 %v391_v57  ;;  %v381_v1 = vmul.f32 0.03125, %v365_v61  ;;  %v410_v6 = vmul.f32 %v8234_v60, %v9040_v0 }
 0x22c   :  { %v382_v4 = vmul.f32 0.03125, %v368_v63  ;;  %8245 = vrsqrt.f32 %v392_v59  ;;  %v427_v9 = vmul.f32 %v9121_v53, %v409_v2 }
 0x22d   :  { %v8236_v10 = vpop.eup %8235  ;;  %v393_v11 = vadd.f32 1e-05, %v381_v1  ;;  %v428_v20 = vmul.f32 %v9121_v53, %v410_v6 }
 0x22e   :  { %v394_v12 = vadd.f32 1e-05, %v382_v4  ;;  %v8238_v13 = vpop.eup %8237  ;;  %v371_v14 = vpop.xlane.xlu1 %370  ;;  %v445_v15 = vadd.f32 %v6740_v5, %v427_v9  ;;  %v411_v18 = vmul.f32 %v8236_v10, %v9048_v7 }
 0x22f   :  { %8247 = vrsqrt.f32 %v393_v11  ;;  %v383_v22 = vmul.f32 0.03125, %v371_v14  ;;  %v412_v23 = vmul.f32 %v8238_v13, %v9061_v17  ;;  %v446_v31 = vadd.f32 %v6740_v5, %v428_v20 }
 0x230   :  { %8249 = vrsqrt.f32 %v394_v12  ;;  %v456_v0 = vpack.c.bf16 %v445_v15, %v444_v8  ;;  %v429_v26 = vmul.f32 %v9121_v53, %v411_v18  ;;  %v12198_v12 = vmov 0.0  }
 0x231   :  { %v8240_v27 = vpop.eup %8239  ;;  %v395_v28 = vadd.f32 1e-05, %v383_v22  ;;  %v430_v7 = vmul.f32 %v9121_v53, %v412_v23  ;;  %7273 = vmatprep.subr.bf16.mxu1 %v12198_v12  ;;  %7291 = vmatprep.subr.bf16.mxu0 %v12198_v12 }
 0x232   :  { %v8242_v29 = vpop.eup %8241  ;;  %7261 = vmatprep.mubr.msk.bf16.mxu1 %vm262_vm1, %v456_v0  ;;  %v447_v32 = vadd.f32 %v6740_v5, %v429_v26  ;;  %v413_v34 = vmul.f32 %v8240_v27, %v9066_v25  ;;  %7297 = vmatprep.mubr.msk.bf16.mxu0 %vm8807_vm2, %v12198_v12 }
 0x233   :  { %8251 = vrsqrt.f32 %v395_v28  ;;  %v414_v35 = vmul.f32 %v8242_v29, %v9072_v30  ;;  %v448_v43 = vadd.f32 %v6740_v5, %v430_v7 }
 0x234   :  { %v457_v39 = vpack.c.bf16 %v447_v32, %v446_v31  ;;  %v431_v17 = vmul.f32 %v9121_v53, %v413_v34 }
 0x235   :  { %v8244_v41 = vpop.eup %8243  ;;  %v432_v47 = vmul.f32 %v9121_v53, %v414_v35 }
 0x236   :  { %v8246_v42 = vpop.eup %8245  ;;  %7262 = vmatmul.mubr.msk.bf16.vlgmr.msra.gmra.mrb[0].mxu1 %vm262_vm1, %v457_v39  ;;  %v449_v45 = vadd.f32 %v6740_v5, %v431_v17  ;;  %v415_v46 = vmul.f32 %v8244_v41, %v9078_v36 }
 0x237   :  { %v416_v25 = vmul.f32 %v8246_v42, %v9084_v44  ;;  %v450_v57 = vadd.f32 %v6740_v5, %v432_v47 }
 0x238   :  { %v458_v48 = vpack.c.bf16 %v449_v45, %v448_v43  ;;  %v433_v52 = vmul.f32 %v9121_v53, %v415_v46 }
 0x239   :  { %v8248_v56 = vpop.eup %8247  ;;  %v434_v61 = vmul.f32 %v9121_v53, %v416_v25 }
 0x23a   :  { %v8250_v30 = vpop.eup %8249  ;;  %7265 = vmatprep.mubr.msk.bf16.mxu1 %vm262_vm1, %v458_v48  ;;  %v451_v59 = vadd.f32 %v6740_v5, %v433_v52  ;;  %v417_v60 = vmul.f32 %v8248_v56, %v9090_v51 }
 0x23b   :  { %v418_v63 = vmul.f32 %v8250_v30, %v9096_v58  ;;  %v452_v44 = vadd.f32 %v6740_v5, %v434_v61 }
 0x23c   :  { %v459_v36 = vpack.c.bf16 %v451_v59, %v450_v57  ;;  %v435_v2 = vmul.f32 %v9121_v53, %v417_v60 }
 0x23d   :  { %v8252_v3 = vpop.eup %8251  ;;  %v436_v6 = vmul.f32 %v9121_v53, %v418_v63 }
 0x23e   :  { %7266 = vmatmul.mubr.msk.bf16.gmra.mrb[4].mxu1 %vm262_vm1, %v459_v36  ;;  %v453_v1 = vadd.f32 %v6740_v5, %v435_v2  ;;  %v419_v4 = vmul.f32 %v8252_v3, %v9102_v62  ;;  %v6741_v62 = vld [vmem:[%s12184_s6] ss:$0 sm:$0xff] }
 0x23f   :  { %v454_v51 = vadd.f32 %v6740_v5, %v436_v6 }
 0x240   :  { %v460_v9 = vpack.c.bf16 %v453_v1, %v452_v44  ;;  %v437_v10 = vmul.f32 %v9121_v53, %v419_v4 }
 0x242   :  { %7269 = vmatprep.mubr.msk.bf16.mxu1 %vm262_vm1, %v460_v9  ;;  %v455_v11 = vadd.f32 %v6740_v5, %v437_v10 }
 0x244   :  { %v461_v58 = vpack.c.bf16 %v455_v11, %v454_v51 }
 0x246   :  { %7270 = vmatmul.mubr.msk.bf16.gmra.mrb[8].mxu1 %vm262_vm1, %v461_v58 }
 0x247   :  { %7279 = vmatprep.mubr.msk.bf16.mxu1 %vm8807_vm2, %v12198_v12 }
 0x309   :  { %v7263_v13 = vpop.f32.mrb[0].mxu1 }
 0x30a   :  { %v537_v14 = vpop.f32.mrb[1].mxu1  ;;  %v546_v53 = vadd.f32 %v7263_v13, %v6741_v62 }
 0x30b   :  { %v7264_v8 = vpop.f32.mrb[2].mxu1  ;;  %v538_v20 = vadd.f32 %v6741_v62, %v537_v14 }
 0x30c   :  { %v549_v15 = vadd.f32 %v7264_v8, %v6741_v62  ;;  %v540_v18 = vpop.f32.mrb[3].mxu1 }
 0x30d   :  { %v541_v5 = vadd.f32 %v6741_v62, %v540_v18 }
 0x30e   :  { %v9160_v22 = vpack.c.bf16 %v549_v15, %v546_v53 }
 0x30f   :  { %v9162_v23 = vpack.c.bf16 %v541_v5, %v538_v20 }
 0x310   :  { %595 = vrot.lane.b32.xlu1 %v9160_v22, %s8806_s23 }
 0x311   :  { %593 = vrot.lane.b32.xlu0 %v9162_v23, %s8806_s23  ;;  %v7267_v0 = vpop.f32.mrb[4].mxu1 }
 0x312   :  { %v553_v26 = vpop.f32.mrb[5].mxu1  ;;  %v562_v28 = vadd.f32 %v7267_v0, %v6741_v62 }
 0x313   :  { %v7268_v27 = vpop.f32.mrb[6].mxu1  ;;  %v554_v32 = vadd.f32 %v6741_v62, %v553_v26 }
 0x314   :  { %v565_v29 = vadd.f32 %v7268_v27, %v6741_v62  ;;  %v556_v31 = vpop.f32.mrb[7].mxu1 }
 0x315   :  { %v557_v34 = vadd.f32 %v6741_v62, %v556_v31 }
 0x316   :  { %v9168_v7 = vpack.c.bf16 %v565_v29, %v562_v28 }
 0x317   :  { %v9170_v35 = vpack.c.bf16 %v557_v34, %v554_v32 }
 0x319   :  { %597 = vrot.lane.b32.xlu1 %v9170_v35, %s8806_s23  ;;  %v7271_v39 = vpop.f32.mrb[8].mxu1 }
 0x31a   :  { %v569_v17 = vpop.f32.mrb[9].mxu1  ;;  %v578_v42 = vadd.f32 %v7271_v39, %v6741_v62 }
 0x31b   :  { %v7272_v41 = vpop.f32.mrb[10].mxu1  ;;  %v570_v46 = vadd.f32 %v6741_v62, %v569_v17 }
 0x31c   :  { %v581_v43 = vadd.f32 %v7272_v41, %v6741_v62  ;;  %v572_v45 = vpop.f32.mrb[11].mxu1 }
 0x31d   :  { %v573_v47 = vadd.f32 %v6741_v62, %v572_v45  ;;  %678 = vrot.lane.b32.xlu1 %v9168_v7, %s8806_s23 }
 0x31e   :  { %v9180_v25 = vpack.c.bf16 %v581_v43, %v578_v42 }
 0x31f   :  { %v9182_v48 = vpack.c.bf16 %v573_v47, %v570_v46 }
 0x321   :  { %682 = vrot.lane.b32.xlu1 %v9180_v25, %s8806_s23  ;;  %680 = vrot.lane.b32.xlu0 %v9182_v48, %s8806_s23 }
 0x325   :  { %900 = vrot.lane.b32.xlu1 %v9160_v22, %s8808_s24  ;;  %898 = vrot.lane.b32.xlu0 %v9162_v23, %s8808_s24 }
 0x329   :  { %1054 = vrot.lane.b32.xlu1 %v9162_v23, %s8809_s25  ;;  %902 = vrot.lane.b32.xlu0 %v9170_v35, %s8808_s24 }
 0x32d   :  { %977 = vrot.lane.b32.xlu1 %v9180_v25, %s8808_s24  ;;  %973 = vrot.lane.b32.xlu0 %v9168_v7, %s8808_s24 }
 0x331   :  { %1056 = vrot.lane.b32.xlu0 %v9160_v22, %s8809_s25 }
 0x335   :  { %975 = vrot.lane.b32.xlu0 %v9182_v48, %s8808_s24 }
 0x382   :  { %v596_v30 = vpop.permute.xlu1 %595 }
 0x383   :  { %v594_v52 = vpop.permute.xlu0 %593  ;;  %v613_v59 = vsel %vm599_vm3, %v596_v30, 0 }
 0x384   :  { %v610_v56 = vsel %vm599_vm3, %v594_v52, 0 }
 0x385   :  { %7274 = vmatpush3.bf16.xpose.msra.mxu1 %v610_v56 }
 0x386   :  { %7275 = vmatprep.subr.bf16.mxu1 %v12198_v12 }
 0x38b   :  { %v598_v57 = vpop.permute.xlu1 %597 }
 0x38c   :  { %v616_v36 = vsel %vm599_vm3, %v598_v57, 0 }
 0x38d   :  { %7276 = vmatpush3.bf16.xpose.msra.mxu1 %v613_v59 }
 0x38e   :  { %7277 = vmatprep.subr.bf16.mxu1 %v12198_v12 }
 0x38f   :  { %v679_v60 = vpop.permute.xlu1 %678 }
 0x390   :  { %v694_v61 = vsel %vm599_vm3, %v679_v60, 0 }
 0x391   :  { %7292 = vmatpush3.bf16.xpose.msra.mxu0 %v694_v61 }
 0x392   :  { %7293 = vmatprep.subr.bf16.mxu0 %v12198_v12 }
 0x393   :  { %v681_v63 = vpop.permute.xlu0 %680  ;;  %v683_v44 = vpop.permute.xlu1 %682 }
 0x394   :  { %v697_v3 = vsel %vm599_vm3, %v681_v63, 0  ;;  %v700_v4 = vsel %vm599_vm3, %v683_v44, 0 }
 0x395   :  { %7278 = vmatpush3.bf16.xpose.msra.mxu1 %v616_v36 }
 0x396   :  { %7309 = vmatprep.subr.bf16.mxu1 %v12198_v12 }
 0x397   :  { %v899_v2 = vpop.permute.xlu0 %898  ;;  %v901_v6 = vpop.permute.xlu1 %900 }
 0x399   :  { %7294 = vmatpush3.bf16.xpose.msra.mxu0 %v697_v3 }
 0x39a   :  { %7295 = vmatprep.subr.bf16.mxu0 %v12198_v12 }
 0x39b   :  { %v903_v1 = vpop.permute.xlu0 %902  ;;  %v9233_v51 = vpop.permute.xlu1 %1054 }
 0x39c   :  { %7280 = vmatmul.mubr.msk.bf16.vlgmr.msra.gmra.mrb[12].mxu1 %vm599_vm3, %v9162_v23 }
 0x39d   :  { %7310 = vmatpush3.bf16.msra.mxu1 %v899_v2  ;;  %7283 = vmatprep.mubr.msk.bf16.mxu1 %vm8807_vm2, %v12198_v12 }
 0x39e   :  { %7311 = vmatprep.subr.bf16.mxu1 %v12198_v12 }
 0x39f   :  { %v974_v9 = vpop.permute.xlu0 %973  ;;  %v978_v58 = vpop.permute.xlu1 %977 }
 0x3a1   :  { %7296 = vmatpush3.bf16.xpose.msra.mxu0 %v700_v4  ;;  %7312 = vmatpush3.bf16.msra.mxu1 %v901_v6 }
 0x3a2   :  { %7313 = vmatprep.subr.bf16.mxu1 %v12198_v12  ;;  %7327 = vmatprep.subr.bf16.mxu0 %v12198_v12 }
 0x3a3   :  { %v9226_v10 = vpop.permute.xlu0 %1056 }
 0x3a4   :  { %7284 = vmatmul.mubr.msk.bf16.gmra.mrb[16].mxu1 %vm599_vm3, %v9160_v22 }
 0x3a5   :  { %7314 = vmatpush3.bf16.msra.mxu1 %v903_v1  ;;  %7287 = vmatprep.mubr.msk.bf16.mxu1 %vm8807_vm2, %v12198_v12 }
 0x3a6   :  { %7345 = vmatprep.subr.bf16.mxu1 %v12198_v12 }
 0x3a7   :  { %v976_v11 = vpop.permute.xlu0 %975 }
 0x3a8   :  { %7298 = vmatmul.mubr.msk.bf16.vlgmr.msra.gmra.mrb[12].mxu0 %vm599_vm3, %v9168_v7 }
 0x3a9   :  { %7328 = vmatpush3.bf16.msra.mxu0 %v974_v9  ;;  %7301 = vmatprep.mubr.msk.bf16.mxu0 %vm8807_vm2, %v12198_v12 }
 0x3aa   :  { %7329 = vmatprep.subr.bf16.mxu0 %v12198_v12 }
 0x3ac   :  { %7288 = vmatmul.mubr.msk.bf16.gmra.mrb[20].mxu1 %vm599_vm3, %v9170_v35 }
 0x3ad   :  { %7330 = vmatpush3.bf16.msra.mxu0 %v976_v11  ;;  %7315 = vmatprep.mubr.msk.bf16.mxu1 %vm8807_vm2, %v12198_v12 }
 0x3ae   :  { %7331 = vmatprep.subr.bf16.mxu0 %v12198_v12 }
 0x3b0   :  { %7302 = vmatmul.mubr.msk.bf16.gmra.mrb[16].mxu0 %vm599_vm3, %v9182_v48 }
 0x3b1   :  { %7332 = vmatpush3.bf16.msra.mxu0 %v978_v58  ;;  %7305 = vmatprep.mubr.msk.bf16.mxu0 %vm8807_vm2, %v12198_v12 }
 0x3b2   :  { %7363 = vmatprep.subr.bf16.mxu0 %v12198_v12 }
 0x3b8   :  { %7306 = vmatmul.mubr.msk.bf16.gmra.mrb[20].mxu0 %vm599_vm3, %v9180_v25 }
 0x3b9   :  { %7333 = vmatprep.mubr.msk.bf16.mxu0 %vm8807_vm2, %v12198_v12 }
 0x46f   :  { %v652_v13 = vpop.f32.mrb[12].mxu1 }
 0x470   :  { %v7281_v62 = vpop.f32.mrb[13].mxu1  ;;  %v760_v14 = vsel %vm759_vm4, %v652_v13, -inf }
 0x471   :  { %761 = vmax.xlane.f32.xlu0 %v760_v14  ;;  %v655_v8 = vpop.f32.mrb[14].mxu1 }
 0x472   :  { %v7282_v53 = vpop.f32.mrb[15].mxu1  ;;  %v763_v15 = vsel %vm759_vm4, %v655_v8, -inf }
 0x473   :  { %764 = vmax.xlane.f32.xlu1 %v763_v15 }
 0x477   :  { %v660_v18 = vpop.f32.mrb[16].mxu1 }
 0x478   :  { %v7285_v20 = vpop.f32.mrb[17].mxu1  ;;  %v766_v5 = vsel %vm759_vm4, %v660_v18, -inf }
 0x479   :  { %767 = vmax.xlane.f32.xlu0 %v766_v5  ;;  %v9253_v0 = vpop.f32.mrb[18].mxu1 }
 0x47a   :  { %v7286_v26 = vpop.f32.mrb[19].mxu1  ;;  %v769_v41 = vsel %vm759_vm4, %v9253_v0, -inf }
 0x47b   :  { %v736_v27 = vpop.f32.mrb[12].mxu0 }
 0x47c   :  { %v7299_v28 = vpop.f32.mrb[13].mxu0  ;;  %v778_v29 = vsel %vm759_vm4, %v736_v27, -inf }
 0x47d   :  { %779 = vmax.xlane.f32.xlu0 %v778_v29  ;;  %v739_v31 = vpop.f32.mrb[14].mxu0 }
 0x47e   :  { %v7300_v32 = vpop.f32.mrb[15].mxu0  ;;  %v781_v34 = vsel %vm759_vm4, %v739_v31, -inf }
 0x47f   :  { %v9257_v39 = vpop.f32.mrb[20].mxu1  ;;  %782 = vmax.xlane.f32.xlu1 %v781_v34 }
 0x480   :  { %v7289_v17 = vpop.f32.mrb[21].mxu1  ;;  %v772_v52 = vsel %vm759_vm4, %v9257_v39, -inf }
 0x481   :  { %v9261_v42 = vpop.f32.mrb[22].mxu1  ;;  %770 = vmax.xlane.f32.xlu0 %v769_v41 }
 0x482   :  { %v7290_v43 = vpop.f32.mrb[23].mxu1  ;;  %v775_v45 = vsel %vm759_vm4, %v9261_v42, -inf }
 0x483   :  { %776 = vmax.xlane.f32.xlu1 %v775_v45  ;;  %v9265_v46 = vpop.f32.mrb[16].mxu0 }
 0x484   :  { %v7303_v47 = vpop.f32.mrb[17].mxu0  ;;  %v784_v59 = vsel %vm759_vm4, %v9265_v46, -inf }
 0x485   :  { %773 = vmax.xlane.f32.xlu0 %v772_v52  ;;  %v9269_v56 = vpop.f32.mrb[18].mxu0 }
 0x486   :  { %v7304_v30 = vpop.f32.mrb[19].mxu0  ;;  %v787_v57 = vsel %vm759_vm4, %v9269_v56, -inf }
 0x487   :  { %788 = vmax.xlane.f32.xlu1 %v787_v57 }
 0x489   :  { %785 = vmax.xlane.f32.xlu0 %v784_v59 }
 0x48b   :  { %v9275_v60 = vpop.f32.mrb[20].mxu0 }
 0x48c   :  { %v7307_v61 = vpop.f32.mrb[21].mxu0  ;;  %v790_v63 = vsel %vm759_vm4, %v9275_v60, -inf }
 0x48d   :  { %791 = vmax.xlane.f32.xlu0 %v790_v63  ;;  %v9279_v36 = vpop.f32.mrb[22].mxu0 }
 0x48e   :  { %v7308_v2 = vpop.f32.mrb[23].mxu0  ;;  %v793_v3 = vsel %vm759_vm4, %v9279_v36, -inf }
 0x498   :  { %1141 = vrot.lane.b32.xlu1 %v9168_v7, %s8809_s25 }
 0x4a3   :  { %1058 = vrot.lane.b32.xlu0 %v9170_v35, %s8809_s25 }
 0x4bc   :  { %794 = vmax.xlane.f32.xlu1 %v793_v3 }
 0x4fe   :  { %v762_v44 = vpop.xlane.xlu0 %761 }
 0x4ff   :  { %v796_v1 = vsub.f32 %v652_v13, %v762_v44 }
 0x500   :  { %v765_v4 = vpop.xlane.xlu1 %764 }
 0x501   :  { %v808_v6 = vmul.f32 1.442695, %v796_v1  ;;  %v797_v9 = vsub.f32 %v655_v8, %v765_v4 }
 0x503   :  { %8253 = vpow2.f32 %v808_v6  ;;  %v810_v11 = vmul.f32 1.442695, %v797_v9 }
 0x505   :  { %8255 = vpow2.f32 %v810_v11 }
 0x506   :  { %v768_v58 = vpop.xlane.xlu0 %767 }
 0x507   :  { %v798_v62 = vsub.f32 %v660_v18, %v768_v58 }
 0x509   :  { %v812_v14 = vmul.f32 1.442695, %v798_v62 }
 0x50a   :  { %v780_v53 = vpop.xlane.xlu0 %779 }
 0x50b   :  { %8257 = vpow2.f32 %v812_v14  ;;  %v802_v15 = vsub.f32 %v736_v27, %v780_v53 }
 0x50c   :  { %v783_v20 = vpop.xlane.xlu1 %782 }
 0x50d   :  { %v9287_v5 = vpop.eup %8253  ;;  %v820_v26 = vmul.f32 1.442695, %v802_v15  ;;  %v803_v28 = vsub.f32 %v739_v31, %v783_v20 }
 0x50e   :  { %v771_v29 = vpop.xlane.xlu0 %770  ;;  %v832_v13 = vsel %vm759_vm4, %v9287_v5, 0.0 }
 0x50f   :  { %v9291_v32 = vpop.eup %8255  ;;  %8259 = vpow2.f32 %v820_v26  ;;  %v799_v8 = vsub.f32 %v9253_v0, %v771_v29  ;;  %833 = vadd.xlane.f32.xlu0 %v832_v13  ;;  %v822_v34 = vmul.f32 1.442695, %v803_v28 }
 0x510   :  { %v835_v18 = vsel %vm759_vm4, %v9291_v32, 0.0  ;;  %v777_v17 = vpop.xlane.xlu1 %776 }
 0x511   :  { %v814_v27 = vmul.f32 1.442695, %v799_v8  ;;  %836 = vadd.xlane.f32.xlu1 %v835_v18  ;;  %v801_v45 = vsub.f32 %v9261_v42, %v777_v17 }
 0x512   :  { %v774_v41 = vpop.xlane.xlu0 %773 }
 0x513   :  { %8261 = vpow2.f32 %v814_v27  ;;  %v800_v31 = vsub.f32 %v9257_v39, %v774_v41  ;;  %v818_v59 = vmul.f32 1.442695, %v801_v45 }
 0x514   :  { %8263 = vpow2.f32 %v822_v34  ;;  %v789_v11 = vpop.xlane.xlu1 %788 }
 0x515   :  { %v9297_v43 = vpop.eup %8257  ;;  %v816_v47 = vmul.f32 1.442695, %v800_v31  ;;  %v805_v53 = vsub.f32 %v9269_v56, %v789_v11 }
 0x516   :  { %v786_v52 = vpop.xlane.xlu0 %785  ;;  %v838_v0 = vsel %vm759_vm4, %v9297_v43, 0.0 }
 0x517   :  { %v804_v30 = vsub.f32 %v9265_v46, %v786_v52  ;;  %839 = vadd.xlane.f32.xlu0 %v838_v0  ;;  %8265 = vpow2.f32 %v816_v47  ;;  %v826_v26 = vmul.f32 1.442695, %v805_v53 }
 0x518   :  { %v9332_v14 = vpop.permute.xlu1 %1141 }
 0x519   :  { %v9303_v57 = vpop.eup %8259  ;;  %v824_v61 = vmul.f32 1.442695, %v804_v30 }
 0x51a   :  { %v850_v39 = vsel %vm759_vm4, %v9303_v57, 0.0  ;;  %v792_v58 = vpop.xlane.xlu0 %791 }
 0x51b   :  { %8267 = vpow2.f32 %v824_v61  ;;  %851 = vadd.xlane.f32.xlu1 %v850_v39  ;;  %v806_v62 = vsub.f32 %v9275_v60, %v792_v58  ;;  %v1070_v61 = vsel %vm599_vm3, %v9233_v51, 0 }
 0x51c   :  { %8269 = vpow2.f32 %v818_v59 }
 0x51d   :  { %v9307_v63 = vpop.eup %8261  ;;  %v828_v15 = vmul.f32 1.442695, %v806_v62 }
 0x51e   :  { %v841_v42 = vsel %vm759_vm4, %v9307_v63, 0.0  ;;  %v9311_v2 = vpop.eup %8263  ;;  %v1059_v34 = vpop.permute.xlu0 %1058 }
 0x51f   :  { %842 = vadd.xlane.f32.xlu1 %v841_v42  ;;  %v853_v46 = vsel %vm759_vm4, %v9311_v2, 0.0  ;;  %8271 = vpow2.f32 %v828_v15  ;;  %v1073_v42 = vsel %vm599_vm3, %v9226_v10, 0  ;;  %v1076_v10 = vsel %vm599_vm3, %v1059_v34, 0 }
 0x520   :  { %8273 = vpow2.f32 %v826_v26 }
 0x521   :  { %v9315_v3 = vpop.eup %8265 }
 0x522   :  { %v844_v1 = vsel %vm759_vm4, %v9315_v3, 0.0 }
 0x523   :  { %854 = vadd.xlane.f32.xlu1 %v853_v46 }
 0x525   :  { %v9317_v44 = vpop.eup %8267 }
 0x526   :  { %v856_v4 = vsel %vm759_vm4, %v9317_v44, 0.0  ;;  %v9323_v6 = vpop.eup %8269 }
 0x527   :  { %845 = vadd.xlane.f32.xlu1 %v844_v1  ;;  %857 = vadd.xlane.f32.xlu0 %v856_v4  ;;  %v847_v9 = vsel %vm759_vm4, %v9323_v6, 0.0 }
 0x529   :  { %v9336_v13 = vpop.eup %8271 }
 0x52a   :  { %v862_v8 = vsel %vm759_vm4, %v9336_v13, 0.0  ;;  %v9340_v18 = vpop.eup %8273 }
 0x52b   :  { %848 = vadd.xlane.f32.xlu1 %v847_v9  ;;  %v859_v56 = vsel %vm759_vm4, %v9340_v18, 0.0 }
 0x53c   :  { %1143 = vrot.lane.b32.xlu1 %v9182_v48, %s8809_s25 }
 0x53d   :  { %1048 = vrot.lane.b32.xlu0 %v9162_v23, %s8810_s18 }
 0x549   :  { %v795_v20 = vpop.xlane.xlu1 %794 }
 0x54a   :  { %v807_v28 = vsub.f32 %v9279_v36, %v795_v20 }
 0x54c   :  { %v830_v29 = vmul.f32 1.442695, %v807_v28 }
 0x54e   :  { %8275 = vpow2.f32 %v830_v29 }
 0x558   :  { %v9344_v60 = vpop.eup %8275 }
 0x559   :  { %v865_v36 = vsel %vm759_vm4, %v9344_v60, 0.0 }
 0x55c   :  { %863 = vadd.xlane.f32.xlu0 %v862_v8 }
 0x560   :  { %860 = vadd.xlane.f32.xlu1 %v859_v56 }
 0x564   :  { %866 = vadd.xlane.f32.xlu1 %v865_v36 }
 0x572   :  { %1050 = vrot.lane.b32.xlu0 %v9160_v22, %s8810_s18 }
 0x575   :  { %1145 = vrot.lane.b32.xlu1 %v9180_v25, %s8809_s25 }
 0x576   :  { %1052 = vrot.lane.b32.xlu0 %v9170_v35, %s8810_s18 }
 0x579   :  { %1135 = vrot.lane.b32.xlu1 %v9168_v7, %s8810_s18 }
 0x57a   :  { %1137 = vrot.lane.b32.xlu0 %v9182_v48, %s8810_s18 }
 0x57d   :  { %1139 = vrot.lane.b32.xlu1 %v9180_v25, %s8810_s18 }
 0x57e   :  { %1360 = vrot.lane.b32.xlu0 %v9162_v23, %s8811_s26 }
 0x581   :  { %1362 = vrot.lane.b32.xlu1 %v9160_v22, %s8811_s26 }
 0x582   :  { %1364 = vrot.lane.b32.xlu0 %v9170_v35, %s8811_s26 }
 0x585   :  { %1516 = vrot.lane.b32.xlu1 %v9162_v23, %s8812_s27 }
 0x586   :  { %1435 = vrot.lane.b32.xlu0 %v9168_v7, %s8811_s26 }
 0x589   :  { %1439 = vrot.lane.b32.xlu1 %v9180_v25, %s8811_s26 }
 0x58a   :  { %1437 = vrot.lane.b32.xlu0 %v9182_v48, %s8811_s26 }
 0x58e   :  { %1518 = vrot.lane.b32.xlu0 %v9160_v22, %s8812_s27 }
 0x59c   :  { %v834_v27 = vpop.xlane.xlu0 %833 }
 0x59d   :  { %8277 = vrcp.f32 %v834_v27 }
 0x59e   :  { %v837_v17 = vpop.xlane.xlu1 %836 }
 0x59f   :  { %8279 = vrcp.f32 %v837_v17 }
 0x5a4   :  { %v840_v31 = vpop.xlane.xlu0 %839 }
 0x5a5   :  { %8281 = vrcp.f32 %v840_v31 }
 0x5a7   :  { %v8278_v41 = vpop.eup %8277 }
 0x5a8   :  { %v852_v45 = vpop.xlane.xlu1 %851  ;;  %v880_v52 = vmul.f32 %v8278_v41, %v9287_v5 }
 0x5a9   :  { %v8280_v47 = vpop.eup %8279 }
 0x5aa   :  { %v881_v0 = vmul.f32 %v8280_v47, %v9291_v32 }
 0x5ac   :  { %v892_v30 = vpack.c.bf16 %v881_v0, %v880_v52  ;;  %v843_v59 = vpop.xlane.xlu1 %842 }
 0x5ad   :  { %8283 = vrcp.f32 %v843_v59 }
 0x5ae   :  { %7316 = vmatmul.mubr.msk.bf16.vlgmr.msra.gmra.mrb[24].mxu1 %vm759_vm4, %v892_v30  ;;  %8285 = vrcp.f32 %v852_v45 }
 0x5af   :  { %7346 = vmatpush3.bf16.xpose.msra.mxu1 %v1070_v61  ;;  %7319 = vmatprep.mubr.msk.bf16.mxu1 %vm8807_vm2, %v12198_v12  ;;  %v8282_v32 = vpop.eup %8281 }
 0x5b0   :  { %v855_v39 = vpop.xlane.xlu1 %854  ;;  %7347 = vmatprep.subr.bf16.mxu1 %v12198_v12  ;;  %v882_v1 = vmul.f32 %v8282_v32, %v9297_v43 }
 0x5b1   :  { %8287 = vrcp.f32 %v855_v39 }
 0x5b4   :  { %v846_v5 = vpop.xlane.xlu1 %845  ;;  %v858_v29 = vpop.xlane.xlu0 %857 }
 0x5b5   :  { %8289 = vrcp.f32 %v846_v5 }
 0x5b7   :  { %v8284_v46 = vpop.eup %8283  ;;  %7348 = vmatpush3.bf16.xpose.msra.mxu1 %v1073_v42 }
 0x5b8   :  { %v849_v51 = vpop.xlane.xlu1 %848  ;;  %v883_v4 = vmul.f32 %v8284_v46, %v9307_v63  ;;  %7349 = vmatprep.subr.bf16.mxu1 %v12198_v12  ;;  %v8286_v9 = vpop.eup %8285  ;;  %v1157_v63 = vsel %vm599_vm3, %v9332_v14, 0 }
 0x5b9   :  { %8291 = vrcp.f32 %v849_v51  ;;  %v886_v62 = vmul.f32 %v8286_v9, %v9303_v57  ;;  %v1049_v8 = vpop.permute.xlu0 %1048 }
 0x5ba   :  { %v893_v11 = vpack.c.bf16 %v883_v4, %v882_v1  ;;  %8293 = vrcp.f32 %v858_v29 }
 0x5bb   :  { %v8288_v58 = vpop.eup %8287 }
 0x5bc   :  { %v887_v53 = vmul.f32 %v8288_v58, %v9311_v2  ;;  %7320 = vmatmul.mubr.msk.bf16.gmra.mrb[28].mxu1 %vm759_vm4, %v893_v11  ;;  %v1144_v26 = vpop.permute.xlu1 %1143 }
 0x5bd   :  { %7323 = vmatprep.mubr.msk.bf16.mxu1 %vm8807_vm2, %v12198_v12  ;;  %v1160_v14 = vsel %vm599_vm3, %v1144_v26, 0 }
 0x5be   :  { %v895_v43 = vpack.c.bf16 %v887_v53, %v886_v62 }
 0x5bf   :  { %7350 = vmatpush3.bf16.xpose.msra.mxu1 %v1076_v10  ;;  %v8290_v15 = vpop.eup %8289 }
 0x5c0   :  { %7334 = vmatmul.mubr.msk.bf16.vlgmr.msra.gmra.mrb[24].mxu0 %vm759_vm4, %v895_v43  ;;  %7381 = vmatprep.subr.bf16.mxu1 %v12198_v12  ;;  %v884_v2 = vmul.f32 %v8290_v15, %v9315_v3 }
 0x5c1   :  { %7364 = vmatpush3.bf16.xpose.msra.mxu0 %v1157_v63  ;;  %7337 = vmatprep.mubr.msk.bf16.mxu0 %vm8807_vm2, %v12198_v12 }
 0x5c2   :  { %7365 = vmatprep.subr.bf16.mxu0 %v12198_v12 }
 0x5c3   :  { %v8292_v57 = vpop.eup %8291 }
 0x5c4   :  { %v885_v20 = vmul.f32 %v8292_v57, %v9323_v6  ;;  %v8294_v41 = vpop.eup %8293 }
 0x5c5   :  { %v888_v0 = vmul.f32 %v8294_v41, %v9317_v44 }
 0x5c6   :  { %v894_v28 = vpack.c.bf16 %v885_v20, %v884_v2 }
 0x5c8   :  { %7324 = vmatmul.mubr.msk.bf16.gmra.mrb[32].mxu1 %vm759_vm4, %v894_v28 }
 0x5c9   :  { %7366 = vmatpush3.bf16.xpose.msra.mxu0 %v1160_v14  ;;  %7351 = vmatprep.mubr.msk.bf16.mxu1 %vm8807_vm2, %v12198_v12 }
 0x5ca   :  { %7367 = vmatprep.subr.bf16.mxu0 %v12198_v12 }
 0x5d0   :  { %7352 = vmatmul.mubr.msk.bf16.vlgmr.msra.gmra.mrb[36].mxu1 %vm599_vm3, %v1049_v8 }
 0x5d1   :  { %7355 = vmatprep.mubr.msk.bf16.mxu1 %vm8807_vm2, %v12198_v12 }
 0x5e9   :  { %v864_v3 = vpop.xlane.xlu0 %863 }
 0x5ed   :  { %v861_v6 = vpop.xlane.xlu1 %860  ;;  %v1051_v56 = vpop.permute.xlu0 %1050 }
 0x5ee   :  { %8295 = vrcp.f32 %v861_v6  ;;  %7356 = vmatmul.mubr.msk.bf16.gmra.mrb[40].mxu1 %vm599_vm3, %v1051_v56 }
 0x5ef   :  { %7359 = vmatprep.mubr.msk.bf16.mxu1 %vm8807_vm2, %v12198_v12 }
 0x5f1   :  { %v867_v36 = vpop.xlane.xlu1 %866  ;;  %v1053_v34 = vpop.permute.xlu0 %1052 }
 0x5f2   :  { %8297 = vrcp.f32 %v867_v36 }
 0x5f3   :  { %8299 = vrcp.f32 %v864_v3 }
 0x5f5   :  { %v1146_v27 = vpop.permute.xlu1 %1145  ;;  %v1138_v17 = vpop.permute.xlu0 %1137 }
 0x5f6   :  { %v1163_v31 = vsel %vm599_vm3, %v1146_v27, 0  ;;  %7360 = vmatmul.mubr.msk.bf16.gmra.mrb[44].mxu1 %vm599_vm3, %v1053_v34 }
 0x5f7   :  { %7368 = vmatpush3.bf16.xpose.msra.mxu0 %v1163_v31  ;;  %7387 = vmatprep.mubr.msk.bf16.mxu1 %vm8807_vm2, %v12198_v12 }
 0x5f8   :  { %v8296_v45 = vpop.eup %8295  ;;  %7399 = vmatprep.subr.bf16.mxu0 %v12198_v12 }
 0x5f9   :  { %v1136_v47 = vpop.permute.xlu1 %1135  ;;  %v1361_v52 = vpop.permute.xlu0 %1360  ;;  %v889_v30 = vmul.f32 %v8296_v45, %v9340_v18 }
 0x5fa   :  { %7382 = vmatpush3.bf16.msra.mxu1 %v1361_v52 }
 0x5fb   :  { %v896_v59 = vpack.c.bf16 %v889_v30, %v888_v0  ;;  %7383 = vmatprep.subr.bf16.mxu1 %v12198_v12 }
 0x5fc   :  { %v8298_v61 = vpop.eup %8297 }
 0x5fd   :  { %v1140_v39 = vpop.permute.xlu1 %1139  ;;  %7338 = vmatmul.mubr.msk.bf16.gmra.mrb[28].mxu0 %vm759_vm4, %v896_v59  ;;  %v8300_v5 = vpop.eup %8299  ;;  %v891_v32 = vmul.f32 %v8298_v61, %v9344_v60 }
 0x5fe   :  { %7341 = vmatprep.mubr.msk.bf16.mxu0 %vm8807_vm2, %v12198_v12  ;;  %v890_v46 = vmul.f32 %v8300_v5, %v9336_v13  ;;  %v1365_v18 = vpop.permute.xlu0 %1364 }
 0x600   :  { %v897_v44 = vpack.c.bf16 %v891_v32, %v890_v46 }
 0x601   :  { %v1363_v42 = vpop.permute.xlu1 %1362 }
 0x602   :  { %7384 = vmatpush3.bf16.msra.mxu1 %v1363_v42  ;;  %v1436_v51 = vpop.permute.xlu0 %1435 }
 0x603   :  { %7385 = vmatprep.subr.bf16.mxu1 %v12198_v12 }
 0x605   :  { %7342 = vmatmul.mubr.msk.bf16.gmra.mrb[32].mxu0 %vm759_vm4, %v897_v44  ;;  %v9436_v13 = vpop.permute.xlu1 %1516 }
 0x606   :  { %7386 = vmatpush3.bf16.msra.mxu1 %v1365_v18  ;;  %7369 = vmatprep.mubr.msk.bf16.mxu0 %vm8807_vm2, %v12198_v12  ;;  %v1438_v60 = vpop.permute.xlu0 %1437 }
 0x607   :  { %7417 = vmatprep.subr.bf16.mxu1 %v12198_v12 }
 0x609   :  { %v1440_v1 = vpop.permute.xlu1 %1439 }
 0x60d   :  { %7370 = vmatmul.mubr.msk.bf16.vlgmr.msra.gmra.mrb[36].mxu0 %vm599_vm3, %v1136_v47 }
 0x60e   :  { %7400 = vmatpush3.bf16.msra.mxu0 %v1436_v51  ;;  %7373 = vmatprep.mubr.msk.bf16.mxu0 %vm8807_vm2, %v12198_v12 }
 0x60f   :  { %7401 = vmatprep.subr.bf16.mxu0 %v12198_v12 }
 0x612   :  { %7402 = vmatpush3.bf16.msra.mxu0 %v1438_v60 }
 0x613   :  { %7403 = vmatprep.subr.bf16.mxu0 %v12198_v12 }
 0x615   :  { %7374 = vmatmul.mubr.msk.bf16.gmra.mrb[40].mxu0 %vm599_vm3, %v1138_v17 }
 0x616   :  { %7404 = vmatpush3.bf16.msra.mxu0 %v1440_v1  ;;  %7377 = vmatprep.mubr.msk.bf16.mxu0 %vm8807_vm2, %v12198_v12 }
 0x617   :  { %7435 = vmatprep.subr.bf16.mxu0 %v12198_v12 }
 0x61d   :  { %7378 = vmatmul.mubr.msk.bf16.gmra.mrb[44].mxu0 %vm599_vm3, %v1140_v39 }
 0x61e   :  { %7405 = vmatprep.mubr.msk.bf16.mxu0 %vm8807_vm2, %v12198_v12 }
 0x681   :  { %v9447_v4 = vpop.f32.mrb[24].mxu1 }
 0x682   :  { %v7317_v9 = vpop.f32.mrb[25].mxu1 }
 0x683   :  { %v9449_v11 = vpop.f32.mrb[26].mxu1 }
 0x684   :  { %v7318_v58 = vpop.f32.mrb[27].mxu1 }
 0x68f   :  { %v9451_v62 = vpop.f32.mrb[28].mxu1 }
 0x690   :  { %v7321_v53 = vpop.f32.mrb[29].mxu1 }
 0x691   :  { %v9453_v10 = vpop.f32.mrb[30].mxu1 }
 0x692   :  { %v7322_v43 = vpop.f32.mrb[31].mxu1 }
 0x693   :  { %v9455_v63 = vpop.f32.mrb[24].mxu0 }
 0x694   :  { %v7335_v15 = vpop.f32.mrb[25].mxu0 }
 0x695   :  { %v9457_v57 = vpop.f32.mrb[26].mxu0 }
 0x696   :  { %v7336_v2 = vpop.f32.mrb[27].mxu0 }
 0x69b   :  { %v9459_v20 = vpop.f32.mrb[32].mxu1 }
 0x69c   :  { %v7325_v26 = vpop.f32.mrb[33].mxu1 }
 0x69d   :  { %v9461_v28 = vpop.f32.mrb[34].mxu1 }
 0x69e   :  { %v7326_v14 = vpop.f32.mrb[35].mxu1 }
 0x6a3   :  { %v1112_v29 = vpop.f32.mrb[36].mxu1 }
 0x6a4   :  { %v7353_v8 = vpop.f32.mrb[37].mxu1  ;;  %v1222_v3 = vsel %vm759_vm4, %v1112_v29, -inf }
 0x6a5   :  { %1223 = vmax.xlane.f32.xlu0 %v1222_v3  ;;  %v1115_v6 = vpop.f32.mrb[38].mxu1 }
 0x6a6   :  { %v7354_v56 = vpop.f32.mrb[39].mxu1  ;;  %v1225_v36 = vsel %vm759_vm4, %v1115_v6, -inf }
 0x6a7   :  { %1226 = vmax.xlane.f32.xlu1 %v1225_v36 }
 0x6c1   :  { %v9465_v34 = vpop.f32.mrb[40].mxu1 }
 0x6c2   :  { %v7357_v27 = vpop.f32.mrb[41].mxu1  ;;  %v1228_v17 = vsel %vm759_vm4, %v9465_v34, -inf }
 0x6c3   :  { %1229 = vmax.xlane.f32.xlu0 %v1228_v17  ;;  %v9469_v41 = vpop.f32.mrb[42].mxu1 }
 0x6c4   :  { %v7358_v31 = vpop.f32.mrb[43].mxu1  ;;  %v1231_v58 = vsel %vm759_vm4, %v9469_v41, -inf }
 0x6c9   :  { %v9471_v45 = vpop.f32.mrb[44].mxu1 }
 0x6ca   :  { %v7361_v47 = vpop.f32.mrb[45].mxu1  ;;  %v1234_v2 = vsel %vm759_vm4, %v9471_v45, -inf }
 0x6cb   :  { %v9473_v52 = vpop.f32.mrb[46].mxu1 }
 0x6cc   :  { %v7362_v0 = vpop.f32.mrb[47].mxu1  ;;  %v1237_v53 = vsel %vm759_vm4, %v9473_v52, -inf }
 0x6cd   :  { %v9511_v0 = vpop.permute.xlu0 %1518 }
 0x6d0   :  { %v9475_v30 = vpop.f32.mrb[28].mxu0 }
 0x6d1   :  { %v7339_v59 = vpop.f32.mrb[29].mxu0 }
 0x6d2   :  { %v9477_v61 = vpop.f32.mrb[30].mxu0 }
 0x6d3   :  { %v7340_v39 = vpop.f32.mrb[31].mxu0 }
 0x6d8   :  { %v9479_v5 = vpop.f32.mrb[32].mxu0 }
 0x6d9   :  { %12252 = vst [vmem:[#allocation17_spill] sm:$0xff] %v9479_v5  ;;  %v7343_v32 = vpop.f32.mrb[33].mxu0 }
 0x6da   :  { %v9481_v42 = vpop.f32.mrb[34].mxu0 }
 0x6db   :  { %12253 = vst [vmem:[#allocation18_spill] sm:$0xff] %v9481_v42  ;;  %v7344_v46 = vpop.f32.mrb[35].mxu0 }
 0x6e0   :  { %v1199_v44 = vpop.f32.mrb[36].mxu0 }
 0x6e1   :  { %v7371_v18 = vpop.f32.mrb[37].mxu0  ;;  %v1240_v51 = vsel %vm759_vm4, %v1199_v44, -inf }
 0x6e2   :  { %v1202_v60 = vpop.f32.mrb[38].mxu0  ;;  %1241 = vmax.xlane.f32.xlu0 %v1240_v51 }
 0x6e3   :  { %v7372_v1 = vpop.f32.mrb[39].mxu0  ;;  %v1243_v9 = vsel %vm759_vm4, %v1202_v60, -inf }
 0x6e4   :  { %1244 = vmax.xlane.f32.xlu1 %v1243_v9 }
 0x6e6   :  { %1232 = vmax.xlane.f32.xlu0 %v1231_v58 }
 0x6e8   :  { %1238 = vmax.xlane.f32.xlu1 %v1237_v53  ;;  %v9489_v43 = vpop.f32.mrb[40].mxu0 }
 0x6e9   :  { %v7375_v15 = vpop.f32.mrb[41].mxu0  ;;  %v1246_v3 = vsel %vm759_vm4, %v9489_v43, -inf }
 0x6ea   :  { %1235 = vmax.xlane.f32.xlu0 %v1234_v2  ;;  %v9493_v26 = vpop.f32.mrb[42].mxu0 }
 0x6eb   :  { %v7376_v14 = vpop.f32.mrb[43].mxu0  ;;  %v1249_v8 = vsel %vm759_vm4, %v9493_v26, -inf }
 0x6ec   :  { %1250 = vmax.xlane.f32.xlu1 %v1249_v8 }
 0x6ee   :  { %1247 = vmax.xlane.f32.xlu0 %v1246_v3 }
 0x6f0   :  { %v9499_v56 = vpop.f32.mrb[44].mxu0 }
 0x6f1   :  { %v7379_v36 = vpop.f32.mrb[45].mxu0  ;;  %v1252_v27 = vsel %vm759_vm4, %v9499_v56, -inf }
 0x6f2   :  { %1253 = vmax.xlane.f32.xlu0 %v1252_v27  ;;  %v9503_v17 = vpop.f32.mrb[46].mxu0 }
 0x6f3   :  { %v7380_v31 = vpop.f32.mrb[47].mxu0  ;;  %v1255_v47 = vsel %vm759_vm4, %v9503_v17, -inf }
 0x6fd   :  { %1603 = vrot.lane.b32.xlu1 %v9168_v7, %s8812_s27 }
 0x708   :  { %1520 = vrot.lane.b32.xlu0 %v9170_v35, %s8812_s27 }
 0x721   :  { %1256 = vmax.xlane.f32.xlu1 %v1255_v47 }
 0x732   :  { %v1224_v59 = vpop.xlane.xlu0 %1223 }
 0x733   :  { %v1258_v39 = vsub.f32 %v1112_v29, %v1224_v59 }
 0x734   :  { %v1227_v32 = vpop.xlane.xlu1 %1226 }
 0x735   :  { %v1270_v46 = vmul.f32 1.442695, %v1258_v39  ;;  %v1259_v18 = vsub.f32 %v1115_v6, %v1227_v32 }
 0x737   :  { %8301 = vpow2.f32 %v1270_v46  ;;  %v1272_v51 = vmul.f32 1.442695, %v1259_v18 }
 0x739   :  { %8303 = vpow2.f32 %v1272_v51 }
 0x741   :  { %v9513_v1 = vpop.eup %8301 }
 0x742   :  { %v1294_v9 = vsel %vm759_vm4, %v9513_v1, 0.0 }
 0x743   :  { %v9517_v58 = vpop.eup %8303  ;;  %1295 = vadd.xlane.f32.xlu0 %v1294_v9 }
 0x744   :  { %v1297_v53 = vsel %vm759_vm4, %v9517_v58, 0.0 }
 0x745   :  { %1298 = vadd.xlane.f32.xlu1 %v1297_v53 }
 0x750   :  { %v1230_v15 = vpop.xlane.xlu0 %1229 }
 0x751   :  { %v1260_v29 = vsub.f32 %v9465_v34, %v1230_v15 }
 0x753   :  { %v1274_v2 = vmul.f32 1.442695, %v1260_v29 }
 0x755   :  { %8305 = vpow2.f32 %v1274_v2 }
 0x75f   :  { %v9522_v6 = vpop.eup %8305 }
 0x760   :  { %v1300_v14 = vsel %vm759_vm4, %v9522_v6, 0.0 }
 0x761   :  { %1301 = vadd.xlane.f32.xlu0 %v1300_v14 }
 0x76f   :  { %v1242_v8 = vpop.xlane.xlu0 %1241 }
 0x770   :  { %v1264_v3 = vsub.f32 %v1199_v44, %v1242_v8 }
 0x771   :  { %v1245_v36 = vpop.xlane.xlu1 %1244 }
 0x772   :  { %v1282_v27 = vmul.f32 1.442695, %v1264_v3  ;;  %v1265_v31 = vsub.f32 %v1202_v60, %v1245_v36 }
 0x773   :  { %v1233_v47 = vpop.xlane.xlu0 %1232 }
 0x774   :  { %8307 = vpow2.f32 %v1282_v27  ;;  %v1261_v59 = vsub.f32 %v9469_v41, %v1233_v47  ;;  %v1284_v39 = vmul.f32 1.442695, %v1265_v31 }
 0x775   :  { %v1239_v34 = vpop.xlane.xlu1 %1238 }
 0x776   :  { %v1276_v32 = vmul.f32 1.442695, %v1261_v59  ;;  %v1263_v51 = vsub.f32 %v9473_v52, %v1239_v34 }
 0x777   :  { %v1236_v46 = vpop.xlane.xlu0 %1235 }
 0x778   :  { %8309 = vpow2.f32 %v1276_v32  ;;  %v1262_v18 = vsub.f32 %v9471_v45, %v1236_v46  ;;  %v1280_v60 = vmul.f32 1.442695, %v1263_v51 }
 0x779   :  { %8311 = vpow2.f32 %v1284_v39  ;;  %v1251_v47 = vpop.xlane.xlu1 %1250 }
 0x77a   :  { %v1278_v9 = vmul.f32 1.442695, %v1262_v18  ;;  %v1267_v34 = vsub.f32 %v9493_v26, %v1251_v47 }
 0x77b   :  { %v1248_v53 = vpop.xlane.xlu0 %1247 }
 0x77c   :  { %v1266_v44 = vsub.f32 %v9489_v43, %v1248_v53  ;;  %8313 = vpow2.f32 %v1278_v9  ;;  %v1288_v51 = vmul.f32 1.442695, %v1267_v34 }
 0x77d   :  { %v9559_v32 = vpop.permute.xlu1 %1603 }
 0x77e   :  { %v9530_v15 = vpop.eup %8307  ;;  %v1286_v29 = vmul.f32 1.442695, %v1266_v44 }
 0x77f   :  { %v1312_v41 = vsel %vm759_vm4, %v9530_v15, 0.0  ;;  %v1254_v59 = vpop.xlane.xlu0 %1253 }
 0x780   :  { %8315 = vpow2.f32 %v1286_v29  ;;  %1313 = vadd.xlane.f32.xlu1 %v1312_v41  ;;  %v1268_v39 = vsub.f32 %v9499_v56, %v1254_v59 }
 0x781   :  { %8317 = vpow2.f32 %v1280_v60 }
 0x782   :  { %v9534_v2 = vpop.eup %8309  ;;  %v1290_v46 = vmul.f32 1.442695, %v1268_v39  ;;  %v1532_v39 = vsel %vm599_vm3, %v9436_v13, 0  ;;  %v1535_v13 = vsel %vm599_vm3, %v9511_v0, 0 }
 0x783   :  { %v1303_v45 = vsel %vm759_vm4, %v9534_v2, 0.0  ;;  %v9538_v52 = vpop.eup %8311  ;;  %v1521_v41 = vpop.permute.xlu0 %1520 }
 0x784   :  { %1304 = vadd.xlane.f32.xlu1 %v1303_v45  ;;  %v1315_v43 = vsel %vm759_vm4, %v9538_v52, 0.0  ;;  %8319 = vpow2.f32 %v1290_v46 }
 0x785   :  { %8321 = vpow2.f32 %v1288_v51 }
 0x786   :  { %v9542_v14 = vpop.eup %8313 }
 0x787   :  { %v1306_v3 = vsel %vm759_vm4, %v9542_v14, 0.0 }
 0x788   :  { %1316 = vadd.xlane.f32.xlu1 %v1315_v43 }
 0x78a   :  { %v9544_v8 = vpop.eup %8315 }
 0x78b   :  { %v1318_v36 = vsel %vm759_vm4, %v9544_v8, 0.0  ;;  %v9550_v27 = vpop.eup %8317 }
 0x78c   :  { %1307 = vadd.xlane.f32.xlu1 %v1306_v3  ;;  %1319 = vadd.xlane.f32.xlu0 %v1318_v36  ;;  %v1309_v31 = vsel %vm759_vm4, %v9550_v27, 0.0 }
 0x78e   :  { %v9563_v44 = vpop.eup %8319 }
 0x78f   :  { %v1324_v60 = vsel %vm759_vm4, %v9563_v44, 0.0  ;;  %v9567_v29 = vpop.eup %8321 }
 0x790   :  { %1310 = vadd.xlane.f32.xlu1 %v1309_v31  ;;  %v1321_v26 = vsel %vm759_vm4, %v9567_v29, 0.0 }
 0x7a1   :  { %1605 = vrot.lane.b32.xlu1 %v9182_v48, %s8812_s27 }
 0x7a2   :  { %1510 = vrot.lane.b32.xlu0 %v9162_v23, %s8813_s21 }
 0x7ae   :  { %v1257_v18 = vpop.xlane.xlu1 %1256 }
 0x7af   :  { %v1269_v9 = vsub.f32 %v9503_v17, %v1257_v18 }
 0x7b1   :  { %v1292_v53 = vmul.f32 1.442695, %v1269_v9 }
 0x7b3   :  { %8323 = vpow2.f32 %v1292_v53 }
 0x7bd   :  { %v9571_v56 = vpop.eup %8323 }
 0x7be   :  { %v1327_v17 = vsel %vm759_vm4, %v9571_v56, 0.0 }
 0x7c1   :  { %1325 = vadd.xlane.f32.xlu0 %v1324_v60 }
 0x7c5   :  { %1322 = vadd.xlane.f32.xlu1 %v1321_v26 }
 0x7c9   :  { %1328 = vadd.xlane.f32.xlu1 %v1327_v17 }
 0x7d0   :  { %v1296_v45 = vpop.xlane.xlu0 %1295 }
 0x7d1   :  { %8325 = vrcp.f32 %v1296_v45 }
 0x7d2   :  { %v1299_v43 = vpop.xlane.xlu1 %1298 }
 0x7d3   :  { %8327 = vrcp.f32 %v1299_v43 }
 0x7d7   :  { %1512 = vrot.lane.b32.xlu0 %v9160_v22, %s8813_s21 }
 0x7da   :  { %1607 = vrot.lane.b32.xlu1 %v9180_v25, %s8812_s27 }
 0x7db   :  { %v8326_v3 = vpop.eup %8325  ;;  %1514 = vrot.lane.b32.xlu0 %v9170_v35, %s8813_s21 }
 0x7dc   :  { %v1342_v31 = vmul.f32 %v8326_v3, %v9513_v1  ;;  %v1538_v1 = vsel %vm599_vm3, %v1521_v41, 0 }
 0x7dd   :  { %v8328_v36 = vpop.eup %8327 }
 0x7de   :  { %v1343_v47 = vmul.f32 %v8328_v36, %v9517_v58  ;;  %1597 = vrot.lane.b32.xlu1 %v9168_v7, %s8813_s21 }
 0x7df   :  { %1599 = vrot.lane.b32.xlu0 %v9182_v48, %s8813_s21 }
 0x7e0   :  { %v1354_v59 = vpack.c.bf16 %v1343_v47, %v1342_v31  ;;  %v1619_v31 = vsel %vm599_vm3, %v9559_v32, 0 }
 0x7e2   :  { %1601 = vrot.lane.b32.xlu1 %v9180_v25, %s8813_s21  ;;  %7388 = vmatmul.mubr.msk.bf16.vlgmr.msra.gmra.mrb[48].mxu1 %vm759_vm4, %v1354_v59 }
 0x7e3   :  { %7418 = vmatpush3.bf16.xpose.msra.mxu1 %v1532_v39  ;;  %1822 = vrot.lane.b32.xlu0 %v9162_v23, %s8814_s28 }
 0x7e4   :  { %7419 = vmatprep.subr.bf16.mxu1 %v12198_v12  ;;  %7391 = vmatprep.mubr.msk.bf16.mxu1 %vm8807_vm2, %v12198_v12 }
 0x7e6   :  { %1824 = vrot.lane.b32.xlu1 %v9160_v22, %s8814_s28 }
 0x7e7   :  { %1826 = vrot.lane.b32.xlu0 %v9170_v35, %s8814_s28 }
 0x7ea   :  { %1978 = vrot.lane.b32.xlu1 %v9162_v23, %s12222_s29 }
 0x7eb   :  { %7420 = vmatpush3.bf16.xpose.msra.mxu1 %v1535_v13  ;;  %1897 = vrot.lane.b32.xlu0 %v9168_v7, %s8814_s28 }
 0x7ec   :  { %7421 = vmatprep.subr.bf16.mxu1 %v12198_v12 }
 0x7ee   :  { %1901 = vrot.lane.b32.xlu1 %v9180_v25, %s8814_s28  ;;  %v1302_v0 = vpop.xlane.xlu0 %1301 }
 0x7ef   :  { %1899 = vrot.lane.b32.xlu0 %v9182_v48, %s8814_s28  ;;  %8329 = vrcp.f32 %v1302_v0 }
 0x7f3   :  { %7422 = vmatpush3.bf16.xpose.msra.mxu1 %v1538_v1  ;;  %1980 = vrot.lane.b32.xlu0 %v9160_v22, %s12222_s29 }
 0x7f4   :  { %7453 = vmatprep.subr.bf16.mxu1 %v12198_v12 }
 0x7f9   :  { %v8330_v51 = vpop.eup %8329 }
 0x7fa   :  { %v1344_v60 = vmul.f32 %v8330_v51, %v9522_v6 }
 0x80d   :  { %v1314_v58 = vpop.xlane.xlu1 %1313 }
 0x811   :  { %v1305_v34 = vpop.xlane.xlu1 %1304 }
 0x812   :  { %8331 = vrcp.f32 %v1305_v34 }
 0x813   :  { %8333 = vrcp.f32 %v1314_v58 }
 0x815   :  { %v1317_v46 = vpop.xlane.xlu1 %1316 }
 0x816   :  { %8335 = vrcp.f32 %v1317_v46 }
 0x819   :  { %v1308_v18 = vpop.xlane.xlu1 %1307  ;;  %v1320_v32 = vpop.xlane.xlu0 %1319 }
 0x81a   :  { %8337 = vrcp.f32 %v1308_v18 }
 0x81c   :  { %v8332_v9 = vpop.eup %8331 }
 0x81d   :  { %v1311_v53 = vpop.xlane.xlu1 %1310  ;;  %v1345_v26 = vmul.f32 %v8332_v9, %v9534_v2  ;;  %v8334_v17 = vpop.eup %8333 }
 0x81e   :  { %8339 = vrcp.f32 %v1311_v53  ;;  %v1348_v43 = vmul.f32 %v8334_v17, %v9530_v15  ;;  %v1511_v13 = vpop.permute.xlu0 %1510 }
 0x81f   :  { %v1355_v41 = vpack.c.bf16 %v1345_v26, %v1344_v60  ;;  %8341 = vrcp.f32 %v1320_v32 }
 0x820   :  { %v8336_v45 = vpop.eup %8335 }
 0x821   :  { %v1349_v3 = vmul.f32 %v8336_v45, %v9538_v52  ;;  %7392 = vmatmul.mubr.msk.bf16.gmra.mrb[52].mxu1 %vm759_vm4, %v1355_v41  ;;  %v1606_v47 = vpop.permute.xlu1 %1605 }
 0x822   :  { %7395 = vmatprep.mubr.msk.bf16.mxu1 %vm8807_vm2, %v12198_v12  ;;  %v1622_v39 = vsel %vm599_vm3, %v1606_v47, 0 }
 0x823   :  { %v1357_v36 = vpack.c.bf16 %v1349_v3, %v1348_v43 }
 0x824   :  { %v8338_v6 = vpop.eup %8337 }
 0x825   :  { %7406 = vmatmul.mubr.msk.bf16.vlgmr.msra.gmra.mrb[48].mxu0 %vm759_vm4, %v1357_v36  ;;  %v1346_v2 = vmul.f32 %v8338_v6, %v9542_v14 }
 0x826   :  { %7436 = vmatpush3.bf16.xpose.msra.mxu0 %v1619_v31  ;;  %7409 = vmatprep.mubr.msk.bf16.mxu0 %vm8807_vm2, %v12198_v12 }
 0x827   :  { %7437 = vmatprep.subr.bf16.mxu0 %v12198_v12 }
 0x828   :  { %v8340_v15 = vpop.eup %8339 }
 0x829   :  { %v1347_v52 = vmul.f32 %v8340_v15, %v9550_v27  ;;  %v8342_v18 = vpop.eup %8341 }
 0x82a   :  { %v1350_v26 = vmul.f32 %v8342_v18, %v9544_v8 }
 0x82b   :  { %v1356_v59 = vpack.c.bf16 %v1347_v52, %v1346_v2 }
 0x82d   :  { %7396 = vmatmul.mubr.msk.bf16.gmra.mrb[56].mxu1 %vm759_vm4, %v1356_v59 }
 0x82e   :  { %7438 = vmatpush3.bf16.xpose.msra.mxu0 %v1622_v39  ;;  %7423 = vmatprep.mubr.msk.bf16.mxu1 %vm8807_vm2, %v12198_v12 }
 0x82f   :  { %7439 = vmatprep.subr.bf16.mxu0 %v12198_v12 }
 0x835   :  { %7424 = vmatmul.mubr.msk.bf16.vlgmr.msra.gmra.mrb[60].mxu1 %vm599_vm3, %v1511_v13 }
 0x836   :  { %7427 = vmatprep.mubr.msk.bf16.mxu1 %vm8807_vm2, %v12198_v12 }
 0x84e   :  { %v1326_v14 = vpop.xlane.xlu0 %1325 }
 0x852   :  { %v1323_v27 = vpop.xlane.xlu1 %1322  ;;  %v1513_v1 = vpop.permute.xlu0 %1512 }
 0x853   :  { %8343 = vrcp.f32 %v1323_v27  ;;  %7428 = vmatmul.mubr.msk.bf16.gmra.mrb[64].mxu1 %vm599_vm3, %v1513_v1 }
 0x854   :  { %7431 = vmatprep.mubr.msk.bf16.mxu1 %vm8807_vm2, %v12198_v12 }
 0x856   :  { %v1329_v0 = vpop.xlane.xlu1 %1328  ;;  %v1515_v58 = vpop.permute.xlu0 %1514 }
 0x857   :  { %8345 = vrcp.f32 %v1329_v0 }
 0x858   :  { %8347 = vrcp.f32 %v1326_v14 }
 0x85a   :  { %v1608_v34 = vpop.permute.xlu1 %1607  ;;  %v1600_v46 = vpop.permute.xlu0 %1599 }
 0x85b   :  { %v1625_v51 = vsel %vm599_vm3, %v1608_v34, 0  ;;  %7432 = vmatmul.mubr.msk.bf16.gmra.mrb[68].mxu1 %vm599_vm3, %v1515_v58 }
 0x85c   :  { %7440 = vmatpush3.bf16.xpose.msra.mxu0 %v1625_v51  ;;  %7459 = vmatprep.mubr.msk.bf16.mxu1 %vm8807_vm2, %v12198_v12 }
 0x85d   :  { %v8344_v9 = vpop.eup %8343  ;;  %7471 = vmatprep.subr.bf16.mxu0 %v12198_v12 }
 0x85e   :  { %v1598_v53 = vpop.permute.xlu1 %1597  ;;  %v1823_v60 = vpop.permute.xlu0 %1822  ;;  %v1351_v17 = vmul.f32 %v8344_v9, %v9567_v29 }
 0x85f   :  { %7454 = vmatpush3.bf16.msra.mxu1 %v1823_v60 }
 0x860   :  { %v1358_v41 = vpack.c.bf16 %v1351_v17, %v1350_v26  ;;  %7455 = vmatprep.subr.bf16.mxu1 %v12198_v12 }
 0x861   :  { %v8346_v45 = vpop.eup %8345 }
 0x862   :  { %v1602_v43 = vpop.permute.xlu1 %1601  ;;  %7410 = vmatmul.mubr.msk.bf16.gmra.mrb[52].mxu0 %vm759_vm4, %v1358_v41  ;;  %v8348_v3 = vpop.eup %8347  ;;  %v1353_v36 = vmul.f32 %v8346_v45, %v9571_v56 }
 0x863   :  { %7413 = vmatprep.mubr.msk.bf16.mxu0 %vm8807_vm2, %v12198_v12  ;;  %v1352_v6 = vmul.f32 %v8348_v3, %v9563_v44  ;;  %v1827_v29 = vpop.permute.xlu0 %1826 }
 0x865   :  { %v1359_v8 = vpack.c.bf16 %v1353_v36, %v1352_v6 }
 0x866   :  { %v1825_v31 = vpop.permute.xlu1 %1824 }
 0x867   :  { %7456 = vmatpush3.bf16.msra.mxu1 %v1825_v31  ;;  %v1898_v15 = vpop.permute.xlu0 %1897 }
 0x868   :  { %7457 = vmatprep.subr.bf16.mxu1 %v12198_v12 }
 0x86a   :  { %7414 = vmatmul.mubr.msk.bf16.gmra.mrb[56].mxu0 %vm759_vm4, %v1359_v8  ;;  %v9663_v44 = vpop.permute.xlu1 %1978 }
 0x86b   :  { %7458 = vmatpush3.bf16.msra.mxu1 %v1827_v29  ;;  %7441 = vmatprep.mubr.msk.bf16.mxu0 %vm8807_vm2, %v12198_v12  ;;  %v1900_v56 = vpop.permute.xlu0 %1899 }
 0x86c   :  { %7489 = vmatprep.subr.bf16.mxu1 %v12198_v12 }
 0x86e   :  { %v1902_v2 = vpop.permute.xlu1 %1901 }
 0x872   :  { %7442 = vmatmul.mubr.msk.bf16.vlgmr.msra.gmra.mrb[60].mxu0 %vm599_vm3, %v1598_v53 }
 0x873   :  { %7472 = vmatpush3.bf16.msra.mxu0 %v1898_v15  ;;  %7445 = vmatprep.mubr.msk.bf16.mxu0 %vm8807_vm2, %v12198_v12 }
 0x874   :  { %7473 = vmatprep.subr.bf16.mxu0 %v12198_v12 }
 0x877   :  { %7474 = vmatpush3.bf16.msra.mxu0 %v1900_v56 }
 0x878   :  { %7475 = vmatprep.subr.bf16.mxu0 %v12198_v12 }
 0x87a   :  { %7446 = vmatmul.mubr.msk.bf16.gmra.mrb[64].mxu0 %vm599_vm3, %v1600_v46 }
 0x87b   :  { %7476 = vmatpush3.bf16.msra.mxu0 %v1902_v2  ;;  %7449 = vmatprep.mubr.msk.bf16.mxu0 %vm8807_vm2, %v12198_v12 }
 0x87c   :  { %7507 = vmatprep.subr.bf16.mxu0 %v12198_v12 }
 0x882   :  { %7450 = vmatmul.mubr.msk.bf16.gmra.mrb[68].mxu0 %vm599_vm3, %v1602_v43 }
 0x883   :  { %7477 = vmatprep.mubr.msk.bf16.mxu0 %vm8807_vm2, %v12198_v12 }
 0x8b5   :  { %v9674_v52 = vpop.f32.mrb[48].mxu1 }
 0x8b6   :  { %v7389_v47 = vpop.f32.mrb[49].mxu1 }
 0x8b7   :  { %v9676_v59 = vpop.f32.mrb[50].mxu1 }
 0x8b8   :  { %v7390_v32 = vpop.f32.mrb[51].mxu1 }
 0x8f4   :  { %v9680_v13 = vpop.f32.mrb[52].mxu1 }
 0x8f5   :  { %v7393_v14 = vpop.f32.mrb[53].mxu1 }
 0x8f6   :  { %v9682_v27 = vpop.f32.mrb[54].mxu1 }
 0x8f7   :  { %v7394_v0 = vpop.f32.mrb[55].mxu1 }
 0x8f8   :  { %v9686_v58 = vpop.f32.mrb[48].mxu0 }
 0x8f9   :  { %v7407_v34 = vpop.f32.mrb[49].mxu0 }
 0x8fa   :  { %v9688_v46 = vpop.f32.mrb[50].mxu0 }
 0x8fb   :  { %v7408_v51 = vpop.f32.mrb[51].mxu0 }
 0x900   :  { %v9692_v9 = vpop.f32.mrb[56].mxu1 }
 0x901   :  { %v7397_v53 = vpop.f32.mrb[57].mxu1 }
 0x902   :  { %v9694_v60 = vpop.f32.mrb[58].mxu1 }
 0x903   :  { %v7398_v17 = vpop.f32.mrb[59].mxu1 }
 0x908   :  { %v9698_v41 = vpop.f32.mrb[60].mxu1 }
 0x909   :  { %v7425_v45 = vpop.f32.mrb[61].mxu1  ;;  %v1684_v43 = vsel %vm759_vm4, %v9698_v41, -inf }
 0x90a   :  { %1685 = vmax.xlane.f32.xlu0 %v1684_v43  ;;  %v9702_v3 = vpop.f32.mrb[62].mxu1 }
 0x90b   :  { %v7426_v36 = vpop.f32.mrb[63].mxu1  ;;  %v1687_v31 = vsel %vm759_vm4, %v9702_v3, -inf }
 0x90c   :  { %1688 = vmax.xlane.f32.xlu1 %v1687_v31 }
 0x926   :  { %v9706_v6 = vpop.f32.mrb[64].mxu1 }
 0x927   :  { %v7429_v8 = vpop.f32.mrb[65].mxu1  ;;  %v1690_v29 = vsel %vm759_vm4, %v9706_v6, -inf }
 0x928   :  { %1691 = vmax.xlane.f32.xlu0 %v1690_v29  ;;  %v9710_v15 = vpop.f32.mrb[66].mxu1 }
 0x929   :  { %v7430_v56 = vpop.f32.mrb[67].mxu1 }
 0x92e   :  { %v9712_v2 = vpop.f32.mrb[68].mxu1 }
 0x92f   :  { %v7433_v47 = vpop.f32.mrb[69].mxu1 }
 0x930   :  { %v9714_v32 = vpop.f32.mrb[70].mxu1 }
 0x931   :  { %v7434_v14 = vpop.f32.mrb[71].mxu1 }
 0x935   :  { %v9716_v0 = vpop.f32.mrb[52].mxu0 }
 0x936   :  { %v7411_v34 = vpop.f32.mrb[53].mxu0 }
 0x937   :  { %v9718_v51 = vpop.f32.mrb[54].mxu0 }
 0x938   :  { %v7412_v17 = vpop.f32.mrb[55].mxu0 }
 0x939   :  { %v1693_v17 = vsel %vm759_vm4, %v9710_v15, -inf }
 0x93d   :  { %v9722_v45 = vpop.f32.mrb[56].mxu0 }
 0x93e   :  { %v7415_v43 = vpop.f32.mrb[57].mxu0 }
 0x93f   :  { %v9724_v36 = vpop.f32.mrb[58].mxu0  ;;  %v1699_v43 = vsel %vm759_vm4, %v9714_v32, -inf }
 0x940   :  { %v7416_v8 = vpop.f32.mrb[59].mxu0 }
 0x945   :  { %v1661_v29 = vpop.f32.mrb[60].mxu0 }
 0x946   :  { %v7443_v56 = vpop.f32.mrb[61].mxu0  ;;  %v1702_v47 = vsel %vm759_vm4, %v1661_v29, -inf }
 0x947   :  { %v1664_v14 = vpop.f32.mrb[62].mxu0  ;;  %1703 = vmax.xlane.f32.xlu0 %v1702_v47  ;;  %v1696_v56 = vsel %vm759_vm4, %v9712_v2, -inf }
 0x948   :  { %v7444_v34 = vpop.f32.mrb[63].mxu0  ;;  %v1705_v26 = vsel %vm759_vm4, %v1664_v14, -inf }
 0x949   :  { %1706 = vmax.xlane.f32.xlu1 %v1705_v26 }
 0x94b   :  { %1694 = vmax.xlane.f32.xlu0 %v1693_v17 }
 0x94d   :  { %1700 = vmax.xlane.f32.xlu1 %v1699_v43  ;;  %v9734_v31 = vpop.f32.mrb[64].mxu0 }
 0x94e   :  { %v7447_v8 = vpop.f32.mrb[65].mxu0  ;;  %v1708_v17 = vsel %vm759_vm4, %v9734_v31, -inf }
 0x94f   :  { %1697 = vmax.xlane.f32.xlu0 %v1696_v56  ;;  %v9738_v47 = vpop.f32.mrb[66].mxu0 }
 0x950   :  { %v7448_v34 = vpop.f32.mrb[67].mxu0  ;;  %v1711_v26 = vsel %vm759_vm4, %v9738_v47, -inf }
 0x951   :  { %1712 = vmax.xlane.f32.xlu1 %v1711_v26  ;;  %v9756_v26 = vpop.permute.xlu0 %1980 }
 0x953   :  { %1709 = vmax.xlane.f32.xlu0 %v1708_v17 }
 0x955   :  { %v9744_v53 = vpop.f32.mrb[68].mxu0 }
 0x956   :  { %v7451_v43 = vpop.f32.mrb[69].mxu0  ;;  %v1714_v8 = vsel %vm759_vm4, %v9744_v53, -inf }
 0x957   :  { %1715 = vmax.xlane.f32.xlu0 %v1714_v8  ;;  %v9748_v18 = vpop.f32.mrb[70].mxu0 }
 0x958   :  { %v7452_v56 = vpop.f32.mrb[71].mxu0  ;;  %v1717_v34 = vsel %vm759_vm4, %v9748_v18, -inf }
 0x962   :  { %2065 = vrot.lane.b32.xlu1 %v9168_v7, %s12222_s29 }
 0x96d   :  { %1982 = vrot.lane.b32.xlu0 %v9170_v35, %s12222_s29 }
 0x986   :  { %1718 = vmax.xlane.f32.xlu1 %v1717_v34 }
 0x997   :  { %v1686_v17 = vpop.xlane.xlu0 %1685 }
 0x998   :  { %v1720_v43 = vsub.f32 %v9698_v41, %v1686_v17 }
 0x999   :  { %v1689_v39 = vpop.xlane.xlu1 %1688 }
 0x99a   :  { %v1732_v8 = vmul.f32 1.442695, %v1720_v43  ;;  %v1721_v1 = vsub.f32 %v9702_v3, %v1689_v39 }
 0x99c   :  { %8349 = vpow2.f32 %v1732_v8  ;;  %v1734_v56 = vmul.f32 1.442695, %v1721_v1 }
 0x99e   :  { %8351 = vpow2.f32 %v1734_v56 }
 0x9a6   :  { %v9760_v12 = vpop.eup %8349 }
 0x9a7   :  { %v1756_v55 = vsel %vm759_vm4, %v9760_v12, 0.0 }
 0x9a8   :  { %v9764_v54 = vpop.eup %8351  ;;  %1757 = vadd.xlane.f32.xlu0 %v1756_v55 }
 0x9a9   :  { %v1759_v34 = vsel %vm759_vm4, %v9764_v54, 0.0 }
 0x9aa   :  { %1760 = vadd.xlane.f32.xlu1 %v1759_v34 }
 0x9b5   :  { %v1692_v41 = vpop.xlane.xlu0 %1691 }
 0x9b6   :  { %v1722_v17 = vsub.f32 %v9706_v6, %v1692_v41 }
 0x9b8   :  { %v1736_v43 = vmul.f32 1.442695, %v1722_v17 }
 0x9ba   :  { %8353 = vpow2.f32 %v1736_v43 }
 0x9c4   :  { %v9769_v39 = vpop.eup %8353 }
 0x9c5   :  { %v1762_v1 = vsel %vm759_vm4, %v9769_v39, 0.0 }
 0x9c6   :  { %1763 = vadd.xlane.f32.xlu0 %v1762_v1 }
 0x9d4   :  { %v1704_v3 = vpop.xlane.xlu0 %1703 }
 0x9d5   :  { %v1726_v8 = vsub.f32 %v1661_v29, %v1704_v3 }
 0x9d6   :  { %v1707_v56 = vpop.xlane.xlu1 %1706 }
 0x9d7   :  { %v1744_v50 = vmul.f32 1.442695, %v1726_v8  ;;  %v1727_v55 = vsub.f32 %v1664_v14, %v1707_v56 }
 0x9d8   :  { %v1695_v49 = vpop.xlane.xlu0 %1694 }
 0x9d9   :  { %8355 = vpow2.f32 %v1744_v50  ;;  %v1723_v34 = vsub.f32 %v9710_v15, %v1695_v49  ;;  %v1746_v38 = vmul.f32 1.442695, %v1727_v55 }
 0x9da   :  { %v1701_v6 = vpop.xlane.xlu1 %1700 }
 0x9db   :  { %v1738_v40 = vmul.f32 1.442695, %v1723_v34  ;;  %v1725_v43 = vsub.f32 %v9714_v32, %v1701_v6 }
 0x9dc   :  { %v1698_v41 = vpop.xlane.xlu0 %1697 }
 0x9dd   :  { %8357 = vpow2.f32 %v1738_v40  ;;  %v1724_v17 = vsub.f32 %v9712_v2, %v1698_v41  ;;  %v1742_v14 = vmul.f32 1.442695, %v1725_v43 }
 0x9de   :  { %8359 = vpow2.f32 %v1746_v38  ;;  %v1713_v34 = vpop.xlane.xlu1 %1712 }
 0x9df   :  { %v1740_v1 = vmul.f32 1.442695, %v1724_v17  ;;  %v1729_v43 = vsub.f32 %v9738_v47, %v1713_v34 }
 0x9e0   :  { %v1710_v33 = vpop.xlane.xlu0 %1709 }
 0x9e1   :  { %v1728_v29 = vsub.f32 %v9734_v31, %v1710_v33  ;;  %8361 = vpow2.f32 %v1740_v1 }
 0x9e2   :  { %v9806_v17 = vpop.permute.xlu1 %2065 }
 0x9e3   :  { %v9777_v3 = vpop.eup %8355  ;;  %v1748_v50 = vmul.f32 1.442695, %v1728_v29 }
 0x9e4   :  { %v1774_v49 = vsel %vm759_vm4, %v9777_v3, 0.0  ;;  %v1716_v6 = vpop.xlane.xlu0 %1715 }
 0x9e5   :  { %8363 = vpow2.f32 %v1748_v50  ;;  %1775 = vadd.xlane.f32.xlu1 %v1774_v49  ;;  %v1730_v41 = vsub.f32 %v9744_v53, %v1716_v6 }
 0x9e6   :  { %8365 = vpow2.f32 %v1742_v14  ;;  %v1750_v14 = vmul.f32 1.442695, %v1729_v43 }
 0x9e7   :  { %v9781_v40 = vpop.eup %8357  ;;  %v1752_v1 = vmul.f32 1.442695, %v1730_v41 }
 0x9e8   :  { %v1765_v38 = vsel %vm759_vm4, %v9781_v40, 0.0  ;;  %v9785_v15 = vpop.eup %8359 }
 0x9e9   :  { %1766 = vadd.xlane.f32.xlu1 %v1765_v38  ;;  %v1777_v33 = vsel %vm759_vm4, %v9785_v15, 0.0  ;;  %8367 = vpow2.f32 %v1752_v1 }
 0x9ea   :  { %8369 = vpow2.f32 %v1750_v14  ;;  %v1994_v14 = vsel %vm599_vm3, %v9663_v44, 0 }
 0x9eb   :  { %v9789_v2 = vpop.eup %8361 }
 0x9ec   :  { %v1768_v31 = vsel %vm759_vm4, %v9789_v2, 0.0 }
 0x9ed   :  { %1778 = vadd.xlane.f32.xlu1 %v1777_v33 }
 0x9ef   :  { %v9791_v32 = vpop.eup %8363 }
 0x9f0   :  { %v1780_v8 = vsel %vm759_vm4, %v9791_v32, 0.0  ;;  %v9797_v56 = vpop.eup %8365 }
 0x9f1   :  { %1769 = vadd.xlane.f32.xlu1 %v1768_v31  ;;  %1781 = vadd.xlane.f32.xlu0 %v1780_v8  ;;  %v1771_v55 = vsel %vm759_vm4, %v9797_v56, 0.0  ;;  %v1983_v8 = vpop.permute.xlu0 %1982 }
 0x9f3   :  { %v9810_v38 = vpop.eup %8367 }
 0x9f4   :  { %v1786_v33 = vsel %vm759_vm4, %v9810_v38, 0.0  ;;  %v9814_v31 = vpop.eup %8369 }
 0x9f5   :  { %1772 = vadd.xlane.f32.xlu1 %v1771_v55  ;;  %v1783_v53 = vsel %vm759_vm4, %v9814_v31, 0.0 }
 0xa06   :  { %2067 = vrot.lane.b32.xlu1 %v9182_v48, %s12222_s29 }
 0xa07   :  { %1972 = vrot.lane.b32.xlu0 %v9162_v23, %s12220_s2 }
 0xa13   :  { %v1719_v29 = vpop.xlane.xlu1 %1718 }
 0xa14   :  { %v1731_v50 = vsub.f32 %v9748_v18, %v1719_v29 }
 0xa16   :  { %v1754_v49 = vmul.f32 1.442695, %v1731_v50  ;;  %v12254_v50 = vmov 0.0  }
 0xa18   :  { %8371 = vpow2.f32 %v1754_v49 }
 0xa22   :  { %v9818_v47 = vpop.eup %8371 }
 0xa23   :  { %v1789_v18 = vsel %vm759_vm4, %v9818_v47, 0.0 }
 0xa26   :  { %1787 = vadd.xlane.f32.xlu0 %v1786_v33 }
 0xa2a   :  { %1784 = vadd.xlane.f32.xlu1 %v1783_v53 }
 0xa2e   :  { %1790 = vadd.xlane.f32.xlu1 %v1789_v18 }
 0xa35   :  { %v1758_v55 = vpop.xlane.xlu0 %1757 }
 0xa36   :  { %8373 = vrcp.f32 %v1758_v55 }
 0xa37   :  { %v1761_v34 = vpop.xlane.xlu1 %1760 }
 0xa38   :  { %8375 = vrcp.f32 %v1761_v34 }
 0xa3c   :  { %1974 = vrot.lane.b32.xlu0 %v9160_v22, %s12220_s2 }
 0xa3f   :  { %2069 = vrot.lane.b32.xlu1 %v9180_v25, %s12222_s29 }
 0xa40   :  { %v8374_v6 = vpop.eup %8373  ;;  %2059 = vrot.lane.b32.xlu0 %v9168_v7, %s12220_s2 }
 0xa41   :  { %v1804_v43 = vmul.f32 %v8374_v6, %v9760_v12  ;;  %v2000_v12 = vsel %vm599_vm3, %v1983_v8, 0 }
 0xa42   :  { %v8376_v41 = vpop.eup %8375 }
 0xa43   :  { %v1805_v1 = vmul.f32 %v8376_v41, %v9764_v54  ;;  %1976 = vrot.lane.b32.xlu1 %v9170_v35, %s12220_s2  ;;  %v1997_v54 = vsel %vm599_vm3, %v9756_v26, 0 }
 0xa44   :  { %2061 = vrot.lane.b32.xlu0 %v9182_v48, %s12220_s2 }
 0xa45   :  { %v1816_v29 = vpack.c.bf16 %v1805_v1, %v1804_v43 }
 0xa47   :  { %2063 = vrot.lane.b32.xlu1 %v9180_v25, %s12220_s2  ;;  %7460 = vmatmul.mubr.msk.bf16.vlgmr.msra.gmra.mrb[72].mxu1 %vm759_vm4, %v1816_v29 }
 0xa48   :  { %7490 = vmatpush3.bf16.xpose.msra.mxu1 %v1994_v14  ;;  %7463 = vmatprep.mubr.msk.bf16.mxu1 %vm8807_vm2, %v12254_v50 }
 0xa49   :  { %7491 = vmatprep.subr.bf16.mxu1 %v12254_v50 }
 0xa50   :  { %7492 = vmatpush3.bf16.xpose.msra.mxu1 %v1997_v54 }
 0xa51   :  { %7493 = vmatprep.subr.bf16.mxu1 %v12254_v50 }
 0xa53   :  { %v1764_v44 = vpop.xlane.xlu0 %1763 }
 0xa54   :  { %8377 = vrcp.f32 %v1764_v44 }
 0xa58   :  { %7494 = vmatpush3.bf16.xpose.msra.mxu1 %v2000_v12  ;;  %v2081_v12 = vsel %vm599_vm3, %v9806_v17, 0 }
 0xa59   :  { %7985 = vmatprep.subr.bf16.mxu1 %v12254_v50 }
 0xa5e   :  { %v8378_v55 = vpop.eup %8377 }
 0xa5f   :  { %v1806_v6 = vmul.f32 %v8378_v55, %v9769_v39 }
 0xa72   :  { %v1776_v49 = vpop.xlane.xlu1 %1775 }
 0xa76   :  { %v1767_v33 = vpop.xlane.xlu1 %1766 }
 0xa77   :  { %8379 = vrcp.f32 %v1767_v33 }
 0xa78   :  { %8381 = vrcp.f32 %v1776_v49 }
 0xa7a   :  { %v1779_v53 = vpop.xlane.xlu1 %1778 }
 0xa7b   :  { %8383 = vrcp.f32 %v1779_v53 }
 0xa7e   :  { %v1770_v18 = vpop.xlane.xlu1 %1769  ;;  %v1782_v17 = vpop.xlane.xlu0 %1781 }
 0xa7f   :  { %8385 = vrcp.f32 %v1770_v18 }
 0xa81   :  { %v8380_v34 = vpop.eup %8379 }
 0xa82   :  { %v1773_v26 = vpop.xlane.xlu1 %1772  ;;  %v1807_v8 = vmul.f32 %v8380_v34, %v9781_v40  ;;  %v8382_v41 = vpop.eup %8381 }
 0xa83   :  { %8387 = vrcp.f32 %v1773_v26  ;;  %v1810_v29 = vmul.f32 %v8382_v41, %v9777_v3  ;;  %v1973_v53 = vpop.permute.xlu0 %1972 }
 0xa84   :  { %v1817_v43 = vpack.c.bf16 %v1807_v8, %v1806_v6  ;;  %8389 = vrcp.f32 %v1782_v17 }
 0xa85   :  { %v8384_v1 = vpop.eup %8383 }
 0xa86   :  { %v1811_v14 = vmul.f32 %v8384_v1, %v9785_v15  ;;  %7464 = vmatmul.mubr.msk.bf16.gmra.mrb[76].mxu1 %vm759_vm4, %v1817_v43  ;;  %v2068_v44 = vpop.permute.xlu1 %2067 }
 0xa87   :  { %7467 = vmatprep.mubr.msk.bf16.mxu1 %vm8807_vm2, %v12254_v50  ;;  %v2084_v33 = vsel %vm599_vm3, %v2068_v44, 0 }
 0xa88   :  { %v1819_v54 = vpack.c.bf16 %v1811_v14, %v1810_v29 }
 0xa89   :  { %v8386_v39 = vpop.eup %8385 }
 0xa8a   :  { %7478 = vmatmul.mubr.msk.bf16.vlgmr.msra.gmra.mrb[72].mxu0 %vm759_vm4, %v1819_v54  ;;  %v1808_v40 = vmul.f32 %v8386_v39, %v9789_v2 }
 0xa8b   :  { %7508 = vmatpush3.bf16.xpose.msra.mxu0 %v2081_v12  ;;  %7481 = vmatprep.mubr.msk.bf16.mxu0 %vm8807_vm2, %v12254_v50 }
 0xa8c   :  { %7509 = vmatprep.subr.bf16.mxu0 %v12254_v50 }
 0xa8d   :  { %v8388_v3 = vpop.eup %8387 }
 0xa8e   :  { %v1809_v15 = vmul.f32 %v8388_v3, %v9797_v56  ;;  %v8390_v26 = vpop.eup %8389 }
 0xa8f   :  { %v1812_v43 = vmul.f32 %v8390_v26, %v9791_v32 }
 0xa90   :  { %v1818_v49 = vpack.c.bf16 %v1809_v15, %v1808_v40 }
 0xa92   :  { %7468 = vmatmul.mubr.msk.bf16.gmra.mrb[80].mxu1 %vm759_vm4, %v1818_v49 }
 0xa93   :  { %7510 = vmatpush3.bf16.xpose.msra.mxu0 %v2084_v33  ;;  %7495 = vmatprep.mubr.msk.bf16.mxu1 %vm8807_vm2, %v12254_v50 }
 0xa94   :  { %7511 = vmatprep.subr.bf16.mxu0 %v12254_v50 }
 0xa9a   :  { %7496 = vmatmul.mubr.msk.bf16.vlgmr.msra.gmra.mrb[84].mxu1 %vm599_vm3, %v1973_v53 }
 0xa9b   :  { %7499 = vmatprep.mubr.msk.bf16.mxu1 %vm8807_vm2, %v12254_v50 }
 0xab3   :  { %v1788_v2 = vpop.xlane.xlu0 %1787 }
 0xab7   :  { %v1785_v56 = vpop.xlane.xlu1 %1784  ;;  %v1975_v18 = vpop.permute.xlu0 %1974 }
 0xab8   :  { %8391 = vrcp.f32 %v1785_v56  ;;  %7500 = vmatmul.mubr.msk.bf16.gmra.mrb[88].mxu1 %vm599_vm3, %v1975_v18 }
 0xab9   :  { %7503 = vmatprep.mubr.msk.bf16.mxu1 %vm8807_vm2, %v12254_v50 }
 0xabb   :  { %v1791_v55 = vpop.xlane.xlu1 %1790 }
 0xabc   :  { %8393 = vrcp.f32 %v1791_v55 }
 0xabd   :  { %8395 = vrcp.f32 %v1788_v2 }
 0xabf   :  { %v2070_v34 = vpop.permute.xlu1 %2069 }
 0xac0   :  { %v2087_v6 = vsel %vm599_vm3, %v2070_v34, 0 }
 0xac1   :  { %7512 = vmatpush3.bf16.xpose.msra.mxu0 %v2087_v6 }
 0xac2   :  { %v8392_v8 = vpop.eup %8391  ;;  %7525 = vmatprep.subr.bf16.mxu0 %v12254_v50 }
 0xac3   :  { %v1977_v41 = vpop.permute.xlu1 %1976  ;;  %v1813_v1 = vmul.f32 %v8392_v8, %v9814_v31  ;;  %v2060_v31 = vpop.permute.xlu0 %2059 }
 0xac4   :  { %7504 = vmatmul.mubr.msk.bf16.gmra.mrb[92].mxu1 %vm599_vm3, %v1977_v41 }
 0xac5   :  { %v1820_v29 = vpack.c.bf16 %v1813_v1, %v1812_v43  ;;  %7539 = vmatprep.mubr.msk.bf16.mxu1 %vm8807_vm2, %v12254_v50 }
 0xac6   :  { %v8394_v14 = vpop.eup %8393 }
 0xac7   :  { %7482 = vmatmul.mubr.msk.bf16.gmra.mrb[76].mxu0 %vm759_vm4, %v1820_v29  ;;  %v8396_v54 = vpop.eup %8395  ;;  %v1815_v12 = vmul.f32 %v8394_v14, %v9818_v47  ;;  %v2062_v3 = vpop.permute.xlu0 %2061 }
 0xac8   :  { %7485 = vmatprep.mubr.msk.bf16.mxu0 %vm8807_vm2, %v12254_v50  ;;  %v1814_v39 = vmul.f32 %v8396_v54, %v9810_v38  ;;  %v2064_v47 = vpop.permute.xlu1 %2063 }
 0xaca   :  { %v1821_v32 = vpack.c.bf16 %v1815_v12, %v1814_v39 }
 0xacf   :  { %7486 = vmatmul.mubr.msk.bf16.gmra.mrb[80].mxu0 %vm759_vm4, %v1821_v32 }
 0xad0   :  { %7513 = vmatprep.mubr.msk.bf16.mxu0 %vm8807_vm2, %v12254_v50 }
 0xad7   :  { %7514 = vmatmul.mubr.msk.bf16.vlgmr.msra.gmra.mrb[84].mxu0 %vm599_vm3, %v2060_v31 }
 0xad8   :  { %7517 = vmatprep.mubr.msk.bf16.mxu0 %vm8807_vm2, %v12254_v50 }
 0xadf   :  { %7518 = vmatmul.mubr.msk.bf16.gmra.mrb[88].mxu0 %vm599_vm3, %v2062_v3 }
 0xae0   :  { %7521 = vmatprep.mubr.msk.bf16.mxu0 %vm8807_vm2, %v12254_v50 }
 0xae7   :  { %7522 = vmatmul.mubr.msk.bf16.gmra.mrb[92].mxu0 %vm599_vm3, %v2064_v47 }
 0xae8   :  { %7531 = vmatprep.mubr.msk.bf16.mxu0 %vm8807_vm2, %v12254_v50 }
 0xb1a   :  { %v9897_v38 = vpop.f32.mrb[72].mxu1 }
 0xb1b   :  { %v7461_v40 = vpop.f32.mrb[73].mxu1 }
 0xb1c   :  { %v9899_v15 = vpop.f32.mrb[74].mxu1 }
 0xb1d   :  { %v7462_v49 = vpop.f32.mrb[75].mxu1 }
 0xb59   :  { %v9903_v33 = vpop.f32.mrb[76].mxu1 }
 0xb5a   :  { %v7465_v17 = vpop.f32.mrb[77].mxu1 }
 0xb5b   :  { %v9905_v53 = vpop.f32.mrb[78].mxu1 }
 0xb5c   :  { %v7466_v56 = vpop.f32.mrb[79].mxu1 }
 0xb5d   :  { %v9909_v18 = vpop.f32.mrb[72].mxu0 }
 0xb5e   :  { %v7479_v55 = vpop.f32.mrb[73].mxu0 }
 0xb5f   :  { %v9911_v34 = vpop.f32.mrb[74].mxu0 }
 0xb60   :  { %v7480_v6 = vpop.f32.mrb[75].mxu0 }
 0xb65   :  { %v9915_v8 = vpop.f32.mrb[80].mxu1 }
 0xb66   :  { %v7469_v41 = vpop.f32.mrb[81].mxu1 }
 0xb67   :  { %v9917_v43 = vpop.f32.mrb[82].mxu1 }
 0xb68   :  { %v7470_v29 = vpop.f32.mrb[83].mxu1 }
 0xb6d   :  { %v9921_v14 = vpop.f32.mrb[84].mxu1 }
 0xb6e   :  { %v7497_v54 = vpop.f32.mrb[85].mxu1  ;;  %v2146_v12 = vsel %vm759_vm4, %v9921_v14, -inf }
 0xb6f   :  { %2147 = vmax.xlane.f32.xlu0 %v2146_v12  ;;  %v2039_v39 = vpop.f32.mrb[86].mxu1 }
 0xb70   :  { %v7498_v32 = vpop.f32.mrb[87].mxu1  ;;  %v2149_v31 = vsel %vm759_vm4, %v2039_v39, -inf }
 0xb71   :  { %2150 = vmax.xlane.f32.xlu1 %v2149_v31 }
 0xb82   :  { %2286 = vrot.lane.b32.xlu1 %v9160_v22, %s12212_s0 }
 0xb8b   :  { %v9928_v3 = vpop.f32.mrb[88].mxu1 }
 0xb8c   :  { %v7501_v47 = vpop.f32.mrb[89].mxu1  ;;  %v2152_v40 = vsel %vm759_vm4, %v9928_v3, -inf }
 0xb8d   :  { %2153 = vmax.xlane.f32.xlu0 %v2152_v40  ;;  %v9932_v49 = vpop.f32.mrb[90].mxu1 }
 0xb8e   :  { %v7502_v17 = vpop.f32.mrb[91].mxu1 }
 0xb97   :  { %v9934_v56 = vpop.f32.mrb[92].mxu1 }
 0xb98   :  { %v7505_v55 = vpop.f32.mrb[93].mxu1 }
 0xb99   :  { %v9936_v6 = vpop.f32.mrb[94].mxu1 }
 0xb9a   :  { %v9938_v41 = vpop.f32.mrb[76].mxu0  ;;  %v7506_v29 = vpop.f32.mrb[95].mxu1 }
 0xb9b   :  { %v7483_v54 = vpop.f32.mrb[77].mxu0 }
 0xb9c   :  { %v9940_v22 = vpop.f32.mrb[78].mxu0 }
 0xb9d   :  { %v7484_v32 = vpop.f32.mrb[79].mxu0 }
 0xb9e   :  { %v2155_v32 = vsel %vm759_vm4, %v9932_v49, -inf }
 0xba2   :  { %v9944_v31 = vpop.f32.mrb[80].mxu0 }
 0xba3   :  { %v7487_v47 = vpop.f32.mrb[81].mxu0 }
 0xba4   :  { %v9946_v40 = vpop.f32.mrb[82].mxu0  ;;  %v2161_v47 = vsel %vm759_vm4, %v9936_v6, -inf }
 0xba5   :  { %v7488_v55 = vpop.f32.mrb[83].mxu0 }
 0xbaa   :  { %v2123_v26 = vpop.f32.mrb[84].mxu0 }
 0xbab   :  { %v7515_v1 = vpop.f32.mrb[85].mxu0  ;;  %v2164_v29 = vsel %vm759_vm4, %v2123_v26, -inf }
 0xbac   :  { %2165 = vmax.xlane.f32.xlu0 %v2164_v29  ;;  %v2126_v54 = vpop.f32.mrb[86].mxu0 }
 0xbad   :  { %v7516_v44 = vpop.f32.mrb[87].mxu0  ;;  %v2167_v2 = vsel %vm759_vm4, %v2126_v54, -inf }
 0xbae   :  { %2168 = vmax.xlane.f32.xlu1 %v2167_v2 }
 0xbb0   :  { %2156 = vmax.xlane.f32.xlu0 %v2155_v32 }
 0xbb2   :  { %2162 = vmax.xlane.f32.xlu1 %v2161_v47  ;;  %v9956_v12 = vpop.f32.mrb[88].mxu0 }
 0xbb3   :  { %v7519_v55 = vpop.f32.mrb[89].mxu0  ;;  %v2170_v47 = vsel %vm759_vm4, %v9956_v12, -inf }
 0xbb4   :  { %v9958_v1 = vpop.f32.mrb[90].mxu0 }
 0xbb5   :  { %v7520_v17 = vpop.f32.mrb[91].mxu0  ;;  %v2173_v44 = vsel %vm759_vm4, %v9958_v1, -inf }
 0xbb6   :  { %2174 = vmax.xlane.f32.xlu1 %v2173_v44  ;;  %v2158_v17 = vsel %vm759_vm4, %v9934_v56, -inf }
 0xbba   :  { %v9962_v29 = vpop.f32.mrb[92].mxu0 }
 0xbbb   :  { %v7523_v2 = vpop.f32.mrb[93].mxu0  ;;  %v2176_v55 = vsel %vm759_vm4, %v9962_v29, -inf }
 0xbbc   :  { %v9964_v37 = vpop.f32.mrb[94].mxu0 }
 0xbbd   :  { %v7524_v32 = vpop.f32.mrb[95].mxu0  ;;  %v2179_v21 = vsel %vm759_vm4, %v9964_v37, -inf }
 0xbbe   :  { %2180 = vmax.xlane.f32.xlu1 %v2179_v21 }
 0xbc6   :  { %2284 = vrot.lane.b32.xlu0 %v9162_v23, %s12212_s0 }
 0xbcf   :  { %2359 = vrot.lane.b32.xlu1 %v9168_v7, %s12212_s0 }
 0xbe5   :  { %2159 = vmax.xlane.f32.xlu0 %v2158_v17 }
 0xbe9   :  { %2171 = vmax.xlane.f32.xlu0 %v2170_v47 }
 0xbed   :  { %2177 = vmax.xlane.f32.xlu0 %v2176_v55 }
 0xbfc   :  { %v2148_v23 = vpop.xlane.xlu0 %2147 }
 0xbfd   :  { %v2182_v7 = vsub.f32 %v9921_v14, %v2148_v23 }
 0xbfe   :  { %v2151_v44 = vpop.xlane.xlu1 %2150 }
 0xbff   :  { %v2183_v21 = vsub.f32 %v2039_v39, %v2151_v44  ;;  %v2194_v47 = vmul.f32 1.442695, %v2182_v7 }
 0xc01   :  { %v2196_v2 = vmul.f32 1.442695, %v2183_v21 }
 0xc03   :  { %8397 = vpow2.f32 %v2196_v2  ;;  %2288 = vrot.lane.b32.xlu0 %v9170_v35, %s12212_s0  ;;  %v2287_v2 = vpop.permute.xlu1 %2286 }
 0xc04   :  { %8399 = vpow2.f32 %v2194_v47 }
 0xc0d   :  { %v9981_v32 = vpop.eup %8397 }
 0xc0e   :  { %v2221_v17 = vsel %vm759_vm4, %v9981_v32, 0.0  ;;  %v9986_v44 = vpop.eup %8399 }
 0xc0f   :  { %2222 = vadd.xlane.f32.xlu1 %v2221_v17  ;;  %v2218_v35 = vsel %vm759_vm4, %v9986_v44, 0.0 }
 0xc1a   :  { %v2154_v24 = vpop.xlane.xlu0 %2153 }
 0xc1b   :  { %v2184_v55 = vsub.f32 %v9928_v3, %v2154_v24 }
 0xc1d   :  { %v2198_v39 = vmul.f32 1.442695, %v2184_v55 }
 0xc1f   :  { %8401 = vpow2.f32 %v2198_v39 }
 0xc22   :  { %2219 = vadd.xlane.f32.xlu0 %v2218_v35 }
 0xc29   :  { %v9990_v14 = vpop.eup %8401 }
 0xc2a   :  { %v2224_v21 = vsel %vm759_vm4, %v9990_v14, 0.0 }
 0xc2b   :  { %2225 = vadd.xlane.f32.xlu0 %v2224_v21 }
 0xc39   :  { %v2166_v23 = vpop.xlane.xlu0 %2165 }
 0xc3a   :  { %v2188_v7 = vsub.f32 %v2123_v26, %v2166_v23 }
 0xc3b   :  { %v2169_v17 = vpop.xlane.xlu1 %2168 }
 0xc3c   :  { %v2206_v47 = vmul.f32 1.442695, %v2188_v7  ;;  %v2189_v24 = vsub.f32 %v2126_v54, %v2169_v17 }
 0xc3d   :  { %v2157_v3 = vpop.xlane.xlu0 %2156 }
 0xc3e   :  { %8403 = vpow2.f32 %v2206_v47  ;;  %v2185_v55 = vsub.f32 %v9932_v49, %v2157_v3  ;;  %v2208_v39 = vmul.f32 1.442695, %v2189_v24 }
 0xc3f   :  { %v2163_v21 = vpop.xlane.xlu1 %2162 }
 0xc40   :  { %v2200_v19 = vmul.f32 1.442695, %v2185_v55  ;;  %v2187_v47 = vsub.f32 %v9936_v6, %v2163_v21 }
 0xc41   :  { %v2285_v16 = vpop.permute.xlu0 %2284 }
 0xc42   :  { %8405 = vpow2.f32 %v2200_v19  ;;  %7526 = vmatpush3.bf16.msra.mxu0 %v2285_v16  ;;  %7988 = vmatpush3.bf16.msra.mxu1 %v2285_v16 }
 0xc43   :  { %7527 = vmatprep.subr.bf16.mxu0 %v12254_v50  ;;  %7986 = vmatprep.subr.bf16.mxu1 %v12254_v50  ;;  %8407 = vpow2.f32 %v2208_v39 }
 0xc46   :  { %7528 = vmatpush3.bf16.msra.mxu0 %v2287_v2  ;;  %7989 = vmatpush3.bf16.msra.mxu1 %v2287_v2  ;;  %v2175_v2 = vpop.xlane.xlu1 %2174 }
 0xc47   :  { %7529 = vmatprep.subr.bf16.mxu0 %v12254_v50  ;;  %7987 = vmatprep.subr.bf16.mxu1 %v12254_v50  ;;  %v2191_v23 = vsub.f32 %v9958_v1, %v2175_v2 }
 0xc48   :  { %v9999_v26 = vpop.eup %8403 }
 0xc49   :  { %v2236_v49 = vsel %vm759_vm4, %v9999_v26, 0.0  ;;  %v2212_v24 = vmul.f32 1.442695, %v2191_v23 }
 0xc4a   :  { %2237 = vadd.xlane.f32.xlu0 %v2236_v49 }
 0xc4b   :  { %v2181_v55 = vpop.xlane.xlu1 %2180 }
 0xc4c   :  { %v10003_v19 = vpop.eup %8405 }
 0xc4d   :  { %v2227_v16 = vsel %vm759_vm4, %v10003_v19, 0.0  ;;  %v10007_v54 = vpop.eup %8407 }
 0xc4e   :  { %2228 = vadd.xlane.f32.xlu1 %v2227_v16  ;;  %v2239_v35 = vsel %vm759_vm4, %v10007_v54, 0.0  ;;  %v2204_v16 = vmul.f32 1.442695, %v2187_v47 }
 0xc52   :  { %2240 = vadd.xlane.f32.xlu1 %v2239_v35  ;;  %v2193_v35 = vsub.f32 %v9964_v37, %v2181_v55  ;;  %v12255_v55 = vpack.i.bf16 %v9682_v27, %v9680_v13  ;;  %v12259_v13 = vpack.i.bf16 %v9688_v46, %v9686_v58 }
 0xc72   :  { %v2160_v7 = vpop.xlane.xlu0 %2159 }
 0xc73   :  { %v2186_v17 = vsub.f32 %v9934_v56, %v2160_v7  ;;  %v2216_v56 = vmul.f32 1.442695, %v2193_v35 }
 0xc75   :  { %v2202_v3 = vmul.f32 1.442695, %v2186_v17 }
 0xc76   :  { %v2172_v39 = vpop.xlane.xlu0 %2171 }
 0xc77   :  { %8409 = vpow2.f32 %v2202_v3  ;;  %v2190_v49 = vsub.f32 %v9956_v12, %v2172_v39  ;;  %v12256_v39 = vpack.i.bf16 %v9676_v59, %v9674_v52  ;;  %v12260_v52 = vpack.i.bf16 %v9694_v60, %v9692_v9 }
 0xc78   :  { %8411 = vpow2.f32 %v2212_v24 }
 0xc79   :  { %v2210_v5 = vmul.f32 1.442695, %v2190_v49  ;;  %v2360_v49 = vpop.permute.xlu1 %2359 }
 0xc7a   :  { %v2178_v42 = vpop.xlane.xlu0 %2177 }
 0xc7b   :  { %8413 = vpow2.f32 %v2210_v5  ;;  %v2192_v1 = vsub.f32 %v9962_v29, %v2178_v42 }
 0xc7c   :  { %8415 = vpow2.f32 %v2204_v16 }
 0xc7d   :  { %v2214_v2 = vmul.f32 1.442695, %v2192_v1 }
 0xc7e   :  { %v2289_v6 = vpop.permute.xlu0 %2288 }
 0xc7f   :  { %8417 = vpow2.f32 %v2214_v2  ;;  %7530 = vmatpush3.bf16.msra.mxu0 %v2289_v6  ;;  %7990 = vmatpush3.bf16.msra.mxu1 %v2289_v6 }
 0xc80   :  { %7543 = vmatprep.subr.bf16.mxu0 %v12254_v50  ;;  %8419 = vpow2.f32 %v2216_v56 }
 0xc81   :  { %v10018_v21 = vpop.eup %8409 }
 0xc82   :  { %v2230_v37 = vsel %vm759_vm4, %v10018_v21, 0.0  ;;  %v10022_v12 = vpop.eup %8411 }
 0xc83   :  { %2231 = vadd.xlane.f32.xlu1 %v2230_v37  ;;  %v2245_v42 = vsel %vm759_vm4, %v10022_v12, 0.0 }
 0xc85   :  { %v10024_v5 = vpop.eup %8413 }
 0xc86   :  { %v2242_v29 = vsel %vm759_vm4, %v10024_v5, 0.0  ;;  %v10030_v23 = vpop.eup %8415 }
 0xc87   :  { %2246 = vadd.xlane.f32.xlu1 %v2245_v42  ;;  %2243 = vadd.xlane.f32.xlu0 %v2242_v29  ;;  %v2233_v17 = vsel %vm759_vm4, %v10030_v23, 0.0 }
 0xc89   :  { %v10032_v7 = vpop.eup %8417 }
 0xc8a   :  { %v2248_v47 = vsel %vm759_vm4, %v10032_v7, 0.0  ;;  %v10038_v24 = vpop.eup %8419 }
 0xc8b   :  { %2234 = vadd.xlane.f32.xlu0 %v2233_v17  ;;  %2249 = vadd.xlane.f32.xlu1 %v2248_v47  ;;  %v2251_v3 = vsel %vm759_vm4, %v10038_v24, 0.0 }
 0xc8f   :  { %2252 = vadd.xlane.f32.xlu1 %v2251_v3 }
 0xc9c   :  { %v2223_v16 = vpop.xlane.xlu1 %2222 }
 0xc9d   :  { %8421 = vrcp.f32 %v2223_v16 }
 0xca0   :  { %2363 = vrot.lane.b32.xlu1 %v9180_v25, %s12212_s0  ;;  %v12257_v25 = vpack.i.bf16 %v9905_v53, %v9903_v33 }
 0xca1   :  { %2361 = vrot.lane.b32.xlu0 %v9182_v48, %s12212_s0  ;;  %v12258_v48 = vpack.i.bf16 %v9899_v15, %v9897_v38 }
 0xca4   :  { %8015 = vrot.lane.b32.xlu1 %v12255_v55, %s12218_s30 }
 0xca5   :  { %8010 = vrot.lane.b32.xlu0 %v12256_v39, %s12218_s30 }
 0xca7   :  { %v8422_v27 = vpop.eup %8421 }
 0xca8   :  { %8025 = vrot.lane.b32.xlu1 %v12257_v25, %s12216_s19  ;;  %v2267_v53 = vmul.f32 %v8422_v27, %v9981_v32 }
 0xca9   :  { %8020 = vrot.lane.b32.xlu0 %v12258_v48, %s12216_s19 }
 0xcac   :  { %8035 = vrot.lane.b32.xlu1 %v12259_v13, %s12218_s30 }
 0xcad   :  { %8030 = vrot.lane.b32.xlu0 %v12260_v52, %s12218_s30 }
 0xcaf   :  { %v2220_v59 = vpop.xlane.xlu0 %2219 }
 0xcb0   :  { %8423 = vrcp.f32 %v2220_v59 }
 0xcb8   :  { %v2226_v58 = vpop.xlane.xlu0 %2225 }
 0xcb9   :  { %8425 = vrcp.f32 %v2226_v58 }
 0xcba   :  { %v8424_v33 = vpop.eup %8423 }
 0xcbb   :  { %v2266_v38 = vmul.f32 %v8424_v33, %v9986_v44 }
 0xcbd   :  { %v2278_v15 = vpack.c.bf16 %v2267_v53, %v2266_v38 }
 0xcbf   :  { %7532 = vmatmul.mubr.msk.bf16.vlgmr.msra.gmra.mrb[96].mxu0 %vm759_vm4, %v2278_v15 }
 0xcc0   :  { %7544 = vmatpush3.bf16.msra.mxu0 %v2360_v49  ;;  %7535 = vmatprep.mubr.msk.bf16.mxu0 %vm8807_vm2, %v12254_v50 }
 0xcc1   :  { %7545 = vmatprep.subr.bf16.mxu0 %v12254_v50 }
 0xcc3   :  { %v8426_v9 = vpop.eup %8425 }
 0xcc4   :  { %v2268_v35 = vmul.f32 %v8426_v9, %v9990_v14 }
 0xcd7   :  { %v2238_v56 = vpop.xlane.xlu0 %2237 }
 0xcdb   :  { %v2229_v46 = vpop.xlane.xlu1 %2228 }
 0xcdc   :  { %8427 = vrcp.f32 %v2229_v46  ;;  %v8203_v46 = vld [vmem:[%s12185_s7] sm:$0xff]  }
 0xcdd   :  { %7561 = vmatprep.subr.bf16.mxu1 %v8203_v46 }
 0xcdf   :  { %v2241_v1 = vpop.xlane.xlu1 %2240 }
 0xce0   :  { %8429 = vrcp.f32 %v2241_v1 }
 0xce1   :  { %8431 = vrcp.f32 %v2238_v56 }
 0xce6   :  { %v8428_v60 = vpop.eup %8427 }
 0xce7   :  { %v2269_v32 = vmul.f32 %v8428_v60, %v10003_v19 }
 0xce9   :  { %v2279_v44 = vpack.c.bf16 %v2269_v32, %v2268_v35  ;;  %v8204_v35 = vld [vmem:[%s12185_s7 + $0x8] sm:$0xff]  }
 0xcea   :  { %v8430_v14 = vpop.eup %8429 }
 0xceb   :  { %7536 = vmatmul.mubr.msk.bf16.gmra.mrb[100].mxu0 %vm759_vm4, %v2279_v44  ;;  %v8432_v47 = vpop.eup %8431  ;;  %v2273_v3 = vmul.f32 %v8430_v14, %v10007_v54 }
 0xcec   :  { %7549 = vmatprep.mubr.msk.bf16.mxu0 %vm8807_vm2, %v12254_v50  ;;  %v2272_v55 = vmul.f32 %v8432_v47, %v9999_v26 }
 0xcee   :  { %v2281_v48 = vpack.c.bf16 %v2273_v3, %v2272_v55 }
 0xd10   :  { %v2232_v2 = vpop.xlane.xlu1 %2231 }
 0xd11   :  { %8433 = vrcp.f32 %v2232_v2 }
 0xd14   :  { %v2247_v6 = vpop.xlane.xlu1 %2246  ;;  %v2244_v37 = vpop.xlane.xlu0 %2243 }
 0xd15   :  { %8435 = vrcp.f32 %v2247_v6 }
 0xd16   :  { %8437 = vrcp.f32 %v2244_v37 }
 0xd18   :  { %v2250_v42 = vpop.xlane.xlu1 %2249  ;;  %v2235_v29 = vpop.xlane.xlu0 %2234 }
 0xd19   :  { %8439 = vrcp.f32 %v2235_v29 }
 0xd1b   :  { %v8434_v49 = vpop.eup %8433 }
 0xd1c   :  { %v2253_v19 = vpop.xlane.xlu1 %2252  ;;  %v2362_v17 = vpop.permute.xlu0 %2361  ;;  %v2270_v52 = vmul.f32 %v8434_v49, %v10018_v21 }
 0xd1d   :  { %7546 = vmatpush3.bf16.msra.mxu0 %v2362_v17  ;;  %8441 = vrcp.f32 %v2253_v19 }
 0xd1e   :  { %7547 = vmatprep.subr.bf16.mxu0 %v12254_v50  ;;  %8443 = vrcp.f32 %v2250_v42 }
 0xd1f   :  { %v8436_v25 = vpop.eup %8435 }
 0xd20   :  { %v2364_v39 = vpop.permute.xlu1 %2363  ;;  %v8438_v16 = vpop.eup %8437  ;;  %v2275_v54 = vmul.f32 %v8436_v25, %v10022_v12 }
 0xd21   :  { %7548 = vmatpush3.bf16.msra.mxu0 %v2364_v39  ;;  %v2274_v26 = vmul.f32 %v8438_v16, %v10024_v5  ;;  %v12266_v16 = vpack.i.bf16 %v9940_v22, %v9938_v41 }
 0xd23   :  { %v8440_v13 = vpop.eup %8439  ;;  %v2282_v33 = vpack.c.bf16 %v2275_v54, %v2274_v26 }
 0xd24   :  { %7550 = vmatmul.mubr.msk.bf16.vlgmr.msra.gmra.mrb[104].mxu0 %vm759_vm4, %v2281_v48  ;;  %v2271_v59 = vmul.f32 %v8440_v13, %v10030_v23 }
 0xd25   :  { %7553 = vmatprep.mubr.msk.bf16.mxu0 %vm8807_vm2, %v12254_v50 }
 0xd26   :  { %v2280_v27 = vpack.c.bf16 %v2271_v59, %v2270_v52 }
 0xd27   :  { %v8442_v53 = vpop.eup %8441 }
 0xd28   :  { %7540 = vmatmul.mubr.msk.bf16.vlgmr.msra.gmra.mrb[96].mxu1 %vm759_vm4, %v2280_v27  ;;  %v8444_v38 = vpop.eup %8443  ;;  %v2277_v21 = vmul.f32 %v8442_v53, %v10038_v24  ;;  %v12262_v24 = vpack.i.bf16 %v9718_v51, %v9716_v0  ;;  %v12264_v0 = vpack.i.bf16 %v9724_v36, %v9722_v45  ;;  %v12265_v45 = vpack.i.bf16 %v9946_v40, %v9944_v31 }
 0xd29   :  { %v2276_v23 = vmul.f32 %v8444_v38, %v10032_v7  ;;  %7562 = vmatpush3.bf16.msra.mxu1 %v8203_v46  ;;  %v12261_v7 = vpack.i.bf16 %v9917_v43, %v9915_v8  ;;  %v12263_v8 = vpack.i.bf16 %v9911_v34, %v9909_v18  ;;  %v8011_v43 = vpop.permute.xlu0 %8010 }
 0xd2a   :  { %7563 = vmatprep.subr.bf16.mxu1 %v8204_v35  ;;  %v8013_v25 = vunpack.i.h.bf16 %v8011_v43  ;;  %v8012_v13 = vunpack.i.l.bf16 %v8011_v43 }
 0xd2b   :  { %v2283_v15 = vpack.c.bf16 %v2277_v21, %v2276_v23 }
 0xd2c   :  { %7554 = vmatmul.mubr.msk.bf16.gmra.mrb[108].mxu0 %vm759_vm4, %v2282_v33  ;;  %v2579_v40 = vsel %vm599_vm3, %v9449_v11, %v8013_v25  ;;  %v2578_v33 = vsel %vm599_vm3, %v9447_v4, %v8012_v13 }
 0xd2d   :  { %7557 = vmatprep.mubr.msk.bf16.mxu0 %vm8807_vm2, %v12254_v50  ;;  %7564 = vmatpush3.bf16.msra.mxu1 %v8204_v35  ;;  %v8021_v17 = vpop.permute.xlu0 %8020 }
 0xd2e   :  { %v8023_v52 = vunpack.i.h.bf16 %v8021_v17  ;;  %v8022_v59 = vunpack.i.l.bf16 %v8021_v17 }
 0xd30   :  { %v2591_v21 = vsel %vm2590_vm5, %v2578_v33, %v8022_v59  ;;  %v2592_v23 = vsel %vm2590_vm5, %v2579_v40, %v8023_v52 }
 0xd31   :  { %v10128_v48 = vpop.permute.xlu0 %8030 }
 0xd34   :  { %7558 = vmatmul.mubr.msk.bf16.gmra.mrb[112].mxu0 %vm759_vm4, %v2283_v15 }
 0xd92   :  { %v2336_v5 = vpop.f32.mrb[96].mxu0 }
 0xd93   :  { %v7533_v12 = vpop.f32.mrb[97].mxu0 }
 0xd94   :  { %v2339_v58 = vpop.f32.mrb[98].mxu0  ;;  %v8016_v12 = vpop.permute.xlu1 %8015 }
 0xd95   :  { %v8039_v9 = vpack.i.bf16 %v2339_v58, %v2336_v5  ;;  %v7534_v60 = vpop.f32.mrb[99].mxu0  ;;  %v8018_v46 = vunpack.i.h.bf16 %v8016_v12 }
 0xd97   :  { %8040 = vrot.lane.b32.xlu0 %v8039_v9, %s12214_s22  ;;  %v8017_v9 = vunpack.i.l.bf16 %v8016_v12  ;;  %v2581_v35 = vsel %vm599_vm3, %v9453_v10, %v8018_v46 }
 0xd98   :  { %v8026_v58 = vpop.permute.xlu1 %8025 }
 0xd99   :  { %v8028_v60 = vunpack.i.h.bf16 %v8026_v58 }
 0xd9b   :  { %8045 = vrot.lane.b32.xlu0 %v12261_v7, %s12216_s19  ;;  %v8027_v7 = vunpack.i.l.bf16 %v8026_v58 }
 0xd9c   :  { %v8036_v4 = vpop.permute.xlu1 %8035 }
 0xd9d   :  { %v8038_v10 = vunpack.i.h.bf16 %v8036_v4 }
 0xd9f   :  { %8060 = vrot.lane.b32.xlu0 %v12262_v24, %s12218_s30 }
 0xdbe   :  { %v2344_v32 = vpop.f32.mrb[100].mxu0 }
 0xdbf   :  { %v7537_v44 = vpop.f32.mrb[101].mxu0 }
 0xdc0   :  { %v2347_v1 = vpop.f32.mrb[102].mxu0 }
 0xdc1   :  { %v8049_v56 = vpack.i.bf16 %v2347_v1, %v2344_v32  ;;  %v7538_v2 = vpop.f32.mrb[103].mxu0  ;;  %v2580_v32 = vsel %vm599_vm3, %v9451_v62, %v8017_v9 }
 0xdc2   :  { %v2594_v2 = vsel %vm2590_vm5, %v2581_v35, %v8028_v60  ;;  %v12267_v60 = vld [vmem:[#allocation18_spill] sm:$0xff] }
 0xdc3   :  { %8050 = vrot.lane.b32.xlu1 %v8049_v56, %s12214_s22  ;;  %v2593_v56 = vsel %vm2590_vm5, %v2580_v32, %v8027_v7  ;;  %v12268_v32 = vld [vmem:[#allocation17_spill] sm:$0xff] }
 0xdc7   :  { %8055 = vrot.lane.b32.xlu1 %v12263_v8, %s12216_s19 }
 0xdcb   :  { %8065 = vrot.lane.b32.xlu1 %v12264_v0, %s12218_s30 }
 0xdf7   :  { %v2411_v51 = vpop.f32.mrb[104].mxu0 }
 0xdf8   :  { %v7551_v6 = vpop.f32.mrb[105].mxu0 }
 0xdf9   :  { %v2414_v37 = vpop.f32.mrb[106].mxu0 }
 0xdfa   :  { %v8079_v42 = vpack.i.bf16 %v2414_v37, %v2411_v51  ;;  %v7552_v29 = vpop.f32.mrb[107].mxu0 }
 0xdfb   :  { %v2352_v14 = vpop.f32.mrb[96].mxu1 }
 0xdfc   :  { %8080 = vrot.lane.b32.xlu1 %v8079_v42, %s12214_s22  ;;  %v7541_v19 = vpop.f32.mrb[97].mxu1  ;;  %v8037_v42 = vunpack.i.l.bf16 %v8036_v4 }
 0xdfd   :  { %v2355_v47 = vpop.f32.mrb[98].mxu1  ;;  %v2585_v19 = vsel %vm599_vm3, %v9457_v57, %v8038_v10 }
 0xdfe   :  { %v8069_v3 = vpack.i.bf16 %v2355_v47, %v2352_v14  ;;  %v7542_v18 = vpop.f32.mrb[99].mxu1  ;;  %v2584_v17 = vsel %vm599_vm3, %v9455_v63, %v8037_v42  ;;  %v12269_v42 = vld [vmem:[#allocation5_spill] sm:$0xff] }
 0xdff   :  { %v2419_v34 = vpop.f32.mrb[108].mxu0 }
 0xe00   :  { %8085 = vrot.lane.b32.xlu1 %v12265_v45, %s12216_s19  ;;  %v7555_v36 = vpop.f32.mrb[109].mxu0  ;;  %8070 = vrot.lane.b32.xlu0 %v8069_v3, %s12214_s22  ;;  %v8032_v45 = vunpack.i.l.bf16 %v10128_v48 }
 0xe01   :  { %v2422_v55 = vpop.f32.mrb[110].mxu0 }
 0xe02   :  { %v8089_v39 = vpack.i.bf16 %v2422_v55, %v2419_v34  ;;  %v7556_v49 = vpop.f32.mrb[111].mxu0  ;;  %v8033_v34 = vunpack.i.h.bf16 %v10128_v48  ;;  %v2582_v52 = vsel %vm599_vm3, %v9459_v20, %v8032_v45  ;;  %v12272_v45 = vld [vmem:[#allocation7_spill] sm:$0xff] }
 0xe04   :  { %8075 = vrot.lane.b32.xlu0 %v12266_v16, %s12216_s19  ;;  %v2583_v63 = vsel %vm599_vm3, %v9461_v28, %v8033_v34 }
 0xe07   :  { %v2427_v26 = vpop.f32.mrb[112].mxu0 }
 0xe08   :  { %v7559_v31 = vpop.f32.mrb[113].mxu0  ;;  %8090 = vrot.lane.b32.xlu0 %v8089_v39, %s12214_s22 }
 0xe09   :  { %v2430_v54 = vpop.f32.mrb[114].mxu0  ;;  %v8041_v27 = vpop.permute.xlu0 %8040 }
 0xe0a   :  { %v8094_v53 = vpack.i.bf16 %v2430_v54, %v2427_v26  ;;  %v8043_v41 = vunpack.i.h.bf16 %v8041_v27  ;;  %v8042_v22 = vunpack.i.l.bf16 %v8041_v27  ;;  %v7560_v38 = vpop.f32.mrb[115].mxu0 }
 0xe0c   :  { %v2604_v15 = vsel %vm2603_vm6, %v2591_v21, %v8042_v22  ;;  %v2605_v11 = vsel %vm2603_vm6, %v2592_v23, %v8043_v41  ;;  %8095 = vrot.lane.b32.xlu1 %v8094_v53, %s12214_s22 }
 0xe0d   :  { %v2616_v5 = vpack.c.bf16 %v2605_v11, %v2604_v15  ;;  %v8046_v6 = vpop.permute.xlu0 %8045 }
 0xe0e   :  { %v8048_v39 = vunpack.i.h.bf16 %v8046_v6  ;;  %v8047_v49 = vunpack.i.l.bf16 %v8046_v6 }
 0xe0f   :  { %7565 = vmatprep.mubr.msk.bf16.mxu1 %vm262_vm1, %v2616_v5 }
 0xe10   :  { %v2595_v26 = vsel %vm2590_vm5, %v2582_v52, %v8047_v49  ;;  %v2596_v31 = vsel %vm2590_vm5, %v2583_v63, %v8048_v39  ;;  %v12273_v52 = vld [vmem:[#allocation10_spill] sm:$0xff] }
 0xe11   :  { %v8061_v47 = vpop.permute.xlu0 %8060 }
 0xe12   :  { %v8063_v27 = vunpack.i.h.bf16 %v8061_v47  ;;  %v8062_v33 = vunpack.i.l.bf16 %v8061_v47 }
 0xe14   :  { %v2587_v21 = vsel %vm599_vm3, %v9477_v61, %v8063_v27  ;;  %v2586_v23 = vsel %vm599_vm3, %v9475_v30, %v8062_v33  ;;  %v12275_v27 = vld [vmem:[#allocation12_spill] sm:$0xff] }
 0xe35   :  { %v8051_v24 = vpop.permute.xlu1 %8050 }
 0xe36   :  { %v8053_v44 = vunpack.i.h.bf16 %v8051_v24  ;;  %v8052_v1 = vunpack.i.l.bf16 %v8051_v24 }
 0xe38   :  { %v2607_v8 = vsel %vm2603_vm6, %v2594_v2, %v8053_v44  ;;  %v2606_v0 = vsel %vm2603_vm6, %v2593_v56, %v8052_v1 }
 0xe39   :  { %v2617_v51 = vpack.c.bf16 %v2607_v8, %v2606_v0  ;;  %v8056_v43 = vpop.permute.xlu1 %8055 }
 0xe3a   :  { %v8058_v29 = vunpack.i.h.bf16 %v8056_v43  ;;  %v8057_v62 = vunpack.i.l.bf16 %v8056_v43 }
 0xe3b   :  { %7566 = vmatmul.mubr.msk.bf16.vlgmr.msra.gmra.mrb[100].mxu1 %vm262_vm1, %v2617_v51 }
 0xe3c   :  { %v2598_v36 = vsel %vm2590_vm5, %v2585_v19, %v8058_v29  ;;  %v2597_v55 = vsel %vm2590_vm5, %v2584_v17, %v8057_v62  ;;  %v12270_v62 = vld [vmem:[#allocation6_spill] sm:$0xff] }
 0xe3d   :  { %v8066_v37 = vpop.permute.xlu1 %8065 }
 0xe3e   :  { %v8068_v20 = vunpack.i.h.bf16 %v8066_v37  ;;  %v8067_v15 = vunpack.i.l.bf16 %v8066_v37  ;;  %v6806_v37 = vld [vmem:[%s12186_s8] ss:$0 sm:$0xff] }
 0xe40   :  { %v2589_v7 = vsel %vm599_vm3, %v12267_v60, %v8068_v20  ;;  %v2588_v30 = vsel %vm599_vm3, %v12268_v32, %v8067_v15 }
 0xe6e   :  { %v8081_v14 = vpop.permute.xlu1 %8080 }
 0xe6f   :  { %v8083_v3 = vunpack.i.h.bf16 %v8081_v14  ;;  %v8082_v18 = vunpack.i.l.bf16 %v8081_v14 }
 0xe71   :  { %v2611_v25 = vsel %vm2603_vm6, %v2598_v36, %v8083_v3  ;;  %v2610_v57 = vsel %vm2603_vm6, %v2597_v55, %v8082_v18  ;;  %v12271_v3 = vld [vmem:[#allocation8_spill] sm:$0xff] }
 0xe72   :  { %v2619_v16 = vpack.c.bf16 %v2611_v25, %v2610_v57  ;;  %v8071_v13 = vpop.permute.xlu0 %8070  ;;  %v8086_v22 = vpop.permute.xlu1 %8085 }
 0xe73   :  { %v8073_v59 = vunpack.i.h.bf16 %v8071_v13  ;;  %v8072_v48 = vunpack.i.l.bf16 %v8071_v13  ;;  %v8088_v5 = vunpack.i.h.bf16 %v8086_v22  ;;  %v8087_v12 = vunpack.i.l.bf16 %v8086_v22 }
 0xe75   :  { %v2608_v40 = vsel %vm2603_vm6, %v2595_v26, %v8072_v48  ;;  %v2609_v54 = vsel %vm2603_vm6, %v2596_v31, %v8073_v59  ;;  %v2602_v2 = vsel %vm2590_vm5, %v2589_v7, %v8088_v5  ;;  %v2601_v8 = vsel %vm2590_vm5, %v2588_v30, %v8087_v12  ;;  %v12274_v48 = vld [vmem:[#allocation9_spill] sm:$0xff] }
 0xe76   :  { %v8076_v53 = vpop.permute.xlu0 %8075  ;;  %v2618_v41 = vpack.c.bf16 %v2609_v54, %v2608_v40  ;;  %v12277_v5 = vld [vmem:[#allocation13_spill] sm:$0xff] }
 0xe77   :  { %v8078_v38 = vunpack.i.h.bf16 %v8076_v53  ;;  %v8077_v28 = vunpack.i.l.bf16 %v8076_v53  ;;  %v12276_v53 = vld [vmem:[#allocation11_spill] sm:$0xff] }
 0xe78   :  { %7569 = vmatprep.mubr.msk.bf16.mxu1 %vm262_vm1, %v2618_v41 }
 0xe79   :  { %7570 = vmatmul.mubr.msk.bf16.gmra.mrb[104].mxu1 %vm262_vm1, %v2619_v16  ;;  %v2599_v46 = vsel %vm2590_vm5, %v2586_v23, %v8077_v28  ;;  %v2600_v9 = vsel %vm2590_vm5, %v2587_v21, %v8078_v38 }
 0xe7a   :  { %v8091_v11 = vpop.permute.xlu0 %8090 }
 0xe7b   :  { %v8093_v58 = vunpack.i.h.bf16 %v8091_v11  ;;  %v8092_v4 = vunpack.i.l.bf16 %v8091_v11 }
 0xe7d   :  { %v2612_v24 = vsel %vm2603_vm6, %v2599_v46, %v8092_v4  ;;  %v2613_v61 = vsel %vm2603_vm6, %v2600_v9, %v8093_v58  ;;  %v12278_v58 = vld [vmem:[#allocation14_spill] sm:$0xff] }
 0xe7e   :  { %v8096_v35 = vpop.permute.xlu1 %8095  ;;  %v2620_v56 = vpack.c.bf16 %v2613_v61, %v2612_v24  ;;  %v12279_v24 = vld [vmem:[#allocation15_spill] sm:$0xff] }
 0xe7f   :  { %v8098_v44 = vunpack.i.h.bf16 %v8096_v35  ;;  %v8097_v1 = vunpack.i.l.bf16 %v8096_v35  ;;  %v12280_v35 = vld [vmem:[#allocation16_spill] sm:$0xff] }
 0xe80   :  { %7573 = vmatprep.mubr.msk.bf16.mxu1 %vm262_vm1, %v2620_v56 }
 0xe81   :  { %v2615_v0 = vsel %vm2603_vm6, %v2602_v2, %v8098_v44  ;;  %v2614_v51 = vsel %vm2603_vm6, %v2601_v8, %v8097_v1 }
 0xe82   :  { %v2621_v43 = vpack.c.bf16 %v2615_v0, %v2614_v51 }
 0xe84   :  { %7574 = vmatmul.mubr.msk.bf16.gmra.mrb[108].mxu1 %vm262_vm1, %v2621_v43 }
 0xf0e   :  { %v7567_v6 = vpop.f32.mrb[100].mxu1 }
 0xf0f   :  { %v2690_v10 = vpop.f32.mrb[101].mxu1  ;;  %v2739_v29 = vadd.f32 %v7567_v6, %v12269_v42 }
 0xf10   :  { %v2737_v14 = vadd.f32 %v2690_v10, %v12270_v62  ;;  %v7568_v19 = vpop.f32.mrb[102].mxu1 }
 0xf11   :  { %v2693_v17 = vpop.f32.mrb[103].mxu1  ;;  %v10200_v34 = vadd.f32 %v6806_v37, %v2739_v29  ;;  %v2740_v36 = vadd.f32 %v7568_v19, %v12272_v45 }
 0xf12   :  { %v10197_v47 = vadd.f32 %v6806_v37, %v2737_v14  ;;  %v2738_v18 = vadd.f32 %v2693_v17, %v12271_v3 }
 0xf13   :  { %v10209_v25 = vadd.f32 %v6806_v37, %v2740_v36  ;;  %v2776_v57 = vsel %vm262_vm1, %v10200_v34, 0.0 }
 0xf14   :  { %v10203_v55 = vadd.f32 %v6806_v37, %v2738_v18  ;;  %v2770_v39 = vsel %vm262_vm1, %v10197_v47, 0.0 }
 0xf15   :  { %2771 = vadd.xlane.f32.xlu0 %v2770_v39  ;;  %v2779_v16 = vsel %vm262_vm1, %v10209_v25, 0.0 }
 0xf16   :  { %v2773_v49 = vsel %vm262_vm1, %v10203_v55, 0.0 }
 0xf17   :  { %2774 = vadd.xlane.f32.xlu1 %v2773_v49 }
 0xf19   :  { %2777 = vadd.xlane.f32.xlu0 %v2776_v57 }
 0xf1d   :  { %2780 = vadd.xlane.f32.xlu0 %v2779_v16 }
 0xf4c   :  { %v7571_v13 = vpop.f32.mrb[104].mxu1 }
 0xf4d   :  { %v2706_v63 = vpop.f32.mrb[105].mxu1  ;;  %v2743_v59 = vadd.f32 %v7571_v13, %v12273_v52  ;;  %v8206_v52 = vld [vmem:[%s12189_s11 + $0x8] sm:$0xff]  }
 0xf4e   :  { %v2741_v26 = vadd.f32 %v2706_v63, %v12274_v48  ;;  %v7572_v31 = vpop.f32.mrb[106].mxu1  ;;  %v8205_v63 = vld [vmem:[%s12189_s11] sm:$0xff]  }
 0xf4f   :  { %v2709_v40 = vpop.f32.mrb[107].mxu1  ;;  %v2744_v33 = vadd.f32 %v7572_v31, %v12275_v27  ;;  %v10221_v22 = vadd.f32 %v6806_v37, %v2743_v59  ;;  %7577 = vmatprep.subr.bf16.mxu0 %v8205_v63 }
 0xf50   :  { %v10217_v54 = vadd.f32 %v6806_v37, %v2741_v26  ;;  %v2742_v41 = vadd.f32 %v2709_v40, %v12276_v53  ;;  %7578 = vmatpush3.bf16.msra.mxu0 %v8205_v63 }
 0xf51   :  { %v10227_v20 = vadd.f32 %v6806_v37, %v2744_v33  ;;  %v2788_v23 = vsel %vm262_vm1, %v10221_v22, 0.0  ;;  %7579 = vmatprep.subr.bf16.mxu0 %v8206_v52 }
 0xf52   :  { %v10223_v38 = vadd.f32 %v6806_v37, %v2742_v41  ;;  %v2782_v28 = vsel %vm262_vm1, %v10217_v54, 0.0 }
 0xf53   :  { %2783 = vadd.xlane.f32.xlu0 %v2782_v28  ;;  %v2791_v46 = vsel %vm262_vm1, %v10227_v20, 0.0 }
 0xf54   :  { %v2785_v21 = vsel %vm262_vm1, %v10223_v38, 0.0  ;;  %7580 = vmatpush3.bf16.msra.mxu0 %v8206_v52 }
 0xf55   :  { %2786 = vadd.xlane.f32.xlu1 %v2785_v21 }
 0xf57   :  { %v7575_v15 = vpop.f32.mrb[108].mxu1  ;;  %2789 = vadd.xlane.f32.xlu0 %v2788_v23 }
 0xf58   :  { %v2722_v11 = vpop.f32.mrb[109].mxu1  ;;  %v2747_v12 = vadd.f32 %v7575_v15, %v12277_v5 }
 0xf59   :  { %v2745_v4 = vadd.f32 %v2722_v11, %v12278_v58  ;;  %v7576_v9 = vpop.f32.mrb[110].mxu1  ;;  %2792 = vadd.xlane.f32.xlu1 %v2791_v46 }
 0xf5a   :  { %v2725_v60 = vpop.f32.mrb[111].mxu1  ;;  %v2748_v61 = vadd.f32 %v7576_v9, %v12279_v24  ;;  %v10241_v30 = vadd.f32 %v6806_v37, %v2747_v12 }
 0xf5b   :  { %v10237_v7 = vadd.f32 %v6806_v37, %v2745_v4  ;;  %v2746_v32 = vadd.f32 %v2725_v60, %v12280_v35 }
 0xf5c   :  { %v10247_v56 = vadd.f32 %v6806_v37, %v2748_v61  ;;  %v2800_v8 = vsel %vm262_vm1, %v10241_v30, 0.0 }
 0xf5d   :  { %v10243_v44 = vadd.f32 %v6806_v37, %v2746_v32  ;;  %v2794_v1 = vsel %vm262_vm1, %v10237_v7, 0.0 }
 0xf5e   :  { %2795 = vadd.xlane.f32.xlu0 %v2794_v1  ;;  %v2803_v0 = vsel %vm262_vm1, %v10247_v56, 0.0 }
 0xf5f   :  { %v2797_v2 = vsel %vm262_vm1, %v10243_v44, 0.0 }
 0xf60   :  { %2798 = vadd.xlane.f32.xlu1 %v2797_v2 }
 0xf62   :  { %2801 = vadd.xlane.f32.xlu0 %v2800_v8 }
 0xf64   :  { %2804 = vadd.xlane.f32.xlu1 %v2803_v0 }
 0xfa2   :  { %v2772_v51 = vpop.xlane.xlu0 %2771 }
 0xfa3   :  { %v2806_v43 = vmul.f32 0.03125, %v2772_v51 }
 0xfa4   :  { %v2775_v6 = vpop.xlane.xlu1 %2774 }
 0xfa5   :  { %v10256_v10 = vsub.f32 %v10197_v47, %v2806_v43  ;;  %v2807_v37 = vmul.f32 0.03125, %v2775_v6 }
 0xfa6   :  { %v2778_v42 = vpop.xlane.xlu0 %2777 }
 0xfa7   :  { %v10259_v29 = vsub.f32 %v10203_v55, %v2807_v37  ;;  %v2808_v62 = vmul.f32 0.03125, %v2778_v42  ;;  %v2830_v14 = vmul.f32 %v10256_v10, %v10256_v10 }
 0xfa9   :  { %v10264_v19 = vsub.f32 %v10200_v34, %v2808_v62  ;;  %v2842_v17 = vsel %vm262_vm1, %v2830_v14, 0.0  ;;  %v2831_v3 = vmul.f32 %v10259_v29, %v10259_v29 }
 0xfaa   :  { %v2781_v18 = vpop.xlane.xlu0 %2780  ;;  %2843 = vadd.xlane.f32.xlu0 %v2842_v17 }
 0xfab   :  { %v2809_v45 = vmul.f32 0.03125, %v2781_v18  ;;  %v2845_v36 = vsel %vm262_vm1, %v2831_v3, 0.0  ;;  %v2832_v39 = vmul.f32 %v10264_v19, %v10264_v19 }
 0xfac   :  { %2846 = vadd.xlane.f32.xlu1 %v2845_v36 }
 0xfad   :  { %v10273_v49 = vsub.f32 %v10209_v25, %v2809_v45  ;;  %v2848_v57 = vsel %vm262_vm1, %v2832_v39, 0.0 }
 0xfae   :  { %2849 = vadd.xlane.f32.xlu0 %v2848_v57 }
 0xfaf   :  { %v2833_v16 = vmul.f32 %v10273_v49, %v10273_v49 }
 0xfb1   :  { %v2851_v13 = vsel %vm262_vm1, %v2833_v16, 0.0 }
 0xfb2   :  { %2852 = vadd.xlane.f32.xlu1 %v2851_v13 }
 0xfe0   :  { %v2784_v59 = vpop.xlane.xlu0 %2783 }
 0xfe1   :  { %v2810_v48 = vmul.f32 0.03125, %v2784_v59 }
 0xfe2   :  { %v2787_v26 = vpop.xlane.xlu1 %2786 }
 0xfe3   :  { %v10286_v31 = vsub.f32 %v10217_v54, %v2810_v48  ;;  %v2811_v40 = vmul.f32 0.03125, %v2787_v26 }
 0xfe4   :  { %v2790_v27 = vpop.xlane.xlu0 %2789 }
 0xfe5   :  { %v10289_v33 = vsub.f32 %v10223_v38, %v2811_v40  ;;  %v2812_v53 = vmul.f32 0.03125, %v2790_v27  ;;  %v2834_v41 = vmul.f32 %v10286_v31, %v10286_v31 }
 0xfe6   :  { %v2793_v28 = vpop.xlane.xlu1 %2792 }
 0xfe7   :  { %v10294_v21 = vsub.f32 %v10221_v22, %v2812_v53  ;;  %v2813_v23 = vmul.f32 0.03125, %v2793_v28  ;;  %v2854_v15 = vsel %vm262_vm1, %v2834_v41, 0.0  ;;  %v2835_v11 = vmul.f32 %v10289_v33, %v10289_v33  ;;  %v10336_v41 = vld [vmem:[%s12187_s9] ss:$0 sm:$0xff] }
 0xfe8   :  { %2855 = vadd.xlane.f32.xlu0 %v2854_v15 }
 0xfe9   :  { %v10300_v5 = vsub.f32 %v10227_v20, %v2813_v23  ;;  %v2857_v12 = vsel %vm262_vm1, %v2835_v11, 0.0  ;;  %v2836_v58 = vmul.f32 %v10294_v21, %v10294_v21 }
 0xfea   :  { %2858 = vadd.xlane.f32.xlu1 %v2857_v12 }
 0xfeb   :  { %v2796_v4 = vpop.xlane.xlu0 %2795  ;;  %v2860_v9 = vsel %vm262_vm1, %v2836_v58, 0.0  ;;  %v2837_v60 = vmul.f32 %v10300_v5, %v10300_v5  ;;  %v10344_v58 = vld [vmem:[%s12188_s10] ss:$0 sm:$0xff] }
 0xfec   :  { %v2814_v46 = vmul.f32 0.03125, %v2796_v4  ;;  %2861 = vadd.xlane.f32.xlu0 %v2860_v9 }
 0xfed   :  { %v2799_v24 = vpop.xlane.xlu1 %2798  ;;  %v2863_v32 = vsel %vm262_vm1, %v2837_v60, 0.0 }
 0xfee   :  { %v10309_v61 = vsub.f32 %v10237_v7, %v2814_v46  ;;  %v2815_v35 = vmul.f32 0.03125, %v2799_v24  ;;  %2864 = vadd.xlane.f32.xlu1 %v2863_v32 }
 0xfef   :  { %v2802_v1 = vpop.xlane.xlu0 %2801 }
 0xff0   :  { %v10313_v2 = vsub.f32 %v10243_v44, %v2815_v35  ;;  %v2816_v8 = vmul.f32 0.03125, %v2802_v1  ;;  %v2838_v0 = vmul.f32 %v10309_v61, %v10309_v61 }
 0xff1   :  { %v2805_v51 = vpop.xlane.xlu1 %2804 }
 0xff2   :  { %v10318_v43 = vsub.f32 %v10241_v30, %v2816_v8  ;;  %v2817_v6 = vmul.f32 0.03125, %v2805_v51  ;;  %v2866_v37 = vsel %vm262_vm1, %v2838_v0, 0.0  ;;  %v2839_v42 = vmul.f32 %v10313_v2, %v10313_v2 }
 0xff3   :  { %2867 = vadd.xlane.f32.xlu0 %v2866_v37 }
 0xff4   :  { %v10324_v62 = vsub.f32 %v10247_v56, %v2817_v6  ;;  %v2869_v14 = vsel %vm262_vm1, %v2839_v42, 0.0  ;;  %v2840_v17 = vmul.f32 %v10318_v43, %v10318_v43 }
 0xff5   :  { %2870 = vadd.xlane.f32.xlu1 %v2869_v14 }
 0xff6   :  { %v2872_v3 = vsel %vm262_vm1, %v2840_v17, 0.0  ;;  %v2841_v18 = vmul.f32 %v10324_v62, %v10324_v62 }
 0xff7   :  { %2873 = vadd.xlane.f32.xlu0 %v2872_v3 }
 0xff8   :  { %v2875_v45 = vsel %vm262_vm1, %v2841_v18, 0.0 }
 0xff9   :  { %2876 = vadd.xlane.f32.xlu1 %v2875_v45 }
0x1037   :  { %v2844_v36 = vpop.xlane.xlu0 %2843 }
0x1038   :  { %v2878_v39 = vmul.f32 0.03125, %v2844_v36 }
0x1039   :  { %v2847_v57 = vpop.xlane.xlu1 %2846 }
0x103a   :  { %v2890_v16 = vadd.f32 1e-05, %v2878_v39  ;;  %v2879_v13 = vmul.f32 0.03125, %v2847_v57 }
0x103b   :  { %v2850_v63 = vpop.xlane.xlu0 %2849 }
0x103c   :  { %8445 = vrsqrt.f32 %v2890_v16  ;;  %v2891_v52 = vadd.f32 1e-05, %v2879_v13  ;;  %v2880_v59 = vmul.f32 0.03125, %v2850_v63 }
0x103e   :  { %8447 = vrsqrt.f32 %v2891_v52  ;;  %v2892_v48 = vadd.f32 1e-05, %v2880_v59 }
0x103f   :  { %v2853_v26 = vpop.xlane.xlu1 %2852 }
0x1040   :  { %8449 = vrsqrt.f32 %v2892_v48  ;;  %v2881_v40 = vmul.f32 0.03125, %v2853_v26 }
0x1042   :  { %v2893_v27 = vadd.f32 1e-05, %v2881_v40 }
0x1044   :  { %8451 = vrsqrt.f32 %v2893_v27 }
0x1046   :  { %v8446_v53 = vpop.eup %8445 }
0x1047   :  { %v2914_v28 = vmul.f32 %v8446_v53, %v10256_v10 }
0x1048   :  { %v8448_v23 = vpop.eup %8447 }
0x1049   :  { %v2915_v15 = vmul.f32 %v8448_v23, %v10259_v29  ;;  %v2932_v11 = vmul.f32 %v10336_v41, %v2914_v28 }
0x104a   :  { %v8450_v12 = vpop.eup %8449 }
0x104b   :  { %v2916_v4 = vmul.f32 %v8450_v12, %v10264_v19  ;;  %v2933_v46 = vmul.f32 %v10336_v41, %v2915_v15  ;;  %v2950_v9 = vadd.f32 %v10344_v58, %v2932_v11 }
0x104d   :  { %v2951_v60 = vadd.f32 %v10344_v58, %v2933_v46  ;;  %v2934_v24 = vmul.f32 %v10336_v41, %v2916_v4 }
0x104e   :  { %v8452_v10 = vpop.eup %8451 }
0x104f   :  { %v2917_v29 = vmul.f32 %v8452_v10, %v10273_v49  ;;  %v2962_v35 = vpack.c.bf16 %v2951_v60, %v2950_v9  ;;  %v2952_v1 = vadd.f32 %v10344_v58, %v2934_v24 }
0x1051   :  { %v2935_v32 = vmul.f32 %v10336_v41, %v2917_v29  ;;  %7581 = vmatprep.mubr.msk.bf16.mxu0 %vm262_vm1, %v2962_v35 }
0x1053   :  { %v2953_v19 = vadd.f32 %v10344_v58, %v2935_v32 }
0x1055   :  { %v2963_v8 = vpack.c.bf16 %v2953_v19, %v2952_v1 }
0x1057   :  { %7582 = vmatmul.mubr.msk.bf16.vlgmr.msra.gmra.mrb[116].mxu0 %vm262_vm1, %v2963_v8 }
0x1075   :  { %v2856_v0 = vpop.xlane.xlu0 %2855 }
0x1076   :  { %v2882_v51 = vmul.f32 0.03125, %v2856_v0 }
0x1077   :  { %v2859_v6 = vpop.xlane.xlu1 %2858 }
0x1078   :  { %v2894_v37 = vadd.f32 1e-05, %v2882_v51  ;;  %v2883_v42 = vmul.f32 0.03125, %v2859_v6 }
0x1079   :  { %v2862_v14 = vpop.xlane.xlu0 %2861 }
0x107a   :  { %8453 = vrsqrt.f32 %v2894_v37  ;;  %v2895_v49 = vadd.f32 1e-05, %v2883_v42  ;;  %v2884_v17 = vmul.f32 0.03125, %v2862_v14 }
0x107b   :  { %v2865_v3 = vpop.xlane.xlu1 %2864 }
0x107c   :  { %8455 = vrsqrt.f32 %v2895_v49  ;;  %v2896_v18 = vadd.f32 1e-05, %v2884_v17  ;;  %v2885_v45 = vmul.f32 0.03125, %v2865_v3 }
0x107e   :  { %8457 = vrsqrt.f32 %v2896_v18  ;;  %v2897_v36 = vadd.f32 1e-05, %v2885_v45 }
0x1080   :  { %v2868_v39 = vpop.xlane.xlu0 %2867  ;;  %8459 = vrsqrt.f32 %v2897_v36 }
0x1081   :  { %v2886_v57 = vmul.f32 0.03125, %v2868_v39 }
0x1082   :  { %v2871_v16 = vpop.xlane.xlu1 %2870 }
0x1083   :  { %v2898_v13 = vadd.f32 1e-05, %v2886_v57  ;;  %v2887_v63 = vmul.f32 0.03125, %v2871_v16  ;;  %v8211_v57 = vld [vmem:[%s12191_s13 + $0x20] sm:$0xff]   ;;  %v8212_v16 = vld [vmem:[%s12191_s13 + $0x28] sm:$0xff]  }
0x1084   :  { %v2874_v52 = vpop.xlane.xlu0 %2873  ;;  %v8454_v59 = vpop.eup %8453 }
0x1085   :  { %8461 = vrsqrt.f32 %v2898_v13  ;;  %v2899_v48 = vadd.f32 1e-05, %v2887_v63  ;;  %v2888_v26 = vmul.f32 0.03125, %v2874_v52  ;;  %v2918_v27 = vmul.f32 %v8454_v59, %v10286_v31  ;;  %v8213_v13 = vld [vmem:[%s12191_s13 + $0x30] sm:$0xff]   ;;  %v8214_v63 = vld [vmem:[%s12191_s13 + $0x38] sm:$0xff]  }
0x1086   :  { %v2877_v40 = vpop.xlane.xlu1 %2876  ;;  %v8456_v53 = vpop.eup %8455  ;;  %v10413_v52 = vld [vmem:[%s12190_s12] ss:$0 sm:$0xff] }
0x1087   :  { %8463 = vrsqrt.f32 %v2899_v48  ;;  %v2900_v28 = vadd.f32 1e-05, %v2888_v26  ;;  %v2889_v23 = vmul.f32 0.03125, %v2877_v40  ;;  %v2919_v15 = vmul.f32 %v8456_v53, %v10289_v33 }
0x1088   :  { %v2936_v11 = vmul.f32 %v10336_v41, %v2918_v27  ;;  %v8458_v12 = vpop.eup %8457 }
0x1089   :  { %8465 = vrsqrt.f32 %v2900_v28  ;;  %v2901_v4 = vadd.f32 1e-05, %v2889_v23  ;;  %v2937_v46 = vmul.f32 %v10336_v41, %v2919_v15  ;;  %v2920_v9 = vmul.f32 %v8458_v12, %v10294_v21 }
0x108a   :  { %v8460_v60 = vpop.eup %8459  ;;  %v2954_v10 = vadd.f32 %v10344_v58, %v2936_v11 }
0x108b   :  { %8467 = vrsqrt.f32 %v2901_v4  ;;  %v2955_v31 = vadd.f32 %v10344_v58, %v2937_v46  ;;  %v2921_v24 = vmul.f32 %v8460_v60, %v10300_v5  ;;  %v2938_v29 = vmul.f32 %v10336_v41, %v2920_v9 }
0x108d   :  { %v2964_v33 = vpack.c.bf16 %v2955_v31, %v2954_v10  ;;  %v2939_v35 = vmul.f32 %v10336_v41, %v2921_v24  ;;  %v2956_v1 = vadd.f32 %v10344_v58, %v2938_v29 }
0x108f   :  { %v8462_v32 = vpop.eup %8461  ;;  %7585 = vmatprep.mubr.msk.bf16.mxu0 %vm262_vm1, %v2964_v33  ;;  %v2957_v21 = vadd.f32 %v10344_v58, %v2939_v35 }
0x1090   :  { %v2922_v19 = vmul.f32 %v8462_v32, %v10309_v61 }
0x1091   :  { %v8464_v8 = vpop.eup %8463  ;;  %v2965_v0 = vpack.c.bf16 %v2957_v21, %v2956_v1 }
0x1092   :  { %v2923_v51 = vmul.f32 %v8464_v8, %v10313_v2  ;;  %v2940_v5 = vmul.f32 %v10336_v41, %v2922_v19 }
0x1093   :  { %v8466_v6 = vpop.eup %8465  ;;  %7586 = vmatmul.mubr.msk.bf16.gmra.mrb[120].mxu0 %vm262_vm1, %v2965_v0 }
0x1094   :  { %v2941_v37 = vmul.f32 %v10336_v41, %v2923_v51  ;;  %v2924_v42 = vmul.f32 %v8466_v6, %v10318_v43  ;;  %v2958_v49 = vadd.f32 %v10344_v58, %v2940_v5  ;;  %v8207_v43 = vld [vmem:[%s12191_s13] sm:$0xff]  }
0x1095   :  { %v8468_v14 = vpop.eup %8467  ;;  %7593 = vmatprep.subr.bf16.mxu1 %v8207_v43 }
0x1096   :  { %v2959_v17 = vadd.f32 %v10344_v58, %v2941_v37  ;;  %v2925_v61 = vmul.f32 %v8468_v14, %v10324_v62  ;;  %v2942_v3 = vmul.f32 %v10336_v41, %v2924_v42  ;;  %7594 = vmatpush3.bf16.msra.mxu1 %v8207_v43  ;;  %v8208_v62 = vld [vmem:[%s12191_s13 + $0x8] sm:$0xff]  }
0x1097   :  { %7595 = vmatprep.subr.bf16.mxu1 %v8208_v62 }
0x1098   :  { %v2966_v18 = vpack.c.bf16 %v2959_v17, %v2958_v49  ;;  %v2943_v2 = vmul.f32 %v10336_v41, %v2925_v61  ;;  %v2960_v45 = vadd.f32 %v10344_v58, %v2942_v3  ;;  %v8209_v41 = vld [vmem:[%s12191_s13 + $0x10] sm:$0xff]  }
0x109a   :  { %7589 = vmatprep.mubr.msk.bf16.mxu0 %vm262_vm1, %v2966_v18  ;;  %v2961_v36 = vadd.f32 %v10344_v58, %v2943_v2  ;;  %7596 = vmatpush3.bf16.msra.mxu1 %v8208_v62  ;;  %v8210_v58 = vld [vmem:[%s12191_s13 + $0x18] sm:$0xff]  }
0x109b   :  { %7597 = vmatprep.subr.bf16.mxu1 %v8209_v41 }
0x109c   :  { %v2967_v39 = vpack.c.bf16 %v2961_v36, %v2960_v45 }
0x109e   :  { %7590 = vmatmul.mubr.msk.bf16.gmra.mrb[124].mxu0 %vm262_vm1, %v2967_v39  ;;  %7598 = vmatpush3.bf16.msra.mxu1 %v8209_v41 }
0x109f   :  { %7599 = vmatprep.subr.bf16.mxu1 %v8210_v58 }
0x10a2   :  { %7600 = vmatpush3.bf16.msra.mxu1 %v8210_v58 }
0x10a3   :  { %7601 = vmatprep.subr.bf16.mxu1 %v8211_v57 }
0x10a6   :  { %7602 = vmatpush3.bf16.msra.mxu1 %v8211_v57 }
0x10a7   :  { %7603 = vmatprep.subr.bf16.mxu1 %v8212_v16 }
0x10aa   :  { %7604 = vmatpush3.bf16.msra.mxu1 %v8212_v16 }
0x10ab   :  { %7605 = vmatprep.subr.bf16.mxu1 %v8213_v13 }
0x10ae   :  { %7606 = vmatpush3.bf16.msra.mxu1 %v8213_v13 }
0x10af   :  { %7607 = vmatprep.subr.bf16.mxu1 %v8214_v63 }
0x10b2   :  { %7608 = vmatpush3.bf16.msra.mxu1 %v8214_v63 }
0x10b3   :  { %7637 = vmatprep.subr.bf16.mxu1 %v12254_v50 }
0x112a   :  { %v7583_v59 = vpop.f32.mrb[116].mxu0 }
0x112b   :  { %v3052_v48 = vadd.f32 %v7583_v59, %v10413_v52  ;;  %v3043_v26 = vpop.f32.mrb[117].mxu0 }
0x112c   :  { %v3044_v40 = vadd.f32 %v10413_v52, %v3043_v26  ;;  %v7584_v27 = vpop.f32.mrb[118].mxu0 }
0x112d   :  { %v3092_v53 = vmul.f32 %v3052_v48, %v3052_v48  ;;  %v3055_v28 = vadd.f32 %v7584_v27, %v10413_v52  ;;  %v3046_v23 = vpop.f32.mrb[119].mxu0 }
0x112e   :  { %v3090_v15 = vmul.f32 %v3044_v40, %v3044_v40  ;;  %v3047_v11 = vadd.f32 %v10413_v52, %v3046_v23 }
0x112f   :  { %v3104_v12 = vmul.f32 %v3092_v53, %v3052_v48  ;;  %v3093_v4 = vmul.f32 %v3055_v28, %v3055_v28 }
0x1130   :  { %v3102_v46 = vmul.f32 %v3090_v15, %v3044_v40  ;;  %v3091_v9 = vmul.f32 %v3047_v11, %v3047_v11 }
0x1131   :  { %v3116_v60 = vmul.f32 0.044715, %v3104_v12  ;;  %v3105_v10 = vmul.f32 %v3093_v4, %v3055_v28 }
0x1132   :  { %v3114_v31 = vmul.f32 0.044715, %v3102_v46  ;;  %v3103_v24 = vmul.f32 %v3091_v9, %v3047_v11 }
0x1133   :  { %v3128_v29 = vadd.f32 %v3116_v60, %v3052_v48  ;;  %v3117_v33 = vmul.f32 0.044715, %v3105_v10 }
0x1134   :  { %v3126_v35 = vadd.f32 %v3114_v31, %v3044_v40  ;;  %v3115_v32 = vmul.f32 0.044715, %v3103_v24 }
0x1135   :  { %v3140_v1 = vmul.f32 0.7978846, %v3128_v29  ;;  %v3129_v21 = vadd.f32 %v3117_v33, %v3055_v28 }
0x1136   :  { %v3138_v19 = vmul.f32 0.7978846, %v3126_v35  ;;  %v3127_v8 = vadd.f32 %v3115_v32, %v3047_v11 }
0x1137   :  { %8469 = vtanh.f32 %v3140_v1  ;;  %v3141_v0 = vmul.f32 0.7978846, %v3129_v21 }
0x1138   :  { %8471 = vtanh.f32 %v3138_v19  ;;  %v3139_v51 = vmul.f32 0.7978846, %v3127_v8 }
0x1139   :  { %8473 = vtanh.f32 %v3141_v0 }
0x113a   :  { %8475 = vtanh.f32 %v3139_v51 }
0x1141   :  { %v8470_v5 = vpop.eup %8469 }
0x1142   :  { %v8472_v6 = vpop.eup %8471  ;;  %v3164_v37 = vadd.f32 1.0, %v8470_v5 }
0x1143   :  { %v8474_v42 = vpop.eup %8473  ;;  %v3162_v14 = vadd.f32 1.0, %v8472_v6 }
0x1144   :  { %v8476_v49 = vpop.eup %8475  ;;  %v3176_v17 = vmul.f32 0.5, %v3164_v37  ;;  %v3165_v61 = vadd.f32 1.0, %v8474_v42 }
0x1145   :  { %v3163_v3 = vadd.f32 1.0, %v8476_v49  ;;  %v3174_v18 = vmul.f32 0.5, %v3162_v14 }
0x1146   :  { %v3177_v2 = vmul.f32 0.5, %v3165_v61  ;;  %v3188_v36 = vmul.f32 %v3176_v17, %v3052_v48 }
0x1147   :  { %v3175_v45 = vmul.f32 0.5, %v3163_v3  ;;  %v3186_v43 = vmul.f32 %v3174_v18, %v3044_v40 }
0x1148   :  { %v3189_v39 = vmul.f32 %v3177_v2, %v3055_v28 }
0x1149   :  { %v3187_v62 = vmul.f32 %v3175_v45, %v3047_v11 }
0x114a   :  { %v3199_v41 = vpack.c.bf16 %v3189_v39, %v3188_v36 }
0x114b   :  { %v3198_v58 = vpack.c.bf16 %v3187_v62, %v3186_v43 }
0x114d   :  { %7609 = vmatprep.mubr.bf16.mxu1 %v3198_v58 }
0x114e   :  { %7610 = vmatmul.mubr.bf16.vlgmr.msra.gmra.mrb[112].mxu1 %v3199_v41 }
0x1166   :  { %v7587_v57 = vpop.f32.mrb[120].mxu0 }
0x1167   :  { %v10420_v16 = vadd.f32 %v7587_v57, %v10413_v52  ;;  %v3059_v13 = vpop.f32.mrb[121].mxu0 }
0x1168   :  { %v10423_v63 = vadd.f32 %v10413_v52, %v3059_v13  ;;  %v7588_v59 = vpop.f32.mrb[122].mxu0 }
0x1169   :  { %v3096_v26 = vmul.f32 %v10420_v16, %v10420_v16  ;;  %v10428_v48 = vadd.f32 %v7588_v59, %v10413_v52  ;;  %v3062_v40 = vpop.f32.mrb[123].mxu0 }
0x116a   :  { %v3094_v27 = vmul.f32 %v10423_v63, %v10423_v63  ;;  %v10433_v53 = vadd.f32 %v10413_v52, %v3062_v40 }
0x116b   :  { %v3108_v28 = vmul.f32 %v3096_v26, %v10420_v16  ;;  %v3097_v23 = vmul.f32 %v10428_v48, %v10428_v48 }
0x116c   :  { %v3106_v15 = vmul.f32 %v3094_v27, %v10423_v63  ;;  %v3095_v11 = vmul.f32 %v10433_v53, %v10433_v53 }
0x116d   :  { %v3120_v12 = vmul.f32 0.044715, %v3108_v28  ;;  %v3109_v4 = vmul.f32 %v3097_v23, %v10428_v48 }
0x116e   :  { %v3118_v46 = vmul.f32 0.044715, %v3106_v15  ;;  %v3107_v9 = vmul.f32 %v3095_v11, %v10433_v53 }
0x116f   :  { %v3132_v60 = vadd.f32 %v3120_v12, %v10420_v16  ;;  %v3121_v10 = vmul.f32 0.044715, %v3109_v4 }
0x1170   :  { %v3130_v31 = vadd.f32 %v3118_v46, %v10423_v63  ;;  %v3119_v24 = vmul.f32 0.044715, %v3107_v9 }
0x1171   :  { %v7591_v29 = vpop.f32.mrb[124].mxu0  ;;  %v3144_v33 = vmul.f32 0.7978846, %v3132_v60  ;;  %v3133_v35 = vadd.f32 %v3121_v10, %v10428_v48 }
0x1172   :  { %v10447_v32 = vadd.f32 %v7591_v29, %v10413_v52  ;;  %v3075_v1 = vpop.f32.mrb[125].mxu0  ;;  %v3142_v21 = vmul.f32 0.7978846, %v3130_v31  ;;  %v3131_v19 = vadd.f32 %v3119_v24, %v10433_v53 }
0x1173   :  { %v10451_v8 = vadd.f32 %v10413_v52, %v3075_v1  ;;  %v7592_v0 = vpop.f32.mrb[126].mxu0  ;;  %8477 = vtanh.f32 %v3144_v33  ;;  %v3145_v51 = vmul.f32 0.7978846, %v3133_v35 }
0x1174   :  { %v3100_v5 = vmul.f32 %v10447_v32, %v10447_v32  ;;  %v10456_v6 = vadd.f32 %v7592_v0, %v10413_v52  ;;  %v3078_v37 = vpop.f32.mrb[127].mxu0  ;;  %8479 = vtanh.f32 %v3142_v21  ;;  %v3143_v42 = vmul.f32 0.7978846, %v3131_v19 }
0x1175   :  { %v3098_v14 = vmul.f32 %v10451_v8, %v10451_v8  ;;  %v3079_v49 = vadd.f32 %v10413_v52, %v3078_v37  ;;  %8481 = vtanh.f32 %v3145_v51 }
0x1176   :  { %v3112_v17 = vmul.f32 %v3100_v5, %v10447_v32  ;;  %v3101_v61 = vmul.f32 %v10456_v6, %v10456_v6  ;;  %8483 = vtanh.f32 %v3143_v42 }
0x1177   :  { %v3110_v3 = vmul.f32 %v3098_v14, %v10451_v8  ;;  %v3099_v18 = vmul.f32 %v3079_v49, %v3079_v49 }
0x1178   :  { %v3124_v2 = vmul.f32 0.044715, %v3112_v17  ;;  %v3113_v45 = vmul.f32 %v3101_v61, %v10456_v6 }
0x1179   :  { %v3122_v36 = vmul.f32 0.044715, %v3110_v3  ;;  %v3111_v39 = vmul.f32 %v3099_v18, %v3079_v49 }
0x117a   :  { %v3136_v43 = vadd.f32 %v3124_v2, %v10447_v32  ;;  %v3125_v62 = vmul.f32 0.044715, %v3113_v45 }
0x117b   :  { %v3134_v52 = vadd.f32 %v3122_v36, %v10451_v8  ;;  %v3123_v41 = vmul.f32 0.044715, %v3111_v39  ;;  %v6818_v39 = vld [vmem:[%s12192_s14] ss:$0 sm:$0xff] }
0x117c   :  { %v3148_v58 = vmul.f32 0.7978846, %v3136_v43  ;;  %v3137_v57 = vadd.f32 %v3125_v62, %v10456_v6 }
0x117d   :  { %v3146_v13 = vmul.f32 0.7978846, %v3134_v52  ;;  %v3135_v59 = vadd.f32 %v3123_v41, %v3079_v49  ;;  %v8478_v26 = vpop.eup %8477 }
0x117e   :  { %8485 = vtanh.f32 %v3148_v58  ;;  %v3149_v40 = vmul.f32 0.7978846, %v3137_v57  ;;  %v8480_v27 = vpop.eup %8479  ;;  %v3168_v23 = vadd.f32 1.0, %v8478_v26 }
0x117f   :  { %8487 = vtanh.f32 %v3146_v13  ;;  %v3147_v28 = vmul.f32 0.7978846, %v3135_v59  ;;  %v8482_v15 = vpop.eup %8481  ;;  %v3166_v11 = vadd.f32 1.0, %v8480_v27 }
0x1180   :  { %8489 = vtanh.f32 %v3149_v40  ;;  %v8484_v12 = vpop.eup %8483  ;;  %v3169_v4 = vadd.f32 1.0, %v8482_v15  ;;  %v3180_v46 = vmul.f32 0.5, %v3168_v23 }
0x1181   :  { %8491 = vtanh.f32 %v3147_v28  ;;  %v3167_v9 = vadd.f32 1.0, %v8484_v12  ;;  %v3178_v60 = vmul.f32 0.5, %v3166_v11 }
0x1182   :  { %v3181_v10 = vmul.f32 0.5, %v3169_v4  ;;  %v3192_v24 = vmul.f32 %v3180_v46, %v10420_v16 }
0x1183   :  { %v3179_v31 = vmul.f32 0.5, %v3167_v9  ;;  %v3190_v33 = vmul.f32 %v3178_v60, %v10423_v63 }
0x1184   :  { %v3193_v29 = vmul.f32 %v3181_v10, %v10428_v48 }
0x1185   :  { %v3191_v35 = vmul.f32 %v3179_v31, %v10433_v53 }
0x1186   :  { %v3201_v1 = vpack.c.bf16 %v3193_v29, %v3192_v24 }
0x1187   :  { %v3200_v19 = vpack.c.bf16 %v3191_v35, %v3190_v33 }
0x1188   :  { %v8486_v21 = vpop.eup %8485 }
0x1189   :  { %v8488_v0 = vpop.eup %8487  ;;  %v3172_v51 = vadd.f32 1.0, %v8486_v21  ;;  %7613 = vmatprep.mubr.bf16.mxu1 %v3200_v19 }
0x118a   :  { %v8490_v5 = vpop.eup %8489  ;;  %v3170_v37 = vadd.f32 1.0, %v8488_v0  ;;  %7614 = vmatmul.mubr.bf16.gmra.mrb[116].mxu1 %v3201_v1 }
0x118b   :  { %v8492_v42 = vpop.eup %8491  ;;  %v3173_v14 = vadd.f32 1.0, %v8490_v5  ;;  %v3184_v17 = vmul.f32 0.5, %v3172_v51 }
0x118c   :  { %v3171_v61 = vadd.f32 1.0, %v8492_v42  ;;  %v3182_v16 = vmul.f32 0.5, %v3170_v37 }
0x118d   :  { %v3185_v3 = vmul.f32 0.5, %v3173_v14  ;;  %v3196_v63 = vmul.f32 %v3184_v17, %v10447_v32 }
0x118e   :  { %v3183_v48 = vmul.f32 0.5, %v3171_v61  ;;  %v3194_v18 = vmul.f32 %v3182_v16, %v10451_v8 }
0x118f   :  { %v3197_v53 = vmul.f32 %v3185_v3, %v10456_v6 }
0x1190   :  { %v3195_v2 = vmul.f32 %v3183_v48, %v3079_v49 }
0x1191   :  { %v3203_v45 = vpack.c.bf16 %v3197_v53, %v3196_v63 }
0x1192   :  { %v3202_v36 = vpack.c.bf16 %v3195_v2, %v3194_v18 }
0x1194   :  { %7617 = vmatprep.mubr.bf16.mxu1 %v3202_v36 }
0x1195   :  { %7618 = vmatmul.mubr.bf16.gmra.mrb[120].mxu1 %v3203_v45 }
0x1196   :  { %7643 = vmatprep.mubr.msk.bf16.mxu1 %vm8807_vm2, %v12254_v50 }
0x1221   :  { %v7611_v43 = vpop.f32.mrb[112].mxu1 }
0x1222   :  { %v3309_v62 = vpop.f32.mrb[113].mxu1  ;;  %v3318_v52 = vadd.f32 %v7611_v43, %v6818_v39 }
0x1223   :  { %v3310_v32 = vadd.f32 %v6818_v39, %v3309_v62  ;;  %v7612_v41 = vpop.f32.mrb[114].mxu1 }
0x1224   :  { %v3312_v6 = vpop.f32.mrb[115].mxu1  ;;  %v3321_v49 = vadd.f32 %v7612_v41, %v6818_v39  ;;  %v10485_v57 = vadd.f32 %v3318_v52, %v10200_v34 }
0x1225   :  { %v10482_v8 = vadd.f32 %v3310_v32, %v10197_v47  ;;  %v3313_v58 = vadd.f32 %v6818_v39, %v3312_v6  ;;  %v8215_v6 = vld [vmem:[%s12183_s5 + $0x10] sm:$0xff]  }
0x1226   :  { %12282 = vst [vmem:[#allocation17_spill] sm:$0xff] %v10485_v57  ;;  %v10493_v26 = vadd.f32 %v3321_v49, %v10209_v25  ;;  %v3378_v47 = vsel %vm262_vm1, %v10485_v57, 0.0  ;;  %7621 = vmatprep.subr.bf16.mxu0 %v8215_v6  ;;  %v8216_v49 = vld [vmem:[%s12183_s5 + $0x18] sm:$0xff]  }
0x1227   :  { %12281 = vst [vmem:[#allocation18_spill] sm:$0xff] %v10482_v8  ;;  %v10488_v13 = vadd.f32 %v3313_v58, %v10203_v55  ;;  %v3372_v59 = vsel %vm262_vm1, %v10482_v8, 0.0  ;;  %7622 = vmatpush3.bf16.msra.mxu0 %v8215_v6 }
0x1228   :  { %3373 = vadd.xlane.f32.xlu0 %v3372_v59  ;;  %12284 = vst [vmem:[#allocation6_spill] sm:$0xff] %v10493_v26  ;;  %v3381_v34 = vsel %vm262_vm1, %v10493_v26, 0.0  ;;  %7623 = vmatprep.subr.bf16.mxu0 %v8216_v49 }
0x1229   :  { %12283 = vst [vmem:[#allocation5_spill] sm:$0xff] %v10488_v13  ;;  %v3375_v40 = vsel %vm262_vm1, %v10488_v13, 0.0 }
0x122a   :  { %3376 = vadd.xlane.f32.xlu1 %v3375_v40 }
0x122b   :  { %7624 = vmatpush3.bf16.msra.mxu0 %v8216_v49 }
0x122c   :  { %3379 = vadd.xlane.f32.xlu0 %v3378_v47  ;;  %7655 = vmatprep.subr.bf16.mxu0 %v12254_v50 }
0x122e   :  { %3382 = vadd.xlane.f32.xlu1 %v3381_v34 }
0x125d   :  { %v7615_v55 = vpop.f32.mrb[116].mxu1 }
0x125e   :  { %v3325_v27 = vpop.f32.mrb[117].mxu1  ;;  %v3334_v28 = vadd.f32 %v7615_v55, %v6818_v39 }
0x125f   :  { %v3326_v23 = vadd.f32 %v6818_v39, %v3325_v27  ;;  %v7616_v15 = vpop.f32.mrb[118].mxu1 }
0x1260   :  { %v3328_v11 = vpop.f32.mrb[119].mxu1  ;;  %v3337_v12 = vadd.f32 %v7616_v15, %v6818_v39  ;;  %v10505_v46 = vadd.f32 %v3334_v28, %v10221_v22 }
0x1261   :  { %v10502_v25 = vadd.f32 %v3326_v23, %v10217_v54  ;;  %v3329_v4 = vadd.f32 %v6818_v39, %v3328_v11 }
0x1262   :  { %12286 = vst [vmem:[#allocation7_spill] sm:$0xff] %v10505_v46  ;;  %v10513_v10 = vadd.f32 %v3337_v12, %v10227_v20  ;;  %v3390_v54 = vsel %vm262_vm1, %v10505_v46, 0.0 }
0x1263   :  { %12285 = vst [vmem:[#allocation8_spill] sm:$0xff] %v10502_v25  ;;  %v10508_v9 = vadd.f32 %v3329_v4, %v10223_v38  ;;  %v3384_v60 = vsel %vm262_vm1, %v10502_v25, 0.0 }
0x1264   :  { %3385 = vadd.xlane.f32.xlu0 %v3384_v60  ;;  %12288 = vst [vmem:[#allocation9_spill] sm:$0xff] %v10513_v10  ;;  %v3393_v33 = vsel %vm262_vm1, %v10513_v10, 0.0 }
0x1265   :  { %12287 = vst [vmem:[#allocation10_spill] sm:$0xff] %v10508_v9  ;;  %v3387_v31 = vsel %vm262_vm1, %v10508_v9, 0.0 }
0x1266   :  { %3388 = vadd.xlane.f32.xlu1 %v3387_v31 }
0x1268   :  { %v7619_v24 = vpop.f32.mrb[120].mxu1  ;;  %3391 = vadd.xlane.f32.xlu0 %v3390_v54 }
0x1269   :  { %v3341_v22 = vpop.f32.mrb[121].mxu1  ;;  %v3350_v29 = vadd.f32 %v7619_v24, %v6818_v39 }
0x126a   :  { %v3342_v38 = vadd.f32 %v6818_v39, %v3341_v22  ;;  %v7620_v35 = vpop.f32.mrb[122].mxu1  ;;  %3394 = vadd.xlane.f32.xlu1 %v3393_v33 }
0x126b   :  { %v3344_v1 = vpop.f32.mrb[123].mxu1  ;;  %v3353_v21 = vadd.f32 %v7620_v35, %v6818_v39  ;;  %v10525_v0 = vadd.f32 %v3350_v29, %v10241_v30 }
0x126c   :  { %v10522_v20 = vadd.f32 %v3342_v38, %v10237_v7  ;;  %v3345_v19 = vadd.f32 %v6818_v39, %v3344_v1 }
0x126d   :  { %12290 = vst [vmem:[#allocation11_spill] sm:$0xff] %v10525_v0  ;;  %v10533_v37 = vadd.f32 %v3353_v21, %v10247_v56  ;;  %v3402_v7 = vsel %vm262_vm1, %v10525_v0, 0.0 }
0x126e   :  { %12289 = vst [vmem:[#allocation12_spill] sm:$0xff] %v10522_v20  ;;  %v10528_v51 = vadd.f32 %v3345_v19, %v10243_v44  ;;  %v3396_v5 = vsel %vm262_vm1, %v10522_v20, 0.0 }
0x126f   :  { %3397 = vadd.xlane.f32.xlu0 %v3396_v5  ;;  %12292 = vst [vmem:[#allocation14_spill] sm:$0xff] %v10533_v37  ;;  %v3405_v30 = vsel %vm262_vm1, %v10533_v37, 0.0 }
0x1270   :  { %12291 = vst [vmem:[#allocation13_spill] sm:$0xff] %v10528_v51  ;;  %v3399_v42 = vsel %vm262_vm1, %v10528_v51, 0.0 }
0x1271   :  { %3400 = vadd.xlane.f32.xlu1 %v3399_v42 }
0x1273   :  { %3403 = vadd.xlane.f32.xlu0 %v3402_v7 }
0x1275   :  { %3406 = vadd.xlane.f32.xlu1 %v3405_v30 }
0x12b5   :  { %v3374_v44 = vpop.xlane.xlu0 %3373 }
0x12b6   :  { %v3408_v14 = vmul.f32 0.03125, %v3374_v44 }
0x12b7   :  { %v3377_v17 = vpop.xlane.xlu1 %3376 }
0x12b8   :  { %v10542_v61 = vsub.f32 %v10482_v8, %v3408_v14  ;;  %v3409_v56 = vmul.f32 0.03125, %v3377_v17 }
0x12b9   :  { %v3380_v16 = vpop.xlane.xlu0 %3379 }
0x12ba   :  { %v10545_v3 = vsub.f32 %v10488_v13, %v3409_v56  ;;  %v3410_v48 = vmul.f32 0.03125, %v3380_v16  ;;  %v3432_v63 = vmul.f32 %v10542_v61, %v10542_v61 }
0x12bb   :  { %v3383_v53 = vpop.xlane.xlu1 %3382 }
0x12bc   :  { %v10550_v18 = vsub.f32 %v10485_v57, %v3410_v48  ;;  %v3411_v2 = vmul.f32 0.03125, %v3383_v53  ;;  %v3444_v45 = vsel %vm262_vm1, %v3432_v63, 0.0  ;;  %v3433_v36 = vmul.f32 %v10545_v3, %v10545_v3 }
0x12bd   :  { %3445 = vadd.xlane.f32.xlu0 %v3444_v45 }
0x12be   :  { %v10556_v39 = vsub.f32 %v10493_v26, %v3411_v2  ;;  %v3447_v43 = vsel %vm262_vm1, %v3433_v36, 0.0  ;;  %v3434_v62 = vmul.f32 %v10550_v18, %v10550_v18 }
0x12bf   :  { %3448 = vadd.xlane.f32.xlu1 %v3447_v43 }
0x12c0   :  { %v3450_v52 = vsel %vm262_vm1, %v3434_v62, 0.0  ;;  %v3435_v32 = vmul.f32 %v10556_v39, %v10556_v39 }
0x12c1   :  { %3451 = vadd.xlane.f32.xlu0 %v3450_v52 }
0x12c2   :  { %v3453_v41 = vsel %vm262_vm1, %v3435_v32, 0.0 }
0x12c3   :  { %3454 = vadd.xlane.f32.xlu1 %v3453_v41 }
0x12f1   :  { %v3386_v58 = vpop.xlane.xlu0 %3385 }
0x12f2   :  { %v3412_v59 = vmul.f32 0.03125, %v3386_v58 }
0x12f3   :  { %v3389_v40 = vpop.xlane.xlu1 %3388 }
0x12f4   :  { %v10573_v47 = vsub.f32 %v10502_v25, %v3412_v59  ;;  %v3413_v34 = vmul.f32 0.03125, %v3389_v40 }
0x12f5   :  { %v3392_v55 = vpop.xlane.xlu0 %3391 }
0x12f6   :  { %v10576_v27 = vsub.f32 %v10508_v9, %v3413_v34  ;;  %v3414_v28 = vmul.f32 0.03125, %v3392_v55  ;;  %v3436_v23 = vmul.f32 %v10573_v47, %v10573_v47 }
0x12f7   :  { %v3395_v15 = vpop.xlane.xlu1 %3394 }
0x12f8   :  { %v10581_v11 = vsub.f32 %v10505_v46, %v3414_v28  ;;  %v3415_v12 = vmul.f32 0.03125, %v3395_v15  ;;  %v3456_v4 = vsel %vm262_vm1, %v3436_v23, 0.0  ;;  %v3437_v60 = vmul.f32 %v10576_v27, %v10576_v27  ;;  %v10623_v23 = vld [vmem:[%s12181_s3 + $0x1] ss:$0 sm:$0xff] }
0x12f9   :  { %3457 = vadd.xlane.f32.xlu0 %v3456_v4 }
0x12fa   :  { %v10587_v31 = vsub.f32 %v10513_v10, %v3415_v12  ;;  %v3459_v54 = vsel %vm262_vm1, %v3437_v60, 0.0  ;;  %v3438_v24 = vmul.f32 %v10581_v11, %v10581_v11 }
0x12fb   :  { %3460 = vadd.xlane.f32.xlu1 %v3459_v54 }
0x12fc   :  { %v3398_v22 = vpop.xlane.xlu0 %3397  ;;  %v3462_v38 = vsel %vm262_vm1, %v3438_v24, 0.0  ;;  %v3439_v33 = vmul.f32 %v10587_v31, %v10587_v31  ;;  %v10631_v24 = vld [vmem:[%s12182_s4 + $0x1] ss:$0 sm:$0xff] }
0x12fd   :  { %v3416_v29 = vmul.f32 0.03125, %v3398_v22  ;;  %3463 = vadd.xlane.f32.xlu0 %v3462_v38 }
0x12fe   :  { %v3401_v35 = vpop.xlane.xlu1 %3400  ;;  %v3465_v19 = vsel %vm262_vm1, %v3439_v33, 0.0 }
0x12ff   :  { %v10596_v1 = vsub.f32 %v10522_v20, %v3416_v29  ;;  %v3417_v21 = vmul.f32 0.03125, %v3401_v35  ;;  %3466 = vadd.xlane.f32.xlu1 %v3465_v19 }
0x1300   :  { %v3404_v5 = vpop.xlane.xlu0 %3403 }
0x1301   :  { %v10600_v42 = vsub.f32 %v10528_v51, %v3417_v21  ;;  %v3418_v7 = vmul.f32 0.03125, %v3404_v5  ;;  %v3440_v30 = vmul.f32 %v10596_v1, %v10596_v1 }
0x1302   :  { %v3407_v44 = vpop.xlane.xlu1 %3406 }
0x1303   :  { %v10605_v14 = vsub.f32 %v10525_v0, %v3418_v7  ;;  %v3419_v17 = vmul.f32 0.03125, %v3407_v44  ;;  %v3468_v56 = vsel %vm262_vm1, %v3440_v30, 0.0  ;;  %v3441_v16 = vmul.f32 %v10600_v42, %v10600_v42 }
0x1304   :  { %3469 = vadd.xlane.f32.xlu0 %v3468_v56 }
0x1305   :  { %v10611_v48 = vsub.f32 %v10533_v37, %v3419_v17  ;;  %v3471_v63 = vsel %vm262_vm1, %v3441_v16, 0.0  ;;  %v3442_v53 = vmul.f32 %v10605_v14, %v10605_v14 }
0x1306   :  { %3472 = vadd.xlane.f32.xlu1 %v3471_v63 }
0x1307   :  { %v3474_v2 = vsel %vm262_vm1, %v3442_v53, 0.0  ;;  %v3443_v45 = vmul.f32 %v10611_v48, %v10611_v48 }
0x1308   :  { %3475 = vadd.xlane.f32.xlu0 %v3474_v2 }
0x1309   :  { %v3477_v36 = vsel %vm262_vm1, %v3443_v45, 0.0 }
0x130a   :  { %3478 = vadd.xlane.f32.xlu1 %v3477_v36 }
0x134a   :  { %v3446_v43 = vpop.xlane.xlu0 %3445 }
0x134b   :  { %v3480_v62 = vmul.f32 0.03125, %v3446_v43 }
0x134c   :  { %v3449_v52 = vpop.xlane.xlu1 %3448 }
0x134d   :  { %v3492_v32 = vadd.f32 1e-05, %v3480_v62  ;;  %v3481_v41 = vmul.f32 0.03125, %v3449_v52 }
0x134e   :  { %v3452_v6 = vpop.xlane.xlu0 %3451 }
0x134f   :  { %8493 = vrsqrt.f32 %v3492_v32  ;;  %v3493_v49 = vadd.f32 1e-05, %v3481_v41  ;;  %v3482_v58 = vmul.f32 0.03125, %v3452_v6 }
0x1350   :  { %v3455_v59 = vpop.xlane.xlu1 %3454 }
0x1351   :  { %8495 = vrsqrt.f32 %v3493_v49  ;;  %v3494_v40 = vadd.f32 1e-05, %v3482_v58  ;;  %v3483_v34 = vmul.f32 0.03125, %v3455_v59 }
0x1353   :  { %8497 = vrsqrt.f32 %v3494_v40  ;;  %v3495_v55 = vadd.f32 1e-05, %v3483_v34 }
0x1355   :  { %8499 = vrsqrt.f32 %v3495_v55 }
0x1359   :  { %v8494_v28 = vpop.eup %8493 }
0x135a   :  { %v3516_v15 = vmul.f32 %v8494_v28, %v10542_v61 }
0x135b   :  { %v8496_v12 = vpop.eup %8495 }
0x135c   :  { %v3517_v4 = vmul.f32 %v8496_v12, %v10545_v3  ;;  %v3534_v60 = vmul.f32 %v10623_v23, %v3516_v15 }
0x135d   :  { %v8498_v54 = vpop.eup %8497 }
0x135e   :  { %v3518_v22 = vmul.f32 %v8498_v54, %v10550_v18  ;;  %v3535_v29 = vmul.f32 %v10623_v23, %v3517_v4  ;;  %v3552_v35 = vadd.f32 %v10631_v24, %v3534_v60 }
0x135f   :  { %v8500_v38 = vpop.eup %8499 }
0x1360   :  { %v3536_v33 = vmul.f32 %v10623_v23, %v3518_v22  ;;  %v3519_v61 = vmul.f32 %v8500_v38, %v10556_v39  ;;  %v3553_v3 = vadd.f32 %v10631_v24, %v3535_v29 }
0x1362   :  { %v3537_v21 = vmul.f32 %v10623_v23, %v3519_v61  ;;  %v3564_v19 = vpack.c.bf16 %v3553_v3, %v3552_v35  ;;  %v3554_v5 = vadd.f32 %v10631_v24, %v3536_v33 }
0x1364   :  { %v3555_v7 = vadd.f32 %v10631_v24, %v3537_v21  ;;  %7625 = vmatprep.mubr.msk.bf16.mxu0 %vm262_vm1, %v3564_v19 }
0x1366   :  { %v3565_v18 = vpack.c.bf16 %v3555_v7, %v3554_v5 }
0x1368   :  { %7626 = vmatmul.mubr.msk.bf16.vlgmr.msra.gmra.mrb[128].mxu0 %vm262_vm1, %v3565_v18 }
0x1386   :  { %v3458_v30 = vpop.xlane.xlu0 %3457 }
0x1387   :  { %v3484_v44 = vmul.f32 0.03125, %v3458_v30 }
0x1388   :  { %v3461_v17 = vpop.xlane.xlu1 %3460 }
0x1389   :  { %v3496_v39 = vadd.f32 1e-05, %v3484_v44  ;;  %v3485_v56 = vmul.f32 0.03125, %v3461_v17 }
0x138a   :  { %v3464_v16 = vpop.xlane.xlu0 %3463 }
0x138b   :  { %8501 = vrsqrt.f32 %v3496_v39  ;;  %v3497_v63 = vadd.f32 1e-05, %v3485_v56  ;;  %v3486_v53 = vmul.f32 0.03125, %v3464_v16 }
0x138c   :  { %v3467_v2 = vpop.xlane.xlu1 %3466 }
0x138d   :  { %8503 = vrsqrt.f32 %v3497_v63  ;;  %v3498_v45 = vadd.f32 1e-05, %v3486_v53  ;;  %v3487_v36 = vmul.f32 0.03125, %v3467_v2 }
0x138f   :  { %8505 = vrsqrt.f32 %v3498_v45  ;;  %v3499_v43 = vadd.f32 1e-05, %v3487_v36 }
0x1391   :  { %v3470_v62 = vpop.xlane.xlu0 %3469  ;;  %8507 = vrsqrt.f32 %v3499_v43 }
0x1392   :  { %v3488_v52 = vmul.f32 0.03125, %v3470_v62 }
0x1393   :  { %v3473_v32 = vpop.xlane.xlu1 %3472 }
0x1394   :  { %v3500_v41 = vadd.f32 1e-05, %v3488_v52  ;;  %v3489_v6 = vmul.f32 0.03125, %v3473_v32 }
0x1395   :  { %v3476_v49 = vpop.xlane.xlu0 %3475  ;;  %v8502_v58 = vpop.eup %8501 }
0x1396   :  { %8509 = vrsqrt.f32 %v3500_v41  ;;  %v3501_v59 = vadd.f32 1e-05, %v3489_v6  ;;  %v3490_v40 = vmul.f32 0.03125, %v3476_v49  ;;  %v3520_v55 = vmul.f32 %v8502_v58, %v10573_v47 }
0x1397   :  { %v3479_v34 = vpop.xlane.xlu1 %3478  ;;  %v8504_v28 = vpop.eup %8503 }
0x1398   :  { %8511 = vrsqrt.f32 %v3501_v59  ;;  %v3502_v15 = vadd.f32 1e-05, %v3490_v40  ;;  %v3491_v12 = vmul.f32 0.03125, %v3479_v34  ;;  %v3521_v4 = vmul.f32 %v8504_v28, %v10576_v27 }
0x1399   :  { %v3538_v60 = vmul.f32 %v10623_v23, %v3520_v55  ;;  %v8506_v54 = vpop.eup %8505 }
0x139a   :  { %8513 = vrsqrt.f32 %v3502_v15  ;;  %v3503_v22 = vadd.f32 1e-05, %v3491_v12  ;;  %v3539_v29 = vmul.f32 %v10623_v23, %v3521_v4  ;;  %v3522_v38 = vmul.f32 %v8506_v54, %v10581_v11 }
0x139b   :  { %v8508_v33 = vpop.eup %8507  ;;  %v3556_v61 = vadd.f32 %v10631_v24, %v3538_v60 }
0x139c   :  { %8515 = vrsqrt.f32 %v3503_v22  ;;  %v3557_v47 = vadd.f32 %v10631_v24, %v3539_v29  ;;  %v3523_v35 = vmul.f32 %v8508_v33, %v10587_v31  ;;  %v3540_v3 = vmul.f32 %v10623_v23, %v3522_v38 }
0x139e   :  { %v3566_v27 = vpack.c.bf16 %v3557_v47, %v3556_v61  ;;  %v3541_v21 = vmul.f32 %v10623_v23, %v3523_v35  ;;  %v3558_v5 = vadd.f32 %v10631_v24, %v3540_v3 }
0x13a0   :  { %v8510_v19 = vpop.eup %8509  ;;  %7629 = vmatprep.mubr.msk.bf16.mxu0 %vm262_vm1, %v3566_v27  ;;  %v3559_v11 = vadd.f32 %v10631_v24, %v3541_v21 }
0x13a1   :  { %v3524_v7 = vmul.f32 %v8510_v19, %v10596_v1 }
0x13a2   :  { %v8512_v18 = vpop.eup %8511  ;;  %v3567_v30 = vpack.c.bf16 %v3559_v11, %v3558_v5 }
0x13a3   :  { %v3525_v44 = vmul.f32 %v8512_v18, %v10600_v42  ;;  %v3542_v31 = vmul.f32 %v10623_v23, %v3524_v7 }
0x13a4   :  { %v8514_v17 = vpop.eup %8513  ;;  %7630 = vmatmul.mubr.msk.bf16.gmra.mrb[132].mxu0 %vm262_vm1, %v3567_v30 }
0x13a5   :  { %v3543_v39 = vmul.f32 %v10623_v23, %v3525_v44  ;;  %v3526_v56 = vmul.f32 %v8514_v17, %v10605_v14  ;;  %v3560_v63 = vadd.f32 %v10631_v24, %v3542_v31 }
0x13a6   :  { %v8516_v16 = vpop.eup %8515 }
0x13a7   :  { %v3561_v53 = vadd.f32 %v10631_v24, %v3543_v39  ;;  %v3527_v1 = vmul.f32 %v8516_v16, %v10611_v48  ;;  %v3544_v2 = vmul.f32 %v10623_v23, %v3526_v56  ;;  %v6836_v48 = vld [vmem:[%s12184_s6 + $0x1] ss:$0 sm:$0xff]  ;;  %s12296_s6 = smov 72  }
0x13a9   :  { %v3568_v45 = vpack.c.bf16 %v3561_v53, %v3560_v63  ;;  %v3545_v42 = vmul.f32 %v10623_v23, %v3527_v1  ;;  %v3562_v36 = vadd.f32 %v10631_v24, %v3544_v2 }
0x13ab   :  { %7633 = vmatprep.mubr.msk.bf16.mxu0 %vm262_vm1, %v3568_v45  ;;  %v3563_v43 = vadd.f32 %v10631_v24, %v3545_v42 }
0x13ad   :  { %v3569_v62 = vpack.c.bf16 %v3563_v43, %v3562_v36 }
0x13af   :  { %7634 = vmatmul.mubr.msk.bf16.gmra.mrb[136].mxu0 %vm262_vm1, %v3569_v62 }
0x13b0   :  { %7661 = vmatprep.mubr.msk.bf16.mxu0 %vm8807_vm2, %v12254_v50 }
0x143b   :  { %v7627_v14 = vpop.f32.mrb[128].mxu0 }
0x143c   :  { %v3647_v52 = vpop.f32.mrb[129].mxu0  ;;  %v3656_v23 = vadd.f32 %v7627_v14, %v6836_v48 }
0x143d   :  { %v7628_v32 = vpop.f32.mrb[130].mxu0  ;;  %v3648_v49 = vadd.f32 %v6836_v48, %v3647_v52 }
0x143e   :  { %v3659_v41 = vadd.f32 %v7628_v32, %v6836_v48  ;;  %v3650_v6 = vpop.f32.mrb[131].mxu0 }
0x143f   :  { %v3651_v58 = vadd.f32 %v6836_v48, %v3650_v6 }
0x1440   :  { %v10677_v59 = vpack.c.bf16 %v3659_v41, %v3656_v23 }
0x1441   :  { %v10679_v24 = vpack.c.bf16 %v3651_v58, %v3648_v49 }
0x1442   :  { %3705 = vrot.lane.b32.xlu1 %v10677_v59, %s8806_s23 }
0x1443   :  { %3703 = vrot.lane.b32.xlu0 %v10679_v24, %s8806_s23 }
0x1477   :  { %v7631_v40 = vpop.f32.mrb[132].mxu0 }
0x1478   :  { %v3663_v34 = vpop.f32.mrb[133].mxu0  ;;  %v3672_v28 = vadd.f32 %v7631_v40, %v6836_v48 }
0x1479   :  { %v7632_v55 = vpop.f32.mrb[134].mxu0  ;;  %v3664_v4 = vadd.f32 %v6836_v48, %v3663_v34 }
0x147a   :  { %v3675_v15 = vadd.f32 %v7632_v55, %v6836_v48  ;;  %v3666_v12 = vpop.f32.mrb[135].mxu0 }
0x147b   :  { %v3667_v60 = vadd.f32 %v6836_v48, %v3666_v12 }
0x147c   :  { %v10685_v54 = vpack.c.bf16 %v3675_v15, %v3672_v28 }
0x147d   :  { %v10687_v22 = vpack.c.bf16 %v3667_v60, %v3664_v4 }
0x147e   :  { %3787 = vrot.lane.b32.xlu1 %v10685_v54, %s8806_s23 }
0x1482   :  { %v7635_v29 = vpop.f32.mrb[136].mxu0  ;;  %3707 = vrot.lane.b32.xlu1 %v10687_v22, %s8806_s23 }
0x1483   :  { %v3679_v38 = vpop.f32.mrb[137].mxu0  ;;  %v3688_v61 = vadd.f32 %v7635_v29, %v6836_v48 }
0x1484   :  { %v7636_v33 = vpop.f32.mrb[138].mxu0  ;;  %v3680_v3 = vadd.f32 %v6836_v48, %v3679_v38 }
0x1485   :  { %v3691_v47 = vadd.f32 %v7636_v33, %v6836_v48  ;;  %v3682_v35 = vpop.f32.mrb[139].mxu0 }
0x1486   :  { %v3683_v27 = vadd.f32 %v6836_v48, %v3682_v35 }
0x1487   :  { %v10693_v21 = vpack.c.bf16 %v3691_v47, %v3688_v61 }
0x1488   :  { %v10695_v19 = vpack.c.bf16 %v3683_v27, %v3680_v3 }
0x1489   :  { %3791 = vrot.lane.b32.xlu1 %v10693_v21, %s8806_s23 }
0x148a   :  { %3789 = vrot.lane.b32.xlu0 %v10695_v19, %s8806_s23  ;;  %s12297_s23 = smov 104  }
0x148d   :  { %4008 = vrot.lane.b32.xlu1 %v10677_v59, %s8808_s24 }
0x148e   :  { %4006 = vrot.lane.b32.xlu0 %v10679_v24, %s8808_s24 }
0x1491   :  { %4162 = vrot.lane.b32.xlu1 %v10679_v24, %s8809_s25 }
0x1492   :  { %4010 = vrot.lane.b32.xlu0 %v10687_v22, %s8808_s24 }
0x1495   :  { %4164 = vrot.lane.b32.xlu1 %v10677_v59, %s8809_s25 }
0x1496   :  { %4081 = vrot.lane.b32.xlu0 %v10685_v54, %s8808_s24 }
0x149a   :  { %4085 = vrot.lane.b32.xlu0 %v10693_v21, %s8808_s24 }
0x149e   :  { %4083 = vrot.lane.b32.xlu0 %v10695_v19, %s8808_s24  ;;  %s12298_s24 = smov 40  }
0x14b4   :  { %v3706_v7 = vpop.permute.xlu1 %3705 }
0x14b5   :  { %v3704_v5 = vpop.permute.xlu0 %3703  ;;  %v3722_v18 = vsel %vm599_vm3, %v3706_v7, 0 }
0x14b6   :  { %v3719_v11 = vsel %vm599_vm3, %v3704_v5, 0 }
0x14b7   :  { %7638 = vmatpush3.bf16.xpose.msra.mxu1 %v3719_v11 }
0x14b8   :  { %7639 = vmatprep.subr.bf16.mxu1 %v12254_v50 }
0x14bf   :  { %7640 = vmatpush3.bf16.xpose.msra.mxu1 %v3722_v18 }
0x14c0   :  { %7641 = vmatprep.subr.bf16.mxu1 %v12254_v50 }
0x14f0   :  { %v3788_v30 = vpop.permute.xlu1 %3787 }
0x14f1   :  { %v3803_v44 = vsel %vm599_vm3, %v3788_v30, 0 }
0x14f2   :  { %7656 = vmatpush3.bf16.xpose.msra.mxu0 %v3803_v44 }
0x14f3   :  { %7657 = vmatprep.subr.bf16.mxu0 %v12254_v50 }
0x14f4   :  { %v3708_v31 = vpop.permute.xlu1 %3707 }
0x14f5   :  { %v3725_v17 = vsel %vm599_vm3, %v3708_v31, 0 }
0x14f6   :  { %7642 = vmatpush3.bf16.xpose.msra.mxu1 %v3725_v17 }
0x14f7   :  { %7673 = vmatprep.subr.bf16.mxu1 %v12254_v50 }
0x14fb   :  { %v3792_v16 = vpop.permute.xlu1 %3791 }
0x14fc   :  { %v3790_v39 = vpop.permute.xlu0 %3789  ;;  %v3809_v2 = vsel %vm599_vm3, %v3792_v16, 0 }
0x14fd   :  { %v3806_v56 = vsel %vm599_vm3, %v3790_v39, 0  ;;  %7644 = vmatmul.mubr.msk.bf16.vlgmr.msra.gmra.mrb[124].mxu1 %vm599_vm3, %v10679_v24 }
0x14fe   :  { %7658 = vmatpush3.bf16.xpose.msra.mxu0 %v3806_v56  ;;  %7647 = vmatprep.mubr.msk.bf16.mxu1 %vm8807_vm2, %v12254_v50 }
0x14ff   :  { %7659 = vmatprep.subr.bf16.mxu0 %v12254_v50  ;;  %v4009_v53 = vpop.permute.xlu1 %4008 }
0x1500   :  { %v4007_v63 = vpop.permute.xlu0 %4006 }
0x1501   :  { %7674 = vmatpush3.bf16.msra.mxu1 %v4007_v63 }
0x1502   :  { %7675 = vmatprep.subr.bf16.mxu1 %v12254_v50 }
0x1503   :  { %v10796_v56 = vpop.permute.xlu1 %4162 }
0x1504   :  { %v4011_v1 = vpop.permute.xlu0 %4010 }
0x1505   :  { %7676 = vmatpush3.bf16.msra.mxu1 %v4009_v53 }
0x1506   :  { %7648 = vmatmul.mubr.msk.bf16.gmra.mrb[128].mxu1 %vm599_vm3, %v10677_v59  ;;  %7660 = vmatpush3.bf16.xpose.msra.mxu0 %v3809_v2 }
0x1507   :  { %7677 = vmatprep.subr.bf16.mxu1 %v12254_v50  ;;  %7651 = vmatprep.mubr.msk.bf16.mxu1 %vm8807_vm2, %v12254_v50  ;;  %v10798_v16 = vpop.permute.xlu1 %4164 }
0x1508   :  { %v4082_v45 = vpop.permute.xlu0 %4081  ;;  %7691 = vmatprep.subr.bf16.mxu0 %v12254_v50 }
0x1509   :  { %7678 = vmatpush3.bf16.msra.mxu1 %v4011_v1 }
0x150a   :  { %7709 = vmatprep.subr.bf16.mxu1 %v12254_v50 }
0x150c   :  { %v4086_v42 = vpop.permute.xlu0 %4085 }
0x150d   :  { %7662 = vmatmul.mubr.msk.bf16.vlgmr.msra.gmra.mrb[140].mxu0 %vm599_vm3, %v10685_v54 }
0x150e   :  { %7652 = vmatmul.mubr.msk.bf16.gmra.mrb[132].mxu1 %vm599_vm3, %v10687_v22  ;;  %7692 = vmatpush3.bf16.msra.mxu0 %v4082_v45 }
0x150f   :  { %7693 = vmatprep.subr.bf16.mxu0 %v12254_v50  ;;  %7665 = vmatprep.mubr.msk.bf16.mxu0 %vm8807_vm2, %v12254_v50 }
0x1510   :  { %v4084_v36 = vpop.permute.xlu0 %4083  ;;  %7679 = vmatprep.mubr.msk.bf16.mxu1 %vm8807_vm2, %v12254_v50 }
0x1512   :  { %7694 = vmatpush3.bf16.msra.mxu0 %v4084_v36 }
0x1513   :  { %7695 = vmatprep.subr.bf16.mxu0 %v12254_v50 }
0x1515   :  { %7666 = vmatmul.mubr.msk.bf16.gmra.mrb[144].mxu0 %vm599_vm3, %v10695_v19 }
0x1516   :  { %7696 = vmatpush3.bf16.msra.mxu0 %v4086_v42  ;;  %7669 = vmatprep.mubr.msk.bf16.mxu0 %vm8807_vm2, %v12254_v50 }
0x1517   :  { %7727 = vmatprep.subr.bf16.mxu0 %v12254_v50 }
0x151d   :  { %7670 = vmatmul.mubr.msk.bf16.gmra.mrb[148].mxu0 %vm599_vm3, %v10693_v21 }
0x151e   :  { %7697 = vmatprep.mubr.msk.bf16.mxu0 %vm8807_vm2, %v12254_v50 }
0x15d0   :  { %v3761_v43 = vpop.f32.mrb[124].mxu1 }
0x15d1   :  { %v7645_v62 = vpop.f32.mrb[125].mxu1  ;;  %v3868_v14 = vsel %vm759_vm4, %v3761_v43, -inf }
0x15d2   :  { %3869 = vmax.xlane.f32.xlu0 %v3868_v14  ;;  %v3764_v48 = vpop.f32.mrb[126].mxu1 }
0x15d3   :  { %v7646_v52 = vpop.f32.mrb[127].mxu1  ;;  %v3871_v32 = vsel %vm759_vm4, %v3764_v48, -inf }
0x15d4   :  { %3872 = vmax.xlane.f32.xlu1 %v3871_v32 }
0x15d9   :  { %v3769_v23 = vpop.f32.mrb[128].mxu1 }
0x15da   :  { %v7649_v41 = vpop.f32.mrb[129].mxu1  ;;  %v3874_v6 = vsel %vm759_vm4, %v3769_v23, -inf }
0x15db   :  { %3875 = vmax.xlane.f32.xlu0 %v3874_v6  ;;  %v3772_v49 = vpop.f32.mrb[130].mxu1 }
0x15dc   :  { %v7650_v58 = vpop.f32.mrb[131].mxu1  ;;  %v3877_v40 = vsel %vm759_vm4, %v3772_v49, -inf }
0x15df   :  { %3878 = vmax.xlane.f32.xlu0 %v3877_v40 }
0x15e0   :  { %v3845_v34 = vpop.f32.mrb[140].mxu0 }
0x15e1   :  { %v10763_v55 = vpop.f32.mrb[132].mxu1  ;;  %v7663_v28 = vpop.f32.mrb[141].mxu0  ;;  %v3886_v15 = vsel %vm759_vm4, %v3845_v34, -inf }
0x15e2   :  { %v7653_v12 = vpop.f32.mrb[133].mxu1  ;;  %v10766_v4 = vpop.f32.mrb[142].mxu0  ;;  %v3880_v61 = vsel %vm759_vm4, %v10763_v55, -inf }
0x15e3   :  { %v10768_v60 = vpop.f32.mrb[134].mxu1  ;;  %3887 = vmax.xlane.f32.xlu0 %v3886_v15  ;;  %v7664_v29 = vpop.f32.mrb[143].mxu0  ;;  %v3889_v38 = vsel %vm759_vm4, %v10766_v4, -inf }
0x15e4   :  { %v7654_v33 = vpop.f32.mrb[135].mxu1  ;;  %3890 = vmax.xlane.f32.xlu1 %v3889_v38  ;;  %v3883_v47 = vsel %vm759_vm4, %v10768_v60, -inf }
0x15e7   :  { %3881 = vmax.xlane.f32.xlu0 %v3880_v61 }
0x15e8   :  { %3884 = vmax.xlane.f32.xlu1 %v3883_v47  ;;  %v10776_v35 = vpop.f32.mrb[144].mxu0 }
0x15e9   :  { %v7667_v3 = vpop.f32.mrb[145].mxu0  ;;  %v3892_v27 = vsel %vm759_vm4, %v10776_v35, -inf }
0x15ea   :  { %v10780_v5 = vpop.f32.mrb[146].mxu0 }
0x15eb   :  { %3893 = vmax.xlane.f32.xlu0 %v3892_v27  ;;  %v7668_v11 = vpop.f32.mrb[147].mxu0  ;;  %v3895_v7 = vsel %vm759_vm4, %v10780_v5, -inf }
0x15ec   :  { %3896 = vmax.xlane.f32.xlu1 %v3895_v7 }
0x15f0   :  { %v10784_v18 = vpop.f32.mrb[148].mxu0 }
0x15f1   :  { %v7671_v30 = vpop.f32.mrb[149].mxu0  ;;  %v3898_v44 = vsel %vm759_vm4, %v10784_v18, -inf }
0x15f2   :  { %3899 = vmax.xlane.f32.xlu0 %v3898_v44  ;;  %v10788_v31 = vpop.f32.mrb[150].mxu0 }
0x15f3   :  { %v7672_v17 = vpop.f32.mrb[151].mxu0  ;;  %v3901_v39 = vsel %vm759_vm4, %v10788_v31, -inf }
0x15f4   :  { %3902 = vmax.xlane.f32.xlu1 %v3901_v39 }
0x1605   :  { %4166 = vrot.lane.b32.xlu1 %v10687_v22, %s8809_s25 }
0x1608   :  { %4249 = vrot.lane.b32.xlu0 %v10685_v54, %s8809_s25 }
0x165f   :  { %v3870_v63 = vpop.xlane.xlu0 %3869 }
0x1660   :  { %v3904_v53 = vsub.f32 %v3761_v43, %v3870_v63 }
0x1661   :  { %v3873_v1 = vpop.xlane.xlu1 %3872 }
0x1662   :  { %v3916_v2 = vmul.f32 1.442695, %v3904_v53  ;;  %v3905_v45 = vsub.f32 %v3764_v48, %v3873_v1 }
0x1664   :  { %8517 = vpow2.f32 %v3916_v2  ;;  %v3918_v42 = vmul.f32 1.442695, %v3905_v45 }
0x1666   :  { %8519 = vpow2.f32 %v3918_v42 }
0x1668   :  { %v3876_v36 = vpop.xlane.xlu0 %3875 }
0x1669   :  { %v3906_v62 = vsub.f32 %v3769_v23, %v3876_v36 }
0x166b   :  { %v3920_v14 = vmul.f32 1.442695, %v3906_v62 }
0x166c   :  { %v3879_v52 = vpop.xlane.xlu0 %3878 }
0x166d   :  { %8521 = vpow2.f32 %v3920_v14  ;;  %v3907_v32 = vsub.f32 %v3772_v49, %v3879_v52 }
0x166e   :  { %v10800_v41 = vpop.eup %8517 }
0x166f   :  { %v3922_v6 = vmul.f32 1.442695, %v3907_v32  ;;  %v3940_v40 = vsel %vm759_vm4, %v10800_v41, 0.0 }
0x1670   :  { %v3888_v58 = vpop.xlane.xlu0 %3887  ;;  %v10804_v43 = vpop.eup %8519  ;;  %3941 = vadd.xlane.f32.xlu0 %v3940_v40 }
0x1671   :  { %8523 = vpow2.f32 %v3922_v6  ;;  %v3910_v48 = vsub.f32 %v3845_v34, %v3888_v58  ;;  %v3891_v28 = vpop.xlane.xlu1 %3890  ;;  %v3943_v23 = vsel %vm759_vm4, %v10804_v43, 0.0 }
0x1672   :  { %v3911_v12 = vsub.f32 %v10766_v4, %v3891_v28  ;;  %3944 = vadd.xlane.f32.xlu1 %v3943_v23 }
0x1673   :  { %v3928_v15 = vmul.f32 1.442695, %v3910_v48 }
0x1674   :  { %v3882_v49 = vpop.xlane.xlu0 %3881  ;;  %v3930_v61 = vmul.f32 1.442695, %v3911_v12 }
0x1675   :  { %8525 = vpow2.f32 %v3928_v15  ;;  %v3908_v29 = vsub.f32 %v10763_v55, %v3882_v49  ;;  %v3885_v38 = vpop.xlane.xlu1 %3884 }
0x1676   :  { %v3909_v34 = vsub.f32 %v10768_v60, %v3885_v38 }
0x1677   :  { %v10810_v33 = vpop.eup %8521  ;;  %v3924_v47 = vmul.f32 1.442695, %v3908_v29 }
0x1678   :  { %v3894_v3 = vpop.xlane.xlu0 %3893  ;;  %v3946_v27 = vsel %vm759_vm4, %v10810_v33, 0.0  ;;  %v3926_v4 = vmul.f32 1.442695, %v3909_v34 }
0x1679   :  { %8527 = vpow2.f32 %v3924_v47  ;;  %3947 = vadd.xlane.f32.xlu0 %v3946_v27  ;;  %v3912_v7 = vsub.f32 %v10776_v35, %v3894_v3  ;;  %v3897_v55 = vpop.xlane.xlu1 %3896 }
0x167a   :  { %8529 = vpow2.f32 %v3930_v61  ;;  %v3913_v17 = vsub.f32 %v10780_v5, %v3897_v55 }
0x167b   :  { %v10815_v11 = vpop.eup %8523  ;;  %8531 = vpow2.f32 %v3926_v4  ;;  %v3932_v60 = vmul.f32 1.442695, %v3912_v7  ;;  %v4178_v7 = vsel %vm599_vm3, %v10796_v56, 0  ;;  %v4181_v56 = vsel %vm599_vm3, %v10798_v16, 0 }
0x167c   :  { %v3949_v30 = vsel %vm759_vm4, %v10815_v11, 0.0  ;;  %v3934_v53 = vmul.f32 1.442695, %v3913_v17 }
0x167d   :  { %3950 = vadd.xlane.f32.xlu1 %v3949_v30  ;;  %8533 = vpow2.f32 %v3932_v60 }
0x167e   :  { %8535 = vpow2.f32 %v3934_v53 }
0x167f   :  { %v10820_v44 = vpop.eup %8525  ;;  %v3900_v52 = vpop.xlane.xlu0 %3899 }
0x1680   :  { %v3958_v39 = vsel %vm759_vm4, %v10820_v44, 0.0  ;;  %v3914_v32 = vsub.f32 %v10784_v18, %v3900_v52 }
0x1681   :  { %3959 = vadd.xlane.f32.xlu0 %v3958_v39  ;;  %v3903_v58 = vpop.xlane.xlu1 %3902 }
0x1682   :  { %v3936_v6 = vmul.f32 1.442695, %v3914_v32  ;;  %v3915_v48 = vsub.f32 %v10788_v31, %v3903_v58 }
0x1683   :  { %v10825_v63 = vpop.eup %8527  ;;  %v4250_v31 = vpop.permute.xlu0 %4249 }
0x1684   :  { %v3952_v35 = vsel %vm759_vm4, %v10825_v63, 0.0  ;;  %v10829_v1 = vpop.eup %8529  ;;  %8537 = vpow2.f32 %v3936_v6  ;;  %v3938_v23 = vmul.f32 1.442695, %v3915_v48  ;;  %v4265_v58 = vsel %vm599_vm3, %v4250_v31, 0 }
0x1685   :  { %3953 = vadd.xlane.f32.xlu1 %v3952_v35  ;;  %v3961_v2 = vsel %vm759_vm4, %v10829_v1, 0.0  ;;  %v10833_v45 = vpop.eup %8531  ;;  %v4167_v12 = vpop.permute.xlu1 %4166 }
0x1686   :  { %v3955_v5 = vsel %vm759_vm4, %v10833_v45, 0.0  ;;  %8539 = vpow2.f32 %v3938_v23 }
0x1687   :  { %v10837_v42 = vpop.eup %8533 }
0x1688   :  { %v3964_v36 = vsel %vm759_vm4, %v10837_v42, 0.0  ;;  %v10841_v62 = vpop.eup %8535 }
0x1689   :  { %3962 = vadd.xlane.f32.xlu1 %v3961_v2  ;;  %v3967_v14 = vsel %vm759_vm4, %v10841_v62, 0.0 }
0x168d   :  { %3956 = vadd.xlane.f32.xlu1 %v3955_v5 }
0x168e   :  { %v10850_v40 = vpop.eup %8537 }
0x168f   :  { %v3970_v28 = vsel %vm759_vm4, %v10850_v40, 0.0 }
0x1690   :  { %v10855_v15 = vpop.eup %8539 }
0x1691   :  { %3965 = vadd.xlane.f32.xlu1 %v3964_v36  ;;  %v3973_v18 = vsel %vm759_vm4, %v10855_v15, 0.0 }
0x1695   :  { %3968 = vadd.xlane.f32.xlu1 %v3967_v14 }
0x1697   :  { %4251 = vrot.lane.b32.xlu0 %v10695_v19, %s8809_s25 }
0x16a6   :  { %4156 = vrot.lane.b32.xlu1 %v10679_v24, %s8810_s18 }
0x16b6   :  { %3971 = vadd.xlane.f32.xlu0 %v3970_v28 }
0x16ca   :  { %3974 = vadd.xlane.f32.xlu1 %v3973_v18 }
0x16cc   :  { %4253 = vrot.lane.b32.xlu0 %v10693_v21, %s8809_s25  ;;  %s12299_s25 = smov 8  }
0x16d0   :  { %4243 = vrot.lane.b32.xlu0 %v10685_v54, %s8810_s18 }
0x16d4   :  { %4245 = vrot.lane.b32.xlu0 %v10695_v19, %s8810_s18 }
0x16d8   :  { %4468 = vrot.lane.b32.xlu0 %v10679_v24, %s8811_s26 }
0x16db   :  { %4158 = vrot.lane.b32.xlu1 %v10677_v59, %s8810_s18 }
0x16dc   :  { %4472 = vrot.lane.b32.xlu0 %v10687_v22, %s8811_s26 }
0x16df   :  { %4160 = vrot.lane.b32.xlu1 %v10687_v22, %s8810_s18 }
0x16e0   :  { %4543 = vrot.lane.b32.xlu0 %v10685_v54, %s8811_s26 }
0x16e3   :  { %4247 = vrot.lane.b32.xlu1 %v10693_v21, %s8810_s18  ;;  %s12302_s18 = smov 16  }
0x16e4   :  { %4545 = vrot.lane.b32.xlu0 %v10695_v19, %s8811_s26 }
0x16e7   :  { %4470 = vrot.lane.b32.xlu1 %v10677_v59, %s8811_s26 }
0x16e8   :  { %4547 = vrot.lane.b32.xlu0 %v10693_v21, %s8811_s26 }
0x16eb   :  { %4624 = vrot.lane.b32.xlu1 %v10679_v24, %s8812_s27 }
0x16ef   :  { %4626 = vrot.lane.b32.xlu1 %v10677_v59, %s8812_s27 }
0x16fd   :  { %v3942_v49 = vpop.xlane.xlu0 %3941 }
0x16fe   :  { %8541 = vrcp.f32 %v3942_v49 }
0x16ff   :  { %v3945_v29 = vpop.xlane.xlu1 %3944 }
0x1700   :  { %8543 = vrcp.f32 %v3945_v29 }
0x1706   :  { %v3948_v38 = vpop.xlane.xlu0 %3947 }
0x1707   :  { %8545 = vrcp.f32 %v3948_v38 }
0x1708   :  { %v8542_v61 = vpop.eup %8541 }
0x1709   :  { %v3988_v3 = vmul.f32 %v8542_v61, %v10800_v41 }
0x170a   :  { %v3951_v47 = vpop.xlane.xlu1 %3950  ;;  %v8544_v34 = vpop.eup %8543 }
0x170b   :  { %8547 = vrcp.f32 %v3951_v47  ;;  %v3989_v27 = vmul.f32 %v8544_v34, %v10804_v43 }
0x170d   :  { %v4000_v4 = vpack.c.bf16 %v3989_v27, %v3988_v3 }
0x170e   :  { %v3960_v55 = vpop.xlane.xlu0 %3959 }
0x170f   :  { %7680 = vmatmul.mubr.msk.bf16.vlgmr.msra.gmra.mrb[136].mxu1 %vm759_vm4, %v4000_v4  ;;  %8549 = vrcp.f32 %v3960_v55 }
0x1710   :  { %7710 = vmatpush3.bf16.xpose.msra.mxu1 %v4178_v7  ;;  %7683 = vmatprep.mubr.msk.bf16.mxu1 %vm8807_vm2, %v12254_v50 }
0x1711   :  { %7711 = vmatprep.subr.bf16.mxu1 %v12254_v50  ;;  %v8546_v60 = vpop.eup %8545 }
0x1712   :  { %v3954_v30 = vpop.xlane.xlu1 %3953  ;;  %v3990_v43 = vmul.f32 %v8546_v60, %v10810_v33  ;;  %v4252_v23 = vpop.permute.xlu0 %4251 }
0x1713   :  { %v4268_v31 = vsel %vm599_vm3, %v4252_v23, 0 }
0x1715   :  { %v8548_v17 = vpop.eup %8547 }
0x1716   :  { %v3963_v41 = vpop.xlane.xlu1 %3962  ;;  %v3991_v39 = vmul.f32 %v8548_v17, %v10815_v11  ;;  %v4184_v11 = vsel %vm599_vm3, %v4167_v12, 0 }
0x1717   :  { %8551 = vrcp.f32 %v3963_v41 }
0x1718   :  { %v4001_v53 = vpack.c.bf16 %v3991_v39, %v3990_v43  ;;  %8553 = vrcp.f32 %v3954_v30  ;;  %7712 = vmatpush3.bf16.xpose.msra.mxu1 %v4181_v56 }
0x1719   :  { %7713 = vmatprep.subr.bf16.mxu1 %v12254_v50  ;;  %v8550_v33 = vpop.eup %8549 }
0x171a   :  { %7684 = vmatmul.mubr.msk.bf16.gmra.mrb[140].mxu1 %vm759_vm4, %v4001_v53  ;;  %v3957_v35 = vpop.xlane.xlu1 %3956  ;;  %v3994_v16 = vmul.f32 %v8550_v33, %v10820_v44 }
0x171b   :  { %8555 = vrcp.f32 %v3957_v35  ;;  %7687 = vmatprep.mubr.msk.bf16.mxu1 %vm8807_vm2, %v12254_v50 }
0x171e   :  { %v3966_v2 = vpop.xlane.xlu1 %3965 }
0x171f   :  { %8557 = vrcp.f32 %v3966_v2 }
0x1720   :  { %7714 = vmatpush3.bf16.xpose.msra.mxu1 %v4184_v11 }
0x1721   :  { %v8552_v5 = vpop.eup %8551  ;;  %7745 = vmatprep.subr.bf16.mxu1 %v12254_v50 }
0x1722   :  { %v3995_v36 = vmul.f32 %v8552_v5, %v10829_v1  ;;  %v3969_v14 = vpop.xlane.xlu1 %3968  ;;  %v8554_v52 = vpop.eup %8553 }
0x1723   :  { %8559 = vrcp.f32 %v3969_v14  ;;  %v3992_v48 = vmul.f32 %v8554_v52, %v10825_v63 }
0x1724   :  { %v4003_v32 = vpack.c.bf16 %v3995_v36, %v3994_v16 }
0x1725   :  { %v8556_v6 = vpop.eup %8555 }
0x1726   :  { %7698 = vmatmul.mubr.msk.bf16.vlgmr.msra.gmra.mrb[152].mxu0 %vm759_vm4, %v4003_v32  ;;  %v3993_v28 = vmul.f32 %v8556_v6, %v10833_v45  ;;  %v4157_v49 = vpop.permute.xlu1 %4156 }
0x1727   :  { %7728 = vmatpush3.bf16.xpose.msra.mxu0 %v4265_v58  ;;  %7701 = vmatprep.mubr.msk.bf16.mxu0 %vm8807_vm2, %v12254_v50 }
0x1728   :  { %v4002_v44 = vpack.c.bf16 %v3993_v28, %v3992_v48  ;;  %7729 = vmatprep.subr.bf16.mxu0 %v12254_v50 }
0x1729   :  { %v8558_v1 = vpop.eup %8557 }
0x172a   :  { %7688 = vmatmul.mubr.msk.bf16.gmra.mrb[144].mxu1 %vm759_vm4, %v4002_v44  ;;  %v3996_v63 = vmul.f32 %v8558_v1, %v10837_v42 }
0x172b   :  { %7715 = vmatprep.mubr.msk.bf16.mxu1 %vm8807_vm2, %v12254_v50 }
0x172d   :  { %v8560_v18 = vpop.eup %8559 }
0x172e   :  { %v3997_v45 = vmul.f32 %v8560_v18, %v10841_v62 }
0x172f   :  { %7730 = vmatpush3.bf16.xpose.msra.mxu0 %v4268_v31 }
0x1730   :  { %v4004_v12 = vpack.c.bf16 %v3997_v45, %v3996_v63  ;;  %7731 = vmatprep.subr.bf16.mxu0 %v12254_v50 }
0x1732   :  { %7702 = vmatmul.mubr.msk.bf16.gmra.mrb[156].mxu0 %vm759_vm4, %v4004_v12  ;;  %7716 = vmatmul.mubr.msk.bf16.vlgmr.msra.gmra.mrb[148].mxu1 %vm599_vm3, %v4157_v49 }
0x1733   :  { %7719 = vmatprep.mubr.msk.bf16.mxu1 %vm8807_vm2, %v12254_v50  ;;  %7705 = vmatprep.mubr.msk.bf16.mxu0 %vm8807_vm2, %v12254_v50 }
0x1743   :  { %v3972_v29 = vpop.xlane.xlu0 %3971 }
0x1744   :  { %8561 = vrcp.f32 %v3972_v29 }
0x1747   :  { %v4254_v38 = vpop.permute.xlu0 %4253 }
0x1748   :  { %v4271_v42 = vsel %vm599_vm3, %v4254_v38, 0 }
0x1749   :  { %7732 = vmatpush3.bf16.xpose.msra.mxu0 %v4271_v42 }
0x174a   :  { %7763 = vmatprep.subr.bf16.mxu0 %v12254_v50 }
0x174b   :  { %v4244_v62 = vpop.permute.xlu0 %4243 }
0x174e   :  { %v8562_v4 = vpop.eup %8561 }
0x174f   :  { %v4246_v61 = vpop.permute.xlu0 %4245  ;;  %v3998_v30 = vmul.f32 %v8562_v4, %v10850_v40 }
0x1753   :  { %v4469_v47 = vpop.permute.xlu0 %4468 }
0x1754   :  { %7746 = vmatpush3.bf16.msra.mxu1 %v4469_v47 }
0x1755   :  { %7747 = vmatprep.subr.bf16.mxu1 %v12254_v50 }
0x1757   :  { %v3975_v34 = vpop.xlane.xlu1 %3974  ;;  %v4473_v17 = vpop.permute.xlu0 %4472 }
0x1758   :  { %8563 = vrcp.f32 %v3975_v34 }
0x175b   :  { %v4159_v3 = vpop.permute.xlu1 %4158  ;;  %v4544_v39 = vpop.permute.xlu0 %4543 }
0x175c   :  { %7720 = vmatmul.mubr.msk.bf16.gmra.mrb[152].mxu1 %vm599_vm3, %v4159_v3 }
0x175d   :  { %7723 = vmatprep.mubr.msk.bf16.mxu1 %vm8807_vm2, %v12254_v50 }
0x175f   :  { %v4161_v27 = vpop.permute.xlu1 %4160  ;;  %v4546_v40 = vpop.permute.xlu0 %4545 }
0x1762   :  { %v8564_v7 = vpop.eup %8563 }
0x1763   :  { %v4248_v55 = vpop.permute.xlu1 %4247  ;;  %v3999_v60 = vmul.f32 %v8564_v7, %v10855_v15  ;;  %v4548_v15 = vpop.permute.xlu0 %4547 }
0x1764   :  { %7724 = vmatmul.mubr.msk.bf16.gmra.mrb[156].mxu1 %vm599_vm3, %v4161_v27 }
0x1765   :  { %v4005_v41 = vpack.c.bf16 %v3999_v60, %v3998_v30  ;;  %7751 = vmatprep.mubr.msk.bf16.mxu1 %vm8807_vm2, %v12254_v50 }
0x1767   :  { %7706 = vmatmul.mubr.msk.bf16.gmra.mrb[160].mxu0 %vm759_vm4, %v4005_v41  ;;  %v4471_v43 = vpop.permute.xlu1 %4470 }
0x1768   :  { %7748 = vmatpush3.bf16.msra.mxu1 %v4471_v43  ;;  %7733 = vmatprep.mubr.msk.bf16.mxu0 %vm8807_vm2, %v12254_v50 }
0x1769   :  { %7749 = vmatprep.subr.bf16.mxu1 %v12254_v50 }
0x176c   :  { %7750 = vmatpush3.bf16.msra.mxu1 %v4473_v17 }
0x176d   :  { %7781 = vmatprep.subr.bf16.mxu1 %v12254_v50 }
0x176f   :  { %7734 = vmatmul.mubr.msk.bf16.vlgmr.msra.gmra.mrb[164].mxu0 %vm599_vm3, %v4244_v62 }
0x1770   :  { %7764 = vmatpush3.bf16.msra.mxu0 %v4544_v39  ;;  %7737 = vmatprep.mubr.msk.bf16.mxu0 %vm8807_vm2, %v12254_v50 }
0x1771   :  { %7765 = vmatprep.subr.bf16.mxu0 %v12254_v50 }
0x1774   :  { %7766 = vmatpush3.bf16.msra.mxu0 %v4546_v40 }
0x1775   :  { %7767 = vmatprep.subr.bf16.mxu0 %v12254_v50 }
0x1777   :  { %7738 = vmatmul.mubr.msk.bf16.gmra.mrb[168].mxu0 %vm599_vm3, %v4246_v61 }
0x1778   :  { %7768 = vmatpush3.bf16.msra.mxu0 %v4548_v15  ;;  %7741 = vmatprep.mubr.msk.bf16.mxu0 %vm8807_vm2, %v12254_v50 }
0x1779   :  { %7799 = vmatprep.subr.bf16.mxu0 %v12254_v50 }
0x177f   :  { %7742 = vmatmul.mubr.msk.bf16.gmra.mrb[172].mxu0 %vm599_vm3, %v4248_v55 }
0x1780   :  { %7769 = vmatprep.mubr.msk.bf16.mxu0 %vm8807_vm2, %v12254_v50 }
0x17e2   :  { %v10955_v56 = vpop.f32.mrb[136].mxu1 }
0x17e3   :  { %v7681_v53 = vpop.f32.mrb[137].mxu1 }
0x17e4   :  { %v10957_v35 = vpop.f32.mrb[138].mxu1 }
0x17e5   :  { %v7682_v2 = vpop.f32.mrb[139].mxu1 }
0x17ed   :  { %v10959_v33 = vpop.f32.mrb[140].mxu1 }
0x17ee   :  { %v7685_v11 = vpop.f32.mrb[141].mxu1 }
0x17ef   :  { %v10961_v5 = vpop.f32.mrb[142].mxu1 }
0x17f0   :  { %v7686_v16 = vpop.f32.mrb[143].mxu1 }
0x17f9   :  { %v10963_v36 = vpop.f32.mrb[152].mxu0 }
0x17fa   :  { %v7699_v14 = vpop.f32.mrb[153].mxu0 }
0x17fb   :  { %v10965_v52 = vpop.f32.mrb[154].mxu0 }
0x17fc   :  { %v7700_v32 = vpop.f32.mrb[155].mxu0 }
0x17fd   :  { %v10967_v6 = vpop.f32.mrb[144].mxu1 }
0x17fe   :  { %v7689_v58 = vpop.f32.mrb[145].mxu1 }
0x17ff   :  { %v10969_v48 = vpop.f32.mrb[146].mxu1 }
0x1800   :  { %v7690_v28 = vpop.f32.mrb[147].mxu1 }
0x1805   :  { %v10971_v44 = vpop.f32.mrb[156].mxu0  ;;  %v4220_v1 = vpop.f32.mrb[148].mxu1 }
0x1806   :  { %12293 = vst [vmem:[#allocation15_spill] sm:$0xff] %v10971_v44  ;;  %v7703_v23 = vpop.f32.mrb[157].mxu0  ;;  %v7717_v18 = vpop.f32.mrb[149].mxu1  ;;  %v4330_v31 = vsel %vm759_vm4, %v4220_v1, -inf }
0x1807   :  { %v10974_v63 = vpop.f32.mrb[158].mxu0  ;;  %4331 = vmax.xlane.f32.xlu0 %v4330_v31  ;;  %v4223_v45 = vpop.f32.mrb[150].mxu1 }
0x1808   :  { %v7704_v12 = vpop.f32.mrb[159].mxu0  ;;  %v7718_v49 = vpop.f32.mrb[151].mxu1  ;;  %v4333_v29 = vsel %vm759_vm4, %v4223_v45, -inf }
0x1809   :  { %4334 = vmax.xlane.f32.xlu1 %v4333_v29 }
0x182f   :  { %v10977_v38 = vpop.f32.mrb[152].mxu1 }
0x1830   :  { %v7721_v42 = vpop.f32.mrb[153].mxu1  ;;  %v4336_v62 = vsel %vm759_vm4, %v10977_v38, -inf }
0x1831   :  { %4337 = vmax.xlane.f32.xlu0 %v4336_v62  ;;  %v10981_v61 = vpop.f32.mrb[154].mxu1  ;;  %v11025_v62 = vpop.permute.xlu1 %4624 }
0x1832   :  { %v7722_v47 = vpop.f32.mrb[155].mxu1  ;;  %v4339_v34 = vsel %vm759_vm4, %v10981_v61, -inf }
0x1835   :  { %4340 = vmax.xlane.f32.xlu0 %v4339_v34  ;;  %v11027_v47 = vpop.permute.xlu1 %4626 }
0x1837   :  { %v10985_v3 = vpop.f32.mrb[156].mxu1 }
0x1838   :  { %v7725_v27 = vpop.f32.mrb[157].mxu1  ;;  %v4342_v2 = vsel %vm759_vm4, %v10985_v3, -inf }
0x1839   :  { %v10987_v4 = vpop.f32.mrb[158].mxu1 }
0x183a   :  { %v10989_v7 = vpop.f32.mrb[160].mxu0  ;;  %v7726_v55 = vpop.f32.mrb[159].mxu1  ;;  %v4345_v11 = vsel %vm759_vm4, %v10987_v4, -inf }
0x183b   :  { %12294 = vst [vmem:[#allocation16_spill] sm:$0xff] %v10989_v7  ;;  %v7707_v30 = vpop.f32.mrb[161].mxu0 }
0x183c   :  { %v10991_v60 = vpop.f32.mrb[162].mxu0 }
0x183d   :  { %12295 = vst [vmem:[#allocation19_spill] sm:$0xff] %v10991_v60  ;;  %v7708_v17 = vpop.f32.mrb[163].mxu0 }
0x1842   :  { %v10993_v41 = vpop.f32.mrb[164].mxu0 }
0x1843   :  { %v7735_v43 = vpop.f32.mrb[165].mxu0  ;;  %v4348_v39 = vsel %vm759_vm4, %v10993_v41, -inf }
0x1844   :  { %v10997_v40 = vpop.f32.mrb[166].mxu0  ;;  %4349 = vmax.xlane.f32.xlu0 %v4348_v39 }
0x1845   :  { %v7736_v15 = vpop.f32.mrb[167].mxu0  ;;  %v4351_v53 = vsel %vm759_vm4, %v10997_v40, -inf }
0x1846   :  { %4352 = vmax.xlane.f32.xlu1 %v4351_v53 }
0x1848   :  { %4343 = vmax.xlane.f32.xlu0 %v4342_v2 }
0x184a   :  { %v11005_v16 = vpop.f32.mrb[168].mxu0  ;;  %4346 = vmax.xlane.f32.xlu1 %v4345_v11 }
0x184b   :  { %v7739_v14 = vpop.f32.mrb[169].mxu0  ;;  %v4354_v32 = vsel %vm759_vm4, %v11005_v16, -inf }
0x184c   :  { %v11009_v58 = vpop.f32.mrb[170].mxu0  ;;  %4355 = vmax.xlane.f32.xlu0 %v4354_v32 }
0x184d   :  { %v7740_v28 = vpop.f32.mrb[171].mxu0  ;;  %v4357_v23 = vsel %vm759_vm4, %v11009_v58, -inf }
0x184e   :  { %4358 = vmax.xlane.f32.xlu1 %v4357_v23 }
0x1852   :  { %v11013_v18 = vpop.f32.mrb[172].mxu0 }
0x1853   :  { %v7743_v31 = vpop.f32.mrb[173].mxu0  ;;  %v4360_v12 = vsel %vm759_vm4, %v11013_v18, -inf }
0x1854   :  { %4361 = vmax.xlane.f32.xlu0 %v4360_v12  ;;  %v11017_v49 = vpop.f32.mrb[174].mxu0 }
0x1855   :  { %v7744_v29 = vpop.f32.mrb[175].mxu0  ;;  %v4363_v42 = vsel %vm759_vm4, %v11017_v49, -inf }
0x1856   :  { %4364 = vmax.xlane.f32.xlu1 %v4363_v42 }
0x1867   :  { %4628 = vrot.lane.b32.xlu1 %v10687_v22, %s8812_s27 }
0x186a   :  { %4711 = vrot.lane.b32.xlu0 %v10685_v54, %s8812_s27 }
0x1894   :  { %v4332_v34 = vpop.xlane.xlu0 %4331 }
0x1895   :  { %v4366_v27 = vsub.f32 %v4220_v1, %v4332_v34 }
0x1896   :  { %v4335_v55 = vpop.xlane.xlu1 %4334 }
0x1897   :  { %v4378_v30 = vmul.f32 1.442695, %v4366_v27  ;;  %v4367_v17 = vsub.f32 %v4223_v45, %v4335_v55 }
0x1899   :  { %8565 = vpow2.f32 %v4378_v30  ;;  %v4380_v43 = vmul.f32 1.442695, %v4367_v17 }
0x189b   :  { %8567 = vpow2.f32 %v4380_v43 }
0x18a3   :  { %v11029_v39 = vpop.eup %8565 }
0x18a4   :  { %v4402_v15 = vsel %vm759_vm4, %v11029_v39, 0.0 }
0x18a5   :  { %v11033_v53 = vpop.eup %8567  ;;  %4403 = vadd.xlane.f32.xlu0 %v4402_v15 }
0x18a6   :  { %v4405_v2 = vsel %vm759_vm4, %v11033_v53, 0.0 }
0x18a7   :  { %4406 = vadd.xlane.f32.xlu1 %v4405_v2 }
0x18be   :  { %v4338_v11 = vpop.xlane.xlu0 %4337 }
0x18bf   :  { %v4368_v1 = vsub.f32 %v10977_v38, %v4338_v11 }
0x18c1   :  { %v4382_v14 = vmul.f32 1.442695, %v4368_v1 }
0x18c2   :  { %v4341_v45 = vpop.xlane.xlu0 %4340 }
0x18c3   :  { %8569 = vpow2.f32 %v4382_v14  ;;  %v4369_v32 = vsub.f32 %v10981_v61, %v4341_v45 }
0x18c5   :  { %v4384_v28 = vmul.f32 1.442695, %v4369_v32 }
0x18c7   :  { %8571 = vpow2.f32 %v4384_v28 }
0x18cd   :  { %v11039_v23 = vpop.eup %8569 }
0x18ce   :  { %v4408_v31 = vsel %vm759_vm4, %v11039_v23, 0.0 }
0x18cf   :  { %4409 = vadd.xlane.f32.xlu0 %v4408_v31 }
0x18d1   :  { %v11043_v12 = vpop.eup %8571  ;;  %v4350_v29 = vpop.xlane.xlu0 %4349 }
0x18d2   :  { %v4372_v42 = vsub.f32 %v10993_v41, %v4350_v29  ;;  %v4411_v38 = vsel %vm759_vm4, %v11043_v12, 0.0 }
0x18d3   :  { %4412 = vadd.xlane.f32.xlu1 %v4411_v38  ;;  %v4353_v34 = vpop.xlane.xlu1 %4352 }
0x18d4   :  { %v4390_v27 = vmul.f32 1.442695, %v4372_v42  ;;  %v4373_v61 = vsub.f32 %v10997_v40, %v4353_v34 }
0x18d5   :  { %v4344_v55 = vpop.xlane.xlu0 %4343 }
0x18d6   :  { %8573 = vpow2.f32 %v4390_v27  ;;  %v4370_v30 = vsub.f32 %v10985_v3, %v4344_v55  ;;  %v4392_v43 = vmul.f32 1.442695, %v4373_v61 }
0x18d7   :  { %v4347_v17 = vpop.xlane.xlu1 %4346 }
0x18d8   :  { %v4386_v15 = vmul.f32 1.442695, %v4370_v30  ;;  %v4371_v2 = vsub.f32 %v10987_v4, %v4347_v17 }
0x18d9   :  { %v4356_v11 = vpop.xlane.xlu0 %4355 }
0x18da   :  { %8575 = vpow2.f32 %v4386_v15  ;;  %v4388_v41 = vmul.f32 1.442695, %v4371_v2  ;;  %v4374_v1 = vsub.f32 %v11005_v16, %v4356_v11 }
0x18db   :  { %8577 = vpow2.f32 %v4392_v43  ;;  %v4359_v14 = vpop.xlane.xlu1 %4358 }
0x18dc   :  { %8579 = vpow2.f32 %v4388_v41  ;;  %v4394_v40 = vmul.f32 1.442695, %v4374_v1  ;;  %v4375_v32 = vsub.f32 %v11009_v58, %v4359_v14 }
0x18de   :  { %8581 = vpow2.f32 %v4394_v40  ;;  %v4396_v4 = vmul.f32 1.442695, %v4375_v32 }
0x18e0   :  { %v11052_v45 = vpop.eup %8573  ;;  %8583 = vpow2.f32 %v4396_v4 }
0x18e1   :  { %v4420_v3 = vsel %vm759_vm4, %v11052_v45, 0.0  ;;  %v4362_v55 = vpop.xlane.xlu0 %4361 }
0x18e2   :  { %4421 = vadd.xlane.f32.xlu0 %v4420_v3  ;;  %v4376_v30 = vsub.f32 %v11013_v18, %v4362_v55 }
0x18e3   :  { %v4365_v43 = vpop.xlane.xlu1 %4364 }
0x18e4   :  { %v11057_v28 = vpop.eup %8575  ;;  %v4398_v17 = vmul.f32 1.442695, %v4376_v30  ;;  %v4377_v2 = vsub.f32 %v11017_v49, %v4365_v43 }
0x18e5   :  { %v4414_v31 = vsel %vm759_vm4, %v11057_v28, 0.0  ;;  %v11061_v29 = vpop.eup %8577  ;;  %v11093_v14 = vpop.permute.xlu0 %4711 }
0x18e6   :  { %4415 = vadd.xlane.f32.xlu1 %v4414_v31  ;;  %v4423_v16 = vsel %vm759_vm4, %v11061_v29, 0.0  ;;  %v11065_v42 = vpop.eup %8579  ;;  %8585 = vpow2.f32 %v4398_v17  ;;  %v4400_v41 = vmul.f32 1.442695, %v4377_v2 }
0x18e7   :  { %v4417_v58 = vsel %vm759_vm4, %v11065_v42, 0.0  ;;  %v4629_v40 = vpop.permute.xlu1 %4628 }
0x18e8   :  { %v11069_v38 = vpop.eup %8581  ;;  %8587 = vpow2.f32 %v4400_v41 }
0x18e9   :  { %v4426_v34 = vsel %vm759_vm4, %v11069_v38, 0.0 }
0x18ea   :  { %4424 = vadd.xlane.f32.xlu1 %v4423_v16  ;;  %v11073_v27 = vpop.eup %8583 }
0x18eb   :  { %v4429_v61 = vsel %vm759_vm4, %v11073_v27, 0.0 }
0x18ee   :  { %4418 = vadd.xlane.f32.xlu1 %v4417_v58 }
0x18f0   :  { %v11082_v15 = vpop.eup %8585 }
0x18f1   :  { %v4432_v11 = vsel %vm759_vm4, %v11082_v15, 0.0 }
0x18f2   :  { %4427 = vadd.xlane.f32.xlu1 %v4426_v34  ;;  %v11087_v1 = vpop.eup %8587  ;;  %v4640_v34 = vsel %vm599_vm3, %v11025_v62, 0  ;;  %v4643_v62 = vsel %vm599_vm3, %v11027_v47, 0 }
0x18f3   :  { %v4435_v18 = vsel %vm759_vm4, %v11087_v1, 0.0 }
0x18f6   :  { %4430 = vadd.xlane.f32.xlu1 %v4429_v61 }
0x18f8   :  { %4713 = vrot.lane.b32.xlu0 %v10695_v19, %s8812_s27 }
0x1907   :  { %4618 = vrot.lane.b32.xlu1 %v10679_v24, %s8813_s21 }
0x1917   :  { %4433 = vadd.xlane.f32.xlu0 %v4432_v11 }
0x192b   :  { %4436 = vadd.xlane.f32.xlu1 %v4435_v18 }
0x192d   :  { %4715 = vrot.lane.b32.xlu0 %v10693_v21, %s8812_s27 }
0x1931   :  { %4705 = vrot.lane.b32.xlu0 %v10685_v54, %s8813_s21 }
0x1932   :  { %v4404_v49 = vpop.xlane.xlu0 %4403 }
0x1933   :  { %8589 = vrcp.f32 %v4404_v49 }
0x1934   :  { %v4407_v32 = vpop.xlane.xlu1 %4406 }
0x1935   :  { %8591 = vrcp.f32 %v4407_v32  ;;  %4707 = vrot.lane.b32.xlu0 %v10695_v19, %s8813_s21 }
0x1939   :  { %4930 = vrot.lane.b32.xlu0 %v10679_v24, %s8814_s28 }
0x193c   :  { %4620 = vrot.lane.b32.xlu1 %v10677_v59, %s8813_s21 }
0x193d   :  { %v8590_v3 = vpop.eup %8589  ;;  %4934 = vrot.lane.b32.xlu0 %v10687_v22, %s8814_s28 }
0x193e   :  { %v4450_v31 = vmul.f32 %v8590_v3, %v11029_v39  ;;  %v4646_v39 = vsel %vm599_vm3, %v4629_v40, 0 }
0x193f   :  { %v8592_v4 = vpop.eup %8591 }
0x1940   :  { %v4451_v16 = vmul.f32 %v8592_v4, %v11033_v53  ;;  %4622 = vrot.lane.b32.xlu1 %v10687_v22, %s8813_s21 }
0x1941   :  { %5005 = vrot.lane.b32.xlu0 %v10685_v54, %s8814_s28 }
0x1942   :  { %v4462_v58 = vpack.c.bf16 %v4451_v16, %v4450_v31 }
0x1944   :  { %4709 = vrot.lane.b32.xlu1 %v10693_v21, %s8813_s21  ;;  %7752 = vmatmul.mubr.msk.bf16.vlgmr.msra.gmra.mrb[160].mxu1 %vm759_vm4, %v4462_v58  ;;  %v4727_v58 = vsel %vm599_vm3, %v11093_v14, 0 }
0x1945   :  { %7782 = vmatpush3.bf16.xpose.msra.mxu1 %v4640_v34  ;;  %5007 = vrot.lane.b32.xlu0 %v10695_v19, %s8814_s28 }
0x1946   :  { %7783 = vmatprep.subr.bf16.mxu1 %v12254_v50  ;;  %7755 = vmatprep.mubr.msk.bf16.mxu1 %vm8807_vm2, %v12254_v50 }
0x1948   :  { %4932 = vrot.lane.b32.xlu1 %v10677_v59, %s8814_s28 }
0x1949   :  { %5009 = vrot.lane.b32.xlu0 %v10693_v21, %s8814_s28 }
0x194c   :  { %5086 = vrot.lane.b32.xlu1 %v10679_v24, %s12296_s6 }
0x194d   :  { %7784 = vmatpush3.bf16.xpose.msra.mxu1 %v4643_v62 }
0x194e   :  { %7785 = vmatprep.subr.bf16.mxu1 %v12254_v50 }
0x1950   :  { %5088 = vrot.lane.b32.xlu1 %v10677_v59, %s12296_s6 }
0x1955   :  { %7786 = vmatpush3.bf16.xpose.msra.mxu1 %v4646_v39 }
0x1956   :  { %7817 = vmatprep.subr.bf16.mxu1 %v12254_v50 }
0x195c   :  { %v4410_v53 = vpop.xlane.xlu0 %4409 }
0x195d   :  { %8593 = vrcp.f32 %v4410_v53 }
0x1960   :  { %v4413_v61 = vpop.xlane.xlu1 %4412 }
0x1961   :  { %8595 = vrcp.f32 %v4413_v61 }
0x1967   :  { %v8594_v55 = vpop.eup %8593 }
0x1968   :  { %v4452_v30 = vmul.f32 %v8594_v55, %v11039_v23 }
0x196b   :  { %v8596_v47 = vpop.eup %8595 }
0x196c   :  { %v4453_v17 = vmul.f32 %v8596_v47, %v11043_v12 }
0x196e   :  { %v4463_v43 = vpack.c.bf16 %v4453_v17, %v4452_v30 }
0x196f   :  { %v4422_v2 = vpop.xlane.xlu0 %4421 }
0x1970   :  { %7756 = vmatmul.mubr.msk.bf16.gmra.mrb[164].mxu1 %vm759_vm4, %v4463_v43  ;;  %8597 = vrcp.f32 %v4422_v2 }
0x1971   :  { %7759 = vmatprep.mubr.msk.bf16.mxu1 %vm8807_vm2, %v12254_v50 }
0x1973   :  { %v4416_v11 = vpop.xlane.xlu1 %4415  ;;  %v4714_v39 = vpop.permute.xlu0 %4713 }
0x1974   :  { %v4730_v53 = vsel %vm599_vm3, %v4714_v39, 0 }
0x1977   :  { %v4425_v41 = vpop.xlane.xlu1 %4424 }
0x1978   :  { %8599 = vrcp.f32 %v4425_v41 }
0x1979   :  { %8601 = vrcp.f32 %v4416_v11 }
0x197a   :  { %v8598_v49 = vpop.eup %8597 }
0x197b   :  { %v4419_v18 = vpop.xlane.xlu1 %4418  ;;  %v4456_v23 = vmul.f32 %v8598_v49, %v11052_v45 }
0x197c   :  { %8603 = vrcp.f32 %v4419_v18 }
0x197f   :  { %v4428_v40 = vpop.xlane.xlu1 %4427 }
0x1980   :  { %8605 = vrcp.f32 %v4428_v40 }
0x1982   :  { %v8600_v32 = vpop.eup %8599 }
0x1983   :  { %v4457_v12 = vmul.f32 %v8600_v32, %v11061_v29  ;;  %v4431_v3 = vpop.xlane.xlu1 %4430  ;;  %v8602_v4 = vpop.eup %8601 }
0x1984   :  { %8607 = vrcp.f32 %v4431_v3  ;;  %v4454_v34 = vmul.f32 %v8602_v4, %v11057_v28 }
0x1985   :  { %v4465_v31 = vpack.c.bf16 %v4457_v12, %v4456_v23 }
0x1986   :  { %v8604_v16 = vpop.eup %8603 }
0x1987   :  { %7770 = vmatmul.mubr.msk.bf16.vlgmr.msra.gmra.mrb[176].mxu0 %vm759_vm4, %v4465_v31  ;;  %v4455_v62 = vmul.f32 %v8604_v16, %v11065_v42  ;;  %v4619_v55 = vpop.permute.xlu1 %4618 }
0x1988   :  { %7800 = vmatpush3.bf16.xpose.msra.mxu0 %v4727_v58  ;;  %7773 = vmatprep.mubr.msk.bf16.mxu0 %vm8807_vm2, %v12254_v50 }
0x1989   :  { %v4464_v45 = vpack.c.bf16 %v4455_v62, %v4454_v34  ;;  %7801 = vmatprep.subr.bf16.mxu0 %v12254_v50 }
0x198a   :  { %v8606_v29 = vpop.eup %8605 }
0x198b   :  { %7760 = vmatmul.mubr.msk.bf16.gmra.mrb[168].mxu1 %vm759_vm4, %v4464_v45  ;;  %v4458_v28 = vmul.f32 %v8606_v29, %v11069_v38 }
0x198c   :  { %7787 = vmatprep.mubr.msk.bf16.mxu1 %vm8807_vm2, %v12254_v50 }
0x198e   :  { %v8608_v14 = vpop.eup %8607 }
0x198f   :  { %v4459_v42 = vmul.f32 %v8608_v14, %v11073_v27 }
0x1990   :  { %7802 = vmatpush3.bf16.xpose.msra.mxu0 %v4730_v53 }
0x1991   :  { %v4466_v61 = vpack.c.bf16 %v4459_v42, %v4458_v28  ;;  %7803 = vmatprep.subr.bf16.mxu0 %v12254_v50 }
0x1993   :  { %7774 = vmatmul.mubr.msk.bf16.gmra.mrb[180].mxu0 %vm759_vm4, %v4466_v61  ;;  %7788 = vmatmul.mubr.msk.bf16.vlgmr.msra.gmra.mrb[172].mxu1 %vm599_vm3, %v4619_v55 }
0x1994   :  { %7791 = vmatprep.mubr.msk.bf16.mxu1 %vm8807_vm2, %v12254_v50  ;;  %7777 = vmatprep.mubr.msk.bf16.mxu0 %vm8807_vm2, %v12254_v50 }
0x19a4   :  { %v4434_v47 = vpop.xlane.xlu0 %4433 }
0x19a5   :  { %8609 = vrcp.f32 %v4434_v47 }
0x19a8   :  { %v4716_v30 = vpop.permute.xlu0 %4715 }
0x19a9   :  { %v4733_v38 = vsel %vm599_vm3, %v4716_v30, 0 }
0x19aa   :  { %7804 = vmatpush3.bf16.xpose.msra.mxu0 %v4733_v38 }
0x19ab   :  { %7835 = vmatprep.subr.bf16.mxu0 %v12254_v50 }
0x19ac   :  { %v4706_v27 = vpop.permute.xlu0 %4705 }
0x19af   :  { %v8610_v18 = vpop.eup %8609 }
0x19b0   :  { %v4708_v17 = vpop.permute.xlu0 %4707  ;;  %v4460_v32 = vmul.f32 %v8610_v18, %v11082_v15 }
0x19b4   :  { %v4931_v43 = vpop.permute.xlu0 %4930 }
0x19b5   :  { %7818 = vmatpush3.bf16.msra.mxu1 %v4931_v43 }
0x19b6   :  { %7819 = vmatprep.subr.bf16.mxu1 %v12254_v50 }
0x19b8   :  { %v4437_v2 = vpop.xlane.xlu1 %4436  ;;  %v4935_v12 = vpop.permute.xlu0 %4934 }
0x19b9   :  { %8611 = vrcp.f32 %v4437_v2 }
0x19bc   :  { %v4621_v11 = vpop.permute.xlu1 %4620  ;;  %v5006_v31 = vpop.permute.xlu0 %5005 }
0x19bd   :  { %7792 = vmatmul.mubr.msk.bf16.gmra.mrb[176].mxu1 %vm599_vm3, %v4621_v11 }
0x19be   :  { %7795 = vmatprep.mubr.msk.bf16.mxu1 %vm8807_vm2, %v12254_v50 }
0x19c0   :  { %v4623_v41 = vpop.permute.xlu1 %4622  ;;  %v5008_v15 = vpop.permute.xlu0 %5007 }
0x19c3   :  { %v8612_v40 = vpop.eup %8611 }
0x19c4   :  { %v4710_v49 = vpop.permute.xlu1 %4709  ;;  %v4461_v23 = vmul.f32 %v8612_v40, %v11087_v1  ;;  %v5010_v1 = vpop.permute.xlu0 %5009 }
0x19c5   :  { %7796 = vmatmul.mubr.msk.bf16.gmra.mrb[180].mxu1 %vm599_vm3, %v4623_v41 }
0x19c6   :  { %v4467_v3 = vpack.c.bf16 %v4461_v23, %v4460_v32  ;;  %7823 = vmatprep.mubr.msk.bf16.mxu1 %vm8807_vm2, %v12254_v50 }
0x19c8   :  { %7778 = vmatmul.mubr.msk.bf16.gmra.mrb[184].mxu0 %vm759_vm4, %v4467_v3  ;;  %v4933_v4 = vpop.permute.xlu1 %4932 }
0x19c9   :  { %7820 = vmatpush3.bf16.msra.mxu1 %v4933_v4  ;;  %7805 = vmatprep.mubr.msk.bf16.mxu0 %vm8807_vm2, %v12254_v50 }
0x19ca   :  { %7821 = vmatprep.subr.bf16.mxu1 %v12254_v50 }
0x19cd   :  { %7822 = vmatpush3.bf16.msra.mxu1 %v4935_v12 }
0x19ce   :  { %7853 = vmatprep.subr.bf16.mxu1 %v12254_v50 }
0x19d0   :  { %7806 = vmatmul.mubr.msk.bf16.vlgmr.msra.gmra.mrb[188].mxu0 %vm599_vm3, %v4706_v27 }
0x19d1   :  { %7836 = vmatpush3.bf16.msra.mxu0 %v5006_v31  ;;  %7809 = vmatprep.mubr.msk.bf16.mxu0 %vm8807_vm2, %v12254_v50 }
0x19d2   :  { %7837 = vmatprep.subr.bf16.mxu0 %v12254_v50 }
0x19d5   :  { %7838 = vmatpush3.bf16.msra.mxu0 %v5008_v15 }
0x19d6   :  { %7839 = vmatprep.subr.bf16.mxu0 %v12254_v50 }
0x19d8   :  { %7810 = vmatmul.mubr.msk.bf16.gmra.mrb[192].mxu0 %vm599_vm3, %v4708_v17 }
0x19d9   :  { %7840 = vmatpush3.bf16.msra.mxu0 %v5010_v1  ;;  %7813 = vmatprep.mubr.msk.bf16.mxu0 %vm8807_vm2, %v12254_v50 }
0x19da   :  { %7871 = vmatprep.subr.bf16.mxu0 %v12254_v50 }
0x19e0   :  { %7814 = vmatmul.mubr.msk.bf16.gmra.mrb[196].mxu0 %vm599_vm3, %v4710_v49 }
0x19e1   :  { %7841 = vmatprep.mubr.msk.bf16.mxu0 %vm8807_vm2, %v12254_v50 }
0x1a17   :  { %v11190_v16 = vpop.f32.mrb[160].mxu1 }
0x1a18   :  { %v7753_v58 = vpop.f32.mrb[161].mxu1 }
0x1a19   :  { %v11192_v34 = vpop.f32.mrb[162].mxu1 }
0x1a1a   :  { %v7754_v45 = vpop.f32.mrb[163].mxu1 }
0x1a43   :  { %v11196_v29 = vpop.f32.mrb[164].mxu1 }
0x1a44   :  { %v7757_v39 = vpop.f32.mrb[165].mxu1 }
0x1a45   :  { %v11198_v14 = vpop.f32.mrb[166].mxu1 }
0x1a46   :  { %v7758_v28 = vpop.f32.mrb[167].mxu1 }
0x1a5a   :  { %v11202_v42 = vpop.f32.mrb[176].mxu0 }
0x1a5b   :  { %v7771_v61 = vpop.f32.mrb[177].mxu0 }
0x1a5c   :  { %v11204_v55 = vpop.f32.mrb[178].mxu0 }
0x1a5d   :  { %v7772_v30 = vpop.f32.mrb[179].mxu0 }
0x1a5e   :  { %v11208_v38 = vpop.f32.mrb[168].mxu1 }
0x1a5f   :  { %v7761_v27 = vpop.f32.mrb[169].mxu1 }
0x1a60   :  { %v11210_v17 = vpop.f32.mrb[170].mxu1 }
0x1a61   :  { %v7762_v2 = vpop.f32.mrb[171].mxu1 }
0x1a66   :  { %v11214_v11 = vpop.f32.mrb[180].mxu0  ;;  %v11216_v41 = vpop.f32.mrb[172].mxu1 }
0x1a67   :  { %v7775_v18 = vpop.f32.mrb[181].mxu0  ;;  %v7789_v40 = vpop.f32.mrb[173].mxu1  ;;  %v4792_v49 = vsel %vm759_vm4, %v11216_v41, -inf }
0x1a68   :  { %v11220_v32 = vpop.f32.mrb[182].mxu0  ;;  %4793 = vmax.xlane.f32.xlu0 %v4792_v49  ;;  %v4685_v23 = vpop.f32.mrb[174].mxu1 }
0x1a69   :  { %v7776_v3 = vpop.f32.mrb[183].mxu0  ;;  %v7790_v4 = vpop.f32.mrb[175].mxu1  ;;  %v4795_v31 = vsel %vm759_vm4, %v4685_v23, -inf }
0x1a6a   :  { %4796 = vmax.xlane.f32.xlu1 %v4795_v31 }
0x1a90   :  { %v11225_v15 = vpop.f32.mrb[176].mxu1 }
0x1a91   :  { %v7793_v1 = vpop.f32.mrb[177].mxu1  ;;  %v4798_v58 = vsel %vm759_vm4, %v11225_v15, -inf }
0x1a92   :  { %4799 = vmax.xlane.f32.xlu0 %v4798_v58  ;;  %v11229_v45 = vpop.f32.mrb[178].mxu1 }
0x1a93   :  { %v7794_v39 = vpop.f32.mrb[179].mxu1  ;;  %v4801_v28 = vsel %vm759_vm4, %v11229_v45, -inf }
0x1a96   :  { %4802 = vmax.xlane.f32.xlu0 %v4801_v28 }
0x1a98   :  { %v11233_v61 = vpop.f32.mrb[180].mxu1 }
0x1a99   :  { %v7797_v30 = vpop.f32.mrb[181].mxu1 }
0x1a9a   :  { %v11235_v27 = vpop.f32.mrb[182].mxu1 }
0x1a9b   :  { %v11237_v2 = vpop.f32.mrb[184].mxu0  ;;  %v7798_v18 = vpop.f32.mrb[183].mxu1 }
0x1a9c   :  { %v7779_v40 = vpop.f32.mrb[185].mxu0  ;;  %v4804_v18 = vsel %vm759_vm4, %v11233_v61, -inf }
0x1a9d   :  { %v11239_v49 = vpop.f32.mrb[186].mxu0  ;;  %v4807_v40 = vsel %vm759_vm4, %v11235_v27, -inf }
0x1a9e   :  { %v7780_v4 = vpop.f32.mrb[187].mxu0 }
0x1aa3   :  { %v11243_v31 = vpop.f32.mrb[188].mxu0 }
0x1aa4   :  { %v7807_v1 = vpop.f32.mrb[189].mxu0  ;;  %v4810_v58 = vsel %vm759_vm4, %v11243_v31, -inf }
0x1aa5   :  { %v11247_v39 = vpop.f32.mrb[190].mxu0  ;;  %4811 = vmax.xlane.f32.xlu0 %v4810_v58 }
0x1aa6   :  { %v7808_v28 = vpop.f32.mrb[191].mxu0  ;;  %v4813_v30 = vsel %vm759_vm4, %v11247_v39, -inf }
0x1aa7   :  { %4814 = vmax.xlane.f32.xlu1 %v4813_v30 }
0x1aa9   :  { %4805 = vmax.xlane.f32.xlu0 %v4804_v18 }
0x1aab   :  { %v11255_v4 = vpop.f32.mrb[192].mxu0  ;;  %4808 = vmax.xlane.f32.xlu1 %v4807_v40 }
0x1aac   :  { %v7811_v1 = vpop.f32.mrb[193].mxu0  ;;  %v4816_v3 = vsel %vm759_vm4, %v11255_v4, -inf }
0x1aad   :  { %v11259_v58 = vpop.f32.mrb[194].mxu0  ;;  %4817 = vmax.xlane.f32.xlu0 %v4816_v3  ;;  %v11275_v3 = vpop.permute.xlu1 %5086 }
0x1aae   :  { %v7812_v28 = vpop.f32.mrb[195].mxu0  ;;  %v4819_v30 = vsel %vm759_vm4, %v11259_v58, -inf }
0x1aaf   :  { %4820 = vmax.xlane.f32.xlu1 %v4819_v30 }
0x1ab1   :  { %v11277_v28 = vpop.permute.xlu1 %5088 }
0x1ab3   :  { %v11263_v12 = vpop.f32.mrb[196].mxu0 }
0x1ab4   :  { %v7815_v18 = vpop.f32.mrb[197].mxu0  ;;  %v4822_v47 = vsel %vm759_vm4, %v11263_v12, -inf }
0x1ab5   :  { %4823 = vmax.xlane.f32.xlu0 %v4822_v47  ;;  %v11267_v40 = vpop.f32.mrb[198].mxu0 }
0x1ab6   :  { %v7816_v1 = vpop.f32.mrb[199].mxu0  ;;  %v4825_v43 = vsel %vm759_vm4, %v11267_v40, -inf }
0x1ab7   :  { %4826 = vmax.xlane.f32.xlu1 %v4825_v43 }
0x1ac8   :  { %5090 = vrot.lane.b32.xlu1 %v10687_v22, %s12296_s6 }
0x1acb   :  { %5173 = vrot.lane.b32.xlu0 %v10685_v54, %s12296_s6 }
0x1af5   :  { %v4794_v30 = vpop.xlane.xlu0 %4793 }
0x1af6   :  { %v4828_v47 = vsub.f32 %v11216_v41, %v4794_v30 }
0x1af7   :  { %v4797_v18 = vpop.xlane.xlu1 %4796 }
0x1af8   :  { %v4840_v53 = vmul.f32 1.442695, %v4828_v47  ;;  %v4829_v1 = vsub.f32 %v4685_v23, %v4797_v18 }
0x1afa   :  { %8613 = vpow2.f32 %v4840_v53  ;;  %v4842_v62 = vmul.f32 1.442695, %v4829_v1 }
0x1afc   :  { %8615 = vpow2.f32 %v4842_v62 }
0x1b04   :  { %v11280_v43 = vpop.eup %8613 }
0x1b05   :  { %v4864_v0 = vsel %vm759_vm4, %v11280_v43, 0.0 }
0x1b06   :  { %v11284_v51 = vpop.eup %8615  ;;  %4865 = vadd.xlane.f32.xlu0 %v4864_v0 }
0x1b07   :  { %v4867_v37 = vsel %vm759_vm4, %v11284_v51, 0.0 }
0x1b08   :  { %4868 = vadd.xlane.f32.xlu1 %v4867_v37 }
0x1b1f   :  { %v4800_v20 = vpop.xlane.xlu0 %4799 }
0x1b20   :  { %v4830_v41 = vsub.f32 %v11225_v15, %v4800_v20 }
0x1b22   :  { %v4844_v30 = vmul.f32 1.442695, %v4830_v41 }
0x1b23   :  { %v4803_v23 = vpop.xlane.xlu0 %4802 }
0x1b24   :  { %8617 = vpow2.f32 %v4844_v30  ;;  %v4831_v62 = vsub.f32 %v11229_v45, %v4803_v23 }
0x1b26   :  { %v4846_v53 = vmul.f32 1.442695, %v4831_v62 }
0x1b28   :  { %8619 = vpow2.f32 %v4846_v53 }
0x1b2e   :  { %v11290_v47 = vpop.eup %8617 }
0x1b2f   :  { %v4870_v18 = vsel %vm759_vm4, %v11290_v47, 0.0 }
0x1b30   :  { %4871 = vadd.xlane.f32.xlu0 %v4870_v18 }
0x1b32   :  { %v11294_v0 = vpop.eup %8619  ;;  %v4812_v1 = vpop.xlane.xlu0 %4811 }
0x1b33   :  { %v4834_v37 = vsub.f32 %v11243_v31, %v4812_v1  ;;  %v4873_v20 = vsel %vm759_vm4, %v11294_v0, 0.0 }
0x1b34   :  { %4874 = vadd.xlane.f32.xlu1 %v4873_v20  ;;  %v4815_v15 = vpop.xlane.xlu1 %4814 }
0x1b35   :  { %v4852_v41 = vmul.f32 1.442695, %v4834_v37  ;;  %v4835_v45 = vsub.f32 %v11247_v39, %v4815_v15 }
0x1b36   :  { %v4806_v30 = vpop.xlane.xlu0 %4805 }
0x1b37   :  { %8621 = vpow2.f32 %v4852_v41  ;;  %v4832_v23 = vsub.f32 %v11233_v61, %v4806_v30  ;;  %v4854_v53 = vmul.f32 1.442695, %v4835_v45 }
0x1b38   :  { %v4809_v62 = vpop.xlane.xlu1 %4808 }
0x1b39   :  { %v4848_v18 = vmul.f32 1.442695, %v4832_v23  ;;  %v4833_v46 = vsub.f32 %v11235_v27, %v4809_v62 }
0x1b3a   :  { %v4818_v9 = vpop.xlane.xlu0 %4817 }
0x1b3b   :  { %8623 = vpow2.f32 %v4848_v18  ;;  %v4850_v31 = vmul.f32 1.442695, %v4833_v46  ;;  %v4836_v1 = vsub.f32 %v11255_v4, %v4818_v9 }
0x1b3c   :  { %8625 = vpow2.f32 %v4854_v53  ;;  %v4821_v20 = vpop.xlane.xlu1 %4820 }
0x1b3d   :  { %8627 = vpow2.f32 %v4850_v31  ;;  %v4856_v39 = vmul.f32 1.442695, %v4836_v1  ;;  %v4837_v37 = vsub.f32 %v11259_v58, %v4821_v20 }
0x1b3f   :  { %8629 = vpow2.f32 %v4856_v39  ;;  %v4858_v27 = vmul.f32 1.442695, %v4837_v37 }
0x1b41   :  { %v11303_v10 = vpop.eup %8621  ;;  %8631 = vpow2.f32 %v4858_v27 }
0x1b42   :  { %v4882_v61 = vsel %vm759_vm4, %v11303_v10, 0.0  ;;  %v4824_v53 = vpop.xlane.xlu0 %4823 }
0x1b43   :  { %4883 = vadd.xlane.f32.xlu0 %v4882_v61  ;;  %v4838_v18 = vsub.f32 %v11263_v12, %v4824_v53 }
0x1b44   :  { %v4827_v1 = vpop.xlane.xlu1 %4826 }
0x1b45   :  { %v11308_v15 = vpop.eup %8623  ;;  %v4860_v31 = vmul.f32 1.442695, %v4838_v18  ;;  %v4839_v39 = vsub.f32 %v11267_v40, %v4827_v1  ;;  %v5102_v1 = vsel %vm599_vm3, %v11275_v3, 0 }
0x1b46   :  { %v4876_v46 = vsel %vm759_vm4, %v11308_v15, 0.0  ;;  %v11312_v41 = vpop.eup %8625 }
0x1b47   :  { %4877 = vadd.xlane.f32.xlu1 %v4876_v46  ;;  %v4885_v9 = vsel %vm759_vm4, %v11312_v41, 0.0  ;;  %v11316_v4 = vpop.eup %8627  ;;  %8633 = vpow2.f32 %v4860_v31  ;;  %v4862_v61 = vmul.f32 1.442695, %v4839_v39  ;;  %v5174_v46 = vpop.permute.xlu0 %5173 }
0x1b48   :  { %v4879_v58 = vsel %vm759_vm4, %v11316_v4, 0.0 }
0x1b49   :  { %v11320_v45 = vpop.eup %8629  ;;  %8635 = vpow2.f32 %v4862_v61 }
0x1b4a   :  { %v4888_v30 = vsel %vm759_vm4, %v11320_v45, 0.0 }
0x1b4b   :  { %4886 = vadd.xlane.f32.xlu1 %v4885_v9  ;;  %v11324_v23 = vpop.eup %8631  ;;  %v5091_v9 = vpop.permute.xlu1 %5090 }
0x1b4c   :  { %v4891_v62 = vsel %vm759_vm4, %v11324_v23, 0.0 }
0x1b4f   :  { %4880 = vadd.xlane.f32.xlu1 %v4879_v58 }
0x1b51   :  { %v11333_v20 = vpop.eup %8633 }
0x1b52   :  { %v4894_v37 = vsel %vm759_vm4, %v11333_v20, 0.0 }
0x1b53   :  { %4889 = vadd.xlane.f32.xlu1 %v4888_v30  ;;  %v11338_v27 = vpop.eup %8635 }
0x1b54   :  { %v4897_v12 = vsel %vm759_vm4, %v11338_v27, 0.0 }
0x1b57   :  { %4892 = vadd.xlane.f32.xlu1 %v4891_v62 }
0x1b59   :  { %5175 = vrot.lane.b32.xlu0 %v10695_v19, %s12296_s6 }
0x1b68   :  { %5080 = vrot.lane.b32.xlu1 %v10679_v24, %s12297_s23 }
0x1b78   :  { %4895 = vadd.xlane.f32.xlu0 %v4894_v37 }
0x1b8c   :  { %4898 = vadd.xlane.f32.xlu1 %v4897_v12 }
0x1b8e   :  { %5177 = vrot.lane.b32.xlu0 %v10693_v21, %s12296_s6 }
0x1b92   :  { %5167 = vrot.lane.b32.xlu0 %v10685_v54, %s12297_s23 }
0x1b93   :  { %v4866_v40 = vpop.xlane.xlu0 %4865 }
0x1b94   :  { %8637 = vrcp.f32 %v4866_v40 }
0x1b95   :  { %v4869_v58 = vpop.xlane.xlu1 %4868 }
0x1b96   :  { %8639 = vrcp.f32 %v4869_v58  ;;  %5169 = vrot.lane.b32.xlu0 %v10695_v19, %s12297_s23 }
0x1b9d   :  { %5082 = vrot.lane.b32.xlu1 %v10677_v59, %s12297_s23 }
0x1b9e   :  { %v8638_v30 = vpop.eup %8637 }
0x1b9f   :  { %v4912_v53 = vmul.f32 %v8638_v30, %v11280_v43  ;;  %v5108_v43 = vsel %vm599_vm3, %v5091_v9, 0 }
0x1ba0   :  { %v8640_v62 = vpop.eup %8639 }
0x1ba1   :  { %v4913_v18 = vmul.f32 %v8640_v62, %v11284_v51  ;;  %5084 = vrot.lane.b32.xlu1 %v10687_v22, %s12297_s23  ;;  %v5105_v51 = vsel %vm599_vm3, %v11277_v28, 0 }
0x1ba3   :  { %v4924_v31 = vpack.c.bf16 %v4913_v18, %v4912_v53 }
0x1ba5   :  { %5171 = vrot.lane.b32.xlu1 %v10693_v21, %s12297_s23  ;;  %7824 = vmatmul.mubr.msk.bf16.vlgmr.msra.gmra.mrb[184].mxu1 %vm759_vm4, %v4924_v31 }
0x1ba6   :  { %7854 = vmatpush3.bf16.xpose.msra.mxu1 %v5102_v1  ;;  %7827 = vmatprep.mubr.msk.bf16.mxu1 %vm8807_vm2, %v12254_v50 }
0x1ba7   :  { %7855 = vmatprep.subr.bf16.mxu1 %v12254_v50 }
0x1bae   :  { %7856 = vmatpush3.bf16.xpose.msra.mxu1 %v5105_v51 }
0x1baf   :  { %7857 = vmatprep.subr.bf16.mxu1 %v12254_v50 }
0x1bb6   :  { %7858 = vmatpush3.bf16.xpose.msra.mxu1 %v5108_v43 }
0x1bb7   :  { %7889 = vmatprep.subr.bf16.mxu1 %v12254_v50 }
0x1bbd   :  { %v4872_v3 = vpop.xlane.xlu0 %4871 }
0x1bbe   :  { %8641 = vrcp.f32 %v4872_v3 }
0x1bc1   :  { %v4875_v39 = vpop.xlane.xlu1 %4874 }
0x1bc2   :  { %8643 = vrcp.f32 %v4875_v39  ;;  %v5189_v39 = vsel %vm599_vm3, %v5174_v46, 0 }
0x1bc8   :  { %v8642_v37 = vpop.eup %8641 }
0x1bc9   :  { %v4914_v12 = vmul.f32 %v8642_v37, %v11290_v47 }
0x1bcc   :  { %v8644_v61 = vpop.eup %8643 }
0x1bcd   :  { %v4915_v40 = vmul.f32 %v8644_v61, %v11294_v0 }
0x1bcf   :  { %v4925_v58 = vpack.c.bf16 %v4915_v40, %v4914_v12 }
0x1bd0   :  { %v4884_v28 = vpop.xlane.xlu0 %4883 }
0x1bd1   :  { %7828 = vmatmul.mubr.msk.bf16.gmra.mrb[188].mxu1 %vm759_vm4, %v4925_v58  ;;  %8645 = vrcp.f32 %v4884_v28 }
0x1bd2   :  { %7831 = vmatprep.mubr.msk.bf16.mxu1 %vm8807_vm2, %v12254_v50 }
0x1bd4   :  { %v4878_v9 = vpop.xlane.xlu1 %4877  ;;  %v5176_v12 = vpop.permute.xlu0 %5175 }
0x1bd5   :  { %v5192_v40 = vsel %vm599_vm3, %v5176_v12, 0 }
0x1bd8   :  { %v4887_v30 = vpop.xlane.xlu1 %4886 }
0x1bd9   :  { %8647 = vrcp.f32 %v4887_v30 }
0x1bda   :  { %8649 = vrcp.f32 %v4878_v9 }
0x1bdb   :  { %v8646_v18 = vpop.eup %8645 }
0x1bdc   :  { %v4881_v62 = vpop.xlane.xlu1 %4880  ;;  %v4918_v47 = vmul.f32 %v8646_v18, %v11303_v10 }
0x1bdd   :  { %8651 = vrcp.f32 %v4881_v62 }
0x1be0   :  { %v4890_v53 = vpop.xlane.xlu1 %4889 }
0x1be1   :  { %8653 = vrcp.f32 %v4890_v53 }
0x1be3   :  { %v8648_v31 = vpop.eup %8647 }
0x1be4   :  { %v4919_v0 = vmul.f32 %v8648_v31, %v11312_v41  ;;  %v4893_v1 = vpop.xlane.xlu1 %4892  ;;  %v8650_v51 = vpop.eup %8649 }
0x1be5   :  { %8655 = vrcp.f32 %v4893_v1  ;;  %v4916_v37 = vmul.f32 %v8650_v51, %v11308_v15 }
0x1be6   :  { %v4927_v43 = vpack.c.bf16 %v4919_v0, %v4918_v47 }
0x1be7   :  { %v8652_v3 = vpop.eup %8651 }
0x1be8   :  { %7842 = vmatmul.mubr.msk.bf16.vlgmr.msra.gmra.mrb[200].mxu0 %vm759_vm4, %v4927_v43  ;;  %v4917_v61 = vmul.f32 %v8652_v3, %v11316_v4  ;;  %v5081_v28 = vpop.permute.xlu1 %5080 }
0x1be9   :  { %7872 = vmatpush3.bf16.xpose.msra.mxu0 %v5189_v39  ;;  %7845 = vmatprep.mubr.msk.bf16.mxu0 %vm8807_vm2, %v12254_v50 }
0x1bea   :  { %v4926_v10 = vpack.c.bf16 %v4917_v61, %v4916_v37  ;;  %7873 = vmatprep.subr.bf16.mxu0 %v12254_v50 }
0x1beb   :  { %v8654_v41 = vpop.eup %8653 }
0x1bec   :  { %7832 = vmatmul.mubr.msk.bf16.gmra.mrb[192].mxu1 %vm759_vm4, %v4926_v10  ;;  %v4920_v15 = vmul.f32 %v8654_v41, %v11320_v45 }
0x1bed   :  { %7859 = vmatprep.mubr.msk.bf16.mxu1 %vm8807_vm2, %v12254_v50 }
0x1bef   :  { %v8656_v46 = vpop.eup %8655 }
0x1bf0   :  { %v4921_v4 = vmul.f32 %v8656_v46, %v11324_v23 }
0x1bf1   :  { %7874 = vmatpush3.bf16.xpose.msra.mxu0 %v5192_v40 }
0x1bf2   :  { %v4928_v58 = vpack.c.bf16 %v4921_v4, %v4920_v15  ;;  %7875 = vmatprep.subr.bf16.mxu0 %v12254_v50 }
0x1bf4   :  { %7846 = vmatmul.mubr.msk.bf16.gmra.mrb[204].mxu0 %vm759_vm4, %v4928_v58  ;;  %7860 = vmatmul.mubr.msk.bf16.vlgmr.msra.gmra.mrb[196].mxu1 %vm599_vm3, %v5081_v28 }
0x1bf5   :  { %7863 = vmatprep.mubr.msk.bf16.mxu1 %vm8807_vm2, %v12254_v50  ;;  %7849 = vmatprep.mubr.msk.bf16.mxu0 %vm8807_vm2, %v12254_v50 }
0x1c05   :  { %v4896_v9 = vpop.xlane.xlu0 %4895 }
0x1c06   :  { %8657 = vrcp.f32 %v4896_v9 }
0x1c09   :  { %v5178_v30 = vpop.permute.xlu0 %5177 }
0x1c0a   :  { %v5195_v45 = vsel %vm599_vm3, %v5178_v30, 0 }
0x1c0b   :  { %7876 = vmatpush3.bf16.xpose.msra.mxu0 %v5195_v45 }
0x1c0c   :  { %7907 = vmatprep.subr.bf16.mxu0 %v12254_v50 }
0x1c0d   :  { %v5168_v51 = vpop.permute.xlu0 %5167 }
0x1c10   :  { %v8658_v53 = vpop.eup %8657 }
0x1c11   :  { %v4922_v47 = vmul.f32 %v8658_v53, %v11333_v20  ;;  %v5170_v20 = vpop.permute.xlu0 %5169 }
0x1c19   :  { %v4899_v23 = vpop.xlane.xlu1 %4898 }
0x1c1a   :  { %8659 = vrcp.f32 %v4899_v23 }
0x1c1d   :  { %v5083_v62 = vpop.permute.xlu1 %5082 }
0x1c1e   :  { %7864 = vmatmul.mubr.msk.bf16.gmra.mrb[200].mxu1 %vm599_vm3, %v5083_v62 }
0x1c1f   :  { %7867 = vmatprep.mubr.msk.bf16.mxu1 %vm8807_vm2, %v12254_v50 }
0x1c21   :  { %v5085_v31 = vpop.permute.xlu1 %5084 }
0x1c24   :  { %v8660_v18 = vpop.eup %8659 }
0x1c25   :  { %v4923_v0 = vmul.f32 %v8660_v18, %v11338_v27  ;;  %v5172_v27 = vpop.permute.xlu1 %5171 }
0x1c26   :  { %7868 = vmatmul.mubr.msk.bf16.gmra.mrb[204].mxu1 %vm599_vm3, %v5085_v31 }
0x1c27   :  { %v4929_v1 = vpack.c.bf16 %v4923_v0, %v4922_v47  ;;  %7895 = vmatprep.mubr.msk.bf16.mxu1 %vm8807_vm2, %v12254_v50 }
0x1c29   :  { %7850 = vmatmul.mubr.msk.bf16.gmra.mrb[208].mxu0 %vm759_vm4, %v4929_v1 }
0x1c2a   :  { %7877 = vmatprep.mubr.msk.bf16.mxu0 %vm8807_vm2, %v12254_v50 }
0x1c31   :  { %7878 = vmatmul.mubr.msk.bf16.vlgmr.msra.gmra.mrb[212].mxu0 %vm599_vm3, %v5168_v51 }
0x1c32   :  { %7881 = vmatprep.mubr.msk.bf16.mxu0 %vm8807_vm2, %v12254_v50 }
0x1c39   :  { %7882 = vmatmul.mubr.msk.bf16.gmra.mrb[216].mxu0 %vm599_vm3, %v5170_v20 }
0x1c3a   :  { %7885 = vmatprep.mubr.msk.bf16.mxu0 %vm8807_vm2, %v12254_v50 }
0x1c41   :  { %7886 = vmatmul.mubr.msk.bf16.gmra.mrb[220].mxu0 %vm599_vm3, %v5172_v27 }
0x1c42   :  { %7913 = vmatprep.mubr.msk.bf16.mxu0 %vm8807_vm2, %v12254_v50 }
0x1c78   :  { %v11416_v43 = vpop.f32.mrb[184].mxu1 }
0x1c79   :  { %v7825_v3 = vpop.f32.mrb[185].mxu1 }
0x1c7a   :  { %v11418_v39 = vpop.f32.mrb[186].mxu1 }
0x1c7b   :  { %v7826_v61 = vpop.f32.mrb[187].mxu1 }
0x1ca4   :  { %v11422_v10 = vpop.f32.mrb[188].mxu1 }
0x1ca5   :  { %v7829_v41 = vpop.f32.mrb[189].mxu1 }
0x1ca6   :  { %v11424_v12 = vpop.f32.mrb[190].mxu1 }
0x1ca7   :  { %v7830_v40 = vpop.f32.mrb[191].mxu1 }
0x1cbb   :  { %v11428_v15 = vpop.f32.mrb[200].mxu0 }
0x1cbc   :  { %v7843_v4 = vpop.f32.mrb[201].mxu0 }
0x1cbd   :  { %v11430_v58 = vpop.f32.mrb[202].mxu0 }
0x1cbe   :  { %v7844_v9 = vpop.f32.mrb[203].mxu0 }
0x1cbf   :  { %v11434_v30 = vpop.f32.mrb[192].mxu1 }
0x1cc0   :  { %v7833_v45 = vpop.f32.mrb[193].mxu1 }
0x1cc1   :  { %v11436_v23 = vpop.f32.mrb[194].mxu1 }
0x1cc2   :  { %v7834_v53 = vpop.f32.mrb[195].mxu1 }
0x1cc7   :  { %v11440_v18 = vpop.f32.mrb[204].mxu0  ;;  %v5144_v31 = vpop.f32.mrb[196].mxu1 }
0x1cc8   :  { %v7847_v47 = vpop.f32.mrb[205].mxu0  ;;  %v7861_v0 = vpop.f32.mrb[197].mxu1  ;;  %v5254_v1 = vsel %vm759_vm4, %v5144_v31, -inf }
0x1cc9   :  { %v11443_v51 = vpop.f32.mrb[206].mxu0  ;;  %5255 = vmax.xlane.f32.xlu0 %v5254_v1  ;;  %v5147_v20 = vpop.f32.mrb[198].mxu1 }
0x1cca   :  { %v7848_v3 = vpop.f32.mrb[207].mxu0  ;;  %v7862_v61 = vpop.f32.mrb[199].mxu1  ;;  %v5257_v41 = vsel %vm759_vm4, %v5147_v20, -inf }
0x1ccb   :  { %5258 = vmax.xlane.f32.xlu1 %v5257_v41 }
0x1cf1   :  { %v11448_v40 = vpop.f32.mrb[200].mxu1 }
0x1cf2   :  { %v7865_v4 = vpop.f32.mrb[201].mxu1  ;;  %v5260_v9 = vsel %vm759_vm4, %v11448_v40, -inf }
0x1cf3   :  { %5261 = vmax.xlane.f32.xlu0 %v5260_v9  ;;  %v11452_v45 = vpop.f32.mrb[202].mxu1 }
0x1cf4   :  { %v7866_v53 = vpop.f32.mrb[203].mxu1  ;;  %v5263_v47 = vsel %vm759_vm4, %v11452_v45, -inf }
0x1cf7   :  { %5264 = vmax.xlane.f32.xlu0 %v5263_v47 }
0x1cf9   :  { %v11456_v0 = vpop.f32.mrb[204].mxu1 }
0x1cfa   :  { %v7869_v1 = vpop.f32.mrb[205].mxu1 }
0x1cfb   :  { %v11458_v3 = vpop.f32.mrb[206].mxu1 }
0x1cfc   :  { %v11460_v61 = vpop.f32.mrb[208].mxu0  ;;  %v7870_v41 = vpop.f32.mrb[207].mxu1 }
0x1cfd   :  { %v7851_v4 = vpop.f32.mrb[209].mxu0  ;;  %v5266_v41 = vsel %vm759_vm4, %v11456_v0, -inf }
0x1cfe   :  { %v11462_v27 = vpop.f32.mrb[210].mxu0  ;;  %v5269_v4 = vsel %vm759_vm4, %v11458_v3, -inf }
0x1cff   :  { %v7852_v28 = vpop.f32.mrb[211].mxu0 }
0x1d04   :  { %v5231_v53 = vpop.f32.mrb[212].mxu0 }
0x1d05   :  { %v7879_v62 = vpop.f32.mrb[213].mxu0  ;;  %v5272_v46 = vsel %vm759_vm4, %v5231_v53, -inf }
0x1d06   :  { %v5234_v47 = vpop.f32.mrb[214].mxu0  ;;  %5273 = vmax.xlane.f32.xlu0 %v5272_v46 }
0x1d07   :  { %v7880_v37 = vpop.f32.mrb[215].mxu0  ;;  %v5275_v1 = vsel %vm759_vm4, %v5234_v47, -inf }
0x1d08   :  { %5276 = vmax.xlane.f32.xlu1 %v5275_v1 }
0x1d0a   :  { %5267 = vmax.xlane.f32.xlu0 %v5266_v41 }
0x1d0c   :  { %v11472_v25 = vpop.f32.mrb[216].mxu0  ;;  %5270 = vmax.xlane.f32.xlu1 %v5269_v4 }
0x1d0d   :  { %v7883_v28 = vpop.f32.mrb[217].mxu0  ;;  %v5278_v62 = vsel %vm759_vm4, %v11472_v25, -inf }
0x1d0e   :  { %v11476_v9 = vpop.f32.mrb[218].mxu0  ;;  %5279 = vmax.xlane.f32.xlu0 %v5278_v62 }
0x1d0f   :  { %v7884_v37 = vpop.f32.mrb[219].mxu0  ;;  %v5281_v46 = vsel %vm759_vm4, %v11476_v9, -inf }
0x1d10   :  { %5282 = vmax.xlane.f32.xlu1 %v5281_v46 }
0x1d14   :  { %v11480_v1 = vpop.f32.mrb[220].mxu0 }
0x1d15   :  { %v7887_v41 = vpop.f32.mrb[221].mxu0  ;;  %v5284_v26 = vsel %vm759_vm4, %v11480_v1, -inf }
0x1d16   :  { %5285 = vmax.xlane.f32.xlu0 %v5284_v26  ;;  %v11484_v4 = vpop.f32.mrb[222].mxu0 }
0x1d17   :  { %v7888_v28 = vpop.f32.mrb[223].mxu0  ;;  %v5287_v13 = vsel %vm759_vm4, %v11484_v4, -inf }
0x1d18   :  { %5288 = vmax.xlane.f32.xlu1 %v5287_v13 }
0x1d29   :  { %5394 = vrot.lane.b32.xlu1 %v10677_v59, %s12298_s24 }
0x1d2c   :  { %5392 = vrot.lane.b32.xlu0 %v10679_v24, %s12298_s24 }
0x1d56   :  { %v5256_v62 = vpop.xlane.xlu0 %5255 }
0x1d57   :  { %v5290_v37 = vsub.f32 %v5144_v31, %v5256_v62 }
0x1d58   :  { %v5259_v46 = vpop.xlane.xlu1 %5258 }
0x1d59   :  { %v5302_v41 = vmul.f32 1.442695, %v5290_v37  ;;  %v5291_v8 = vsub.f32 %v5147_v20, %v5259_v46 }
0x1d5b   :  { %8661 = vpow2.f32 %v5302_v41  ;;  %v5304_v26 = vmul.f32 1.442695, %v5291_v8 }
0x1d5d   :  { %8663 = vpow2.f32 %v5304_v26 }
0x1d65   :  { %v11492_v57 = vpop.eup %8661 }
0x1d66   :  { %v5326_v28 = vsel %vm759_vm4, %v11492_v57, 0.0 }
0x1d67   :  { %v11496_v13 = vpop.eup %8663  ;;  %5327 = vadd.xlane.f32.xlu0 %v5326_v28 }
0x1d68   :  { %v5329_v59 = vsel %vm759_vm4, %v11496_v13, 0.0 }
0x1d69   :  { %5330 = vadd.xlane.f32.xlu1 %v5329_v59 }
0x1d80   :  { %v5262_v24 = vpop.xlane.xlu0 %5261 }
0x1d81   :  { %v5292_v31 = vsub.f32 %v11448_v40, %v5262_v24 }
0x1d83   :  { %v5306_v62 = vmul.f32 1.442695, %v5292_v31 }
0x1d84   :  { %v5265_v20 = vpop.xlane.xlu0 %5264 }
0x1d85   :  { %8665 = vpow2.f32 %v5306_v62  ;;  %v5293_v8 = vsub.f32 %v11452_v45, %v5265_v20 }
0x1d87   :  { %v5308_v37 = vmul.f32 1.442695, %v5293_v8 }
0x1d89   :  { %8667 = vpow2.f32 %v5308_v37 }
0x1d8f   :  { %v11502_v46 = vpop.eup %8665 }
0x1d90   :  { %v5332_v41 = vsel %vm759_vm4, %v11502_v46, 0.0 }
0x1d91   :  { %5333 = vadd.xlane.f32.xlu0 %v5332_v41 }
0x1d93   :  { %v11506_v26 = vpop.eup %8667  ;;  %v5274_v28 = vpop.xlane.xlu0 %5273 }
0x1d94   :  { %v5296_v59 = vsub.f32 %v5231_v53, %v5274_v28  ;;  %v5335_v40 = vsel %vm759_vm4, %v11506_v26, 0.0 }
0x1d95   :  { %5336 = vadd.xlane.f32.xlu1 %v5335_v40  ;;  %v5277_v24 = vpop.xlane.xlu1 %5276 }
0x1d96   :  { %v5314_v31 = vmul.f32 1.442695, %v5296_v59  ;;  %v5297_v62 = vsub.f32 %v5234_v47, %v5277_v24 }
0x1d97   :  { %v5268_v45 = vpop.xlane.xlu0 %5267 }
0x1d98   :  { %8669 = vpow2.f32 %v5314_v31  ;;  %v5316_v20 = vmul.f32 1.442695, %v5297_v62  ;;  %v5294_v8 = vsub.f32 %v11456_v0, %v5268_v45 }
0x1d99   :  { %v5271_v37 = vpop.xlane.xlu1 %5270 }
0x1d9a   :  { %8671 = vpow2.f32 %v5316_v20  ;;  %v5310_v7 = vmul.f32 1.442695, %v5294_v8  ;;  %v5295_v41 = vsub.f32 %v11458_v3, %v5271_v37 }
0x1d9b   :  { %v5280_v60 = vpop.xlane.xlu0 %5279 }
0x1d9c   :  { %8673 = vpow2.f32 %v5310_v7  ;;  %v5312_v53 = vmul.f32 1.442695, %v5295_v41  ;;  %v5298_v28 = vsub.f32 %v11472_v25, %v5280_v60 }
0x1d9d   :  { %v5283_v44 = vpop.xlane.xlu1 %5282 }
0x1d9e   :  { %8675 = vpow2.f32 %v5312_v53  ;;  %v5318_v40 = vmul.f32 1.442695, %v5298_v28  ;;  %v5299_v47 = vsub.f32 %v11476_v9, %v5283_v44 }
0x1da0   :  { %8677 = vpow2.f32 %v5318_v40  ;;  %v5320_v59 = vmul.f32 1.442695, %v5299_v47 }
0x1da2   :  { %v11514_v24 = vpop.eup %8669  ;;  %8679 = vpow2.f32 %v5320_v59 }
0x1da3   :  { %v5286_v0 = vpop.xlane.xlu0 %5285  ;;  %v5344_v31 = vsel %vm759_vm4, %v11514_v24, 0.0 }
0x1da4   :  { %v11518_v3 = vpop.eup %8671  ;;  %v5300_v7 = vsub.f32 %v11480_v1, %v5286_v0  ;;  %5345 = vadd.xlane.f32.xlu0 %v5344_v31 }
0x1da5   :  { %v5289_v25 = vpop.xlane.xlu1 %5288  ;;  %v5347_v60 = vsel %vm759_vm4, %v11518_v3, 0.0 }
0x1da6   :  { %v11523_v62 = vpop.eup %8673  ;;  %v5322_v44 = vmul.f32 1.442695, %v5300_v7  ;;  %v5301_v9 = vsub.f32 %v11484_v4, %v5289_v25  ;;  %5348 = vadd.xlane.f32.xlu1 %v5347_v60  ;;  %v12300_v7 = vpack.i.bf16 %v11192_v34, %v11190_v16  ;;  %v12301_v25 = vpack.i.bf16 %v11198_v14, %v11196_v29 }
0x1da7   :  { %v5393_v45 = vpop.permute.xlu0 %5392  ;;  %v5338_v20 = vsel %vm759_vm4, %v11523_v62, 0.0  ;;  %v12307_v16 = vpack.i.bf16 %v11436_v23, %v11434_v30  ;;  %v12308_v34 = vpack.i.bf16 %v11430_v58, %v11428_v15 }
0x1da8   :  { %v11528_v8 = vpop.eup %8675  ;;  %8681 = vpow2.f32 %v5322_v44  ;;  %v5324_v37 = vmul.f32 1.442695, %v5301_v9  ;;  %5339 = vadd.xlane.f32.xlu0 %v5338_v20  ;;  %7890 = vmatpush3.bf16.msra.mxu1 %v5393_v45 }
0x1da9   :  { %v5341_v1 = vsel %vm759_vm4, %v11528_v8, 0.0  ;;  %7891 = vmatprep.subr.bf16.mxu1 %v12254_v50  ;;  %v5395_v4 = vpop.permute.xlu1 %5394 }
0x1daa   :  { %v11533_v41 = vpop.eup %8677  ;;  %8683 = vpow2.f32 %v5324_v37  ;;  %5342 = vadd.xlane.f32.xlu1 %v5341_v1 }
0x1dab   :  { %v5350_v53 = vsel %vm759_vm4, %v11533_v41, 0.0 }
0x1dac   :  { %v11537_v28 = vpop.eup %8679  ;;  %5351 = vadd.xlane.f32.xlu0 %v5350_v53  ;;  %7892 = vmatpush3.bf16.msra.mxu1 %v5395_v4 }
0x1dad   :  { %v5353_v40 = vsel %vm759_vm4, %v11537_v28, 0.0  ;;  %7893 = vmatprep.subr.bf16.mxu1 %v12254_v50 }
0x1dae   :  { %5354 = vadd.xlane.f32.xlu1 %v5353_v40 }
0x1db2   :  { %v11542_v47 = vpop.eup %8681 }
0x1db3   :  { %v5356_v59 = vsel %vm759_vm4, %v11542_v47, 0.0 }
0x1db4   :  { %v11546_v0 = vpop.eup %8683  ;;  %5357 = vadd.xlane.f32.xlu1 %v5356_v59 }
0x1db5   :  { %v5359_v31 = vsel %vm759_vm4, %v11546_v0, 0.0 }
0x1db6   :  { %5360 = vadd.xlane.f32.xlu0 %v5359_v31 }
0x1dc5   :  { %5467 = vrot.lane.b32.xlu1 %v10685_v54, %s12298_s24  ;;  %v12303_v54 = vpack.i.bf16 %v11418_v39, %v11416_v43 }
0x1dc9   :  { %5469 = vrot.lane.b32.xlu1 %v10695_v19, %s12298_s24  ;;  %v12306_v19 = vpack.i.bf16 %v11204_v55, %v11202_v42 }
0x1dcc   :  { %5396 = vrot.lane.b32.xlu0 %v10687_v22, %s12298_s24  ;;  %v12304_v22 = vpack.i.bf16 %v11424_v12, %v11422_v10 }
0x1dcd   :  { %5471 = vrot.lane.b32.xlu1 %v10693_v21, %s12298_s24  ;;  %v12305_v21 = vpack.i.bf16 %v11210_v17, %v11208_v38 }
0x1dd0   :  { %8100 = vrot.lane.b32.xlu0 %v12300_v7, %s12299_s25 }
0x1dd1   :  { %8105 = vrot.lane.b32.xlu1 %v12301_v25, %s12299_s25 }
0x1dd4   :  { %8110 = vrot.lane.b32.xlu0 %v12303_v54, %s12302_s18 }
0x1dd5   :  { %8115 = vrot.lane.b32.xlu1 %v12304_v22, %s12302_s18 }
0x1dd8   :  { %8120 = vrot.lane.b32.xlu0 %v12305_v21, %s12299_s25 }
0x1dd9   :  { %8125 = vrot.lane.b32.xlu1 %v12306_v19, %s12299_s25 }
0x1ddc   :  { %8130 = vrot.lane.b32.xlu0 %v12307_v16, %s12302_s18 }
0x1ddd   :  { %8135 = vrot.lane.b32.xlu1 %v12308_v34, %s12302_s18 }
0x1df4   :  { %v5328_v29 = vpop.xlane.xlu0 %5327 }
0x1df6   :  { %v5331_v14 = vpop.xlane.xlu1 %5330 }
0x1df7   :  { %8685 = vrcp.f32 %v5331_v14 }
0x1df8   :  { %8687 = vrcp.f32 %v5328_v29 }
0x1e01   :  { %v8686_v23 = vpop.eup %8685 }
0x1e02   :  { %v8688_v58 = vpop.eup %8687  ;;  %v5375_v60 = vmul.f32 %v8686_v23, %v11496_v13  ;;  %v12310_v23 = vpack.i.bf16 %v11220_v32, %v11214_v11 }
0x1e03   :  { %v5374_v9 = vmul.f32 %v8688_v58, %v11492_v57 }
0x1e05   :  { %v5386_v1 = vpack.c.bf16 %v5375_v60, %v5374_v9 }
0x1e1e   :  { %v5334_v43 = vpop.xlane.xlu0 %5333 }
0x1e22   :  { %v5337_v38 = vpop.xlane.xlu1 %5336 }
0x1e31   :  { %v5346_v17 = vpop.xlane.xlu0 %5345 }
0x1e33   :  { %v5349_v39 = vpop.xlane.xlu1 %5348 }
0x1e34   :  { %8689 = vrcp.f32 %v5349_v39 }
0x1e35   :  { %v5340_v42 = vpop.xlane.xlu0 %5339  ;;  %8691 = vrcp.f32 %v5337_v38 }
0x1e36   :  { %8693 = vrcp.f32 %v5346_v17 }
0x1e37   :  { %v5343_v10 = vpop.xlane.xlu1 %5342  ;;  %8695 = vrcp.f32 %v5334_v43 }
0x1e39   :  { %v5352_v12 = vpop.xlane.xlu0 %5351 }
0x1e3b   :  { %v5355_v55 = vpop.xlane.xlu1 %5354 }
0x1e3c   :  { %8697 = vrcp.f32 %v5355_v55 }
0x1e3d   :  { %8699 = vrcp.f32 %v5343_v10 }
0x1e3e   :  { %v8690_v20 = vpop.eup %8689  ;;  %8701 = vrcp.f32 %v5352_v12 }
0x1e3f   :  { %v8692_v37 = vpop.eup %8691  ;;  %8703 = vrcp.f32 %v5340_v42  ;;  %v5381_v13 = vmul.f32 %v8690_v20, %v11518_v3 }
0x1e40   :  { %v8694_v53 = vpop.eup %8693  ;;  %v5377_v31 = vmul.f32 %v8692_v37, %v11506_v26 }
0x1e41   :  { %v5358_v30 = vpop.xlane.xlu1 %5357  ;;  %v8696_v57 = vpop.eup %8695  ;;  %v5380_v40 = vmul.f32 %v8694_v53, %v11514_v24  ;;  %v12311_v53 = vpack.i.bf16 %v11239_v49, %v11237_v2  ;;  %v12313_v2 = vpack.i.bf16 %v11462_v27, %v11460_v61 }
0x1e42   :  { %v5376_v25 = vmul.f32 %v8696_v57, %v11502_v46 }
0x1e43   :  { %v5361_v15 = vpop.xlane.xlu0 %5360  ;;  %v5389_v7 = vpack.c.bf16 %v5381_v13, %v5380_v40 }
0x1e44   :  { %8705 = vrcp.f32 %v5361_v15  ;;  %v5387_v22 = vpack.c.bf16 %v5377_v31, %v5376_v25 }
0x1e45   :  { %v5468_v44 = vpop.permute.xlu1 %5467  ;;  %8707 = vrcp.f32 %v5358_v30 }
0x1e46   :  { %7908 = vmatpush3.bf16.msra.mxu0 %v5468_v44  ;;  %v8698_v54 = vpop.eup %8697 }
0x1e47   :  { %v5397_v45 = vpop.permute.xlu0 %5396  ;;  %7909 = vmatprep.subr.bf16.mxu0 %v12254_v50  ;;  %v8700_v3 = vpop.eup %8699  ;;  %v5383_v24 = vmul.f32 %v8698_v54, %v11537_v28  ;;  %v12312_v54 = vpack.i.bf16 %v11443_v51, %v11440_v18 }
0x1e48   :  { %7894 = vmatpush3.bf16.msra.mxu1 %v5397_v45  ;;  %v8702_v21 = vpop.eup %8701  ;;  %v5379_v19 = vmul.f32 %v8700_v3, %v11528_v8 }
0x1e49   :  { %v5470_v4 = vpop.permute.xlu1 %5469  ;;  %v8704_v26 = vpop.eup %8703  ;;  %v5382_v46 = vmul.f32 %v8702_v21, %v11533_v41 }
0x1e4a   :  { %7910 = vmatpush3.bf16.msra.mxu0 %v5470_v4  ;;  %v5378_v34 = vmul.f32 %v8704_v26, %v11523_v62  ;;  %v8217_v62 = vld [vmem:[%s12185_s7 + $0x10] sm:$0xff]  }
0x1e4b   :  { %7896 = vmatmul.mubr.msk.bf16.vlgmr.msra.gmra.mrb[208].mxu1 %vm759_vm4, %v5386_v1  ;;  %7911 = vmatprep.subr.bf16.mxu0 %v12254_v50  ;;  %v5390_v16 = vpack.c.bf16 %v5383_v24, %v5382_v46  ;;  %v8101_v3 = vpop.permute.xlu0 %8100 }
0x1e4c   :  { %7899 = vmatprep.mubr.msk.bf16.mxu1 %vm8807_vm2, %v12254_v50  ;;  %v5388_v14 = vpack.c.bf16 %v5379_v19, %v5378_v34  ;;  %7925 = vmatprep.subr.bf16.mxu1 %v8217_v62  ;;  %v8103_v19 = vunpack.i.h.bf16 %v8101_v3 }
0x1e4d   :  { %v5472_v59 = vpop.permute.xlu1 %5471  ;;  %7926 = vmatpush3.bf16.msra.mxu1 %v8217_v62 }
0x1e4e   :  { %7912 = vmatpush3.bf16.msra.mxu0 %v5472_v59  ;;  %v8706_v29 = vpop.eup %8705  ;;  %v5687_v27 = vsel %vm599_vm3, %v10957_v35, %v8103_v19 }
0x1e4f   :  { %v8708_v43 = vpop.eup %8707  ;;  %v5385_v28 = vmul.f32 %v8706_v29, %v11546_v0 }
0x1e50   :  { %v5384_v38 = vmul.f32 %v8708_v43, %v11542_v47 }
0x1e51   :  { %7914 = vmatmul.mubr.msk.bf16.vlgmr.msra.gmra.mrb[224].mxu0 %vm759_vm4, %v5389_v7  ;;  %v8106_v21 = vpop.permute.xlu1 %8105 }
0x1e52   :  { %7917 = vmatprep.mubr.msk.bf16.mxu0 %vm8807_vm2, %v12254_v50  ;;  %v5391_v41 = vpack.c.bf16 %v5385_v28, %v5384_v38 }
0x1e53   :  { %7900 = vmatmul.mubr.msk.bf16.gmra.mrb[212].mxu1 %vm759_vm4, %v5387_v22  ;;  %v8111_v22 = vpop.permute.xlu0 %8110 }
0x1e54   :  { %7903 = vmatprep.mubr.msk.bf16.mxu1 %vm8807_vm2, %v12254_v50  ;;  %v8113_v18 = vunpack.i.h.bf16 %v8111_v22  ;;  %v8112_v51 = vunpack.i.l.bf16 %v8111_v22 }
0x1e55   :  { %v8116_v26 = vpop.permute.xlu1 %8115 }
0x1e56   :  { %v5699_v38 = vsel %vm2590_vm5, %v5687_v27, %v8113_v18 }
0x1e57   :  { %v8121_v24 = vpop.permute.xlu0 %8120 }
0x1e59   :  { %7918 = vmatmul.mubr.msk.bf16.gmra.mrb[228].mxu0 %vm759_vm4, %v5390_v16  ;;  %v8102_v16 = vunpack.i.l.bf16 %v8101_v3  ;;  %v8126_v34 = vpop.permute.xlu1 %8125 }
0x1e5a   :  { %7921 = vmatprep.mubr.msk.bf16.mxu0 %vm8807_vm2, %v12254_v50  ;;  %v8218_v50 = vld [vmem:[%s12185_s7 + $0x18] sm:$0xff]  }
0x1e5b   :  { %7904 = vmatmul.mubr.msk.bf16.gmra.mrb[216].mxu1 %vm759_vm4, %v5388_v14  ;;  %7927 = vmatprep.subr.bf16.mxu1 %v8218_v50  ;;  %v8131_v46 = vpop.permute.xlu0 %8130  ;;  %v5686_v61 = vsel %vm599_vm3, %v10955_v56, %v8102_v16 }
0x1e5c   :  { %7928 = vmatpush3.bf16.msra.mxu1 %v8218_v50  ;;  %v5698_v28 = vsel %vm2590_vm5, %v5686_v61, %v8112_v51 }
0x1e61   :  { %7922 = vmatmul.mubr.msk.bf16.gmra.mrb[232].mxu0 %vm759_vm4, %v5391_v41 }
0x1f1e   :  { %v5444_v8 = vpop.f32.mrb[208].mxu1 }
0x1f1f   :  { %v7897_v17 = vpop.f32.mrb[209].mxu1 }
0x1f20   :  { %v5447_v39 = vpop.f32.mrb[210].mxu1  ;;  %v8108_v17 = vunpack.i.h.bf16 %v8106_v21 }
0x1f21   :  { %v8139_v0 = vpack.i.bf16 %v5447_v39, %v5444_v8  ;;  %v7898_v10 = vpop.f32.mrb[211].mxu1  ;;  %v8136_v8 = vpop.permute.xlu1 %8135  ;;  %v8107_v39 = vunpack.i.l.bf16 %v8106_v21 }
0x1f22   :  { %v8117_v10 = vunpack.i.l.bf16 %v8116_v26  ;;  %v5689_v56 = vsel %vm599_vm3, %v10961_v5, %v8108_v17 }
0x1f23   :  { %8140 = vrot.lane.b32.xlu0 %v8139_v0, %s12309_s20  ;;  %v8118_v0 = vunpack.i.h.bf16 %v8116_v26 }
0x1f24   :  { %v5519_v47 = vpop.f32.mrb[224].mxu0 }
0x1f25   :  { %v7915_v42 = vpop.f32.mrb[225].mxu0 }
0x1f26   :  { %v5452_v55 = vpop.f32.mrb[212].mxu1  ;;  %v5522_v12 = vpop.f32.mrb[226].mxu0 }
0x1f27   :  { %v8169_v30 = vpack.i.bf16 %v5522_v12, %v5519_v47  ;;  %8145 = vrot.lane.b32.xlu0 %v12310_v23, %s12299_s25  ;;  %v7901_v15 = vpop.f32.mrb[213].mxu1  ;;  %v7916_v58 = vpop.f32.mrb[227].mxu0  ;;  %v5688_v47 = vsel %vm599_vm3, %v10959_v33, %v8107_v39  ;;  %v8123_v12 = vunpack.i.h.bf16 %v8121_v24  ;;  %v5701_v23 = vsel %vm2590_vm5, %v5689_v56, %v8118_v0 }
0x1f28   :  { %v5455_v60 = vpop.f32.mrb[214].mxu1  ;;  %v8122_v15 = vunpack.i.l.bf16 %v8121_v24  ;;  %v8133_v58 = vunpack.i.h.bf16 %v8131_v46  ;;  %v8138_v33 = vunpack.i.h.bf16 %v8136_v8 }
0x1f29   :  { %v8149_v44 = vpack.i.bf16 %v5455_v60, %v5452_v55  ;;  %v7902_v9 = vpop.f32.mrb[215].mxu1 }
0x1f2a   :  { %v8132_v9 = vunpack.i.l.bf16 %v8131_v46 }
0x1f2b   :  { %8150 = vrot.lane.b32.xlu1 %v8149_v44, %s12309_s20 }
0x1f2c   :  { %v5527_v45 = vpop.f32.mrb[228].mxu0 }
0x1f2d   :  { %v7919_v20 = vpop.f32.mrb[229].mxu0 }
0x1f2e   :  { %v5460_v37 = vpop.f32.mrb[216].mxu1  ;;  %v5530_v1 = vpop.f32.mrb[230].mxu0  ;;  %v8127_v20 = vunpack.i.l.bf16 %v8126_v34 }
0x1f2f   :  { %v8179_v4 = vpack.i.bf16 %v5530_v1, %v5527_v45  ;;  %8155 = vrot.lane.b32.xlu1 %v12311_v53, %s12299_s25  ;;  %v7905_v13 = vpop.f32.mrb[217].mxu1  ;;  %v7920_v11 = vpop.f32.mrb[231].mxu0  ;;  %v8128_v45 = vunpack.i.h.bf16 %v8126_v34  ;;  %v5691_v53 = vsel %vm599_vm3, %v10969_v48, %v8123_v12 }
0x1f30   :  { %v5463_v32 = vpop.f32.mrb[218].mxu1  ;;  %v5690_v13 = vsel %vm599_vm3, %v10967_v6, %v8122_v15 }
0x1f31   :  { %v8159_v57 = vpack.i.bf16 %v5463_v32, %v5460_v37  ;;  %v7906_v40 = vpop.f32.mrb[219].mxu1  ;;  %v5702_v11 = vsel %vm2590_vm5, %v5690_v13, %v8132_v9  ;;  %v5703_v32 = vsel %vm2590_vm5, %v5691_v53, %v8133_v58  ;;  %v12317_v9 = vld [vmem:[#allocation17_spill] sm:$0xff] }
0x1f32   :  { %v5692_v40 = vsel %vm599_vm3, %v10963_v36, %v8127_v20  ;;  %v12318_v20 = vld [vmem:[#allocation18_spill] sm:$0xff] }
0x1f33   :  { %8160 = vrot.lane.b32.xlu0 %v8159_v57, %s12309_s20  ;;  %8170 = vrot.lane.b32.xlu1 %v8169_v30, %s12309_s20  ;;  %v5700_v30 = vsel %vm2590_vm5, %v5688_v47, %v8117_v10  ;;  %v5693_v57 = vsel %vm599_vm3, %v10965_v52, %v8128_v45 }
0x1f34   :  { %v5535_v59 = vpop.f32.mrb[232].mxu0  ;;  %v5705_v6 = vsel %vm2590_vm5, %v5693_v57, %v8138_v33 }
0x1f35   :  { %v7923_v31 = vpop.f32.mrb[233].mxu0 }
0x1f36   :  { %v5538_v7 = vpop.f32.mrb[234].mxu0 }
0x1f37   :  { %v8184_v25 = vpack.i.bf16 %v5538_v7, %v5535_v59  ;;  %8165 = vrot.lane.b32.xlu0 %v12312_v54, %s12302_s18  ;;  %8175 = vrot.lane.b32.xlu1 %v12313_v2, %s12302_s18  ;;  %v7924_v49 = vpop.f32.mrb[235].mxu0 }
0x1f3b   :  { %8180 = vrot.lane.b32.xlu0 %v8179_v4, %s12309_s20  ;;  %8185 = vrot.lane.b32.xlu1 %v8184_v25, %s12309_s20  ;;  %v8137_v4 = vunpack.i.l.bf16 %v8136_v8 }
0x1f3d   :  { %v5704_v48 = vsel %vm2590_vm5, %v5692_v40, %v8137_v4  ;;  %v12319_v4 = vld [vmem:[#allocation5_spill] sm:$0xff] }
0x1f95   :  { %v8141_v29 = vpop.permute.xlu0 %8140 }
0x1f96   :  { %v8143_v14 = vunpack.i.h.bf16 %v8141_v29  ;;  %v8142_v43 = vunpack.i.l.bf16 %v8141_v29 }
0x1f98   :  { %v5711_v41 = vsel %vm2603_vm6, %v5699_v38, %v8143_v14  ;;  %v5710_v62 = vsel %vm2603_vm6, %v5698_v28, %v8142_v43  ;;  %v12314_v14 = vld [vmem:[#allocation15_spill] sm:$0xff] }
0x1f99   :  { %v5722_v50 = vpack.c.bf16 %v5711_v41, %v5710_v62  ;;  %v8146_v5 = vpop.permute.xlu0 %8145  ;;  %v12315_v28 = vld [vmem:[#allocation19_spill] sm:$0xff]  ;;  %v12316_v41 = vld [vmem:[#allocation16_spill] sm:$0xff] }
0x1f9a   :  { %v8148_v49 = vunpack.i.h.bf16 %v8146_v5  ;;  %v8147_v3 = vunpack.i.l.bf16 %v8146_v5 }
0x1f9b   :  { %7929 = vmatprep.mubr.msk.bf16.mxu1 %vm262_vm1, %v5722_v50 }
0x1f9c   :  { %v5695_v61 = vsel %vm599_vm3, %v10974_v63, %v8148_v49  ;;  %v5694_v43 = vsel %vm599_vm3, %v12314_v14, %v8147_v3  ;;  %v12322_v3 = vld [vmem:[#allocation9_spill] sm:$0xff] }
0x1f9d   :  { %v8151_v35 = vpop.permute.xlu1 %8150 }
0x1f9e   :  { %v8153_v42 = vunpack.i.h.bf16 %v8151_v35  ;;  %v8152_v55 = vunpack.i.l.bf16 %v8151_v35 }
0x1fa0   :  { %v5712_v60 = vsel %vm2603_vm6, %v5700_v30, %v8152_v55  ;;  %v5713_v44 = vsel %vm2603_vm6, %v5701_v23, %v8153_v42 }
0x1fa1   :  { %v5723_v37 = vpack.c.bf16 %v5713_v44, %v5712_v60  ;;  %v8156_v1 = vpop.permute.xlu1 %8155  ;;  %v6906_v60 = vld [vmem:[%s12186_s8 + $0x1] ss:$0 sm:$0xff] }
0x1fa2   :  { %v8158_v24 = vunpack.i.h.bf16 %v8156_v1  ;;  %v8157_v26 = vunpack.i.l.bf16 %v8156_v1 }
0x1fa3   :  { %7930 = vmatmul.mubr.msk.bf16.vlgmr.msra.gmra.mrb[220].mxu1 %vm262_vm1, %v5723_v37 }
0x1fa4   :  { %v5697_v38 = vsel %vm599_vm3, %v12315_v28, %v8158_v24  ;;  %v5696_v62 = vsel %vm599_vm3, %v12316_v41, %v8157_v26 }
0x1fa5   :  { %v8161_v59 = vpop.permute.xlu0 %8160  ;;  %v8171_v31 = vpop.permute.xlu1 %8170 }
0x1fa6   :  { %v8163_v7 = vunpack.i.h.bf16 %v8161_v59  ;;  %v8162_v25 = vunpack.i.l.bf16 %v8161_v59  ;;  %v8173_v54 = vunpack.i.h.bf16 %v8171_v31  ;;  %v8172_v2 = vunpack.i.l.bf16 %v8171_v31 }
0x1fa8   :  { %v5715_v22 = vsel %vm2603_vm6, %v5703_v32, %v8163_v7  ;;  %v5714_v21 = vsel %vm2603_vm6, %v5702_v11, %v8162_v25  ;;  %v5716_v52 = vsel %vm2603_vm6, %v5704_v48, %v8172_v2  ;;  %v5717_v36 = vsel %vm2603_vm6, %v5705_v6, %v8173_v54  ;;  %v12320_v11 = vld [vmem:[#allocation6_spill] sm:$0xff]  ;;  %v12321_v2 = vld [vmem:[#allocation8_spill] sm:$0xff] }
0x1fa9   :  { %v5724_v46 = vpack.c.bf16 %v5715_v22, %v5714_v21  ;;  %v5725_v19 = vpack.c.bf16 %v5717_v36, %v5716_v52  ;;  %v8166_v16 = vpop.permute.xlu0 %8165  ;;  %v8176_v18 = vpop.permute.xlu1 %8175  ;;  %v12323_v21 = vld [vmem:[#allocation10_spill] sm:$0xff]  ;;  %v12324_v36 = vld [vmem:[#allocation7_spill] sm:$0xff] }
0x1faa   :  { %v8168_v51 = vunpack.i.h.bf16 %v8166_v16  ;;  %v8167_v34 = vunpack.i.l.bf16 %v8166_v16  ;;  %v8178_v29 = vunpack.i.h.bf16 %v8176_v18  ;;  %v8177_v27 = vunpack.i.l.bf16 %v8176_v18 }
0x1fab   :  { %7933 = vmatprep.mubr.msk.bf16.mxu1 %vm262_vm1, %v5724_v46 }
0x1fac   :  { %7934 = vmatmul.mubr.msk.bf16.gmra.mrb[224].mxu1 %vm262_vm1, %v5725_v19  ;;  %v5707_v35 = vsel %vm2590_vm5, %v5695_v61, %v8168_v51  ;;  %v5706_v56 = vsel %vm2590_vm5, %v5694_v43, %v8167_v34  ;;  %v5708_v63 = vsel %vm2590_vm5, %v5696_v62, %v8177_v27  ;;  %v5709_v47 = vsel %vm2590_vm5, %v5697_v38, %v8178_v29  ;;  %v12325_v61 = vld [vmem:[#allocation12_spill] sm:$0xff]  ;;  %v12326_v38 = vld [vmem:[#allocation14_spill] sm:$0xff]  ;;  %v12327_v62 = vld [vmem:[#allocation13_spill] sm:$0xff] }
0x1fad   :  { %v8181_v8 = vpop.permute.xlu0 %8180  ;;  %v8186_v50 = vpop.permute.xlu1 %8185 }
0x1fae   :  { %v8183_v17 = vunpack.i.h.bf16 %v8181_v8  ;;  %v8182_v39 = vunpack.i.l.bf16 %v8181_v8  ;;  %v8188_v0 = vunpack.i.h.bf16 %v8186_v50  ;;  %v8187_v10 = vunpack.i.l.bf16 %v8186_v50 }
0x1fb0   :  { %v5719_v42 = vsel %vm2603_vm6, %v5707_v35, %v8183_v17  ;;  %v5718_v55 = vsel %vm2603_vm6, %v5706_v56, %v8182_v39  ;;  %v5720_v12 = vsel %vm2603_vm6, %v5708_v63, %v8187_v10  ;;  %v5721_v30 = vsel %vm2603_vm6, %v5709_v47, %v8188_v0  ;;  %v12328_v17 = vld [vmem:[#allocation11_spill] sm:$0xff] }
0x1fb1   :  { %v5726_v23 = vpack.c.bf16 %v5719_v42, %v5718_v55  ;;  %v5727_v15 = vpack.c.bf16 %v5721_v30, %v5720_v12 }
0x1fb3   :  { %7937 = vmatprep.mubr.msk.bf16.mxu1 %vm262_vm1, %v5726_v23 }
0x1fb4   :  { %7938 = vmatmul.mubr.msk.bf16.gmra.mrb[228].mxu1 %vm262_vm1, %v5727_v15 }
0x2076   :  { %v7931_v58 = vpop.f32.mrb[220].mxu1 }
0x2077   :  { %v5797_v44 = vpop.f32.mrb[221].mxu1  ;;  %v5846_v45 = vadd.f32 %v7931_v58, %v12317_v9 }
0x2078   :  { %v5844_v5 = vadd.f32 %v5797_v44, %v12318_v20  ;;  %v7932_v37 = vpop.f32.mrb[222].mxu1 }
0x2079   :  { %v5800_v1 = vpop.f32.mrb[223].mxu1  ;;  %v11708_v13 = vadd.f32 %v6906_v60, %v5846_v45  ;;  %v5847_v32 = vadd.f32 %v7932_v37, %v12320_v11 }
0x207a   :  { %v11705_v33 = vadd.f32 %v6906_v60, %v5844_v5  ;;  %v5845_v53 = vadd.f32 %v5800_v1, %v12319_v4 }
0x207b   :  { %v11717_v7 = vadd.f32 %v6906_v60, %v5847_v32  ;;  %v5886_v54 = vsel %vm262_vm1, %v11708_v13, 0.0 }
0x207c   :  { %v11711_v57 = vadd.f32 %v6906_v60, %v5845_v53  ;;  %v5880_v40 = vsel %vm262_vm1, %v11705_v33, 0.0 }
0x207d   :  { %5881 = vadd.xlane.f32.xlu0 %v5880_v40  ;;  %v5889_v46 = vsel %vm262_vm1, %v11717_v7, 0.0 }
0x207e   :  { %v5883_v59 = vsel %vm262_vm1, %v11711_v57, 0.0 }
0x207f   :  { %5884 = vadd.xlane.f32.xlu1 %v5883_v59  ;;  %v7935_v31 = vpop.f32.mrb[224].mxu1 }
0x2080   :  { %v5813_v25 = vpop.f32.mrb[225].mxu1  ;;  %v5850_v24 = vadd.f32 %v7935_v31, %v12324_v36 }
0x2081   :  { %v5848_v48 = vadd.f32 %v5813_v25, %v12321_v2  ;;  %5887 = vadd.xlane.f32.xlu0 %v5886_v54  ;;  %v7936_v6 = vpop.f32.mrb[226].mxu1 }
0x2082   :  { %v5816_v49 = vpop.f32.mrb[227].mxu1  ;;  %v5851_v22 = vadd.f32 %v7936_v6, %v12322_v3  ;;  %v11735_v34 = vadd.f32 %v6906_v60, %v5850_v24 }
0x2083   :  { %v5849_v52 = vadd.f32 %v5816_v49, %v12323_v21  ;;  %v11725_v26 = vadd.f32 %v6906_v60, %v5848_v48 }
0x2084   :  { %v11731_v16 = vadd.f32 %v6906_v60, %v5851_v22  ;;  %v5898_v10 = vsel %vm262_vm1, %v11735_v34, 0.0 }
0x2085   :  { %v11729_v19 = vadd.f32 %v6906_v60, %v5849_v52  ;;  %5890 = vadd.xlane.f32.xlu0 %v5889_v46  ;;  %v5892_v27 = vsel %vm262_vm1, %v11725_v26, 0.0 }
0x2086   :  { %v5901_v50 = vsel %vm262_vm1, %v11731_v16, 0.0 }
0x2087   :  { %v7939_v18 = vpop.f32.mrb[228].mxu1  ;;  %v5895_v51 = vsel %vm262_vm1, %v11729_v19, 0.0 }
0x2088   :  { %5896 = vadd.xlane.f32.xlu1 %v5895_v51  ;;  %v5829_v29 = vpop.f32.mrb[229].mxu1  ;;  %v5854_v39 = vadd.f32 %v7939_v18, %v12328_v17 }
0x2089   :  { %v5852_v14 = vadd.f32 %v5829_v29, %v12325_v61  ;;  %5893 = vadd.xlane.f32.xlu0 %v5892_v27  ;;  %v7940_v43 = vpop.f32.mrb[230].mxu1 }
0x208a   :  { %v5832_v28 = vpop.f32.mrb[231].mxu1  ;;  %v5855_v41 = vadd.f32 %v7940_v43, %v12326_v38  ;;  %v11755_v47 = vadd.f32 %v6906_v60, %v5854_v39 }
0x208b   :  { %v5853_v8 = vadd.f32 %v5832_v28, %v12327_v62  ;;  %v11745_v0 = vadd.f32 %v6906_v60, %v5852_v14 }
0x208c   :  { %5902 = vadd.xlane.f32.xlu1 %v5901_v50  ;;  %v11751_v56 = vadd.f32 %v6906_v60, %v5855_v41  ;;  %v5910_v12 = vsel %vm262_vm1, %v11755_v47, 0.0 }
0x208d   :  { %v11749_v35 = vadd.f32 %v6906_v60, %v5853_v8  ;;  %5899 = vadd.xlane.f32.xlu0 %v5898_v10  ;;  %v5904_v42 = vsel %vm262_vm1, %v11745_v0, 0.0 }
0x208e   :  { %v5913_v55 = vsel %vm262_vm1, %v11751_v56, 0.0 }
0x208f   :  { %v5907_v63 = vsel %vm262_vm1, %v11749_v35, 0.0 }
0x2090   :  { %5908 = vadd.xlane.f32.xlu1 %v5907_v63 }
0x2091   :  { %5905 = vadd.xlane.f32.xlu0 %v5904_v42 }
0x2094   :  { %5914 = vadd.xlane.f32.xlu1 %v5913_v55 }
0x2095   :  { %5911 = vadd.xlane.f32.xlu0 %v5910_v12 }
0x210a   :  { %v5882_v30 = vpop.xlane.xlu0 %5881 }
0x210b   :  { %v5916_v23 = vmul.f32 0.03125, %v5882_v30 }
0x210c   :  { %v5885_v15 = vpop.xlane.xlu1 %5884 }
0x210d   :  { %v11764_v58 = vsub.f32 %v11705_v33, %v5916_v23  ;;  %v5917_v60 = vmul.f32 0.03125, %v5885_v15 }
0x210e   :  { %v5888_v44 = vpop.xlane.xlu0 %5887 }
0x210f   :  { %v11767_v9 = vsub.f32 %v11711_v57, %v5917_v60  ;;  %v5918_v45 = vmul.f32 0.03125, %v5888_v44  ;;  %v5940_v20 = vmul.f32 %v11764_v58, %v11764_v58 }
0x2111   :  { %v11772_v5 = vsub.f32 %v11708_v13, %v5918_v45  ;;  %v5952_v37 = vsel %vm262_vm1, %v5940_v20, 0.0  ;;  %v5941_v1 = vmul.f32 %v11767_v9, %v11767_v9 }
0x2112   :  { %v5891_v4 = vpop.xlane.xlu0 %5890  ;;  %5953 = vadd.xlane.f32.xlu0 %v5952_v37 }
0x2113   :  { %v5919_v53 = vmul.f32 0.03125, %v5891_v4  ;;  %v5955_v11 = vsel %vm262_vm1, %v5941_v1, 0.0  ;;  %v5942_v32 = vmul.f32 %v11772_v5, %v11772_v5  ;;  %v8219_v1 = vld [vmem:[%s12189_s11 + $0x10] sm:$0xff]   ;;  %v8220_v4 = vld [vmem:[%s12189_s11 + $0x18] sm:$0xff]  }
0x2114   :  { %5956 = vadd.xlane.f32.xlu1 %v5955_v11  ;;  %7941 = vmatprep.subr.bf16.mxu0 %v8219_v1 }
0x2115   :  { %v11781_v40 = vsub.f32 %v11717_v7, %v5919_v53  ;;  %v5897_v59 = vpop.xlane.xlu1 %5896  ;;  %v5958_v31 = vsel %vm262_vm1, %v5942_v32, 0.0  ;;  %7942 = vmatpush3.bf16.msra.mxu0 %v8219_v1 }
0x2116   :  { %v5921_v25 = vmul.f32 0.03125, %v5897_v59  ;;  %v5894_v54 = vpop.xlane.xlu0 %5893  ;;  %5959 = vadd.xlane.f32.xlu0 %v5958_v31  ;;  %7943 = vmatprep.subr.bf16.mxu0 %v8220_v4 }
0x2117   :  { %v5920_v2 = vmul.f32 0.03125, %v5894_v54  ;;  %v5943_v48 = vmul.f32 %v11781_v40, %v11781_v40 }
0x2118   :  { %v11787_v6 = vsub.f32 %v11729_v19, %v5921_v25 }
0x2119   :  { %v11790_v49 = vsub.f32 %v11725_v26, %v5920_v2  ;;  %v5903_v3 = vpop.xlane.xlu1 %5902  ;;  %v5961_v22 = vsel %vm262_vm1, %v5943_v48, 0.0  ;;  %7944 = vmatpush3.bf16.msra.mxu0 %v8220_v4 }
0x211a   :  { %v5923_v21 = vmul.f32 0.03125, %v5903_v3  ;;  %v5900_v52 = vpop.xlane.xlu0 %5899  ;;  %5962 = vadd.xlane.f32.xlu1 %v5961_v22  ;;  %v5945_v36 = vmul.f32 %v11787_v6, %v11787_v6 }
0x211b   :  { %v5922_v24 = vmul.f32 0.03125, %v5900_v52  ;;  %v5944_v46 = vmul.f32 %v11790_v49, %v11790_v49 }
0x211c   :  { %v11798_v18 = vsub.f32 %v11731_v16, %v5923_v21  ;;  %v5967_v51 = vsel %vm262_vm1, %v5945_v36, 0.0 }
0x211d   :  { %v11802_v29 = vsub.f32 %v11735_v34, %v5922_v24  ;;  %v5909_v27 = vpop.xlane.xlu1 %5908  ;;  %v5964_v61 = vsel %vm262_vm1, %v5944_v46, 0.0 }
0x211e   :  { %v5925_v14 = vmul.f32 0.03125, %v5909_v27  ;;  %5965 = vadd.xlane.f32.xlu0 %v5964_v61  ;;  %v5906_v43 = vpop.xlane.xlu0 %5905  ;;  %5968 = vadd.xlane.f32.xlu1 %v5967_v51  ;;  %v5947_v28 = vmul.f32 %v11798_v18, %v11798_v18  ;;  %v11844_v27 = vld [vmem:[%s12187_s9 + $0x1] ss:$0 sm:$0xff] }
0x211f   :  { %v5924_v38 = vmul.f32 0.03125, %v5906_v43  ;;  %v5946_v41 = vmul.f32 %v11802_v29, %v11802_v29 }
0x2120   :  { %v11810_v62 = vsub.f32 %v11749_v35, %v5925_v14  ;;  %v5973_v8 = vsel %vm262_vm1, %v5947_v28, 0.0 }
0x2121   :  { %v11814_v50 = vsub.f32 %v11745_v0, %v5924_v38  ;;  %v5915_v17 = vpop.xlane.xlu1 %5914  ;;  %v5970_v39 = vsel %vm262_vm1, %v5946_v41, 0.0 }
0x2122   :  { %v5927_v10 = vmul.f32 0.03125, %v5915_v17  ;;  %5971 = vadd.xlane.f32.xlu0 %v5970_v39  ;;  %v5912_v63 = vpop.xlane.xlu0 %5911  ;;  %5974 = vadd.xlane.f32.xlu1 %v5973_v8  ;;  %v5949_v42 = vmul.f32 %v11810_v62, %v11810_v62 }
0x2123   :  { %v5926_v55 = vmul.f32 0.03125, %v5912_v63  ;;  %v5948_v12 = vmul.f32 %v11814_v50, %v11814_v50 }
0x2124   :  { %v11822_v30 = vsub.f32 %v11751_v56, %v5927_v10  ;;  %v5979_v23 = vsel %vm262_vm1, %v5949_v42, 0.0  ;;  %v11852_v42 = vld [vmem:[%s12188_s10 + $0x1] ss:$0 sm:$0xff] }
0x2125   :  { %v11826_v15 = vsub.f32 %v11755_v47, %v5926_v55  ;;  %v5976_v60 = vsel %vm262_vm1, %v5948_v12, 0.0 }
0x2126   :  { %5977 = vadd.xlane.f32.xlu0 %v5976_v60  ;;  %5980 = vadd.xlane.f32.xlu1 %v5979_v23  ;;  %v5951_v44 = vmul.f32 %v11822_v30, %v11822_v30 }
0x2127   :  { %v5950_v45 = vmul.f32 %v11826_v15, %v11826_v15 }
0x2128   :  { %v5985_v20 = vsel %vm262_vm1, %v5951_v44, 0.0 }
0x2129   :  { %v5982_v37 = vsel %vm262_vm1, %v5950_v45, 0.0 }
0x212a   :  { %5983 = vadd.xlane.f32.xlu0 %v5982_v37  ;;  %5986 = vadd.xlane.f32.xlu1 %v5985_v20 }
0x219f   :  { %v5954_v53 = vpop.xlane.xlu0 %5953 }
0x21a0   :  { %v5988_v11 = vmul.f32 0.03125, %v5954_v53 }
0x21a1   :  { %v5957_v32 = vpop.xlane.xlu1 %5956 }
0x21a2   :  { %v6000_v59 = vadd.f32 1e-05, %v5988_v11  ;;  %v5989_v31 = vmul.f32 0.03125, %v5957_v32 }
0x21a3   :  { %v5960_v25 = vpop.xlane.xlu0 %5959 }
0x21a4   :  { %8709 = vrsqrt.f32 %v6000_v59  ;;  %v6001_v54 = vadd.f32 1e-05, %v5989_v31  ;;  %v5990_v2 = vmul.f32 0.03125, %v5960_v25 }
0x21a6   :  { %8711 = vrsqrt.f32 %v6001_v54  ;;  %v6002_v48 = vadd.f32 1e-05, %v5990_v2 }
0x21a7   :  { %v5963_v3 = vpop.xlane.xlu1 %5962 }
0x21a8   :  { %8713 = vrsqrt.f32 %v6002_v48  ;;  %v5991_v22 = vmul.f32 0.03125, %v5963_v3 }
0x21aa   :  { %v6003_v21 = vadd.f32 1e-05, %v5991_v22 }
0x21ab   :  { %v5966_v52 = vpop.xlane.xlu0 %5965  ;;  %v5969_v36 = vpop.xlane.xlu1 %5968 }
0x21ac   :  { %8715 = vrsqrt.f32 %v6003_v21  ;;  %v5992_v24 = vmul.f32 0.03125, %v5966_v52  ;;  %v5993_v46 = vmul.f32 0.03125, %v5969_v36 }
0x21ae   :  { %v8710_v51 = vpop.eup %8709  ;;  %v6004_v61 = vadd.f32 1e-05, %v5992_v24  ;;  %v6005_v14 = vadd.f32 1e-05, %v5993_v46 }
0x21af   :  { %v6024_v43 = vmul.f32 %v8710_v51, %v11764_v58  ;;  %v5972_v28 = vpop.xlane.xlu0 %5971  ;;  %v5975_v38 = vpop.xlane.xlu1 %5974 }
0x21b0   :  { %v8712_v41 = vpop.eup %8711  ;;  %8717 = vrsqrt.f32 %v6004_v61  ;;  %v5994_v8 = vmul.f32 0.03125, %v5972_v28  ;;  %v5995_v17 = vmul.f32 0.03125, %v5975_v38 }
0x21b1   :  { %v6025_v39 = vmul.f32 %v8712_v41, %v11767_v9  ;;  %8719 = vrsqrt.f32 %v6005_v14  ;;  %v6042_v10 = vmul.f32 %v11844_v27, %v6024_v43 }
0x21b2   :  { %v8714_v63 = vpop.eup %8713  ;;  %v6006_v55 = vadd.f32 1e-05, %v5994_v8  ;;  %v6007_v12 = vadd.f32 1e-05, %v5995_v17 }
0x21b3   :  { %v6026_v58 = vmul.f32 %v8714_v63, %v11772_v5  ;;  %v5978_v23 = vpop.xlane.xlu0 %5977  ;;  %v5981_v60 = vpop.xlane.xlu1 %5980  ;;  %v6043_v44 = vmul.f32 %v11844_v27, %v6025_v39  ;;  %v6060_v20 = vadd.f32 %v11852_v42, %v6042_v10 }
0x21b4   :  { %8721 = vrsqrt.f32 %v6006_v55  ;;  %v5996_v45 = vmul.f32 0.03125, %v5978_v23  ;;  %v5997_v9 = vmul.f32 0.03125, %v5981_v60 }
0x21b5   :  { %8723 = vrsqrt.f32 %v6007_v12  ;;  %v6061_v37 = vadd.f32 %v11852_v42, %v6043_v44  ;;  %v6044_v11 = vmul.f32 %v11844_v27, %v6026_v58 }
0x21b6   :  { %v8716_v1 = vpop.eup %8715  ;;  %v6008_v4 = vadd.f32 1e-05, %v5996_v45  ;;  %v6009_v53 = vadd.f32 1e-05, %v5997_v9 }
0x21b7   :  { %v6027_v32 = vmul.f32 %v8716_v1, %v11781_v40  ;;  %v5984_v5 = vpop.xlane.xlu0 %5983  ;;  %v5987_v59 = vpop.xlane.xlu1 %5986  ;;  %v6072_v31 = vpack.c.bf16 %v6061_v37, %v6060_v20  ;;  %v6062_v52 = vadd.f32 %v11852_v42, %v6044_v11  ;;  %v8222_v11 = vld [vmem:[%s12191_s13 + $0x48] sm:$0xff]  }
0x21b8   :  { %8725 = vrsqrt.f32 %v6008_v4  ;;  %v5998_v25 = vmul.f32 0.03125, %v5984_v5  ;;  %v5999_v54 = vmul.f32 0.03125, %v5987_v59  ;;  %v8226_v5 = vld [vmem:[%s12191_s13 + $0x68] sm:$0xff]   ;;  %v8227_v59 = vld [vmem:[%s12191_s13 + $0x70] sm:$0xff]  }
0x21b9   :  { %v6045_v2 = vmul.f32 %v11844_v27, %v6027_v32  ;;  %8727 = vrsqrt.f32 %v6009_v53  ;;  %7945 = vmatprep.mubr.msk.bf16.mxu0 %vm262_vm1, %v6072_v31  ;;  %v8225_v32 = vld [vmem:[%s12191_s13 + $0x60] sm:$0xff]   ;;  %v8228_v31 = vld [vmem:[%s12191_s13 + $0x78] sm:$0xff]  }
0x21ba   :  { %v8718_v48 = vpop.eup %8717  ;;  %v6010_v3 = vadd.f32 1e-05, %v5998_v25  ;;  %v6011_v22 = vadd.f32 1e-05, %v5999_v54  ;;  %v11920_v25 = vld [vmem:[%s12190_s12 + $0x1] ss:$0 sm:$0xff] }
0x21bb   :  { %v8720_v21 = vpop.eup %8719  ;;  %v6063_v36 = vadd.f32 %v11852_v42, %v6045_v2  ;;  %v6028_v40 = vmul.f32 %v8718_v48, %v11790_v49 }
0x21bc   :  { %v6029_v24 = vmul.f32 %v8720_v21, %v11787_v6  ;;  %8729 = vrsqrt.f32 %v6010_v3 }
0x21bd   :  { %8731 = vrsqrt.f32 %v6011_v22  ;;  %v6073_v46 = vpack.c.bf16 %v6063_v36, %v6062_v52  ;;  %v6046_v51 = vmul.f32 %v11844_v27, %v6028_v40 }
0x21be   :  { %v8722_v61 = vpop.eup %8721  ;;  %v6047_v14 = vmul.f32 %v11844_v27, %v6029_v24 }
0x21bf   :  { %v8724_v43 = vpop.eup %8723  ;;  %v6030_v28 = vmul.f32 %v8722_v61, %v11802_v29  ;;  %7946 = vmatmul.mubr.msk.bf16.vlgmr.msra.gmra.mrb[236].mxu0 %vm262_vm1, %v6073_v46  ;;  %v6064_v38 = vadd.f32 %v11852_v42, %v6046_v51 }
0x21c0   :  { %v6031_v41 = vmul.f32 %v8724_v43, %v11798_v18  ;;  %v6065_v49 = vadd.f32 %v11852_v42, %v6047_v14 }
0x21c1   :  { %v6048_v6 = vmul.f32 %v11844_v27, %v6030_v28 }
0x21c2   :  { %v8726_v8 = vpop.eup %8725  ;;  %v6074_v17 = vpack.c.bf16 %v6065_v49, %v6064_v38  ;;  %v6049_v39 = vmul.f32 %v11844_v27, %v6031_v41 }
0x21c3   :  { %v8728_v10 = vpop.eup %8727  ;;  %v6032_v63 = vmul.f32 %v8726_v8, %v11814_v50  ;;  %v6066_v55 = vadd.f32 %v11852_v42, %v6048_v6 }
0x21c4   :  { %v6033_v29 = vmul.f32 %v8728_v10, %v11810_v62  ;;  %7949 = vmatprep.mubr.msk.bf16.mxu0 %vm262_vm1, %v6074_v17  ;;  %v6067_v12 = vadd.f32 %v11852_v42, %v6049_v39 }
0x21c5   :  { %v6050_v18 = vmul.f32 %v11844_v27, %v6032_v63 }
0x21c6   :  { %v8730_v58 = vpop.eup %8729  ;;  %v6075_v23 = vpack.c.bf16 %v6067_v12, %v6066_v55  ;;  %v6051_v60 = vmul.f32 %v11844_v27, %v6033_v29 }
0x21c7   :  { %v8732_v44 = vpop.eup %8731  ;;  %v6034_v45 = vmul.f32 %v8730_v58, %v11826_v15  ;;  %v6068_v9 = vadd.f32 %v11852_v42, %v6050_v18 }
0x21c8   :  { %v6035_v50 = vmul.f32 %v8732_v44, %v11822_v30  ;;  %7950 = vmatmul.mubr.msk.bf16.gmra.mrb[240].mxu0 %vm262_vm1, %v6075_v23  ;;  %v6069_v62 = vadd.f32 %v11852_v42, %v6051_v60  ;;  %v8221_v30 = vld [vmem:[%s12191_s13 + $0x40] sm:$0xff]  }
0x21c9   :  { %v6052_v20 = vmul.f32 %v11844_v27, %v6034_v45  ;;  %7957 = vmatprep.subr.bf16.mxu1 %v8221_v30 }
0x21ca   :  { %v6076_v37 = vpack.c.bf16 %v6069_v62, %v6068_v9  ;;  %v6053_v1 = vmul.f32 %v11844_v27, %v6035_v50  ;;  %7958 = vmatpush3.bf16.msra.mxu1 %v8221_v30  ;;  %v8223_v27 = vld [vmem:[%s12191_s13 + $0x50] sm:$0xff]  }
0x21cb   :  { %v6070_v4 = vadd.f32 %v11852_v42, %v6052_v20  ;;  %7959 = vmatprep.subr.bf16.mxu1 %v8222_v11 }
0x21cc   :  { %7953 = vmatprep.mubr.msk.bf16.mxu0 %vm262_vm1, %v6076_v37  ;;  %v6071_v53 = vadd.f32 %v11852_v42, %v6053_v1  ;;  %v8224_v42 = vld [vmem:[%s12191_s13 + $0x58] sm:$0xff]  }
0x21ce   :  { %v6077_v15 = vpack.c.bf16 %v6071_v53, %v6070_v4  ;;  %7960 = vmatpush3.bf16.msra.mxu1 %v8222_v11 }
0x21cf   :  { %7961 = vmatprep.subr.bf16.mxu1 %v8223_v27 }
0x21d0   :  { %7954 = vmatmul.mubr.msk.bf16.gmra.mrb[244].mxu0 %vm262_vm1, %v6077_v15 }
0x21d2   :  { %7962 = vmatpush3.bf16.msra.mxu1 %v8223_v27 }
0x21d3   :  { %7963 = vmatprep.subr.bf16.mxu1 %v8224_v42 }
0x21d6   :  { %7964 = vmatpush3.bf16.msra.mxu1 %v8224_v42 }
0x21d7   :  { %7965 = vmatprep.subr.bf16.mxu1 %v8225_v32 }
0x21da   :  { %7966 = vmatpush3.bf16.msra.mxu1 %v8225_v32 }
0x21db   :  { %7967 = vmatprep.subr.bf16.mxu1 %v8226_v5 }
0x21de   :  { %7968 = vmatpush3.bf16.msra.mxu1 %v8226_v5 }
0x21df   :  { %7969 = vmatprep.subr.bf16.mxu1 %v8227_v59 }
0x21e2   :  { %7970 = vmatpush3.bf16.msra.mxu1 %v8227_v59 }
0x21e3   :  { %7971 = vmatprep.subr.bf16.mxu1 %v8228_v31 }
0x21e6   :  { %7972 = vmatpush3.bf16.msra.mxu1 %v8228_v31 }
0x2292   :  { %v7947_v54 = vpop.f32.mrb[236].mxu0 }
0x2293   :  { %v11923_v2 = vadd.f32 %v7947_v54, %v11920_v25  ;;  %v6155_v48 = vpop.f32.mrb[237].mxu0 }
0x2294   :  { %v11926_v3 = vadd.f32 %v11920_v25, %v6155_v48  ;;  %v7948_v22 = vpop.f32.mrb[238].mxu0 }
0x2295   :  { %v6204_v21 = vmul.f32 %v11923_v2, %v11923_v2  ;;  %v11931_v52 = vadd.f32 %v7948_v22, %v11920_v25  ;;  %v6158_v36 = vpop.f32.mrb[239].mxu0 }
0x2296   :  { %v6202_v40 = vmul.f32 %v11926_v3, %v11926_v3  ;;  %v11936_v24 = vadd.f32 %v11920_v25, %v6158_v36 }
0x2297   :  { %v6216_v46 = vmul.f32 %v6204_v21, %v11923_v2  ;;  %v6205_v51 = vmul.f32 %v11931_v52, %v11931_v52 }
0x2298   :  { %v6214_v61 = vmul.f32 %v6202_v40, %v11926_v3  ;;  %v6203_v14 = vmul.f32 %v11936_v24, %v11936_v24 }
0x2299   :  { %v6228_v43 = vmul.f32 0.044715, %v6216_v46  ;;  %v6217_v28 = vmul.f32 %v6205_v51, %v11931_v52 }
0x229a   :  { %v6226_v38 = vmul.f32 0.044715, %v6214_v61  ;;  %v6215_v41 = vmul.f32 %v6203_v14, %v11936_v24 }
0x229b   :  { %v6240_v49 = vadd.f32 %v6228_v43, %v11923_v2  ;;  %v6229_v6 = vmul.f32 0.044715, %v6217_v28  ;;  %v7951_v8 = vpop.f32.mrb[240].mxu0 }
0x229c   :  { %v6238_v17 = vadd.f32 %v6226_v38, %v11926_v3  ;;  %v6227_v39 = vmul.f32 0.044715, %v6215_v41  ;;  %v11949_v10 = vadd.f32 %v7951_v8, %v11920_v25  ;;  %v6171_v63 = vpop.f32.mrb[241].mxu0 }
0x229d   :  { %v6252_v55 = vmul.f32 0.7978846, %v6240_v49  ;;  %v6241_v29 = vadd.f32 %v6229_v6, %v11931_v52  ;;  %v11953_v12 = vadd.f32 %v11920_v25, %v6171_v63  ;;  %v7952_v18 = vpop.f32.mrb[242].mxu0 }
0x229e   :  { %v6250_v58 = vmul.f32 0.7978846, %v6238_v17  ;;  %v6239_v23 = vadd.f32 %v6227_v39, %v11936_v24  ;;  %v6208_v60 = vmul.f32 %v11949_v10, %v11949_v10  ;;  %v11959_v44 = vadd.f32 %v7952_v18, %v11920_v25  ;;  %v6174_v45 = vpop.f32.mrb[243].mxu0 }
0x229f   :  { %8733 = vtanh.f32 %v6252_v55  ;;  %v6253_v9 = vmul.f32 0.7978846, %v6241_v29  ;;  %v6206_v50 = vmul.f32 %v11953_v12, %v11953_v12  ;;  %v11964_v62 = vadd.f32 %v11920_v25, %v6174_v45 }
0x22a0   :  { %8735 = vtanh.f32 %v6250_v58  ;;  %v6251_v20 = vmul.f32 0.7978846, %v6239_v23  ;;  %v6220_v37 = vmul.f32 %v6208_v60, %v11949_v10  ;;  %v6209_v1 = vmul.f32 %v11959_v44, %v11959_v44 }
0x22a1   :  { %8737 = vtanh.f32 %v6253_v9  ;;  %v6218_v4 = vmul.f32 %v6206_v50, %v11953_v12  ;;  %v6207_v53 = vmul.f32 %v11964_v62, %v11964_v62 }
0x22a2   :  { %8739 = vtanh.f32 %v6251_v20  ;;  %v6232_v15 = vmul.f32 0.044715, %v6220_v37  ;;  %v6221_v30 = vmul.f32 %v6209_v1, %v11959_v44 }
0x22a3   :  { %v6230_v11 = vmul.f32 0.044715, %v6218_v4  ;;  %v6219_v27 = vmul.f32 %v6207_v53, %v11964_v62  ;;  %v7955_v42 = vpop.f32.mrb[244].mxu0 }
0x22a4   :  { %v6244_v32 = vadd.f32 %v6232_v15, %v11949_v10  ;;  %v6233_v5 = vmul.f32 0.044715, %v6221_v30  ;;  %v11976_v59 = vadd.f32 %v7955_v42, %v11920_v25  ;;  %v6187_v31 = vpop.f32.mrb[245].mxu0 }
0x22a5   :  { %v6242_v54 = vadd.f32 %v6230_v11, %v11953_v12  ;;  %v6231_v48 = vmul.f32 0.044715, %v6219_v27  ;;  %v11980_v22 = vadd.f32 %v11920_v25, %v6187_v31  ;;  %v7956_v21 = vpop.f32.mrb[246].mxu0 }
0x22a6   :  { %v6256_v36 = vmul.f32 0.7978846, %v6244_v32  ;;  %v6245_v40 = vadd.f32 %v6233_v5, %v11959_v44  ;;  %v6212_v46 = vmul.f32 %v11976_v59, %v11976_v59  ;;  %v11986_v51 = vadd.f32 %v7956_v21, %v11920_v25  ;;  %v6190_v61 = vpop.f32.mrb[247].mxu0 }
0x22a7   :  { %v6254_v14 = vmul.f32 0.7978846, %v6242_v54  ;;  %v6243_v43 = vadd.f32 %v6231_v48, %v11964_v62  ;;  %v6210_v28 = vmul.f32 %v11980_v22, %v11980_v22  ;;  %v11992_v38 = vadd.f32 %v11920_v25, %v6190_v61 }
0x22a8   :  { %8741 = vtanh.f32 %v6256_v36  ;;  %v6257_v41 = vmul.f32 0.7978846, %v6245_v40  ;;  %v6224_v49 = vmul.f32 %v6212_v46, %v11976_v59  ;;  %v6213_v6 = vmul.f32 %v11986_v51, %v11986_v51 }
0x22a9   :  { %v8734_v8 = vpop.eup %8733  ;;  %8743 = vtanh.f32 %v6254_v14  ;;  %v6255_v17 = vmul.f32 0.7978846, %v6243_v43  ;;  %v6222_v39 = vmul.f32 %v6210_v28, %v11980_v22  ;;  %v6211_v63 = vmul.f32 %v11992_v38, %v11992_v38 }
0x22aa   :  { %v8736_v55 = vpop.eup %8735  ;;  %v6276_v29 = vadd.f32 1.0, %v8734_v8  ;;  %8745 = vtanh.f32 %v6257_v41  ;;  %v6236_v25 = vmul.f32 0.044715, %v6224_v49  ;;  %v6225_v18 = vmul.f32 %v6213_v6, %v11986_v51 }
0x22ab   :  { %v8738_v58 = vpop.eup %8737  ;;  %8747 = vtanh.f32 %v6255_v17  ;;  %v6234_v23 = vmul.f32 0.044715, %v6222_v39  ;;  %v6223_v60 = vmul.f32 %v6211_v63, %v11992_v38  ;;  %v6274_v45 = vadd.f32 1.0, %v8736_v55 }
0x22ac   :  { %v8740_v9 = vpop.eup %8739  ;;  %v6288_v50 = vmul.f32 0.5, %v6276_v29  ;;  %v6277_v20 = vadd.f32 1.0, %v8738_v58  ;;  %v6248_v37 = vadd.f32 %v6236_v25, %v11976_v59  ;;  %v6237_v1 = vmul.f32 0.044715, %v6225_v18 }
0x22ad   :  { %v6246_v4 = vadd.f32 %v6234_v23, %v11980_v22  ;;  %v6235_v53 = vmul.f32 0.044715, %v6223_v60  ;;  %v6275_v15 = vadd.f32 1.0, %v8740_v9  ;;  %v6286_v30 = vmul.f32 0.5, %v6274_v45 }
0x22ae   :  { %v6289_v11 = vmul.f32 0.5, %v6277_v20  ;;  %v6260_v27 = vmul.f32 0.7978846, %v6248_v37  ;;  %v6249_v42 = vadd.f32 %v6237_v1, %v11986_v51  ;;  %v6300_v54 = vmul.f32 %v6288_v50, %v11923_v2 }
0x22af   :  { %v6258_v32 = vmul.f32 0.7978846, %v6246_v4  ;;  %v6247_v5 = vadd.f32 %v6235_v53, %v11992_v38  ;;  %v6287_v31 = vmul.f32 0.5, %v6275_v15  ;;  %v6298_v40 = vmul.f32 %v6286_v30, %v11926_v3 }
0x22b0   :  { %v6301_v48 = vmul.f32 %v6289_v11, %v11931_v52  ;;  %8749 = vtanh.f32 %v6260_v27  ;;  %v6261_v21 = vmul.f32 0.7978846, %v6249_v42  ;;  %v6942_v42 = vld [vmem:[%s12192_s14 + $0x1] ss:$0 sm:$0xff] }
0x22b1   :  { %8751 = vtanh.f32 %v6258_v32  ;;  %v6259_v36 = vmul.f32 0.7978846, %v6247_v5  ;;  %v6299_v46 = vmul.f32 %v6287_v31, %v11936_v24 }
0x22b2   :  { %v8742_v61 = vpop.eup %8741  ;;  %v6311_v14 = vpack.c.bf16 %v6301_v48, %v6300_v54  ;;  %8753 = vtanh.f32 %v6261_v21 }
0x22b3   :  { %v8744_v43 = vpop.eup %8743  ;;  %8755 = vtanh.f32 %v6259_v36  ;;  %v6310_v28 = vpack.c.bf16 %v6299_v46, %v6298_v40  ;;  %v6280_v41 = vadd.f32 1.0, %v8742_v61 }
0x22b4   :  { %v8746_v49 = vpop.eup %8745  ;;  %v6278_v6 = vadd.f32 1.0, %v8744_v43 }
0x22b5   :  { %v8748_v2 = vpop.eup %8747  ;;  %7973 = vmatprep.mubr.bf16.mxu1 %v6310_v28  ;;  %v6281_v52 = vadd.f32 1.0, %v8746_v49  ;;  %v6292_v8 = vmul.f32 0.5, %v6280_v41 }
0x22b6   :  { %7974 = vmatmul.mubr.bf16.vlgmr.msra.gmra.mrb[232].mxu1 %v6311_v14  ;;  %v6279_v17 = vadd.f32 1.0, %v8748_v2  ;;  %v6290_v39 = vmul.f32 0.5, %v6278_v6 }
0x22b7   :  { %v6293_v63 = vmul.f32 0.5, %v6281_v52  ;;  %v6304_v24 = vmul.f32 %v6292_v8, %v11949_v10 }
0x22b8   :  { %v6291_v3 = vmul.f32 0.5, %v6279_v17  ;;  %v6302_v25 = vmul.f32 %v6290_v39, %v11953_v12 }
0x22b9   :  { %v6305_v55 = vmul.f32 %v6293_v63, %v11959_v44 }
0x22ba   :  { %v8750_v29 = vpop.eup %8749  ;;  %v6303_v18 = vmul.f32 %v6291_v3, %v11964_v62 }
0x22bb   :  { %v8752_v58 = vpop.eup %8751  ;;  %v6313_v23 = vpack.c.bf16 %v6305_v55, %v6304_v24  ;;  %v6284_v60 = vadd.f32 1.0, %v8750_v29 }
0x22bc   :  { %v8754_v45 = vpop.eup %8753  ;;  %v6312_v9 = vpack.c.bf16 %v6303_v18, %v6302_v25  ;;  %v6282_v50 = vadd.f32 1.0, %v8752_v58 }
0x22bd   :  { %v8756_v20 = vpop.eup %8755  ;;  %v6285_v37 = vadd.f32 1.0, %v8754_v45  ;;  %v6296_v1 = vmul.f32 0.5, %v6284_v60 }
0x22be   :  { %7977 = vmatprep.mubr.bf16.mxu1 %v6312_v9  ;;  %v6283_v4 = vadd.f32 1.0, %v8756_v20  ;;  %v6294_v53 = vmul.f32 0.5, %v6282_v50 }
0x22bf   :  { %7978 = vmatmul.mubr.bf16.gmra.mrb[236].mxu1 %v6313_v23  ;;  %v6297_v10 = vmul.f32 0.5, %v6285_v37  ;;  %v6308_v15 = vmul.f32 %v6296_v1, %v11976_v59 }
0x22c0   :  { %v6295_v44 = vmul.f32 0.5, %v6283_v4  ;;  %v6306_v62 = vmul.f32 %v6294_v53, %v11980_v22 }
0x22c1   :  { %v6309_v12 = vmul.f32 %v6297_v10, %v11986_v51 }
0x22c2   :  { %v6307_v30 = vmul.f32 %v6295_v44, %v11992_v38 }
0x22c3   :  { %v6315_v11 = vpack.c.bf16 %v6309_v12, %v6308_v15 }
0x22c4   :  { %v6314_v27 = vpack.c.bf16 %v6307_v30, %v6306_v62 }
0x22c6   :  { %7981 = vmatprep.mubr.bf16.mxu1 %v6314_v27 }
0x22c7   :  { %7982 = vmatmul.mubr.bf16.gmra.mrb[240].mxu1 %v6315_v11 }
0x2389   :  { %v7975_v32 = vpop.f32.mrb[232].mxu1 }
0x238a   :  { %v6432_v5 = vadd.f32 %v7975_v32, %v6942_v42  ;;  %v6423_v31 = vpop.f32.mrb[233].mxu1 }
0x238b   :  { %v6424_v54 = vadd.f32 %v6942_v42, %v6423_v31  ;;  %v7976_v48 = vpop.f32.mrb[234].mxu1 }
0x238c   :  { %v6472_v59 = vadd.f32 %v6432_v5, %v11708_v13  ;;  %v6435_v51 = vadd.f32 %v7976_v48, %v6942_v42  ;;  %v6426_v21 = vpop.f32.mrb[235].mxu1 }
0x238d   :  { %v6427_v22 = vadd.f32 %v6942_v42, %v6426_v21  ;;  %v6470_v38 = vadd.f32 %v6424_v54, %v11705_v33 }
0x238e   :  { %v6473_v36 = vadd.f32 %v6435_v51, %v11717_v7  ;;  %v6490_v40 = vsel %vm262_vm1, %v6472_v59, 0.0 }
0x238f   :  { %6491 = vadd.xlane.f32.xlu0 %v6490_v40  ;;  %v6471_v46 = vadd.f32 %v6427_v22, %v11711_v57  ;;  %v6484_v43 = vsel %vm262_vm1, %v6470_v38, 0.0 }
0x2390   :  { %v6493_v61 = vsel %vm262_vm1, %v6473_v36, 0.0 }
0x2391   :  { %6494 = vadd.xlane.f32.xlu1 %v6493_v61  ;;  %v6487_v33 = vsel %vm262_vm1, %v6471_v46, 0.0 }
0x2392   :  { %v7979_v14 = vpop.f32.mrb[236].mxu1 }
0x2393   :  { %v6448_v28 = vadd.f32 %v7979_v14, %v6942_v42  ;;  %v6439_v13 = vpop.f32.mrb[237].mxu1  ;;  %6485 = vadd.xlane.f32.xlu0 %v6484_v43 }
0x2394   :  { %v6440_v41 = vadd.f32 %v6942_v42, %v6439_v13  ;;  %v7980_v49 = vpop.f32.mrb[238].mxu1 }
0x2395   :  { %v6476_v7 = vadd.f32 %v6448_v28, %v11735_v34  ;;  %v6451_v6 = vadd.f32 %v7980_v49, %v6942_v42  ;;  %v6442_v2 = vpop.f32.mrb[239].mxu1  ;;  %6488 = vadd.xlane.f32.xlu1 %v6487_v33 }
0x2396   :  { %v6443_v52 = vadd.f32 %v6942_v42, %v6442_v2  ;;  %v12031_v57 = vadd.f32 %v6440_v41, %v11725_v26 }
0x2397   :  { %v6477_v8 = vadd.f32 %v6451_v6, %v11731_v16  ;;  %v6502_v17 = vsel %vm262_vm1, %v6476_v7, 0.0 }
0x2398   :  { %6503 = vadd.xlane.f32.xlu0 %v6502_v17  ;;  %v12036_v39 = vadd.f32 %v6443_v52, %v11729_v19  ;;  %v6496_v24 = vsel %vm262_vm1, %v12031_v57, 0.0 }
0x2399   :  { %v6505_v63 = vsel %vm262_vm1, %v6477_v8, 0.0 }
0x239a   :  { %6506 = vadd.xlane.f32.xlu1 %v6505_v63  ;;  %v7983_v3 = vpop.f32.mrb[240].mxu1  ;;  %v6499_v16 = vsel %vm262_vm1, %v12036_v39, 0.0 }
0x239b   :  { %v6455_v34 = vpop.f32.mrb[241].mxu1  ;;  %v6464_v55 = vadd.f32 %v7983_v3, %v6942_v42 }
0x239c   :  { %v6456_v29 = vadd.f32 %v6942_v42, %v6455_v34  ;;  %6497 = vadd.xlane.f32.xlu0 %v6496_v24  ;;  %v7984_v26 = vpop.f32.mrb[242].mxu1 }
0x239d   :  { %v6458_v25 = vpop.f32.mrb[243].mxu1  ;;  %v6467_v19 = vadd.f32 %v7984_v26, %v6942_v42  ;;  %v12047_v23 = vadd.f32 %v6464_v55, %v11755_v47 }
0x239e   :  { %v12044_v18 = vadd.f32 %v6456_v29, %v11745_v0  ;;  %v6459_v58 = vadd.f32 %v6942_v42, %v6458_v25  ;;  %6500 = vadd.xlane.f32.xlu1 %v6499_v16 }
0x239f   :  { %v12055_v9 = vadd.f32 %v6467_v19, %v11751_v56  ;;  %v6514_v50 = vsel %vm262_vm1, %v12047_v23, 0.0 }
0x23a0   :  { %v12050_v60 = vadd.f32 %v6459_v58, %v11749_v35  ;;  %v6508_v45 = vsel %vm262_vm1, %v12044_v18, 0.0 }
0x23a1   :  { %6509 = vadd.xlane.f32.xlu0 %v6508_v45  ;;  %v6517_v47 = vsel %vm262_vm1, %v12055_v9, 0.0 }
0x23a2   :  { %v6511_v0 = vsel %vm262_vm1, %v12050_v60, 0.0 }
0x23a3   :  { %6512 = vadd.xlane.f32.xlu1 %v6511_v0 }
0x23a5   :  { %6515 = vadd.xlane.f32.xlu0 %v6514_v50 }
0x23a7   :  { %6518 = vadd.xlane.f32.xlu1 %v6517_v47 }
0x241c   :  { %v6492_v35 = vpop.xlane.xlu0 %6491 }
0x241d   :  { %v6522_v20 = vmul.f32 0.03125, %v6492_v35 }
0x241e   :  { %v6495_v37 = vpop.xlane.xlu1 %6494 }
0x241f   :  { %v12063_v1 = vsub.f32 %v6472_v59, %v6522_v20  ;;  %v6523_v4 = vmul.f32 0.03125, %v6495_v37 }
0x2420   :  { %v6486_v56 = vpop.xlane.xlu0 %6485 }
0x2421   :  { %v12065_v53 = vsub.f32 %v6473_v36, %v6523_v4  ;;  %v6520_v10 = vmul.f32 0.03125, %v6486_v56  ;;  %v6546_v44 = vmul.f32 %v12063_v1, %v12063_v1 }
0x2422   :  { %v6489_v15 = vpop.xlane.xlu1 %6488 }
0x2423   :  { %v12069_v12 = vsub.f32 %v6470_v38, %v6520_v10  ;;  %v6521_v62 = vmul.f32 0.03125, %v6489_v15  ;;  %v6562_v30 = vsel %vm262_vm1, %v6546_v44, 0.0  ;;  %v6547_v11 = vmul.f32 %v12065_v53, %v12065_v53 }
0x2424   :  { %6563 = vadd.xlane.f32.xlu0 %v6562_v30 }
0x2425   :  { %v12074_v27 = vsub.f32 %v6471_v46, %v6521_v62  ;;  %v6504_v42 = vpop.xlane.xlu0 %6503  ;;  %v6565_v32 = vsel %vm262_vm1, %v6547_v11, 0.0  ;;  %v6544_v5 = vmul.f32 %v12069_v12, %v12069_v12 }
0x2426   :  { %v6526_v31 = vmul.f32 0.03125, %v6504_v42  ;;  %6566 = vadd.xlane.f32.xlu1 %v6565_v32 }
0x2427   :  { %v6507_v54 = vpop.xlane.xlu1 %6506  ;;  %v6556_v48 = vsel %vm262_vm1, %v6544_v5, 0.0  ;;  %v6545_v59 = vmul.f32 %v12074_v27, %v12074_v27 }
0x2428   :  { %v12082_v51 = vsub.f32 %v6476_v7, %v6526_v31  ;;  %v6527_v21 = vmul.f32 0.03125, %v6507_v54  ;;  %6557 = vadd.xlane.f32.xlu0 %v6556_v48 }
0x2429   :  { %v6498_v22 = vpop.xlane.xlu0 %6497  ;;  %v6559_v38 = vsel %vm262_vm1, %v6545_v59, 0.0 }
0x242a   :  { %v12085_v36 = vsub.f32 %v6477_v8, %v6527_v21  ;;  %v6524_v40 = vmul.f32 0.03125, %v6498_v22  ;;  %6560 = vadd.xlane.f32.xlu1 %v6559_v38  ;;  %v6550_v46 = vmul.f32 %v12082_v51, %v12082_v51 }
0x242b   :  { %v6501_v61 = vpop.xlane.xlu1 %6500 }
0x242c   :  { %v12090_v14 = vsub.f32 %v12031_v57, %v6524_v40  ;;  %v6525_v43 = vmul.f32 0.03125, %v6501_v61  ;;  %v6574_v28 = vsel %vm262_vm1, %v6550_v46, 0.0  ;;  %v6551_v13 = vmul.f32 %v12085_v36, %v12085_v36 }
0x242d   :  { %6575 = vadd.xlane.f32.xlu0 %v6574_v28 }
0x242e   :  { %v12096_v41 = vsub.f32 %v12036_v39, %v6525_v43  ;;  %v6510_v49 = vpop.xlane.xlu0 %6509  ;;  %v6577_v33 = vsel %vm262_vm1, %v6551_v13, 0.0  ;;  %v6548_v7 = vmul.f32 %v12090_v14, %v12090_v14 }
0x242f   :  { %v6528_v6 = vmul.f32 0.03125, %v6510_v49  ;;  %6578 = vadd.xlane.f32.xlu1 %v6577_v33 }
0x2430   :  { %v6513_v2 = vpop.xlane.xlu1 %6512  ;;  %v6568_v52 = vsel %vm262_vm1, %v6548_v7, 0.0  ;;  %v6549_v57 = vmul.f32 %v12096_v41, %v12096_v41  ;;  %v12134_v7 = vld [vmem:[%s12193_s15] ss:$0 sm:$0xff] }
0x2431   :  { %v12105_v8 = vsub.f32 %v12044_v18, %v6528_v6  ;;  %v6529_v17 = vmul.f32 0.03125, %v6513_v2  ;;  %6569 = vadd.xlane.f32.xlu0 %v6568_v52 }
0x2432   :  { %v6516_v39 = vpop.xlane.xlu0 %6515  ;;  %v6571_v63 = vsel %vm262_vm1, %v6549_v57, 0.0 }
0x2433   :  { %v12109_v3 = vsub.f32 %v12050_v60, %v6529_v17  ;;  %v6530_v34 = vmul.f32 0.03125, %v6516_v39  ;;  %6572 = vadd.xlane.f32.xlu1 %v6571_v63  ;;  %v6552_v24 = vmul.f32 %v12105_v8, %v12105_v8 }
0x2434   :  { %v6519_v55 = vpop.xlane.xlu1 %6518 }
0x2435   :  { %v12114_v29 = vsub.f32 %v12047_v23, %v6530_v34  ;;  %v6531_v26 = vmul.f32 0.03125, %v6519_v55  ;;  %v6580_v25 = vsel %vm262_vm1, %v6552_v24, 0.0  ;;  %v6553_v16 = vmul.f32 %v12109_v3, %v12109_v3 }
0x2436   :  { %6581 = vadd.xlane.f32.xlu0 %v6580_v25 }
0x2437   :  { %v12120_v18 = vsub.f32 %v12055_v9, %v6531_v26  ;;  %v6583_v19 = vsel %vm262_vm1, %v6553_v16, 0.0  ;;  %v6554_v58 = vmul.f32 %v12114_v29, %v12114_v29 }
0x2438   :  { %6584 = vadd.xlane.f32.xlu1 %v6583_v19 }
0x2439   :  { %v6586_v60 = vsel %vm262_vm1, %v6554_v58, 0.0  ;;  %v6555_v23 = vmul.f32 %v12120_v18, %v12120_v18 }
0x243a   :  { %6587 = vadd.xlane.f32.xlu0 %v6586_v60 }
0x243b   :  { %v6589_v45 = vsel %vm262_vm1, %v6555_v23, 0.0 }
0x243c   :  { %6590 = vadd.xlane.f32.xlu1 %v6589_v45 }
0x24b1   :  { %v6564_v0 = vpop.xlane.xlu0 %6563 }
0x24b2   :  { %v6594_v50 = vmul.f32 0.03125, %v6564_v0 }
0x24b3   :  { %v6567_v47 = vpop.xlane.xlu1 %6566 }
0x24b4   :  { %v6606_v9 = vadd.f32 1e-05, %v6594_v50  ;;  %v6595_v35 = vmul.f32 0.03125, %v6567_v47 }
0x24b5   :  { %v6558_v20 = vpop.xlane.xlu0 %6557 }
0x24b6   :  { %v6607_v37 = vadd.f32 1e-05, %v6595_v35  ;;  %v6592_v4 = vmul.f32 0.03125, %v6558_v20  ;;  %8757 = vrsqrt.f32 %v6606_v9 }
0x24b7   :  { %v6561_v56 = vpop.xlane.xlu1 %6560 }
0x24b8   :  { %v6604_v10 = vadd.f32 1e-05, %v6592_v4  ;;  %v6593_v44 = vmul.f32 0.03125, %v6561_v56  ;;  %8759 = vrsqrt.f32 %v6607_v37 }
0x24ba   :  { %8761 = vrsqrt.f32 %v6604_v10  ;;  %v6605_v15 = vadd.f32 1e-05, %v6593_v44  ;;  %v6576_v62 = vpop.xlane.xlu0 %6575 }
0x24bb   :  { %v6598_v30 = vmul.f32 0.03125, %v6576_v62 }
0x24bc   :  { %8763 = vrsqrt.f32 %v6605_v15  ;;  %v6579_v11 = vpop.xlane.xlu1 %6578 }
0x24bd   :  { %v6610_v42 = vadd.f32 1e-05, %v6598_v30  ;;  %v6599_v32 = vmul.f32 0.03125, %v6579_v11 }
0x24be   :  { %v6570_v5 = vpop.xlane.xlu0 %6569 }
0x24bf   :  { %v6611_v31 = vadd.f32 1e-05, %v6599_v32  ;;  %v6596_v54 = vmul.f32 0.03125, %v6570_v5  ;;  %8765 = vrsqrt.f32 %v6610_v42 }
0x24c0   :  { %v6573_v48 = vpop.xlane.xlu1 %6572  ;;  %v8758_v22 = vpop.eup %8757 }
0x24c1   :  { %v6608_v59 = vadd.f32 1e-05, %v6596_v54  ;;  %v6597_v21 = vmul.f32 0.03125, %v6573_v48  ;;  %8767 = vrsqrt.f32 %v6611_v31  ;;  %v6630_v28 = vmul.f32 %v8758_v22, %v12063_v1 }
0x24c2   :  { %v8760_v38 = vpop.eup %8759 }
0x24c3   :  { %8769 = vrsqrt.f32 %v6608_v59  ;;  %v6609_v40 = vadd.f32 1e-05, %v6597_v21  ;;  %v6582_v46 = vpop.xlane.xlu0 %6581  ;;  %v6631_v52 = vmul.f32 %v8760_v38, %v12065_v53  ;;  %v6648_v63 = vmul.f32 %v12134_v7, %v6630_v28  ;;  %v6952_v53 = vld [vmem:[%s12194_s16] ss:$0 sm:$0xff]  ;;  %s8821_s16 = smov [#allocation2]  }
0x24c4   :  { %v8762_v61 = vpop.eup %8761  ;;  %v6600_v43 = vmul.f32 0.03125, %v6582_v46  ;;  %s6710_s11 = sshll.u32 %s8821_s16, 4  ;;  %s6711_s11 = int_to_ptr.vmem [resolvable:$true] %s6710_s11 }
0x24c5   :  { %v6628_v13 = vmul.f32 %v8762_v61, %v12069_v12  ;;  %8771 = vrsqrt.f32 %v6609_v40  ;;  %v6585_v49 = vpop.xlane.xlu1 %6584  ;;  %v6666_v23 = vadd.f32 %v6952_v53, %v6648_v63  ;;  %s8781_s5 = scalar_lea.vmem %s6711_s11, 512  ;;  %p8786_p1 = scmp.lt.s32.totalorder %s6711_s11, %s6711_s11 }
0x24c6   :  { %v8764_v33 = vpop.eup %8763  ;;  %v6612_v6 = vadd.f32 1e-05, %v6600_v43  ;;  %v6601_v2 = vmul.f32 0.03125, %v6585_v49  ;;  %p8782_p0 = scmp.ne.s32.totalorder %s6711_s11, %s8781_s5  ;;  %p8787_p2 = scmp.lt.s32.totalorder %s8781_s5, %s8781_s5 }
0x24c7   :  { %v6629_v57 = vmul.f32 %v8764_v33, %v12074_v27  ;;  %v6588_v17 = vpop.xlane.xlu0 %6587  ;;  %v6646_v39 = vmul.f32 %v12134_v7, %v6628_v13  ;;  %v6649_v27 = vmul.f32 %v12134_v7, %v6631_v52  ;;  %v6680_v10 = vmul.f32 0.25, %v6666_v23 }
0x24c8   :  { %8773 = vrsqrt.f32 %v6612_v6  ;;  %v6613_v1 = vadd.f32 1e-05, %v6601_v2  ;;  %v6602_v12 = vmul.f32 0.03125, %v6588_v17  ;;  %p8788_p3 = por %p8787_p2, %p8786_p1 }
0x24c9   :  { %v6591_v34 = vpop.xlane.xlu1 %6590  ;;  %v6647_v24 = vmul.f32 %v12134_v7, %v6629_v57  ;;  %v8766_v25 = vpop.eup %8765  ;;  %v6664_v19 = vadd.f32 %v6952_v53, %v6646_v39  ;;  %v6667_v47 = vadd.f32 %v6952_v53, %v6649_v27 }
0x24ca   :  { %8775 = vrsqrt.f32 %v6613_v1  ;;  %v6614_v55 = vadd.f32 1e-05, %v6602_v12  ;;  %v6603_v26 = vmul.f32 0.03125, %v6591_v34  ;;  %v6634_v9 = vmul.f32 %v8766_v25, %v12082_v51  ;;  %p8789_p4 = pnand %p8788_p3, %p8782_p0 }
0x24cb   :  { %v8768_v16 = vpop.eup %8767  ;;  %v6665_v45 = vadd.f32 %v6952_v53, %v6647_v24  ;;  %v6676_v35 = vmul.f32 0.25, %v6664_v19  ;;  %v6681_v30 = vmul.f32 0.25, %v6667_v47 }
0x24cc   :  { %8777 = vrsqrt.f32 %v6614_v55  ;;  %v6615_v58 = vadd.f32 1e-05, %v6603_v26  ;;  %v6635_v20 = vmul.f32 %v8768_v16, %v12085_v36 }
0x24cd   :  { %v8770_v60 = vpop.eup %8769  ;;  %v6677_v44 = vmul.f32 0.25, %v6665_v45  ;;  %v6682_v51 = vadd.f32 %v6680_v10, %v6676_v35 }
0x24ce   :  { %v6632_v0 = vmul.f32 %v8770_v60, %v12090_v14  ;;  %8779 = vrsqrt.f32 %v6615_v58  ;;  %v6652_v14 = vmul.f32 %v12134_v7, %v6634_v9  ;;  %v6653_v32 = vmul.f32 %v12134_v7, %v6635_v20 }
0x24cf   :  { %v8772_v50 = vpop.eup %8771  ;;  %v6683_v48 = vadd.f32 %v6681_v30, %v6677_v44 }
0x24d0   :  { %v6650_v37 = vmul.f32 %v12134_v7, %v6632_v0  ;;  %v6633_v4 = vmul.f32 %v8772_v50, %v12096_v41  ;;  %v6670_v22 = vadd.f32 %v6952_v53, %v6652_v14  ;;  %v6671_v61 = vadd.f32 %v6952_v53, %v6653_v32 }
0x24d2   :  { %v8774_v56 = vpop.eup %8773  ;;  %v6668_v15 = vadd.f32 %v6952_v53, %v6650_v37  ;;  %v6651_v62 = vmul.f32 %v12134_v7, %v6633_v4  ;;  %v6690_v33 = vmul.f32 0.25, %v6670_v22  ;;  %v6691_v57 = vmul.f32 0.25, %v6671_v61 }
0x24d3   :  { %v6636_v11 = vmul.f32 %v8774_v56, %v12105_v8 }
0x24d4   :  { %v8776_v42 = vpop.eup %8775  ;;  %v6684_v36 = vmul.f32 0.5, %v6668_v15  ;;  %v6669_v5 = vadd.f32 %v6952_v53, %v6651_v62 }
0x24d5   :  { %v6654_v31 = vmul.f32 %v12134_v7, %v6636_v11  ;;  %v6637_v41 = vmul.f32 %v8776_v42, %v12109_v3 }
0x24d6   :  { %v8778_v54 = vpop.eup %8777  ;;  %v6685_v59 = vmul.f32 0.5, %v6669_v5  ;;  %v6686_v21 = vadd.f32 %v6684_v36, %v6682_v51 }
0x24d7   :  { %v6672_v38 = vadd.f32 %v6952_v53, %v6654_v31  ;;  %v6655_v40 = vmul.f32 %v12134_v7, %v6637_v41  ;;  %v6638_v8 = vmul.f32 %v8778_v54, %v12114_v29 }
0x24d8   :  { %v8780_v46 = vpop.eup %8779  ;;  %v6687_v43 = vadd.f32 %v6685_v59, %v6683_v48  ;;  %6688 = vst.msk [vmem:[#allocation2] sm:$0xff] %vm262_vm1, %v6686_v21 }
0x24d9   :  { %v6694_v28 = vmul.f32 0.25, %v6672_v38  ;;  %v6673_v13 = vadd.f32 %v6952_v53, %v6655_v40  ;;  %v6656_v49 = vmul.f32 %v12134_v7, %v6638_v8  ;;  %v6639_v3 = vmul.f32 %v8780_v46, %v12120_v18 }
0x24da   :  { %6689 = vst.msk [vmem:[#allocation2 + $0x8] sm:$0xff] %vm262_vm1, %v6687_v43 }
0x24db   :  { %v6695_v6 = vmul.f32 0.25, %v6673_v13  ;;  %v6674_v2 = vadd.f32 %v6952_v53, %v6656_v49  ;;  %v6657_v52 = vmul.f32 %v12134_v7, %v6639_v3  ;;  %v6696_v29 = vadd.f32 %v6694_v28, %v6690_v33 }
0x24dd   :  { %v6698_v17 = vmul.f32 0.5, %v6674_v2  ;;  %v6675_v39 = vadd.f32 %v6952_v53, %v6657_v52  ;;  %v6697_v1 = vadd.f32 %v6695_v6, %v6691_v57 }
0x24df   :  { %v6699_v12 = vmul.f32 0.5, %v6675_v39  ;;  %v6700_v63 = vadd.f32 %v6698_v17, %v6696_v29 }
0x24e1   :  { %v6701_v34 = vadd.f32 %v6699_v12, %v6697_v1  ;;  %6703 = vst.msk [vmem:[#allocation2 + $0x10] sm:$0xff] %vm262_vm1, %v6700_v63 }
0x24e3   :  { %6704 = vst.msk [vmem:[#allocation2 + $0x18] sm:$0xff] %vm262_vm1, %v6701_v34 }
0x24e4   :  { %8792 = shalt.err (!%p8789_p4)
}
0x24e5   :  { %s8793_s9 = scalar_lea.hbm %s12195_s17, 512 }
0x24e6   :  { %p8794_p5 = scmp.ne.s32.totalorder %s12195_s17, %s8793_s9  ;;  %p8797_p6 = scmp.lt.u32.totalorder %s8793_s9, %s12195_s17 }
0x24e8   :  { %p8799_p7 = pnand %p8797_p6, %p8794_p5 }
0x24ea   :  { %8802 = shalt.err (!%p8799_p7)
}
0x24eb   :  { %s8822_s6 = smov 128  }
0x24ec   :  { %6716 = dma.vmem_to_hbm [thread:$0]  %s6711_s11, 512, %s12195_s17, [#allocation3], %s8822_s6, %s8822_s6, %s12299_s25  }
0x24ed   :  { %8803 = dma.done.wait [#allocation3], 512  }
0x24ee   :  { %8804 = vsyncadd [#allocation3], 4294966784 }
0x24ef   :  { %6720 = vsyncpa [#allocation3], 1 }

</bundles_post_ra>
